<compile_context>
chip_gen: v5e
topology: v5e:2x2
jax: 0.10.0
libtpu: 0.0.40
codegen_flags: <defaults>
</compile_context>

<pallas_src>
import numpy as np

import jax
import jax.numpy as jnp
from jax.experimental import pallas as pl
from jax.experimental.pallas import tpu as pltpu

_NUM_CORES = 2            # v7x megacore; harmless (sequential halves) on 1-core chips
_STEP_OVERHEAD_MACS = 2.5e7  # ~0.35us per-step overhead, in f32-HIGHEST MAC-equivalents


def _round_up(x, m):
    return ((x + m - 1) // m) * m


def _pick_tile(n, max_tile=512):
    """Square tile size (multiple of 128) and padded problem size."""
    base = _round_up(n, 128)
    if base <= max_tile:
        return base, base  # single resident block
    best_t, best_cost = 128, None
    for t in range(128, max_tile + 1, 128):
        padded = _round_up(base, t)
        nb = padded // t
        # ~padded^3/6 useful MACs + a fixed pipeline-overhead cost per live step.
        cost = padded ** 3 / 6.0 + _STEP_OVERHEAD_MACS * nb ** 3 / 6.0
        if best_cost is None or cost < best_cost:
            best_t, best_cost = t, cost
    return best_t, _round_up(base, best_t)


def _build_schedule(nb, num_cores):
    """Flattened per-core schedule of block steps.

    Each step is (i, k, bj, oj, first, live):
      A block = (i, k), B block = (k, bj), C block = (i, oj)
      first: zero-init the resident output block; live: run the MXU product.
    Only live k blocks (k in [j, i]) are enumerated per lower tile (i, j);
    each above-diagonal tile gets a single zero-fill step that reuses the
    already-resident (i, i) A/B blocks so its input DMAs are elided.
    """
    units = []
    for i in range(nb):
        for j in range(i):  # strictly-below-diagonal tiles
            units.append(
                [(i, k, j, j, 1 if k == j else 0, 1) for k in range(j, i + 1)]
            )
        diag = [(i, i, i, i, 1, 1)]                                # diagonal tile
        diag += [(i, i, i, j, 1, 0) for j in range(i + 1, nb)]     # zero fills
        units.append(diag)

    if len(units) < num_cores:
        num_cores = 1
    if num_cores == 1:
        cores = [[s for u in units for s in u]]
    else:
        # Greedy balance of MXU work (live-step count) across cores.
        units.sort(key=lambda u: sum(s[5] for s in u), reverse=True)
        cores = [[] for _ in range(num_cores)]
        load = [0] * num_cores
        for u in units:
            c = load.index(min(load))
            cores[c].extend(u)
            load[c] += sum(s[5] for s in u)

    steps_per_core = max(len(c) for c in cores)
    for c in cores:  # pad with no-op replicas of the core's last step
        i, k, bj, oj, _, _ = c[-1]
        c.extend([(i, k, bj, oj, 0, 0)] * (steps_per_core - len(c)))

    flat = [s for c in cores for s in c]
    arrs = tuple(
        jnp.asarray(np.array([s[f] for s in flat], dtype=np.int32))
        for f in range(6)
    )
    return num_cores, steps_per_core, arrs


def _tri_matmul_kernel(ii, kk, bj, oj, first, live, a_ref, b_ref, o_ref):
    t = pl.program_id(0) * pl.num_programs(1) + pl.program_id(1)

    @pl.when(first[t] == 1)
    def _():
        o_ref[...] = jnp.zeros_like(o_ref)

    @pl.when(live[t] == 1)
    def _():
        o_ref[...] += jnp.dot(
            a_ref[...],
            b_ref[...],
            preferred_element_type=jnp.float32,
            precision=jax.lax.Precision.HIGHEST,  # parity with torch.matmul f32
        )


def tri_matmul(A, B, *, max_tile=512):
    """C = A @ B for square lower-triangular float32 matrices."""
    M, K = A.shape
    K2, N = B.shape
    assert M == K == K2 == N, "expected square (N, N) operands"
    n = M

    T, Np = _pick_tile(n, max_tile)
    nb = Np // T

    # Zero padding preserves lower-triangularity.
    A_p = A if Np == n else jnp.pad(A, ((0, Np - n), (0, Np - n)))
    B_p = B if Np == n else jnp.pad(B, ((0, Np - n), (0, Np - n)))

    num_cores, spc, (ii, kk, bj, oj, first, live) = _build_schedule(nb, _NUM_CORES)

    def a_map(c, s, ii, kk, bj, oj, first, live):
        t = c * spc + s
        return (ii[t], kk[t])

    def b_map(c, s, ii, kk, bj, oj, first, live):
        t = c * spc + s
        return (kk[t], bj[t])

    def o_map(c, s, ii, kk, bj, oj, first, live):
        t = c * spc + s
        return (ii[t], oj[t])

    cost = pl.CostEstimate(
        flops=max(n * n * n // 3, 1),        # triangular product: ~N^3/6 MACs
        transcendentals=0,
        bytes_accessed=4 * 2 * n * n,        # ~half of A and B read + all of C written
    )

    out = pl.pallas_call(
        _tri_matmul_kernel,
        out_shape=jax.ShapeDtypeStruct((Np, Np), jnp.float32),
        grid_spec=pltpu.PrefetchScalarGridSpec(
            num_scalar_prefetch=6,
            grid=(num_cores, spc),
            in_specs=[
                pl.BlockSpec((T, T), a_map),
                pl.BlockSpec((T, T), b_map),
            ],
            out_specs=pl.BlockSpec((T, T), o_map),
        ),
        compiler_params=pltpu.CompilerParams(
            dimension_semantics=("parallel", "arbitrary"),
            vmem_limit_bytes=32 * 1024 * 1024,  # ~6 MiB used; safe on v5e/v6e/v7x
        ),
        cost_estimate=cost,
    )(ii, kk, bj, oj, first, live,
      A_p.astype(jnp.float32), B_p.astype(jnp.float32))

    if Np != n:
        out = out[:n, :n]
    return out.astype(A.dtype)


if __name__ == "__main__":
    key = jax.random.PRNGKey(0)
    ok = True
    # 256: single resident block / 1-core path; 640: multi-tile + padding +
    # 2-way core split + zero-fill tiles.
    for n in (256, 640):
        key, ka, kb = jax.random.split(key, 3)
        A = jnp.tril(jax.random.normal(ka, (n, n), dtype=jnp.float32))
        B = jnp.tril(jax.random.normal(kb, (n, n), dtype=jnp.float32))

        C = jax.block_until_ready(tri_matmul(A, B))
        C_ref = jnp.matmul(A, B, precision=jax.lax.Precision.HIGHEST)

        assert C.shape == (n, n)
        ok = ok and bool(jnp.allclose(C, C_ref, atol=1e-4, rtol=1e-4))

    assert ok, "mismatch vs reference"
    print("KERNEL_OK")
</pallas_src>

<mosaic_0001>
module attributes {stable_mosaic.version = 11 : i64} {
  func.func @_tri_matmul_kernel(%arg0: i32, %arg1: i32, %arg2: memref<1xi32, #tpu.memory_space<smem>>, %arg3: memref<1xi32, #tpu.memory_space<smem>>, %arg4: memref<1xi32, #tpu.memory_space<smem>>, %arg5: memref<1xi32, #tpu.memory_space<smem>>, %arg6: memref<1xi32, #tpu.memory_space<smem>>, %arg7: memref<1xi32, #tpu.memory_space<smem>>, %arg8: memref<256x256xf32, #tpu.memory_space<vmem>>, %arg9: memref<256x256xf32, #tpu.memory_space<vmem>>, %arg10: memref<256x256xf32, #tpu.memory_space<vmem>>) attributes {dimension_semantics = [#tpu.dimension_semantics<parallel>, #tpu.dimension_semantics<arbitrary>], iteration_bounds = array<i64: 1, 1>, scalar_prefetch = 6 : i64, scratch_operands = 0 : i64, tpu.core_type = #tpu.core_type<tc>, window_params = [{transform_indices = @transform_0, window_bounds = array<i64: 256, 256>}, {transform_indices = @transform_1, window_bounds = array<i64: 256, 256>}, {transform_indices = @transform_2, window_bounds = array<i64: 256, 256>}]} {
    %c1_i32 = arith.constant 1 : i32
    %0 = arith.muli %arg0, %c1_i32 : i32
    %1 = arith.addi %0, %arg1 : i32
    %2 = arith.index_cast %1 : i32 to index
    %3 = memref.load %arg6[%2] : memref<1xi32, #tpu.memory_space<smem>>
    %c1_i32_0 = arith.constant 1 : i32
    %4 = arith.cmpi eq, %3, %c1_i32_0 : i32
    %5 = arith.extui %4 : i1 to i32
    %c0_i32 = arith.constant 0 : i32
    %6 = arith.cmpi ne, %5, %c0_i32 : i32
    scf.if %6 {
      %cst = arith.constant 0.000000e+00 : f32
      %12 = vector.broadcast %cst : f32 to vector<256x256xf32>
      %c0 = arith.constant 0 : index
      %c0_3 = arith.constant 0 : index
      %13 = vector.load %arg10[%c0, %c0_3] : memref<256x256xf32, #tpu.memory_space<vmem>>, vector<256x256xf32>
      tpu.vector_store %arg10[%c0, %c0_3], %12 {strides = array<i32>} : memref<256x256xf32, #tpu.memory_space<vmem>>, vector<256x256xf32>,
    } else {
    }
    %7 = arith.index_cast %1 : i32 to index
    %8 = memref.load %arg7[%7] : memref<1xi32, #tpu.memory_space<smem>>
    %c1_i32_1 = arith.constant 1 : i32
    %9 = arith.cmpi eq, %8, %c1_i32_1 : i32
    %10 = arith.extui %9 : i1 to i32
    %c0_i32_2 = arith.constant 0 : i32
    %11 = arith.cmpi ne, %10, %c0_i32_2 : i32
    scf.if %11 {
      %c0 = arith.constant 0 : index
      %c0_3 = arith.constant 0 : index
      %12 = vector.load %arg10[%c0, %c0_3] : memref<256x256xf32, #tpu.memory_space<vmem>>, vector<256x256xf32>
      %c0_4 = arith.constant 0 : index
      %c0_5 = arith.constant 0 : index
      %13 = vector.load %arg8[%c0_4, %c0_5] : memref<256x256xf32, #tpu.memory_space<vmem>>, vector<256x256xf32>
      %c0_6 = arith.constant 0 : index
      %c0_7 = arith.constant 0 : index
      %14 = vector.load %arg9[%c0_6, %c0_7] : memref<256x256xf32, #tpu.memory_space<vmem>>, vector<256x256xf32>
      %cst = arith.constant dense<0.000000e+00> : vector<256x256xf32>
      %15 = tpu.matmul %13, %14, %cst {dimension_numbers = #tpu.dot_dimension_numbers<[1], [0], [0], [1], [0, 0, 1, 1], [], []>, precision = #tpu.contract_precision<fp32>} : vector<256x256xf32>, vector<256x256xf32>, vector<256x256xf32> -> vector<256x256xf32>
      %16 = arith.addf %12, %15 : vector<256x256xf32>
      %c0_8 = arith.constant 0 : index
      %c0_9 = arith.constant 0 : index
      %17 = vector.load %arg10[%c0_8, %c0_9] : memref<256x256xf32, #tpu.memory_space<vmem>>, vector<256x256xf32>
      tpu.vector_store %arg10[%c0_8, %c0_9], %16 {strides = array<i32>} : memref<256x256xf32, #tpu.memory_space<vmem>>, vector<256x256xf32>,
    } else {
    }
    return
  }
  func.func @transform_0(%arg0: i32, %arg1: i32, %arg2: memref<1xi32, #tpu.memory_space<smem>>, %arg3: memref<1xi32, #tpu.memory_space<smem>>, %arg4: memref<1xi32, #tpu.memory_space<smem>>, %arg5: memref<1xi32, #tpu.memory_space<smem>>, %arg6: memref<1xi32, #tpu.memory_space<smem>>, %arg7: memref<1xi32, #tpu.memory_space<smem>>) -> (i32, i32) {
    %c1_i32 = arith.constant 1 : i32
    %0 = arith.muli %arg0, %c1_i32 : i32
    %1 = arith.addi %0, %arg1 : i32
    %2 = arith.index_cast %1 : i32 to index
    %3 = memref.load %arg2[%2] : memref<1xi32, #tpu.memory_space<smem>>
    %4 = arith.index_cast %1 : i32 to index
    %5 = memref.load %arg3[%4] : memref<1xi32, #tpu.memory_space<smem>>
    %c0_i32 = arith.constant 0 : i32
    return %3, %5 : i32, i32
  }
  func.func @transform_1(%arg0: i32, %arg1: i32, %arg2: memref<1xi32, #tpu.memory_space<smem>>, %arg3: memref<1xi32, #tpu.memory_space<smem>>, %arg4: memref<1xi32, #tpu.memory_space<smem>>, %arg5: memref<1xi32, #tpu.memory_space<smem>>, %arg6: memref<1xi32, #tpu.memory_space<smem>>, %arg7: memref<1xi32, #tpu.memory_space<smem>>) -> (i32, i32) {
    %c1_i32 = arith.constant 1 : i32
    %0 = arith.muli %arg0, %c1_i32 : i32
    %1 = arith.addi %0, %arg1 : i32
    %2 = arith.index_cast %1 : i32 to index
    %3 = memref.load %arg3[%2] : memref<1xi32, #tpu.memory_space<smem>>
    %4 = arith.index_cast %1 : i32 to index
    %5 = memref.load %arg4[%4] : memref<1xi32, #tpu.memory_space<smem>>
    %c0_i32 = arith.constant 0 : i32
    return %3, %5 : i32, i32
  }
  func.func @transform_2(%arg0: i32, %arg1: i32, %arg2: memref<1xi32, #tpu.memory_space<smem>>, %arg3: memref<1xi32, #tpu.memory_space<smem>>, %arg4: memref<1xi32, #tpu.memory_space<smem>>, %arg5: memref<1xi32, #tpu.memory_space<smem>>, %arg6: memref<1xi32, #tpu.memory_space<smem>>, %arg7: memref<1xi32, #tpu.memory_space<smem>>) -> (i32, i32) {
    %c1_i32 = arith.constant 1 : i32
    %0 = arith.muli %arg0, %c1_i32 : i32
    %1 = arith.addi %0, %arg1 : i32
    %2 = arith.index_cast %1 : i32 to index
    %3 = memref.load %arg2[%2] : memref<1xi32, #tpu.memory_space<smem>>
    %4 = arith.index_cast %1 : i32 to index
    %5 = memref.load %arg5[%4] : memref<1xi32, #tpu.memory_space<smem>>
    %c0_i32 = arith.constant 0 : i32
    return %3, %5 : i32, i32
  }
}

</mosaic_0001>

<bundles_post_ra>
// kernel: tpu_custom_call.1
= control target key start
LH: loop header
LB: loop body
LE: loop exit
PB: predicated region body
PF: predicated region fallthrough
CT: control target
= control target key end

     0   :  { %s8901_s0 = inlined_call_operand.<no memory space> [shape: s32[1], index: 0, kind: input, shape index: {}]   ;;  %s8902_s1 = inlined_call_operand.<no memory space> [shape: s32[1], index: 1, kind: input, shape index: {}]   ;;  %s8903_s2 = inlined_call_operand.<no memory space> [shape: s32[1], index: 2, kind: input, shape index: {}]   ;;  %s8904_s3 = inlined_call_operand.<no memory space> [shape: s32[1], index: 3, kind: input, shape index: {}]   ;;  %s8905_s4 = inlined_call_operand.<no memory space> [shape: s32[1], index: 4, kind: input, shape index: {}]   ;;  %s8906_s5 = inlined_call_operand.<no memory space> [shape: s32[1], index: 5, kind: input, shape index: {}]   ;;  %s8907_s6 = inlined_call_operand.hbm [shape: f32[256,256], index: 6, kind: input, shape index: {}]   ;;  %s8908_s7 = inlined_call_operand.hbm [shape: f32[256,256], index: 7, kind: input, shape index: {}]   ;;  %s8909_s8 = inlined_call_operand.hbm [shape: f32[256,256], index: 8, kind: output, shape index: {}]  }
   0x1   :  { %13 = sst [smem:[#allocation3]] %s8901_s0 }
   0x2   :  { %16 = sst [smem:[#allocation6]] %s8904_s3 }
   0x3   :  { %18 = sst [smem:[#allocation8]] %s8906_s5 }
   0x4   :  { %19 = vsyncpa [#allocation10], 0 }
   0x5   :  { %20 = vsyncpa [#allocation13], 0 }
   0x6   :  { %21 = vsyncpa [#allocation11], 0  ;;  %s25_s11 = sld [smem:[#allocation3]]  ;;  %s5737_s14 = sshll.u32 %s8902_s1, 1 }
   0x7   :  { %s5837_s15 = smov [#allocation9]   ;;  %s5741_s3 = sshll.u32 %s8903_s2, 1 }
   0x8   :  { %s5900_s16 = sshll.u32 %s5837_s15, 4  ;;  %s5751_s5 = sshll.u32 %s8902_s1, 6  ;;  %s38_s16 = int_to_ptr.vmem [resolvable:$true] %s5900_s16 }
   0x9   :  { %s54_s20 = sadd.s32 %s5751_s5, %s5741_s3  ;;  %s5838_s21 = smov [#allocation12]  }
   0xa   :  { %s5909_s22 = sshll.u32 %s5838_s21, 4  ;;  %s5743_s24 = sshll.u32 %s54_s20, 3  ;;  %s60_s22 = int_to_ptr.vmem [resolvable:$true] %s5909_s22 }
   0xb   :  { %s56_s28 = scalar_lea.hbm %s8908_s7, %s5743_s24  ;;  %s5763_s15 = scalar_lea.hbm %s8907_s6, 512 }
   0xc   :  { %s5750_s23 = sshll.u32 %s25_s11, 6  ;;  %s57_s30 = sshll.u32 %s56_s28, 4  ;;  %s5917_s30 = int_to_ptr.hbm [resolvable:$true] %s57_s30 }
   0xd   :  { %s32_s25 = sadd.s32 %s5750_s23, %s5737_s14 }
   0xe   :  { %s5739_s29 = sshll.u32 %s32_s25, 3 }
   0xf   :  { %s34_s10 = scalar_lea.hbm %s8907_s6, %s5739_s29 }
  0x10   :  { %s35_s1 = sshll.u32 %s34_s10, 4  ;;  %s36_s1 = int_to_ptr.hbm [resolvable:$true] %s35_s1 }
  0x11   :  { %s5759_s12 = sshra.s32 %s36_s1, 4  ;;  %s5760_s12 = int_to_ptr.hbm [resolvable:$true] %s5759_s12 }
  0x12   :  { %s5761_s11 = scalar_lea.hbm %s5760_s12, 512  ;;  %p5764_p1 = scmp.lt.s32.totalorder %s5760_s12, %s8907_s6 }
  0x13   :  { %p5762_p0 = scmp.ne.s32.totalorder %s5760_s12, %s5761_s11  ;;  %p5765_p2 = scmp.lt.s32.totalorder %s5763_s15, %s5761_s11 }
  0x15   :  { %p5766_p3 = por %p5765_p2, %p5764_p1 }
  0x17   :  { %p5767_p4 = pnand %p5766_p3, %p5762_p0 }
  0x19   :  { %5770 = shalt.err (!%p5767_p4)
}
  0x1a   :  { %s5839_s3 = smov 256   ;;  %s5840_s18 = smov 16  }
  0x1b   :  { %43 = dma.hbm_to_vmem [thread:$0]  %s36_s1, 8192, %s38_s16, [#allocation10], %s5839_s3, %s5839_s3, %s5840_s18  }
  0x1c   :  { %s5783_s19 = sshra.s32 %s5917_s30, 4  ;;  %s5787_s6 = scalar_lea.hbm %s8908_s7, 512  ;;  %s5784_s19 = int_to_ptr.hbm [resolvable:$true] %s5783_s19 }
  0x1d   :  { %s5785_s5 = scalar_lea.hbm %s5784_s19, 512  ;;  %p5788_p6 = scmp.lt.s32.totalorder %s5784_s19, %s8908_s7 }
  0x1e   :  { %p5786_p5 = scmp.ne.s32.totalorder %s5784_s19, %s5785_s5  ;;  %p5789_p7 = scmp.lt.s32.totalorder %s5787_s6, %s5785_s5 }
  0x20   :  { %p5790_p8 = por %p5789_p7, %p5788_p6 }
  0x22   :  { %p5791_p9 = pnand %p5790_p8, %p5786_p5 }
  0x24   :  { %5794 = shalt.err (!%p5791_p9)
}
  0x25   :  { %65 = dma.hbm_to_vmem [thread:$0]  %s5917_s30, 8192, %s60_s22, [#allocation13], %s5839_s3, %s5839_s3, %s5840_s18  }
  0x26   :  { %5831 = dma.done.wait [#allocation10], 8192  }
  0x27   :  { %5832 = vsyncadd [#allocation10], 4294959104 }
  0x28   :  { %5833 = dma.done.wait [#allocation13], 8192  }
  0x29   :  { %5834 = vsyncadd [#allocation13], 4294959104  ;;  %p5744_p10 = scmp.ne.s32.totalorder %s8905_s4, 1 }
  0x2b   :  { %94 = sbr.rel (%p5744_p10) target bundleno = 113 (0x71), region = 21 }
  0x30   :  { %v5841_v0 = vmov 0.0  }
  0x31   :  { %95 = vst [vmem:[#allocation14] sm:$0xff] %v5841_v0 }
  0x32   :  { %96 = vst [vmem:[#allocation14 + $0x8] sm:$0xff] %v5841_v0 }
  0x33   :  { %97 = vst [vmem:[#allocation14 + $0x10] sm:$0xff] %v5841_v0 }
  0x34   :  { %98 = vst [vmem:[#allocation14 + $0x18] sm:$0xff] %v5841_v0 }
  0x35   :  { %99 = vst [vmem:[#allocation14 + $0x20] sm:$0xff] %v5841_v0 }
  0x36   :  { %100 = vst [vmem:[#allocation14 + $0x28] sm:$0xff] %v5841_v0 }
  0x37   :  { %101 = vst [vmem:[#allocation14 + $0x30] sm:$0xff] %v5841_v0 }
  0x38   :  { %102 = vst [vmem:[#allocation14 + $0x38] sm:$0xff] %v5841_v0 }
  0x39   :  { %103 = vst [vmem:[#allocation14 + $0x40] sm:$0xff] %v5841_v0 }
  0x3a   :  { %104 = vst [vmem:[#allocation14 + $0x48] sm:$0xff] %v5841_v0 }
  0x3b   :  { %105 = vst [vmem:[#allocation14 + $0x50] sm:$0xff] %v5841_v0 }
  0x3c   :  { %106 = vst [vmem:[#allocation14 + $0x58] sm:$0xff] %v5841_v0 }
  0x3d   :  { %107 = vst [vmem:[#allocation14 + $0x60] sm:$0xff] %v5841_v0 }
  0x3e   :  { %108 = vst [vmem:[#allocation14 + $0x68] sm:$0xff] %v5841_v0 }
  0x3f   :  { %109 = vst [vmem:[#allocation14 + $0x70] sm:$0xff] %v5841_v0 }
  0x40   :  { %110 = vst [vmem:[#allocation14 + $0x78] sm:$0xff] %v5841_v0 }
  0x41   :  { %111 = vst [vmem:[#allocation14 + $0x80] sm:$0xff] %v5841_v0 }
  0x42   :  { %112 = vst [vmem:[#allocation14 + $0x88] sm:$0xff] %v5841_v0 }
  0x43   :  { %113 = vst [vmem:[#allocation14 + $0x90] sm:$0xff] %v5841_v0 }
  0x44   :  { %114 = vst [vmem:[#allocation14 + $0x98] sm:$0xff] %v5841_v0 }
  0x45   :  { %115 = vst [vmem:[#allocation14 + $0xa0] sm:$0xff] %v5841_v0 }
  0x46   :  { %116 = vst [vmem:[#allocation14 + $0xa8] sm:$0xff] %v5841_v0 }
  0x47   :  { %117 = vst [vmem:[#allocation14 + $0xb0] sm:$0xff] %v5841_v0 }
  0x48   :  { %118 = vst [vmem:[#allocation14 + $0xb8] sm:$0xff] %v5841_v0 }
  0x49   :  { %119 = vst [vmem:[#allocation14 + $0xc0] sm:$0xff] %v5841_v0 }
  0x4a   :  { %120 = vst [vmem:[#allocation14 + $0xc8] sm:$0xff] %v5841_v0 }
  0x4b   :  { %121 = vst [vmem:[#allocation14 + $0xd0] sm:$0xff] %v5841_v0 }
  0x4c   :  { %122 = vst [vmem:[#allocation14 + $0xd8] sm:$0xff] %v5841_v0 }
  0x4d   :  { %123 = vst [vmem:[#allocation14 + $0xe0] sm:$0xff] %v5841_v0 }
  0x4e   :  { %124 = vst [vmem:[#allocation14 + $0xe8] sm:$0xff] %v5841_v0 }
  0x4f   :  { %125 = vst [vmem:[#allocation14 + $0xf0] sm:$0xff] %v5841_v0 }
  0x50   :  { %126 = vst [vmem:[#allocation14 + $0xf8] sm:$0xff] %v5841_v0 }
  0x51   :  { %127 = vst [vmem:[#allocation14 + $0x100] sm:$0xff] %v5841_v0 }
  0x52   :  { %128 = vst [vmem:[#allocation14 + $0x108] sm:$0xff] %v5841_v0 }
  0x53   :  { %129 = vst [vmem:[#allocation14 + $0x110] sm:$0xff] %v5841_v0 }
  0x54   :  { %130 = vst [vmem:[#allocation14 + $0x118] sm:$0xff] %v5841_v0 }
  0x55   :  { %131 = vst [vmem:[#allocation14 + $0x120] sm:$0xff] %v5841_v0 }
  0x56   :  { %132 = vst [vmem:[#allocation14 + $0x128] sm:$0xff] %v5841_v0 }
  0x57   :  { %133 = vst [vmem:[#allocation14 + $0x130] sm:$0xff] %v5841_v0 }
  0x58   :  { %134 = vst [vmem:[#allocation14 + $0x138] sm:$0xff] %v5841_v0 }
  0x59   :  { %135 = vst [vmem:[#allocation14 + $0x140] sm:$0xff] %v5841_v0 }
  0x5a   :  { %136 = vst [vmem:[#allocation14 + $0x148] sm:$0xff] %v5841_v0 }
  0x5b   :  { %137 = vst [vmem:[#allocation14 + $0x150] sm:$0xff] %v5841_v0 }
  0x5c   :  { %138 = vst [vmem:[#allocation14 + $0x158] sm:$0xff] %v5841_v0 }
  0x5d   :  { %139 = vst [vmem:[#allocation14 + $0x160] sm:$0xff] %v5841_v0 }
  0x5e   :  { %140 = vst [vmem:[#allocation14 + $0x168] sm:$0xff] %v5841_v0 }
  0x5f   :  { %141 = vst [vmem:[#allocation14 + $0x170] sm:$0xff] %v5841_v0 }
  0x60   :  { %142 = vst [vmem:[#allocation14 + $0x178] sm:$0xff] %v5841_v0 }
  0x61   :  { %143 = vst [vmem:[#allocation14 + $0x180] sm:$0xff] %v5841_v0 }
  0x62   :  { %144 = vst [vmem:[#allocation14 + $0x188] sm:$0xff] %v5841_v0 }
  0x63   :  { %145 = vst [vmem:[#allocation14 + $0x190] sm:$0xff] %v5841_v0 }
  0x64   :  { %146 = vst [vmem:[#allocation14 + $0x198] sm:$0xff] %v5841_v0 }
  0x65   :  { %147 = vst [vmem:[#allocation14 + $0x1a0] sm:$0xff] %v5841_v0 }
  0x66   :  { %148 = vst [vmem:[#allocation14 + $0x1a8] sm:$0xff] %v5841_v0 }
  0x67   :  { %149 = vst [vmem:[#allocation14 + $0x1b0] sm:$0xff] %v5841_v0 }
  0x68   :  { %150 = vst [vmem:[#allocation14 + $0x1b8] sm:$0xff] %v5841_v0 }
  0x69   :  { %151 = vst [vmem:[#allocation14 + $0x1c0] sm:$0xff] %v5841_v0 }
  0x6a   :  { %152 = vst [vmem:[#allocation14 + $0x1c8] sm:$0xff] %v5841_v0 }
  0x6b   :  { %153 = vst [vmem:[#allocation14 + $0x1d0] sm:$0xff] %v5841_v0 }
  0x6c   :  { %154 = vst [vmem:[#allocation14 + $0x1d8] sm:$0xff] %v5841_v0 }
  0x6d   :  { %155 = vst [vmem:[#allocation14 + $0x1e0] sm:$0xff] %v5841_v0 }
  0x6e   :  { %156 = vst [vmem:[#allocation14 + $0x1e8] sm:$0xff] %v5841_v0 }
  0x6f   :  { %157 = vst [vmem:[#allocation14 + $0x1f0] sm:$0xff] %v5841_v0 }
  0x70   :  { %158 = vst [vmem:[#allocation14 + $0x1f8] sm:$0xff] %v5841_v0 }
  0x71 PF:  { %s159_s4 = sld [smem:[#allocation8]] }
  0x77   :  { %p5745_p11 = scmp.ne.s32.totalorder %s159_s4, 1 }
  0x79   :  { %163 = sbr.rel (%p5745_p11) target bundleno = 1832 (0x728), region = 25 }
  0x7e   :  { %v322_v1 = vld [vmem:[#allocation12 + $0xf0] sm:$0xff]  ;;  %v320_v2 = vld [vmem:[#allocation12 + $0xe0] sm:$0xff] }
  0x7f   :  { %v318_v3 = vld [vmem:[#allocation12 + $0xd0] sm:$0xff]  ;;  %v6009_v4 = vand.u32 4294901760, %v322_v1  ;;  %v6011_v5 = vand.u32 4294901760, %v320_v2  ;;  %v316_v7 = vld [vmem:[#allocation12 + $0xc0] sm:$0xff] }
  0x80   :  { %v6013_v6 = vand.u32 4294901760, %v318_v3  ;;  %v314_v8 = vld [vmem:[#allocation12 + $0xb0] sm:$0xff]  ;;  %v312_v9 = vld [vmem:[#allocation12 + $0xa0] sm:$0xff]  ;;  %v6015_v10 = vand.u32 4294901760, %v316_v7 }
  0x81   :  { %v6017_v11 = vand.u32 4294901760, %v314_v8  ;;  %v6019_v12 = vand.u32 4294901760, %v312_v9  ;;  %v310_v13 = vld [vmem:[#allocation12 + $0x90] sm:$0xff]  ;;  %v308_v14 = vld [vmem:[#allocation12 + $0x80] sm:$0xff]  ;;  %357 = vmatpush.msra.mxu0 %v6009_v4  ;;  %v6023_v15 = vsub.f32 %v322_v1, %v6009_v4  ;;  %v6026_v16 = vsub.f32 %v320_v2, %v6011_v5  ;;  %1080 = vmatpush.msra.mxu3 %v6009_v4 }
  0x82   :  { %v6030_v17 = vsub.f32 %v318_v3, %v6013_v6  ;;  %v6032_v18 = vand.u32 4294901760, %v310_v13  ;;  %v306_v19 = vld [vmem:[#allocation12 + $0x70] sm:$0xff]  ;;  %v6035_v20 = vsub.f32 %v316_v7, %v6015_v10  ;;  %v6048_v26 = vand.u32 4294901760, %v308_v14  ;;  %v304_v27 = vld [vmem:[#allocation12 + $0x60] sm:$0xff] }
  0x83   :  { %v6038_v21 = vsub.f32 %v314_v8, %v6017_v11  ;;  %v6041_v22 = vsub.f32 %v312_v9, %v6019_v12  ;;  %359 = vmatpush.msra.mxu0 %v6011_v5  ;;  %872 = vmatpush.msra.mxu2 %v6023_v15  ;;  %v647_v23 = vand.u32 4294901760, %v6023_v15  ;;  %v653_v24 = vand.u32 4294901760, %v6026_v16  ;;  %v302_v35 = vld [vmem:[#allocation12 + $0x50] sm:$0xff]  ;;  %v300_v45 = vld [vmem:[#allocation12 + $0x40] sm:$0xff] }
  0x84   :  { %v659_v25 = vand.u32 4294901760, %v6030_v17  ;;  %1082 = vmatpush.msra.mxu3 %v6011_v5  ;;  %v665_v28 = vand.u32 4294901760, %v6035_v20  ;;  %v6052_v29 = vand.u32 4294901760, %v306_v19  ;;  %v6055_v30 = vsub.f32 %v310_v13, %v6032_v18  ;;  %v298_v50 = vld [vmem:[#allocation12 + $0x30] sm:$0xff]  ;;  %v296_v57 = vld [vmem:[#allocation12 + $0x20] sm:$0xff] }
  0x85   :  { %361 = vmatpush.msra.mxu0 %v6013_v6  ;;  %875 = vmatpush.msra.mxu2 %v6026_v16  ;;  %v648_v31 = vsub.f32 %v6023_v15, %v647_v23  ;;  %v654_v32 = vsub.f32 %v6026_v16, %v653_v24  ;;  %v671_v34 = vand.u32 4294901760, %v6038_v21  ;;  %v6070_v36 = vand.u32 4294901760, %v304_v27  ;;  %v228_v58 = vld [vmem:[#allocation9] sm:$0xff]  ;;  %v294_v63 = vld [vmem:[#allocation12 + $0x10] sm:$0xff] }
  0x86   :  { %v660_v33 = vsub.f32 %v6030_v17, %v659_v25  ;;  %1084 = vmatpush.msra.mxu3 %v6013_v6  ;;  %v8922_v37 = vand.u32 4294901760, %v6041_v22  ;;  %v666_v40 = vsub.f32 %v6035_v20, %v665_v28  ;;  %v6079_v41 = vsub.f32 %v308_v14, %v6048_v26  ;;  %v354_v0 = vld [vmem:[#allocation12 + $0x1f0] sm:$0xff]  ;;  %v292_v14 = vld [vmem:[#allocation12] sm:$0xff] }
  0x87   :  { %363 = vmatpush.msra.mxu0 %v6015_v10  ;;  %v649_v38 = vand.u32 4294901760, %v648_v31  ;;  %878 = vmatpush.msra.mxu2 %v6030_v17  ;;  %v655_v39 = vand.u32 4294901760, %v654_v32  ;;  %v6082_v42 = vand.u32 4294901760, %v302_v35  ;;  %v8921_v43 = vand.u32 4294901760, %v6055_v30  ;;  %v236_v16 = vld [vmem:[#allocation9 + $0x40] sm:$0xff] }
  0x88   :  { %1086 = vmatpush.msra.mxu3 %v6015_v10  ;;  %v6086_v44 = vsub.f32 %v306_v19, %v6052_v29  ;;  %v661_v46 = vand.u32 4294901760, %v660_v33  ;;  %v672_v47 = vsub.f32 %v6038_v21, %v671_v34  ;;  %v678_v48 = vsub.f32 %v6041_v22, %v8922_v37  ;;  %v230_v33 = vld [vmem:[#allocation9 + $0x10] sm:$0xff] }
  0x89   :  { %365 = vmatpush.msra.mxu0 %v6017_v11  ;;  %650 = vmatpush.msra.mxu1 %v649_v38  ;;  %v6098_v49 = vsub.f32 %v304_v27, %v6070_v36  ;;  %v667_v51 = vand.u32 4294901760, %v666_v40  ;;  %v6101_v52 = vand.u32 4294901760, %v300_v45  ;;  %v8915_v53 = vand.u32 4294901760, %v6079_v41  ;;  %v350_v37 = vld [vmem:[#allocation12 + $0x1d0] sm:$0xff] }
  0x8a   :  { %881 = vmatpush.msra.mxu2 %v6035_v20  ;;  %1088 = vmatpush.msra.mxu3 %v6017_v11  ;;  %v684_v54 = vsub.f32 %v6055_v30, %v8921_v43  ;;  %v8914_v55 = vand.u32 4294901760, %v6086_v44  ;;  %v6111_v56 = vsub.f32 %v302_v35, %v6082_v42  ;;  %v673_v59 = vand.u32 4294901760, %v672_v47  ;;  %v238_v20 = vld [vmem:[#allocation9 + $0x50] sm:$0xff] }
  0x8b   :  { %367 = vmatpush.msra.mxu0 %v6019_v12  ;;  %656 = vmatpush.msra.mxu1 %v655_v39  ;;  %v6114_v60 = vand.u32 4294901760, %v298_v50  ;;  %v679_v61 = vand.u32 4294901760, %v678_v48  ;;  %v8913_v62 = vand.u32 4294901760, %v6098_v49  ;;  %v690_v1 = vsub.f32 %v6079_v41, %v8915_v53 }
  0x8c   :  { %884 = vmatpush.msra.mxu2 %v6038_v21  ;;  %1090 = vmatpush.msra.mxu3 %v6019_v12  ;;  %v6123_v2 = vand.u32 4294901760, %v296_v57  ;;  %v6126_v3 = vsub.f32 %v300_v45, %v6101_v52  ;;  %v6128_v7 = vand.u32 4294901760, %v228_v58  ;;  %v685_v8 = vand.u32 4294901760, %v684_v54 }
  0x8d   :  { %369 = vmatpush.msra.mxu0 %v6032_v18  ;;  %662 = vmatpush.msra.mxu1 %v661_v46  ;;  %v696_v9 = vsub.f32 %v6086_v44, %v8914_v55  ;;  %v8911_v13 = vand.u32 4294901760, %v6111_v56  ;;  %v6137_v19 = vand.u32 4294901760, %v294_v63  ;;  %v6140_v27 = vsub.f32 %v298_v50, %v6114_v60  ;;  %v352_v46 = vld [vmem:[#allocation12 + $0x1e0] sm:$0xff] }
  0x8e   :  { %887 = vmatpush.msra.mxu2 %v6041_v22  ;;  %1092 = vmatpush.msra.mxu3 %v6032_v18  ;;  %9371 = vst [vmem:[#allocation18_spill] sm:$0xff] %v6128_v7  ;;  %v6143_v31 = vsub.f32 %v228_v58, %v6128_v7  ;;  %v6145_v32 = vand.u32 4294901760, %v354_v0  ;;  %v702_v35 = vsub.f32 %v6098_v49, %v8913_v62  ;;  %v691_v38 = vand.u32 4294901760, %v690_v1 }
  0x8f   :  { %371 = vmatpush.msra.mxu0 %v6048_v26  ;;  %668 = vmatpush.msra.mxu1 %v667_v51  ;;  %v6153_v39 = vand.u32 4294901760, %v292_v14  ;;  %v8910_v40 = vand.u32 4294901760, %v6126_v3  ;;  %v6157_v45 = vsub.f32 %v296_v57, %v6123_v2  ;;  %v697_v47 = vand.u32 4294901760, %v696_v9 }
  0x90   :  { %890 = vmatpush.msra.mxu2 %v6055_v30  ;;  %1094 = vmatpush.msra.mxu3 %v6048_v26  ;;  %9372 = vst [vmem:[#allocation19_spill] sm:$0xff] %v6143_v31  ;;  %v708_v48 = vsub.f32 %v6111_v56, %v8911_v13  ;;  %v6165_v50 = vand.u32 4294901760, %v6143_v31  ;;  %v6167_v51 = vand.u32 4294901760, %v230_v33  ;;  %v8912_v54 = vand.u32 4294901760, %v6140_v27  ;;  %v232_v13 = vld [vmem:[#allocation9 + $0x20] sm:$0xff] }
  0x91   :  { %373 = vmatpush.msra.mxu0 %v6052_v29  ;;  %674 = vmatpush.msra.mxu1 %v673_v59  ;;  %v6172_v57 = vsub.f32 %v294_v63, %v6137_v19  ;;  %v6175_v58 = vsub.f32 %v354_v0, %v6145_v32  ;;  %v6177_v59 = vand.u32 4294901760, %v352_v46  ;;  %v714_v1 = vsub.f32 %v6126_v3, %v8910_v40 }
  0x92   :  { %893 = vmatpush.msra.mxu2 %v6079_v41  ;;  %1096 = vmatpush.msra.mxu3 %v6052_v29  ;;  %9373 = vst [vmem:[#allocation20_spill] sm:$0xff] %v6165_v50  ;;  %v8916_v63 = vand.u32 4294901760, %v6157_v45  ;;  %v391_v9 = vsub.f32 %v6143_v31, %v6165_v50  ;;  %v6220_v53 = vand.u32 4294901760, %v232_v13 }
  0x93   :  { %375 = vmatpush.msra.mxu0 %v6070_v36  ;;  %680 = vmatpush.msra.mxu1 %v679_v61  ;;  %9374 = vst [vmem:[#allocation21_spill] sm:$0xff] %v6167_v51  ;;  %v703_v61 = vand.u32 4294901760, %v702_v35  ;;  %v6190_v0 = vsub.f32 %v352_v46, %v6177_v59  ;;  %v6197_v35 = vsub.f32 %v230_v33, %v6167_v51  ;;  %v8918_v46 = vand.u32 4294901760, %v6172_v57 }
  0x94   :  { %896 = vmatpush.msra.mxu2 %v6086_v44  ;;  %1098 = vmatpush.msra.mxu3 %v6070_v36  ;;  %v8917_v40 = vand.u32 4294901760, %v6175_v58  ;;  %v715_v33 = vand.u32 4294901760, %v714_v1  ;;  %v6214_v62 = vand.u32 4294901760, %v391_v9  ;;  %9378 = vst [vmem:[#allocation25_spill] sm:$0xff] %v6220_v53 }
  0x95   :  { %377 = vmatpush.msra.mxu0 %v6082_v42  ;;  %686 = vmatpush.msra.mxu1 %v685_v8  ;;  %v6187_v8 = vsub.f32 %v292_v14, %v6153_v39  ;;  %9375 = vst [vmem:[#allocation22_spill] sm:$0xff] %v6197_v35  ;;  %v720_v14 = vsub.f32 %v6140_v27, %v8912_v54  ;;  %v8920_v54 = vand.u32 4294901760, %v6190_v0  ;;  %v6218_v55 = vand.u32 4294901760, %v6197_v35 }
  0x96   :  { %899 = vmatpush.msra.mxu2 %v6098_v49  ;;  %1100 = vmatpush.msra.mxu3 %v6082_v42  ;;  %9376 = vst [vmem:[#allocation23_spill] sm:$0xff] %v6214_v62  ;;  %v732_v1 = vsub.f32 %v6172_v57, %v8918_v46  ;;  %v1950_v9 = vsub.f32 %v6175_v58, %v8917_v40 }
  0x97   :  { %379 = vmatpush.msra.mxu0 %v6101_v52  ;;  %692 = vmatpush.msra.mxu1 %v691_v38  ;;  %v709_v38 = vand.u32 4294901760, %v708_v48  ;;  %v8919_v48 = vand.u32 4294901760, %v6187_v8  ;;  %9377 = vst [vmem:[#allocation24_spill] sm:$0xff] %v6218_v55  ;;  %v399_v40 = vsub.f32 %v6197_v35, %v6218_v55  ;;  %v6243_v46 = vsub.f32 %v232_v13, %v6220_v53 }
  0x98   :  { %902 = vmatpush.msra.mxu2 %v6111_v56  ;;  %1102 = vmatpush.msra.mxu3 %v6101_v52 }
  0x99   :  { %381 = vmatpush.msra.mxu0 %v6114_v60  ;;  %698 = vmatpush.msra.mxu1 %v697_v47  ;;  %v726_v47 = vsub.f32 %v6157_v45, %v8916_v63  ;;  %9379 = vst [vmem:[#allocation26_spill] sm:$0xff] %v6243_v46  ;;  %v6252_v13 = vand.u32 4294901760, %v399_v40 }
  0x9a   :  { %905 = vmatpush.msra.mxu2 %v6126_v3  ;;  %1104 = vmatpush.msra.mxu3 %v6114_v60 }
  0x9b   :  { %383 = vmatpush.msra.mxu0 %v6123_v2  ;;  %704 = vmatpush.msra.mxu1 %v703_v61  ;;  %v721_v61 = vand.u32 4294901760, %v720_v14  ;;  %v727_v63 = vand.u32 4294901760, %v726_v47  ;;  %v1956_v14 = vsub.f32 %v6190_v0, %v8920_v54  ;;  %v1951_v47 = vand.u32 4294901760, %v1950_v9  ;;  %9380 = vst [vmem:[#allocation27_spill] sm:$0xff] %v6252_v13 }
  0x9c   :  { %908 = vmatpush.msra.mxu2 %v6140_v27  ;;  %1106 = vmatpush.msra.mxu3 %v6123_v2  ;;  %v6259_v9 = vand.u32 4294901760, %v350_v37 }
  0x9d   :  { %385 = vmatpush.msra.mxu0 %v6137_v19  ;;  %710 = vmatpush.msra.mxu1 %v709_v38  ;;  %v738_v38 = vsub.f32 %v6187_v8, %v8919_v48  ;;  %v234_v48 = vld [vmem:[#allocation9 + $0x30] sm:$0xff]  ;;  %v1957_v43 = vand.u32 4294901760, %v1956_v14  ;;  %v9395_v14 = vand.u32 4294901760, %v6086_v44 }
  0x9e   :  { %911 = vmatpush.msra.mxu2 %v6157_v45  ;;  %1108 = vmatpush.msra.mxu3 %v6137_v19 }
  0x9f   :  { %387 = vmatpush.msra.mxu0 %v6153_v39  ;;  %716 = vmatpush.msra.mxu1 %v715_v33  ;;  %v733_v33 = vand.u32 4294901760, %v732_v1  ;;  %v739_v54 = vand.u32 4294901760, %v738_v38  ;;  %v6257_v1 = vand.u32 4294901760, %v234_v48  ;;  %v240_v38 = vld [vmem:[#allocation9 + $0x60] sm:$0xff] }
  0xa0   :  { %393 = vmatmul.f32.vlgmr.msra.gmra.mxu0 %v6214_v62  ;;  %914 = vmatpush.msra.mxu2 %v6172_v57  ;;  %v6353_v44 = vand.u32 4294901760, %v240_v38 }
  0xa1   :  { %722 = vmatpush.msra.mxu1 %v721_v61  ;;  %1110 = vmatpush.msra.mxu3 %v6153_v39  ;;  %v6255_v61 = vand.u32 4294901760, %v6243_v46  ;;  %9382 = vst [vmem:[#allocation29_spill] sm:$0xff] %v6257_v1 }
  0xa2   :  { %917 = vmatpush.msra.mxu2 %v6187_v8  ;;  %1114 = vmatmul.f32.vlgmr.msra.gmra.mxu3 %v6165_v50  ;;  %9399 = vst [vmem:[#allocation41_spill] sm:$0xff] %v6353_v44 }
  0xa3   :  { %728 = vmatpush.msra.mxu1 %v727_v63  ;;  %920 = vmatmul.f32.vlgmr.msra.gmra.mxu2 %v6143_v31  ;;  %9381 = vst [vmem:[#allocation28_spill] sm:$0xff] %v6255_v61  ;;  %v6265_v63 = vsub.f32 %v350_v37, %v6259_v9  ;;  %v407_v15 = vsub.f32 %v6243_v46, %v6255_v61 }
  0xa4   :  { %1659 = vmatpush.msrb.mxu2 %v6145_v32  ;;  %1307 = vmatpush.msrb.mxu0 %v647_v23  ;;  %v6272_v23 = vsub.f32 %v234_v48, %v6257_v1 }
  0xa5   :  { %734 = vmatpush.msra.mxu1 %v733_v33  ;;  %1952 = vmatpush.msrb.mxu3 %v1951_v47  ;;  %v8926_v40 = vand.u32 4294901760, %v6265_v63  ;;  %v6285_v37 = vand.u32 4294901760, %v407_v15 }
  0xa6   :  { %1661 = vmatpush.msrb.mxu2 %v6177_v59  ;;  %1311 = vmatpush.msrb.mxu0 %v653_v24  ;;  %9383 = vst [vmem:[#allocation30_spill] sm:$0xff] %v6272_v23 }
  0xa7   :  { %740 = vmatpush.msra.mxu1 %v739_v54  ;;  %1958 = vmatpush.msrb.mxu3 %v1957_v43  ;;  %v1962_v24 = vsub.f32 %v6265_v63, %v8926_v40  ;;  %9384 = vst [vmem:[#allocation31_spill] sm:$0xff] %v6285_v37  ;;  %v6290_v43 = vand.u32 4294901760, %v236_v16  ;;  %v252_v40 = vld [vmem:[#allocation9 + $0xc0] sm:$0xff] }
  0xa8   :  { %401 = vmatmul.f32.gmra.mxu0 %v6252_v13  ;;  %742 = vmatmul.f32.vlgmr.msra.gmra.mxu1 %v6128_v7 }
  0xa9   :  { %1498 = vmatpush.msrb.mxu1 %v6009_v4  ;;  %1663 = vmatpush.msrb.mxu2 %v6259_v9  ;;  %v6288_v4 = vand.u32 4294901760, %v6272_v23  ;;  %9386 = vst [vmem:[#allocation33_spill] sm:$0xff] %v6290_v43  ;;  %v1963_v54 = vand.u32 4294901760, %v1962_v24  ;;  %v6303_v17 = vsub.f32 %v236_v16, %v6290_v43  ;;  %v9401_v16 = vand.u32 4294901760, %v6126_v3 }
  0xaa   :  { %1120 = vmatmul.f32.gmra.mxu3 %v6218_v55  ;;  %1315 = vmatpush.msrb.mxu0 %v659_v25  ;;  %v6366_v24 = vsub.f32 %v240_v38, %v6353_v44 }
  0xab   :  { %925 = vmatmul.f32.gmra.mxu2 %v6197_v35  ;;  %1500 = vmatpush.msrb.mxu1 %v6011_v5  ;;  %9385 = vst [vmem:[#allocation32_spill] sm:$0xff] %v6288_v4  ;;  %v415_v5 = vsub.f32 %v6272_v23, %v6288_v4  ;;  %v6314_v25 = vand.u32 4294901760, %v6303_v17 }
  0xac   :  { %1319 = vmatpush.msrb.mxu0 %v665_v28  ;;  %1964 = vmatpush.msrb.mxu3 %v1963_v54  ;;  %9387 = vst [vmem:[#allocation34_spill] sm:$0xff] %v6303_v17  ;;  %v6316_v28 = vand.u32 4294901760, %v238_v20  ;;  %v6377_v54 = vand.u32 4294901760, %v6366_v24 }
  0xad   :  { %1502 = vmatpush.msrb.mxu1 %v6013_v6  ;;  %v9388_v6 = vand.u32 4294901760, %v6041_v22  ;;  %v6311_v21 = vand.u32 4294901760, %v415_v5  ;;  %9390 = vst [vmem:[#allocation36_spill] sm:$0xff] %v6314_v25 }
  0xae   :  { %1323 = vmatpush.msrb.mxu0 %v671_v34  ;;  %9391 = vst [vmem:[#allocation37_spill] sm:$0xff] %v6316_v28  ;;  %v6335_v48 = vsub.f32 %v238_v20, %v6316_v28 }
  0xaf   :  { %1504 = vmatpush.msrb.mxu1 %v6015_v10  ;;  %v348_v10 = vld [vmem:[#allocation12 + $0x1c0] sm:$0xff]  ;;  %9389 = vst [vmem:[#allocation35_spill] sm:$0xff] %v6311_v21 }
  0xb0   :  { %409 = vmatmul.f32.gmra.mxu0 %v6285_v37  ;;  %746 = vmatmul.f32.gmra.mxu1 %v6167_v51  ;;  %v6318_v34 = vand.u32 4294901760, %v348_v10  ;;  %9394 = vst [vmem:[#allocation38_spill] sm:$0xff] %v6335_v48  ;;  %v6351_v47 = vand.u32 4294901760, %v6335_v48 }
  0xb1   :  { %1506 = vmatpush.msrb.mxu1 %v6017_v11  ;;  %1327 = vmatpush.msrb.mxu0 %v9388_v6  ;;  %v9392_v11 = vand.u32 4294901760, %v6055_v30  ;;  %v423_v30 = vsub.f32 %v6303_v17, %v6314_v25  ;;  %9402 = vst [vmem:[#allocation42_spill] sm:$0xff] %v6366_v24 }
  0xb2   :  { %1126 = vmatmul.f32.gmra.mxu3 %v6255_v61  ;;  %1665 = vmatpush.msrb.mxu2 %v6318_v34  ;;  %v6325_v22 = vsub.f32 %v348_v10, %v6318_v34  ;;  %9398 = vst [vmem:[#allocation40_spill] sm:$0xff] %v6351_v47  ;;  %v244_v10 = vld [vmem:[#allocation9 + $0x80] sm:$0xff] }
  0xb3   :  { %930 = vmatmul.f32.gmra.mxu2 %v6243_v46  ;;  %1508 = vmatpush.msrb.mxu1 %v6019_v12  ;;  %v9393_v12 = vand.u32 4294901760, %v6079_v41  ;;  %v9396_v41 = vand.u32 4294901760, %v6098_v49  ;;  %v6348_v33 = vand.u32 4294901760, %v423_v30  ;;  %v431_v49 = vsub.f32 %v6335_v48, %v6351_v47  ;;  %9405 = vst [vmem:[#allocation44_spill] sm:$0xff] %v6377_v54 }
  0xb4   :  { %1331 = vmatpush.msrb.mxu0 %v9392_v11  ;;  %v9410_v11 = vand.u32 4294901760, %v6187_v8  ;;  %v6416_v8 = vand.u32 4294901760, %v244_v10 }
  0xb5   :  { %1510 = vmatpush.msrb.mxu1 %v6032_v18  ;;  %v8925_v18 = vand.u32 4294901760, %v6325_v22  ;;  %9397 = vst [vmem:[#allocation39_spill] sm:$0xff] %v6348_v33  ;;  %v6374_v3 = vand.u32 4294901760, %v431_v49 }
  0xb6   :  { %1335 = vmatpush.msrb.mxu0 %v9393_v12  ;;  %9413 = vst [vmem:[#allocation49_spill] sm:$0xff] %v6416_v8  ;;  %v6427_v38 = vsub.f32 %v244_v10, %v6416_v8 }
  0xb7   :  { %1512 = vmatpush.msrb.mxu1 %v6048_v26  ;;  %v1968_v26 = vsub.f32 %v6325_v22, %v8925_v18  ;;  %9404 = vst [vmem:[#allocation43_spill] sm:$0xff] %v6374_v3 }
  0xb8   :  { %417 = vmatmul.f32.gmra.mxu0 %v6311_v21  ;;  %750 = vmatmul.f32.gmra.mxu1 %v6220_v53  ;;  %9414 = vst [vmem:[#allocation50_spill] sm:$0xff] %v6427_v38 }
  0xb9   :  { %1339 = vmatpush.msrb.mxu0 %v9395_v14  ;;  %1514 = vmatpush.msrb.mxu1 %v6052_v29  ;;  %v1969_v15 = vand.u32 4294901760, %v1968_v26  ;;  %v9400_v29 = vand.u32 4294901760, %v6111_v56  ;;  %v9403_v56 = vand.u32 4294901760, %v6140_v27  ;;  %v246_v14 = vld [vmem:[#allocation9 + $0x90] sm:$0xff]  ;;  %v344_v26 = vld [vmem:[#allocation12 + $0x1a0] sm:$0xff] }
  0xba   :  { %1132 = vmatmul.f32.gmra.mxu3 %v6288_v4 }
  0xbb   :  { %935 = vmatmul.f32.gmra.mxu2 %v6272_v23  ;;  %1343 = vmatpush.msrb.mxu0 %v9396_v41 }
  0xbc   :  { %1516 = vmatpush.msrb.mxu1 %v6070_v36  ;;  %1970 = vmatpush.msrb.mxu3 %v1969_v15  ;;  %v242_v36 = vld [vmem:[#allocation9 + $0x70] sm:$0xff]  ;;  %v6437_v15 = vand.u32 4294901760, %v6427_v38 }
  0xbd   :  { %1347 = vmatpush.msrb.mxu0 %v9400_v29  ;;  %v6379_v5 = vand.u32 4294901760, %v242_v36  ;;  %v6439_v29 = vand.u32 4294901760, %v246_v14 }
  0xbe   :  { %1518 = vmatpush.msrb.mxu1 %v6082_v42  ;;  %v346_v42 = vld [vmem:[#allocation12 + $0x1b0] sm:$0xff]  ;;  %9416 = vst [vmem:[#allocation52_spill] sm:$0xff] %v6437_v15 }
  0xbf   :  { %1351 = vmatpush.msrb.mxu0 %v9401_v16  ;;  %9406 = vst [vmem:[#allocation45_spill] sm:$0xff] %v6379_v5  ;;  %v6381_v20 = vand.u32 4294901760, %v346_v42  ;;  %v6398_v6 = vsub.f32 %v242_v36, %v6379_v5  ;;  %v6441_v16 = vand.u32 4294901760, %v344_v26  ;;  %v455_v36 = vsub.f32 %v6427_v38, %v6437_v15 }
  0xc0   :  { %425 = vmatmul.f32.gmra.mxu0 %v6348_v33  ;;  %754 = vmatmul.f32.gmra.mxu1 %v6257_v1  ;;  %9417 = vst [vmem:[#allocation53_spill] sm:$0xff] %v6439_v29 }
  0xc1   :  { %1520 = vmatpush.msrb.mxu1 %v6101_v52  ;;  %1355 = vmatpush.msrb.mxu0 %v9403_v56  ;;  %v9407_v52 = vand.u32 4294901760, %v6157_v45  ;;  %v6388_v27 = vsub.f32 %v346_v42, %v6381_v20  ;;  %v439_v45 = vsub.f32 %v6366_v24, %v6377_v54  ;;  %9409 = vst [vmem:[#allocation46_spill] sm:$0xff] %v6398_v6  ;;  %v6414_v12 = vand.u32 4294901760, %v6398_v6 }
  0xc2   :  { %1138 = vmatmul.f32.gmra.mxu3 %v6314_v25  ;;  %1667 = vmatpush.msrb.mxu2 %v6381_v20  ;;  %v6446_v49 = vsub.f32 %v344_v26, %v6441_v16  ;;  %v6454_v56 = vsub.f32 %v246_v14, %v6439_v29  ;;  %v250_v14 = vld [vmem:[#allocation9 + $0xb0] sm:$0xff] }
  0xc3   :  { %940 = vmatmul.f32.gmra.mxu2 %v6303_v17  ;;  %1522 = vmatpush.msrb.mxu1 %v6114_v60  ;;  %v9408_v60 = vand.u32 4294901760, %v6172_v57  ;;  %v6411_v57 = vand.u32 4294901760, %v439_v45  ;;  %9412 = vst [vmem:[#allocation48_spill] sm:$0xff] %v6414_v12  ;;  %v447_v30 = vsub.f32 %v6398_v6, %v6414_v12  ;;  %v6463_v45 = vand.u32 4294901760, %v455_v36  ;;  %v342_v26 = vld [vmem:[#allocation12 + $0x190] sm:$0xff] }
  0xc4   :  { %1359 = vmatpush.msrb.mxu0 %v9407_v52  ;;  %1669 = vmatpush.msrb.mxu2 %v6441_v16  ;;  %9418 = vst [vmem:[#allocation54_spill] sm:$0xff] %v6454_v56  ;;  %v8923_v42 = vand.u32 4294901760, %v6446_v49  ;;  %v248_v52 = vld [vmem:[#allocation9 + $0xa0] sm:$0xff]  ;;  %v6466_v10 = vand.u32 4294901760, %v6454_v56 }
  0xc5   :  { %1524 = vmatpush.msrb.mxu1 %v6123_v2  ;;  %v8924_v2 = vand.u32 4294901760, %v6388_v27  ;;  %9411 = vst [vmem:[#allocation47_spill] sm:$0xff] %v6411_v57  ;;  %v6434_v41 = vand.u32 4294901760, %v447_v30 }
  0xc6   :  { %1363 = vmatpush.msrb.mxu0 %v9408_v60  ;;  %v1980_v60 = vsub.f32 %v6446_v49, %v8923_v42  ;;  %9419 = vst [vmem:[#allocation55_spill] sm:$0xff] %v6463_v45  ;;  %v6486_v42 = vand.u32 4294901760, %v342_v26 }
  0xc7   :  { %1526 = vmatpush.msrb.mxu1 %v6137_v19  ;;  %v1974_v19 = vsub.f32 %v6388_v27, %v8924_v2  ;;  %9415 = vst [vmem:[#allocation51_spill] sm:$0xff] %v6434_v41 }
  0xc8   :  { %433 = vmatmul.f32.gmra.mxu0 %v6374_v3  ;;  %758 = vmatmul.f32.gmra.mxu1 %v6290_v43  ;;  %9420 = vst [vmem:[#allocation56_spill] sm:$0xff] %v6466_v10  ;;  %v264_v3 = vld [vmem:[#allocation9 + $0x120] sm:$0xff] }
  0xc9   :  { %1367 = vmatpush.msrb.mxu0 %v9410_v11  ;;  %1528 = vmatpush.msrb.mxu1 %v6153_v39  ;;  %v1975_v39 = vand.u32 4294901760, %v1974_v19  ;;  %v6468_v11 = vand.u32 4294901760, %v248_v52  ;;  %v1981_v19 = vand.u32 4294901760, %v1980_v60 }
  0xca   :  { %1144 = vmatmul.f32.gmra.mxu3 %v6351_v47  ;;  %1671 = vmatpush.msrb.mxu2 %v6486_v42 }
  0xcb   :  { %2174 = vmatpush.msra.mxu0 %v6175_v58  ;;  %945 = vmatmul.f32.gmra.mxu2 %v6335_v48  ;;  %9421 = vst [vmem:[#allocation57_spill] sm:$0xff] %v6468_v11  ;;  %v6475_v30 = vsub.f32 %v248_v52, %v6468_v11  ;;  %v6490_v52 = vsub.f32 %v342_v26, %v6486_v42 }
  0xcc   :  { %2382 = vmatpush.msra.mxu1 %v6145_v32  ;;  %1976 = vmatpush.msrb.mxu3 %v1975_v39  ;;  %v463_v39 = vsub.f32 %v6454_v56, %v6466_v10 }
  0xcd   :  { %2177 = vmatpush.msra.mxu0 %v6190_v0  ;;  %9422 = vst [vmem:[#allocation58_spill] sm:$0xff] %v6475_v30  ;;  %v6482_v60 = vand.u32 4294901760, %v6475_v30  ;;  %v8931_v18 = vand.u32 4294901760, %v6490_v52 }
  0xce   :  { %2384 = vmatpush.msra.mxu1 %v6177_v59  ;;  %1982 = vmatpush.msrb.mxu3 %v1981_v19  ;;  %v6479_v36 = vand.u32 4294901760, %v463_v39  ;;  %v6484_v19 = vand.u32 4294901760, %v250_v14 }
  0xcf   :  { %2180 = vmatpush.msra.mxu0 %v6265_v63  ;;  %9424 = vst [vmem:[#allocation60_spill] sm:$0xff] %v6482_v60  ;;  %v471_v39 = vsub.f32 %v6475_v30, %v6482_v60  ;;  %v1986_v26 = vsub.f32 %v6490_v52, %v8931_v18 }
  0xd0   :  { %2386 = vmatpush.msra.mxu1 %v6259_v9  ;;  %441 = vmatmul.f32.gmra.mxu0 %v6411_v57  ;;  %9423 = vst [vmem:[#allocation59_spill] sm:$0xff] %v6479_v36  ;;  %v6498_v2 = vsub.f32 %v250_v14, %v6484_v19  ;;  %v6512_v14 = vand.u32 4294901760, %v252_v40 }
  0xd1   :  { %762 = vmatmul.f32.gmra.mxu1 %v6316_v28  ;;  %2183 = vmatpush.msra.mxu0 %v6325_v22  ;;  %9425 = vst [vmem:[#allocation61_spill] sm:$0xff] %v6484_v19 }
  0xd2   :  { %2388 = vmatpush.msra.mxu1 %v6318_v34  ;;  %1150 = vmatmul.f32.gmra.mxu3 %v6377_v54  ;;  %9426 = vst [vmem:[#allocation62_spill] sm:$0xff] %v6498_v2  ;;  %v6519_v18 = vsub.f32 %v252_v40, %v6512_v14  ;;  %v260_v54 = vld [vmem:[#allocation9 + $0x100] sm:$0xff] }
  0xd3   :  { %950 = vmatmul.f32.gmra.mxu2 %v6366_v24  ;;  %2186 = vmatpush.msra.mxu0 %v6388_v27  ;;  %9429 = vst [vmem:[#allocation65_spill] sm:$0xff] %v6512_v14 }
  0xd4   :  { %2390 = vmatpush.msra.mxu1 %v6381_v20  ;;  %9430 = vst [vmem:[#allocation66_spill] sm:$0xff] %v6519_v18 }
  0xd5   :  { %2189 = vmatpush.msra.mxu0 %v6446_v49 }
  0xd6   :  { %2392 = vmatpush.msra.mxu1 %v6441_v16 }
  0xd7   :  { %2192 = vmatpush.msra.mxu0 %v6490_v52 }
  0xd8   :  { %449 = vmatmul.f32.gmra.mxu0 %v6434_v41  ;;  %2394 = vmatpush.msra.mxu1 %v6486_v42 }
  0xd9   :  { %766 = vmatmul.f32.gmra.mxu1 %v6353_v44 }
  0xda   :  { %1156 = vmatmul.f32.gmra.mxu3 %v6414_v12 }
  0xdb   :  { %955 = vmatmul.f32.gmra.mxu2 %v6398_v6  ;;  %v256_v6 = vld [vmem:[#allocation9 + $0xe0] sm:$0xff] }
  0xe0   :  { %457 = vmatmul.f32.gmra.mxu0 %v6463_v45 }
  0xe1   :  { %770 = vmatmul.f32.gmra.mxu1 %v6379_v5 }
  0xe2   :  { %1162 = vmatmul.f32.gmra.mxu3 %v6437_v15  ;;  %v1987_v15 = vand.u32 4294901760, %v1986_v26 }
  0xe3   :  { %960 = vmatmul.f32.gmra.mxu2 %v6427_v38  ;;  %v6510_v38 = vand.u32 4294901760, %v6498_v2 }
  0xe4   :  { %1988 = vmatpush.msrb.mxu3 %v1987_v15  ;;  %v6526_v15 = vand.u32 4294901760, %v6519_v18 }
  0xe5   :  { %9428 = vst [vmem:[#allocation64_spill] sm:$0xff] %v6510_v38 }
  0xe6   :  { %9432 = vst [vmem:[#allocation68_spill] sm:$0xff] %v6526_v15 }
  0xe8   :  { %465 = vmatmul.f32.gmra.mxu0 %v6479_v36  ;;  %v6507_v36 = vand.u32 4294901760, %v471_v39  ;;  %v340_v39 = vld [vmem:[#allocation12 + $0x180] sm:$0xff] }
  0xe9   :  { %774 = vmatmul.f32.gmra.mxu1 %v6416_v8 }
  0xea   :  { %1168 = vmatmul.f32.gmra.mxu3 %v6466_v10  ;;  %9427 = vst [vmem:[#allocation63_spill] sm:$0xff] %v6507_v36  ;;  %v479_v10 = vsub.f32 %v6498_v2, %v6510_v38 }
  0xeb   :  { %965 = vmatmul.f32.gmra.mxu2 %v6454_v56  ;;  %v254_v56 = vld [vmem:[#allocation9 + $0xd0] sm:$0xff] }
  0xec   :  { %v6523_v45 = vand.u32 4294901760, %v479_v10  ;;  %v6528_v26 = vand.u32 4294901760, %v254_v56  ;;  %v487_v10 = vsub.f32 %v6519_v18, %v6526_v15 }
  0xee   :  { %9431 = vst [vmem:[#allocation67_spill] sm:$0xff] %v6523_v45 }
  0xef   :  { %9433 = vst [vmem:[#allocation69_spill] sm:$0xff] %v6528_v26 }
  0xf0   :  { %473 = vmatmul.f32.gmra.mxu0 %v6507_v36  ;;  %v6530_v36 = vand.u32 4294901760, %v340_v39 }
  0xf1   :  { %778 = vmatmul.f32.gmra.mxu1 %v6439_v29 }
  0xf2   :  { %1174 = vmatmul.f32.gmra.mxu3 %v6482_v60  ;;  %1673 = vmatpush.msrb.mxu2 %v6530_v36  ;;  %v6534_v40 = vsub.f32 %v340_v39, %v6530_v36 }
  0xf3   :  { %970 = vmatmul.f32.gmra.mxu2 %v6475_v30  ;;  %2396 = vmatpush.msra.mxu1 %v6530_v36  ;;  %v6542_v30 = vsub.f32 %v254_v56, %v6528_v26  ;;  %v6556_v56 = vand.u32 4294901760, %v256_v6 }
  0xf4   :  { %v8942_v60 = vand.u32 4294901760, %v6534_v40  ;;  %2195 = vmatpush.msra.mxu0 %v6534_v40 }
  0xf5   :  { %9434 = vst [vmem:[#allocation70_spill] sm:$0xff] %v6542_v30  ;;  %v6554_v12 = vand.u32 4294901760, %v6542_v30 }
  0xf6   :  { %v1992_v39 = vsub.f32 %v6534_v40, %v8942_v60  ;;  %9437 = vst [vmem:[#allocation73_spill] sm:$0xff] %v6556_v56  ;;  %v6563_v60 = vsub.f32 %v256_v6, %v6556_v56 }
  0xf7   :  { %9436 = vst [vmem:[#allocation72_spill] sm:$0xff] %v6554_v12 }
  0xf8   :  { %481 = vmatmul.f32.gmra.mxu0 %v6523_v45  ;;  %v6551_v45 = vand.u32 4294901760, %v487_v10  ;;  %v1993_v41 = vand.u32 4294901760, %v1992_v39  ;;  %9438 = vst [vmem:[#allocation74_spill] sm:$0xff] %v6563_v60  ;;  %v338_v10 = vld [vmem:[#allocation12 + $0x170] sm:$0xff] }
  0xf9   :  { %782 = vmatmul.f32.gmra.mxu1 %v6468_v11 }
  0xfa   :  { %1180 = vmatmul.f32.gmra.mxu3 %v6510_v38  ;;  %9435 = vst [vmem:[#allocation71_spill] sm:$0xff] %v6551_v45  ;;  %v495_v38 = vsub.f32 %v6542_v30, %v6554_v12 }
  0xfb   :  { %975 = vmatmul.f32.gmra.mxu2 %v6498_v2  ;;  %1994 = vmatpush.msrb.mxu3 %v1993_v41  ;;  %v258_v2 = vld [vmem:[#allocation9 + $0xf0] sm:$0xff]  ;;  %v6570_v41 = vand.u32 4294901760, %v6563_v60 }
  0xfc   :  { %v6567_v24 = vand.u32 4294901760, %v495_v38  ;;  %v6572_v39 = vand.u32 4294901760, %v258_v2 }
  0xfd   :  { %9440 = vst [vmem:[#allocation76_spill] sm:$0xff] %v6570_v41  ;;  %v503_v38 = vsub.f32 %v6563_v60, %v6570_v41 }
  0xfe   :  { %9439 = vst [vmem:[#allocation75_spill] sm:$0xff] %v6567_v24 }
  0xff   :  { %9441 = vst [vmem:[#allocation77_spill] sm:$0xff] %v6572_v39 }
 0x100   :  { %489 = vmatmul.f32.gmra.mxu0 %v6551_v45  ;;  %v6574_v45 = vand.u32 4294901760, %v338_v10 }
 0x101   :  { %786 = vmatmul.f32.gmra.mxu1 %v6484_v19 }
 0x102   :  { %1186 = vmatmul.f32.gmra.mxu3 %v6526_v15  ;;  %1675 = vmatpush.msrb.mxu2 %v6574_v45  ;;  %v6578_v6 = vsub.f32 %v338_v10, %v6574_v45 }
 0x103   :  { %980 = vmatmul.f32.gmra.mxu2 %v6519_v18  ;;  %2398 = vmatpush.msra.mxu1 %v6574_v45  ;;  %v6586_v18 = vsub.f32 %v258_v2, %v6572_v39  ;;  %v6600_v2 = vand.u32 4294901760, %v260_v54 }
 0x104   :  { %v8953_v15 = vand.u32 4294901760, %v6578_v6  ;;  %2198 = vmatpush.msra.mxu0 %v6578_v6 }
 0x105   :  { %9442 = vst [vmem:[#allocation78_spill] sm:$0xff] %v6586_v18  ;;  %v6598_v57 = vand.u32 4294901760, %v6586_v18 }
 0x106   :  { %v1998_v10 = vsub.f32 %v6578_v6, %v8953_v15  ;;  %9445 = vst [vmem:[#allocation81_spill] sm:$0xff] %v6600_v2  ;;  %v6607_v15 = vsub.f32 %v260_v54, %v6600_v2 }
 0x107   :  { %9444 = vst [vmem:[#allocation80_spill] sm:$0xff] %v6598_v57 }
 0x108   :  { %497 = vmatmul.f32.gmra.mxu0 %v6567_v24  ;;  %v6595_v24 = vand.u32 4294901760, %v503_v38  ;;  %v1999_v48 = vand.u32 4294901760, %v1998_v10  ;;  %9446 = vst [vmem:[#allocation82_spill] sm:$0xff] %v6607_v15  ;;  %v336_v38 = vld [vmem:[#allocation12 + $0x160] sm:$0xff] }
 0x109   :  { %790 = vmatmul.f32.gmra.mxu1 %v6512_v14 }
 0x10a   :  { %1192 = vmatmul.f32.gmra.mxu3 %v6554_v12  ;;  %9443 = vst [vmem:[#allocation79_spill] sm:$0xff] %v6595_v24  ;;  %v511_v12 = vsub.f32 %v6586_v18, %v6598_v57 }
 0x10b   :  { %985 = vmatmul.f32.gmra.mxu2 %v6542_v30  ;;  %2000 = vmatpush.msrb.mxu3 %v1999_v48  ;;  %v262_v30 = vld [vmem:[#allocation9 + $0x110] sm:$0xff]  ;;  %v6614_v48 = vand.u32 4294901760, %v6607_v15 }
 0x10c   :  { %v6611_v47 = vand.u32 4294901760, %v511_v12  ;;  %v6616_v10 = vand.u32 4294901760, %v262_v30 }
 0x10d   :  { %9448 = vst [vmem:[#allocation84_spill] sm:$0xff] %v6614_v48  ;;  %v519_v12 = vsub.f32 %v6607_v15, %v6614_v48 }
 0x10e   :  { %9447 = vst [vmem:[#allocation83_spill] sm:$0xff] %v6611_v47 }
 0x10f   :  { %9449 = vst [vmem:[#allocation85_spill] sm:$0xff] %v6616_v10 }
 0x110   :  { %505 = vmatmul.f32.gmra.mxu0 %v6595_v24  ;;  %v6618_v24 = vand.u32 4294901760, %v336_v38 }
 0x111   :  { %794 = vmatmul.f32.gmra.mxu1 %v6528_v26 }
 0x112   :  { %1198 = vmatmul.f32.gmra.mxu3 %v6570_v41  ;;  %1677 = vmatpush.msrb.mxu2 %v6618_v24  ;;  %v6622_v54 = vsub.f32 %v336_v38, %v6618_v24 }
 0x113   :  { %990 = vmatmul.f32.gmra.mxu2 %v6563_v60  ;;  %2400 = vmatpush.msra.mxu1 %v6618_v24  ;;  %v6630_v60 = vsub.f32 %v262_v30, %v6616_v10  ;;  %v6644_v30 = vand.u32 4294901760, %v264_v3 }
 0x114   :  { %v8965_v41 = vand.u32 4294901760, %v6622_v54  ;;  %2201 = vmatpush.msra.mxu0 %v6622_v54 }
 0x115   :  { %9450 = vst [vmem:[#allocation86_spill] sm:$0xff] %v6630_v60  ;;  %v6642_v17 = vand.u32 4294901760, %v6630_v60 }
 0x116   :  { %v2004_v38 = vsub.f32 %v6622_v54, %v8965_v41  ;;  %9453 = vst [vmem:[#allocation89_spill] sm:$0xff] %v6644_v30  ;;  %v6651_v41 = vsub.f32 %v264_v3, %v6644_v30 }
 0x117   :  { %9452 = vst [vmem:[#allocation88_spill] sm:$0xff] %v6642_v17 }
 0x118   :  { %513 = vmatmul.f32.gmra.mxu0 %v6611_v47  ;;  %v6639_v47 = vand.u32 4294901760, %v519_v12  ;;  %v2005_v25 = vand.u32 4294901760, %v2004_v38  ;;  %9454 = vst [vmem:[#allocation90_spill] sm:$0xff] %v6651_v41  ;;  %v266_v12 = vld [vmem:[#allocation9 + $0x130] sm:$0xff] }
 0x119   :  { %798 = vmatmul.f32.gmra.mxu1 %v6556_v56  ;;  %v6660_v38 = vand.u32 4294901760, %v266_v12 }
 0x11a   :  { %1204 = vmatmul.f32.gmra.mxu3 %v6598_v57  ;;  %9451 = vst [vmem:[#allocation87_spill] sm:$0xff] %v6639_v47  ;;  %v527_v57 = vsub.f32 %v6630_v60, %v6642_v17 }
 0x11b   :  { %995 = vmatmul.f32.gmra.mxu2 %v6586_v18  ;;  %2006 = vmatpush.msrb.mxu3 %v2005_v25  ;;  %v334_v18 = vld [vmem:[#allocation12 + $0x150] sm:$0xff]  ;;  %v6658_v25 = vand.u32 4294901760, %v6651_v41  ;;  %9457 = vst [vmem:[#allocation93_spill] sm:$0xff] %v6660_v38  ;;  %v6674_v37 = vsub.f32 %v266_v12, %v6660_v38 }
 0x11c   :  { %v6655_v23 = vand.u32 4294901760, %v527_v57 }
 0x11d   :  { %v394_v33 = vpop.f32.mrf.mxu0  ;;  %9456 = vst [vmem:[#allocation92_spill] sm:$0xff] %v6658_v25  ;;  %v6688_v12 = vand.u32 4294901760, %v6674_v37 }
 0x11e   :  { %9455 = vst [vmem:[#allocation91_spill] sm:$0xff] %v6655_v23 }
 0x11f   :  { %9458 = vst [vmem:[#allocation94_spill] sm:$0xff] %v6674_v37 }
 0x120   :  { %521 = vmatmul.f32.gmra.mxu0 %v6639_v47  ;;  %v6662_v47 = vand.u32 4294901760, %v334_v18  ;;  %9461 = vst [vmem:[#allocation97_spill] sm:$0xff] %v6688_v12 }
 0x121   :  { %802 = vmatmul.f32.gmra.mxu1 %v6572_v39 }
 0x122   :  { %1210 = vmatmul.f32.gmra.mxu3 %v6614_v48  ;;  %1679 = vmatpush.msrb.mxu2 %v6662_v47  ;;  %v6666_v48 = vsub.f32 %v334_v18, %v6662_v47 }
 0x123   :  { %1000 = vmatmul.f32.gmra.mxu2 %v6607_v15  ;;  %2402 = vmatpush.msra.mxu1 %v6662_v47  ;;  %v535_v15 = vsub.f32 %v6651_v41, %v6658_v25 }
 0x124   :  { %2204 = vmatpush.msra.mxu0 %v6666_v48 }
 0x125   :  { %v402_v4 = vpop.f32.mrf.mxu0  ;;  %v743_v21 = vpop.f32.mrf.mxu1 }
 0x126   :  { %v744_v46 = vadd.f32 %v743_v21, %v394_v33  ;;  %v921_v3 = vpop.f32.mrf.mxu2  ;;  %v1115_v61 = vpop.f32.mrf.mxu3  ;;  %v8982_v21 = vand.u32 4294901760, %v6666_v48  ;;  %v268_v33 = vld [vmem:[#allocation9 + $0x140] sm:$0xff] }
 0x128   :  { %v922_v57 = vadd.f32 %v921_v3, %v744_v46  ;;  %529 = vmatmul.f32.gmra.mxu0 %v6655_v23  ;;  %v2010_v46 = vsub.f32 %v6666_v48, %v8982_v21  ;;  %v6685_v3 = vand.u32 4294901760, %v535_v15  ;;  %v6690_v23 = vand.u32 4294901760, %v268_v33 }
 0x129   :  { %806 = vmatmul.f32.gmra.mxu1 %v6600_v2  ;;  %v543_v15 = vsub.f32 %v6674_v37, %v6688_v12 }
 0x12a   :  { %v6678_v18 = vadd.f32 %v1115_v61, %v922_v57  ;;  %1216 = vmatmul.f32.gmra.mxu3 %v6642_v17  ;;  %9460 = vst [vmem:[#allocation96_spill] sm:$0xff] %v6685_v3  ;;  %v2011_v35 = vand.u32 4294901760, %v2010_v46  ;;  %v6697_v21 = vsub.f32 %v268_v33, %v6690_v23 }
 0x12b   :  { %1005 = vmatmul.f32.gmra.mxu2 %v6630_v60  ;;  %9462 = vst [vmem:[#allocation98_spill] sm:$0xff] %v6690_v23  ;;  %v270_v60 = vld [vmem:[#allocation9 + $0x150] sm:$0xff] }
 0x12c   :  { %9459 = vst [vmem:[#allocation95_spill] sm:$0xff] %v6678_v18  ;;  %2012 = vmatpush.msrb.mxu3 %v2011_v35  ;;  %v6703_v35 = vand.u32 4294901760, %v543_v15  ;;  %v6708_v46 = vand.u32 4294901760, %v270_v60 }
 0x12d   :  { %v410_v55 = vpop.f32.mrf.mxu0  ;;  %v747_v13 = vpop.f32.mrf.mxu1  ;;  %9463 = vst [vmem:[#allocation99_spill] sm:$0xff] %v6697_v21 }
 0x12e   :  { %v748_v61 = vadd.f32 %v747_v13, %v402_v4  ;;  %v926_v57 = vpop.f32.mrf.mxu2  ;;  %v1121_v31 = vpop.f32.mrf.mxu3  ;;  %v332_v13 = vld [vmem:[#allocation12 + $0x140] sm:$0xff]  ;;  %9465 = vst [vmem:[#allocation101_spill] sm:$0xff] %v6703_v35  ;;  %v6706_v4 = vand.u32 4294901760, %v6697_v21 }
 0x12f   :  { %9467 = vst [vmem:[#allocation103_spill] sm:$0xff] %v6708_v46 }
 0x130   :  { %v927_v17 = vadd.f32 %v926_v57, %v748_v61  ;;  %537 = vmatmul.f32.gmra.mxu0 %v6685_v3  ;;  %9466 = vst [vmem:[#allocation102_spill] sm:$0xff] %v6706_v4  ;;  %v6710_v61 = vand.u32 4294901760, %v332_v13 }
 0x131   :  { %810 = vmatmul.f32.gmra.mxu1 %v6616_v10 }
 0x132   :  { %v6699_v50 = vadd.f32 %v1121_v31, %v927_v17  ;;  %1222 = vmatmul.f32.gmra.mxu3 %v6658_v25  ;;  %1681 = vmatpush.msrb.mxu2 %v6710_v61  ;;  %v6714_v17 = vsub.f32 %v332_v13, %v6710_v61  ;;  %v6722_v25 = vsub.f32 %v270_v60, %v6708_v46 }
 0x133   :  { %1010 = vmatmul.f32.gmra.mxu2 %v6651_v41  ;;  %2404 = vmatpush.msra.mxu1 %v6710_v61  ;;  %v551_v41 = vsub.f32 %v6697_v21, %v6706_v4 }
 0x134   :  { %9464 = vst [vmem:[#allocation100_spill] sm:$0xff] %v6699_v50  ;;  %2207 = vmatpush.msra.mxu0 %v6714_v17  ;;  %v6736_v60 = vand.u32 4294901760, %v6722_v25 }
 0x135   :  { %v418_v57 = vpop.f32.mrf.mxu0  ;;  %v751_v33 = vpop.f32.mrf.mxu1  ;;  %9468 = vst [vmem:[#allocation104_spill] sm:$0xff] %v6722_v25 }
 0x136   :  { %v752_v3 = vadd.f32 %v751_v33, %v410_v55  ;;  %v931_v62 = vpop.f32.mrf.mxu2  ;;  %v1127_v31 = vpop.f32.mrf.mxu3  ;;  %v8995_v55 = vand.u32 4294901760, %v6714_v17  ;;  %v272_v33 = vld [vmem:[#allocation9 + $0x160] sm:$0xff]  ;;  %9471 = vst [vmem:[#allocation107_spill] sm:$0xff] %v6736_v60 }
 0x138   :  { %v932_v15 = vadd.f32 %v931_v62, %v752_v3  ;;  %545 = vmatmul.f32.gmra.mxu0 %v6703_v35  ;;  %v2016_v62 = vsub.f32 %v6714_v17, %v8995_v55  ;;  %v6733_v3 = vand.u32 4294901760, %v551_v41  ;;  %v6738_v35 = vand.u32 4294901760, %v272_v33 }
 0x139   :  { %814 = vmatmul.f32.gmra.mxu1 %v6644_v30  ;;  %v559_v41 = vsub.f32 %v6722_v25, %v6736_v60 }
 0x13a   :  { %v6726_v13 = vadd.f32 %v1127_v31, %v932_v15  ;;  %1228 = vmatmul.f32.gmra.mxu3 %v6688_v12  ;;  %9470 = vst [vmem:[#allocation106_spill] sm:$0xff] %v6733_v3  ;;  %v2017_v30 = vand.u32 4294901760, %v2016_v62  ;;  %v6745_v55 = vsub.f32 %v272_v33, %v6738_v35 }
 0x13b   :  { %1015 = vmatmul.f32.gmra.mxu2 %v6674_v37  ;;  %9472 = vst [vmem:[#allocation108_spill] sm:$0xff] %v6738_v35  ;;  %v274_v37 = vld [vmem:[#allocation9 + $0x170] sm:$0xff] }
 0x13c   :  { %9469 = vst [vmem:[#allocation105_spill] sm:$0xff] %v6726_v13  ;;  %2018 = vmatpush.msrb.mxu3 %v2017_v30  ;;  %v6751_v30 = vand.u32 4294901760, %v559_v41  ;;  %v6756_v62 = vand.u32 4294901760, %v274_v37 }
 0x13d   :  { %v426_v50 = vpop.f32.mrf.mxu0  ;;  %v755_v10 = vpop.f32.mrf.mxu1  ;;  %9473 = vst [vmem:[#allocation109_spill] sm:$0xff] %v6745_v55 }
 0x13e   :  { %v756_v31 = vadd.f32 %v755_v10, %v418_v57  ;;  %v936_v15 = vpop.f32.mrf.mxu2  ;;  %v1133_v13 = vpop.f32.mrf.mxu3  ;;  %v330_v10 = vld [vmem:[#allocation12 + $0x130] sm:$0xff]  ;;  %9475 = vst [vmem:[#allocation111_spill] sm:$0xff] %v6751_v30  ;;  %v6754_v57 = vand.u32 4294901760, %v6745_v55 }
 0x13f   :  { %9477 = vst [vmem:[#allocation113_spill] sm:$0xff] %v6756_v62 }
 0x140   :  { %v937_v12 = vadd.f32 %v936_v15, %v756_v31  ;;  %553 = vmatmul.f32.gmra.mxu0 %v6733_v3  ;;  %9476 = vst [vmem:[#allocation112_spill] sm:$0xff] %v6754_v57  ;;  %v6758_v31 = vand.u32 4294901760, %v330_v10 }
 0x141   :  { %818 = vmatmul.f32.gmra.mxu1 %v6660_v38 }
 0x142   :  { %v6747_v18 = vadd.f32 %v1133_v13, %v937_v12  ;;  %1234 = vmatmul.f32.gmra.mxu3 %v6706_v4  ;;  %1683 = vmatpush.msrb.mxu2 %v6758_v31  ;;  %v6762_v13 = vsub.f32 %v330_v10, %v6758_v31  ;;  %v6770_v4 = vsub.f32 %v274_v37, %v6756_v62 }
 0x143   :  { %1020 = vmatmul.f32.gmra.mxu2 %v6697_v21  ;;  %2406 = vmatpush.msra.mxu1 %v6758_v31  ;;  %v567_v21 = vsub.f32 %v6745_v55, %v6754_v57 }
 0x144   :  { %9474 = vst [vmem:[#allocation110_spill] sm:$0xff] %v6747_v18  ;;  %2210 = vmatpush.msra.mxu0 %v6762_v13  ;;  %v6784_v37 = vand.u32 4294901760, %v6770_v4 }
 0x145   :  { %v434_v15 = vpop.f32.mrf.mxu0  ;;  %v759_v33 = vpop.f32.mrf.mxu1  ;;  %9478 = vst [vmem:[#allocation114_spill] sm:$0xff] %v6770_v4 }
 0x146   :  { %v760_v3 = vadd.f32 %v759_v33, %v426_v50  ;;  %v941_v38 = vpop.f32.mrf.mxu2  ;;  %v1139_v12 = vpop.f32.mrf.mxu3  ;;  %v9008_v50 = vand.u32 4294901760, %v6762_v13  ;;  %v276_v33 = vld [vmem:[#allocation9 + $0x180] sm:$0xff]  ;;  %9481 = vst [vmem:[#allocation117_spill] sm:$0xff] %v6784_v37 }
 0x148   :  { %v942_v41 = vadd.f32 %v941_v38, %v760_v3  ;;  %561 = vmatmul.f32.gmra.mxu0 %v6751_v30  ;;  %v2022_v38 = vsub.f32 %v6762_v13, %v9008_v50  ;;  %v6781_v3 = vand.u32 4294901760, %v567_v21  ;;  %v6786_v30 = vand.u32 4294901760, %v276_v33 }
 0x149   :  { %822 = vmatmul.f32.gmra.mxu1 %v6690_v23  ;;  %v575_v21 = vsub.f32 %v6770_v4, %v6784_v37 }
 0x14a   :  { %v6774_v10 = vadd.f32 %v1139_v12, %v942_v41  ;;  %1240 = vmatmul.f32.gmra.mxu3 %v6736_v60  ;;  %9480 = vst [vmem:[#allocation116_spill] sm:$0xff] %v6781_v3  ;;  %v2023_v23 = vand.u32 4294901760, %v2022_v38  ;;  %v6793_v50 = vsub.f32 %v276_v33, %v6786_v30 }
 0x14b   :  { %1025 = vmatmul.f32.gmra.mxu2 %v6722_v25  ;;  %9482 = vst [vmem:[#allocation118_spill] sm:$0xff] %v6786_v30  ;;  %v278_v25 = vld [vmem:[#allocation9 + $0x190] sm:$0xff] }
 0x14c   :  { %9479 = vst [vmem:[#allocation115_spill] sm:$0xff] %v6774_v10  ;;  %2024 = vmatpush.msrb.mxu3 %v2023_v23  ;;  %v6799_v23 = vand.u32 4294901760, %v575_v21  ;;  %v6804_v38 = vand.u32 4294901760, %v278_v25 }
 0x14d   :  { %v442_v18 = vpop.f32.mrf.mxu0  ;;  %9483 = vst [vmem:[#allocation119_spill] sm:$0xff] %v6793_v50 }
 0x14e   :  { %v763_v2 = vpop.f32.mrf.mxu1  ;;  %v946_v41 = vpop.f32.mrf.mxu2  ;;  %9485 = vst [vmem:[#allocation121_spill] sm:$0xff] %v6799_v23 }
 0x14f   :  { %v764_v12 = vadd.f32 %v763_v2, %v434_v15  ;;  %v1145_v10 = vpop.f32.mrf.mxu3  ;;  %v328_v2 = vld [vmem:[#allocation12 + $0x120] sm:$0xff]  ;;  %v6802_v15 = vand.u32 4294901760, %v6793_v50  ;;  %9487 = vst [vmem:[#allocation123_spill] sm:$0xff] %v6804_v38 }
 0x150   :  { %569 = vmatmul.f32.gmra.mxu0 %v6781_v3 }
 0x151   :  { %v947_v60 = vadd.f32 %v946_v41, %v764_v12  ;;  %826 = vmatmul.f32.gmra.mxu1 %v6708_v46  ;;  %9486 = vst [vmem:[#allocation122_spill] sm:$0xff] %v6802_v15  ;;  %v6806_v12 = vand.u32 4294901760, %v328_v2 }
 0x152   :  { %1246 = vmatmul.f32.gmra.mxu3 %v6754_v57  ;;  %v6818_v57 = vsub.f32 %v278_v25, %v6804_v38 }
 0x153   :  { %v6795_v39 = vadd.f32 %v1145_v10, %v947_v60  ;;  %1030 = vmatmul.f32.gmra.mxu2 %v6745_v55  ;;  %v6810_v10 = vsub.f32 %v328_v2, %v6806_v12  ;;  %2408 = vmatpush.msra.mxu1 %v6806_v12  ;;  %v583_v55 = vsub.f32 %v6793_v50, %v6802_v15 }
 0x154   :  { %1685 = vmatpush.msrb.mxu2 %v6806_v12  ;;  %9488 = vst [vmem:[#allocation124_spill] sm:$0xff] %v6818_v57  ;;  %v6832_v25 = vand.u32 4294901760, %v6818_v57 }
 0x155   :  { %9484 = vst [vmem:[#allocation120_spill] sm:$0xff] %v6795_v39  ;;  %v450_v41 = vpop.f32.mrf.mxu0  ;;  %2213 = vmatpush.msra.mxu0 %v6810_v10 }
 0x156   :  { %v767_v33 = vpop.f32.mrf.mxu1  ;;  %v951_v46 = vpop.f32.mrf.mxu2  ;;  %9491 = vst [vmem:[#allocation127_spill] sm:$0xff] %v6832_v25 }
 0x157   :  { %v768_v3 = vadd.f32 %v767_v33, %v442_v18  ;;  %v1151_v60 = vpop.f32.mrf.mxu3  ;;  %v9023_v18 = vand.u32 4294901760, %v6810_v10  ;;  %v280_v33 = vld [vmem:[#allocation9 + $0x1a0] sm:$0xff] }
 0x158   :  { %577 = vmatmul.f32.gmra.mxu0 %v6799_v23  ;;  %v6834_v23 = vand.u32 4294901760, %v280_v33 }
 0x159   :  { %v952_v21 = vadd.f32 %v951_v46, %v768_v3  ;;  %830 = vmatmul.f32.gmra.mxu1 %v6738_v35  ;;  %v2028_v46 = vsub.f32 %v6810_v10, %v9023_v18  ;;  %v6829_v3 = vand.u32 4294901760, %v583_v55  ;;  %v591_v55 = vsub.f32 %v6818_v57, %v6832_v25 }
 0x15a   :  { %1252 = vmatmul.f32.gmra.mxu3 %v6784_v37  ;;  %9492 = vst [vmem:[#allocation128_spill] sm:$0xff] %v6834_v23  ;;  %v6841_v18 = vsub.f32 %v280_v33, %v6834_v23 }
 0x15b   :  { %v6822_v2 = vadd.f32 %v1151_v60, %v952_v21  ;;  %1035 = vmatmul.f32.gmra.mxu2 %v6770_v4  ;;  %9490 = vst [vmem:[#allocation126_spill] sm:$0xff] %v6829_v3  ;;  %v2029_v35 = vand.u32 4294901760, %v2028_v46  ;;  %v282_v4 = vld [vmem:[#allocation9 + $0x1b0] sm:$0xff] }
 0x15c   :  { %9493 = vst [vmem:[#allocation129_spill] sm:$0xff] %v6841_v18  ;;  %v6852_v46 = vand.u32 4294901760, %v282_v4 }
 0x15d   :  { %9489 = vst [vmem:[#allocation125_spill] sm:$0xff] %v6822_v2  ;;  %v458_v39 = vpop.f32.mrf.mxu0  ;;  %2030 = vmatpush.msrb.mxu3 %v2029_v35  ;;  %v6847_v35 = vand.u32 4294901760, %v591_v55 }
 0x15e   :  { %v771_v56 = vpop.f32.mrf.mxu1  ;;  %v956_v21 = vpop.f32.mrf.mxu2  ;;  %9497 = vst [vmem:[#allocation133_spill] sm:$0xff] %v6852_v46 }
 0x15f   :  { %v772_v60 = vadd.f32 %v771_v56, %v450_v41  ;;  %v1157_v2 = vpop.f32.mrf.mxu3  ;;  %v326_v56 = vld [vmem:[#allocation12 + $0x110] sm:$0xff]  ;;  %9495 = vst [vmem:[#allocation131_spill] sm:$0xff] %v6847_v35  ;;  %v6850_v41 = vand.u32 4294901760, %v6841_v18 }
 0x160   :  { %585 = vmatmul.f32.gmra.mxu0 %v6829_v3 }
 0x161   :  { %v957_v37 = vadd.f32 %v956_v21, %v772_v60  ;;  %834 = vmatmul.f32.gmra.mxu1 %v6756_v62  ;;  %9496 = vst [vmem:[#allocation132_spill] sm:$0xff] %v6850_v41  ;;  %v6854_v60 = vand.u32 4294901760, %v326_v56 }
 0x162   :  { %1258 = vmatmul.f32.gmra.mxu3 %v6802_v15  ;;  %v6866_v15 = vsub.f32 %v282_v4, %v6852_v46 }
 0x163   :  { %v6843_v26 = vadd.f32 %v1157_v2, %v957_v37  ;;  %1040 = vmatmul.f32.gmra.mxu2 %v6793_v50  ;;  %v6858_v2 = vsub.f32 %v326_v56, %v6854_v60  ;;  %2410 = vmatpush.msra.mxu1 %v6854_v60  ;;  %v599_v50 = vsub.f32 %v6841_v18, %v6850_v41 }
 0x164   :  { %1687 = vmatpush.msrb.mxu2 %v6854_v60  ;;  %9498 = vst [vmem:[#allocation134_spill] sm:$0xff] %v6866_v15  ;;  %v6880_v4 = vand.u32 4294901760, %v6866_v15 }
 0x165   :  { %9494 = vst [vmem:[#allocation130_spill] sm:$0xff] %v6843_v26  ;;  %v466_v21 = vpop.f32.mrf.mxu0  ;;  %2216 = vmatpush.msra.mxu0 %v6858_v2 }
 0x166   :  { %v775_v33 = vpop.f32.mrf.mxu1  ;;  %v961_v62 = vpop.f32.mrf.mxu2  ;;  %9501 = vst [vmem:[#allocation137_spill] sm:$0xff] %v6880_v4 }
 0x167   :  { %v776_v3 = vadd.f32 %v775_v33, %v458_v39  ;;  %v1163_v37 = vpop.f32.mrf.mxu3  ;;  %v9038_v39 = vand.u32 4294901760, %v6858_v2  ;;  %v284_v33 = vld [vmem:[#allocation9 + $0x1c0] sm:$0xff] }
 0x168   :  { %593 = vmatmul.f32.gmra.mxu0 %v6847_v35  ;;  %v6882_v35 = vand.u32 4294901760, %v284_v33 }
 0x169   :  { %v962_v55 = vadd.f32 %v961_v62, %v776_v3  ;;  %838 = vmatmul.f32.gmra.mxu1 %v6786_v30  ;;  %v2034_v62 = vsub.f32 %v6858_v2, %v9038_v39  ;;  %v6877_v3 = vand.u32 4294901760, %v599_v50  ;;  %v607_v50 = vsub.f32 %v6866_v15, %v6880_v4 }
 0x16a   :  { %1264 = vmatmul.f32.gmra.mxu3 %v6832_v25  ;;  %9502 = vst [vmem:[#allocation138_spill] sm:$0xff] %v6882_v35  ;;  %v6889_v39 = vsub.f32 %v284_v33, %v6882_v35 }
 0x16b   :  { %v6870_v56 = vadd.f32 %v1163_v37, %v962_v55  ;;  %1045 = vmatmul.f32.gmra.mxu2 %v6818_v57  ;;  %9500 = vst [vmem:[#allocation136_spill] sm:$0xff] %v6877_v3  ;;  %v2035_v30 = vand.u32 4294901760, %v2034_v62  ;;  %v286_v57 = vld [vmem:[#allocation9 + $0x1d0] sm:$0xff] }
 0x16c   :  { %9503 = vst [vmem:[#allocation139_spill] sm:$0xff] %v6889_v39  ;;  %v6900_v62 = vand.u32 4294901760, %v286_v57 }
 0x16d   :  { %9499 = vst [vmem:[#allocation135_spill] sm:$0xff] %v6870_v56  ;;  %v474_v26 = vpop.f32.mrf.mxu0  ;;  %2036 = vmatpush.msrb.mxu3 %v2035_v30  ;;  %v6895_v30 = vand.u32 4294901760, %v607_v50  ;;  %v9508_v50 = vand.u32 4294901760, %v6175_v58 }
 0x16e   :  { %v779_v14 = vpop.f32.mrf.mxu1  ;;  %v966_v55 = vpop.f32.mrf.mxu2  ;;  %9507 = vst [vmem:[#allocation143_spill] sm:$0xff] %v6900_v62 }
 0x16f   :  { %v780_v37 = vadd.f32 %v779_v14, %v466_v21  ;;  %v1169_v56 = vpop.f32.mrf.mxu3  ;;  %v324_v14 = vld [vmem:[#allocation12 + $0x100] sm:$0xff]  ;;  %9505 = vst [vmem:[#allocation141_spill] sm:$0xff] %v6895_v30  ;;  %v6898_v21 = vand.u32 4294901760, %v6889_v39 }
 0x170   :  { %601 = vmatmul.f32.gmra.mxu0 %v6877_v3 }
 0x171   :  { %v967_v25 = vadd.f32 %v966_v55, %v780_v37  ;;  %842 = vmatmul.f32.gmra.mxu1 %v6804_v38  ;;  %9506 = vst [vmem:[#allocation142_spill] sm:$0xff] %v6898_v21  ;;  %v6902_v37 = vand.u32 4294901760, %v324_v14 }
 0x172   :  { %1270 = vmatmul.f32.gmra.mxu3 %v6850_v41 }
 0x173   :  { %v6891_v19 = vadd.f32 %v1169_v56, %v967_v25  ;;  %1050 = vmatmul.f32.gmra.mxu2 %v6841_v18  ;;  %v6906_v56 = vsub.f32 %v324_v14, %v6902_v37  ;;  %2412 = vmatpush.msra.mxu1 %v6902_v37  ;;  %v288_v14 = vld [vmem:[#allocation9 + $0x1e0] sm:$0xff] }
 0x174   :  { %1689 = vmatpush.msrb.mxu2 %v6902_v37 }
 0x175   :  { %9504 = vst [vmem:[#allocation140_spill] sm:$0xff] %v6891_v19  ;;  %v482_v55 = vpop.f32.mrf.mxu0  ;;  %v9049_v41 = vand.u32 4294901760, %v6906_v56  ;;  %v9510_v19 = vand.u32 4294901760, %v6190_v0  ;;  %2219 = vmatpush.msra.mxu0 %v6906_v56 }
 0x176   :  { %v783_v33 = vpop.f32.mrf.mxu1  ;;  %v971_v38 = vpop.f32.mrf.mxu2  ;;  %2609 = vmatpush.msra.mxu2 %v9508_v50  ;;  %v6934_v50 = vand.u32 4294901760, %v288_v14 }
 0x177   :  { %v784_v3 = vadd.f32 %v783_v33, %v474_v26  ;;  %v1175_v25 = vpop.f32.mrf.mxu3  ;;  %v615_v26 = vsub.f32 %v6889_v39, %v6898_v21  ;;  %v6916_v33 = vsub.f32 %v286_v57, %v6900_v62 }
 0x178   :  { %609 = vmatmul.f32.gmra.mxu0 %v6895_v30  ;;  %2613 = vmatpush.msra.mxu2 %v9510_v19  ;;  %9514 = vst [vmem:[#allocation148_spill] sm:$0xff] %v6934_v50  ;;  %v9515_v19 = vand.u32 4294901760, %v6265_v63 }
 0x179   :  { %v972_v18 = vadd.f32 %v971_v38, %v784_v3  ;;  %846 = vmatmul.f32.gmra.mxu1 %v6834_v23  ;;  %9509 = vst [vmem:[#allocation144_spill] sm:$0xff] %v6916_v33  ;;  %v2040_v38 = vsub.f32 %v6906_v56, %v9049_v41  ;;  %v6929_v57 = vand.u32 4294901760, %v615_v26  ;;  %v6932_v3 = vand.u32 4294901760, %v6916_v33 }
 0x17a   :  { %1276 = vmatmul.f32.gmra.mxu3 %v6880_v4  ;;  %2617 = vmatpush.msra.mxu2 %v9515_v19  ;;  %v9516_v41 = vand.u32 4294901760, %v6325_v22 }
 0x17b   :  { %v6922_v58 = vadd.f32 %v1175_v25, %v972_v18  ;;  %1055 = vmatmul.f32.gmra.mxu2 %v6866_v15  ;;  %9512 = vst [vmem:[#allocation146_spill] sm:$0xff] %v6929_v57  ;;  %v2041_v0 = vand.u32 4294901760, %v2040_v38  ;;  %v623_v63 = vsub.f32 %v6916_v33, %v6932_v3  ;;  %v6946_v38 = vsub.f32 %v288_v14, %v6934_v50 }
 0x17c   :  { %9513 = vst [vmem:[#allocation147_spill] sm:$0xff] %v6932_v3  ;;  %2621 = vmatpush.msra.mxu2 %v9516_v41 }
 0x17d   :  { %9511 = vst [vmem:[#allocation145_spill] sm:$0xff] %v6922_v58  ;;  %v490_v18 = vpop.f32.mrf.mxu0  ;;  %2042 = vmatpush.msrb.mxu3 %v2041_v0  ;;  %v9518_v0 = vand.u32 4294901760, %v6388_v27  ;;  %v6959_v41 = vand.u32 4294901760, %v6946_v38 }
 0x17e   :  { %v787_v25 = vpop.f32.mrf.mxu1  ;;  %v976_v30 = vpop.f32.mrf.mxu2  ;;  %9517 = vst [vmem:[#allocation149_spill] sm:$0xff] %v6946_v38 }
 0x17f   :  { %v788_v4 = vadd.f32 %v787_v25, %v482_v55  ;;  %v1181_v58 = vpop.f32.mrf.mxu3  ;;  %2800 = vmatpush.msra.mxu3 %v6145_v32  ;;  %v290_v55 = vld [vmem:[#allocation9 + $0x1f0] sm:$0xff]  ;;  %2625 = vmatpush.msra.mxu2 %v9518_v0  ;;  %v6956_v32 = vand.u32 4294901760, %v623_v63  ;;  %9520 = vst [vmem:[#allocation151_spill] sm:$0xff] %v6959_v41  ;;  %v9523_v25 = vand.u32 4294901760, %v6490_v52  ;;  %v229_v63 = vld [vmem:[#allocation9 + $0x8] sm:$0xff] }
 0x180   :  { %617 = vmatmul.f32.gmra.mxu0 %v6929_v57 }
 0x181   :  { %v977_v26 = vadd.f32 %v976_v30, %v788_v4  ;;  %850 = vmatmul.f32.gmra.mxu1 %v6852_v46  ;;  %2802 = vmatpush.msra.mxu3 %v6177_v59  ;;  %9519 = vst [vmem:[#allocation150_spill] sm:$0xff] %v6956_v32  ;;  %v6961_v4 = vand.u32 4294901760, %v290_v55  ;;  %v9522_v59 = vand.u32 4294901760, %v6446_v49  ;;  %v631_v49 = vsub.f32 %v6946_v38, %v6959_v41 }
 0x182   :  { %1282 = vmatmul.f32.gmra.mxu3 %v6898_v21 }
 0x183   :  { %v6951_v22 = vadd.f32 %v1181_v58, %v977_v26  ;;  %1060 = vmatmul.f32.gmra.mxu2 %v6889_v39  ;;  %2804 = vmatpush.msra.mxu3 %v6259_v9  ;;  %9521 = vst [vmem:[#allocation152_spill] sm:$0xff] %v6961_v4  ;;  %v6974_v26 = vsub.f32 %v290_v55, %v6961_v4  ;;  %v9528_v55 = vand.u32 4294901760, %v6578_v6 }
 0x184   :  { %2629 = vmatpush.msra.mxu2 %v9522_v59 }
 0x185   :  { %v498_v27 = vpop.f32.mrf.mxu0  ;;  %2806 = vmatpush.msra.mxu3 %v6318_v34  ;;  %9524 = vst [vmem:[#allocation153_spill] sm:$0xff] %v6974_v26  ;;  %v9525_v34 = vand.u32 4294901760, %v6534_v40 }
 0x186   :  { %v791_v30 = vpop.f32.mrf.mxu1  ;;  %v981_v58 = vpop.f32.mrf.mxu2  ;;  %2633 = vmatpush.msra.mxu2 %v9523_v25  ;;  %v9534_v25 = vand.u32 4294901760, %v6714_v17 }
 0x187   :  { %v792_v14 = vadd.f32 %v791_v30, %v490_v18  ;;  %v1187_v19 = vpop.f32.mrf.mxu3  ;;  %2808 = vmatpush.msra.mxu3 %v6381_v20  ;;  %v6984_v20 = vand.u32 4294901760, %v631_v49  ;;  %v6987_v18 = vand.u32 4294901760, %v6974_v26 }
 0x188   :  { %625 = vmatmul.f32.gmra.mxu0 %v6956_v32  ;;  %2637 = vmatpush.msra.mxu2 %v9525_v34 }
 0x189   :  { %v982_v9 = vadd.f32 %v981_v58, %v792_v14  ;;  %854 = vmatmul.f32.gmra.mxu1 %v6882_v35  ;;  %2810 = vmatpush.msra.mxu3 %v6441_v16  ;;  %9526 = vst [vmem:[#allocation154_spill] sm:$0xff] %v6984_v20  ;;  %v9529_v14 = vand.u32 4294901760, %v6622_v54  ;;  %v639_v6 = vsub.f32 %v6974_v26, %v6987_v18 }
 0x18a   :  { %1288 = vmatmul.f32.gmra.mxu3 %v6932_v3  ;;  %9527 = vst [vmem:[#allocation155_spill] sm:$0xff] %v6987_v18  ;;  %2641 = vmatpush.msra.mxu2 %v9528_v55  ;;  %v9535_v55 = vand.u32 4294901760, %v6762_v13 }
 0x18b   :  { %v6979_v52 = vadd.f32 %v1187_v19, %v982_v9  ;;  %1065 = vmatmul.f32.gmra.mxu2 %v6916_v33  ;;  %2812 = vmatpush.msra.mxu3 %v6486_v42  ;;  %v6994_v42 = vand.u32 4294901760, %v229_v63  ;;  %v7012_v54 = vand.u32 4294901760, %v639_v6  ;;  %v231_v19 = vld [vmem:[#allocation9 + $0x18] sm:$0xff] }
 0x18c   :  { %2645 = vmatpush.msra.mxu2 %v9529_v14 }
 0x18d   :  { %v506_v16 = vpop.f32.mrf.mxu0  ;;  %2814 = vmatpush.msra.mxu3 %v6530_v36  ;;  %9530 = vst [vmem:[#allocation156_spill] sm:$0xff] %v6994_v42  ;;  %v9531_v36 = vand.u32 4294901760, %v6666_v48 }
 0x18e   :  { %v795_v40 = vpop.f32.mrf.mxu1  ;;  %v986_v59 = vpop.f32.mrf.mxu2  ;;  %9533 = vst [vmem:[#allocation158_spill] sm:$0xff] %v7012_v54 }
 0x18f   :  { %v796_v0 = vadd.f32 %v795_v40, %v498_v27  ;;  %v1193_v30 = vpop.f32.mrf.mxu3  ;;  %2816 = vmatpush.msra.mxu3 %v6574_v45  ;;  %2649 = vmatpush.msra.mxu2 %v9531_v36  ;;  %v7009_v45 = vsub.f32 %v229_v63, %v6994_v42 }
 0x190   :  { %633 = vmatmul.f32.gmra.mxu0 %v6984_v20 }
 0x191   :  { %v987_v58 = vadd.f32 %v986_v59, %v796_v0  ;;  %858 = vmatmul.f32.gmra.mxu1 %v6900_v62  ;;  %2818 = vmatpush.msra.mxu3 %v6618_v24  ;;  %9532 = vst [vmem:[#allocation157_spill] sm:$0xff] %v7009_v45  ;;  %v7020_v63 = vand.u32 4294901760, %v7009_v45 }
 0x192   :  { %1294 = vmatmul.f32.gmra.mxu3 %v6959_v41  ;;  %2653 = vmatpush.msra.mxu2 %v9534_v25  ;;  %v235_v25 = vld [vmem:[#allocation9 + $0x38] sm:$0xff] }
 0x193   :  { %v7004_v27 = vadd.f32 %v1193_v30, %v987_v58  ;;  %1070 = vmatmul.f32.gmra.mxu2 %v6946_v38  ;;  %2820 = vmatpush.msra.mxu3 %v6662_v47  ;;  %9536 = vst [vmem:[#allocation159_spill] sm:$0xff] %v7020_v63  ;;  %v7022_v47 = vand.u32 4294901760, %v231_v19  ;;  %v1693_v13 = vsub.f32 %v7009_v45, %v7020_v63  ;;  %v9541_v58 = vand.u32 4294901760, %v6906_v56 }
 0x194   :  { %2657 = vmatpush.msra.mxu2 %v9535_v55 }
 0x195   :  { %v514_v24 = vpop.f32.mrf.mxu0  ;;  %2822 = vmatpush.msra.mxu3 %v6710_v61  ;;  %9537 = vst [vmem:[#allocation160_spill] sm:$0xff] %v7022_v47  ;;  %v9538_v61 = vand.u32 4294901760, %v6810_v10  ;;  %v9540_v10 = vand.u32 4294901760, %v6858_v2  ;;  %v7045_v6 = vand.u32 4294901760, %v1693_v13 }
 0x196   :  { %v799_v48 = vpop.f32.mrf.mxu1  ;;  %v991_v49 = vpop.f32.mrf.mxu2 }
 0x197   :  { %v800_v9 = vadd.f32 %v799_v48, %v506_v16  ;;  %v1199_v34 = vpop.f32.mrf.mxu3  ;;  %2824 = vmatpush.msra.mxu3 %v6758_v31  ;;  %2661 = vmatpush.msra.mxu2 %v9538_v61  ;;  %v7037_v31 = vsub.f32 %v231_v19, %v7022_v47  ;;  %v233_v16 = vld [vmem:[#allocation9 + $0x28] sm:$0xff]  ;;  %9542 = vst [vmem:[#allocation162_spill] sm:$0xff] %v7045_v6  ;;  %v7068_v61 = vand.u32 4294901760, %v235_v25 }
 0x198   :  { %641 = vmatmul.f32.gmra.mxu0 %v7012_v54 }
 0x199   :  { %v992_v40 = vadd.f32 %v991_v49, %v800_v9  ;;  %862 = vmatmul.f32.gmra.mxu1 %v6934_v50  ;;  %2826 = vmatpush.msra.mxu3 %v6806_v12  ;;  %9539 = vst [vmem:[#allocation161_spill] sm:$0xff] %v7037_v31  ;;  %v7048_v36 = vand.u32 4294901760, %v7037_v31 }
 0x19a   :  { %1300 = vmatmul.f32.gmra.mxu3 %v6987_v18  ;;  %2665 = vmatpush.msra.mxu2 %v9540_v10  ;;  %9548 = vst [vmem:[#allocation168_spill] sm:$0xff] %v7068_v61 }
 0x19b   :  { %v7030_v17 = vadd.f32 %v1199_v34, %v992_v40  ;;  %1075 = vmatmul.f32.gmra.mxu2 %v6974_v26  ;;  %2828 = vmatpush.msra.mxu3 %v6854_v60  ;;  %9543 = vst [vmem:[#allocation163_spill] sm:$0xff] %v7048_v36  ;;  %v7050_v60 = vand.u32 4294901760, %v233_v16 }
 0x19c   :  { %2669 = vmatpush.msra.mxu2 %v9541_v58 }
 0x19d   :  { %v522_v0 = vpop.f32.mrf.mxu0  ;;  %2830 = vmatpush.msra.mxu3 %v6902_v37  ;;  %9544 = vst [vmem:[#allocation164_spill] sm:$0xff] %v7050_v60  ;;  %v1701_v37 = vsub.f32 %v7037_v31, %v7048_v36  ;;  %v7061_v56 = vsub.f32 %v233_v16, %v7050_v60 }
 0x19e   :  { %v803_v12 = vpop.f32.mrf.mxu1  ;;  %v996_v30 = vpop.f32.mrf.mxu2 }
 0x19f   :  { %v804_v59 = vadd.f32 %v803_v12, %v514_v24  ;;  %v1205_v14 = vpop.f32.mrf.mxu3  ;;  %9545 = vst [vmem:[#allocation165_spill] sm:$0xff] %v7061_v56  ;;  %v7063_v55 = vand.u32 4294901760, %v1701_v37  ;;  %v7066_v40 = vand.u32 4294901760, %v7061_v56  ;;  %v237_v12 = vld [vmem:[#allocation9 + $0x48] sm:$0xff] }
 0x1a0   :  { %1369 = vmatmul.f32.vlgmr.msrb.gmra.mxu0 %v6128_v7 }
 0x1a1   :  { %v997_v19 = vadd.f32 %v996_v30, %v804_v59  ;;  %866 = vmatmul.f32.gmra.mxu1 %v6961_v4  ;;  %9546 = vst [vmem:[#allocation166_spill] sm:$0xff] %v7063_v55  ;;  %v1709_v10 = vsub.f32 %v7061_v56, %v7066_v40 }
 0x1a2   :  { %2044 = vmatmul.f32.vlgmr.msrb.gmra.mxu3 %v6994_v42  ;;  %9547 = vst [vmem:[#allocation167_spill] sm:$0xff] %v7066_v40 }
 0x1a3   :  { %v7054_v2 = vadd.f32 %v1205_v14, %v997_v19  ;;  %1695 = vmatmul.f32.vlgmr.msrb.gmra.mxu2 %v7045_v6  ;;  %v7081_v37 = vand.u32 4294901760, %v1709_v10 }
 0x1a5   :  { %v530_v24 = vpop.f32.mrf.mxu0  ;;  %9550 = vst [vmem:[#allocation170_spill] sm:$0xff] %v7081_v37 }
 0x1a6   :  { %v807_v48 = vpop.f32.mrf.mxu1  ;;  %v1001_v49 = vpop.f32.mrf.mxu2 }
 0x1a7   :  { %v808_v9 = vadd.f32 %v807_v48, %v522_v0  ;;  %v1211_v34 = vpop.f32.mrf.mxu3  ;;  %v7079_v0 = vsub.f32 %v235_v25, %v7068_v61 }
 0x1a8   :  { %1373 = vmatmul.f32.gmra.mxu0 %v6167_v51 }
 0x1a9   :  { %v1002_v13 = vadd.f32 %v1001_v49, %v808_v9  ;;  %1530 = vmatmul.f32.vlgmr.msrb.gmra.mxu1 %v6128_v7  ;;  %9549 = vst [vmem:[#allocation169_spill] sm:$0xff] %v7079_v0  ;;  %v7084_v48 = vand.u32 4294901760, %v7079_v0  ;;  %v7086_v9 = vand.u32 4294901760, %v237_v12 }
 0x1aa   :  { %2048 = vmatmul.f32.gmra.mxu3 %v7022_v47 }
 0x1ab   :  { %v7072_v16 = vadd.f32 %v1211_v34, %v1002_v13  ;;  %1703 = vmatmul.f32.gmra.mxu2 %v7063_v55  ;;  %9551 = vst [vmem:[#allocation171_spill] sm:$0xff] %v7084_v48  ;;  %v7097_v34 = vsub.f32 %v237_v12, %v7086_v9  ;;  %v239_v13 = vld [vmem:[#allocation9 + $0x58] sm:$0xff] }
 0x1ac   :  { %9552 = vst [vmem:[#allocation172_spill] sm:$0xff] %v7086_v9 }
 0x1ad   :  { %v538_v59 = vpop.f32.mrf.mxu0  ;;  %9553 = vst [vmem:[#allocation173_spill] sm:$0xff] %v7097_v34 }
 0x1ae   :  { %v811_v30 = vpop.f32.mrf.mxu1  ;;  %v1006_v58 = vpop.f32.mrf.mxu2 }
 0x1af   :  { %v812_v14 = vadd.f32 %v811_v30, %v530_v24  ;;  %v1217_v19 = vpop.f32.mrf.mxu3  ;;  %v1717_v24 = vsub.f32 %v7079_v0, %v7084_v48 }
 0x1b0   :  { %1377 = vmatmul.f32.gmra.mxu0 %v6220_v53 }
 0x1b1   :  { %v1007_v49 = vadd.f32 %v1006_v58, %v812_v14  ;;  %1534 = vmatmul.f32.gmra.mxu1 %v6167_v51  ;;  %v7099_v6 = vand.u32 4294901760, %v1717_v24 }
 0x1b2   :  { %2052 = vmatmul.f32.gmra.mxu3 %v7050_v60 }
 0x1b3   :  { %v7090_v25 = vadd.f32 %v1217_v19, %v1007_v49  ;;  %1711 = vmatmul.f32.gmra.mxu2 %v7081_v37  ;;  %9554 = vst [vmem:[#allocation174_spill] sm:$0xff] %v7099_v6  ;;  %v7102_v19 = vand.u32 4294901760, %v7097_v34  ;;  %v7104_v49 = vand.u32 4294901760, %v239_v13 }
 0x1b5   :  { %v546_v10 = vpop.f32.mrf.mxu0  ;;  %9555 = vst [vmem:[#allocation175_spill] sm:$0xff] %v7102_v19  ;;  %v7115_v24 = vsub.f32 %v239_v13, %v7104_v49 }
 0x1b6   :  { %v815_v30 = vpop.f32.mrf.mxu1  ;;  %v1011_v58 = vpop.f32.mrf.mxu2  ;;  %9556 = vst [vmem:[#allocation176_spill] sm:$0xff] %v7104_v49 }
 0x1b7   :  { %v816_v14 = vadd.f32 %v815_v30, %v538_v59  ;;  %v1223_v55 = vpop.f32.mrf.mxu3  ;;  %v1725_v59 = vsub.f32 %v7097_v34, %v7102_v19  ;;  %9557 = vst [vmem:[#allocation177_spill] sm:$0xff] %v7115_v24  ;;  %v241_v30 = vld [vmem:[#allocation9 + $0x68] sm:$0xff] }
 0x1b8   :  { %1381 = vmatmul.f32.gmra.mxu0 %v6257_v1 }
 0x1b9   :  { %v1012_v37 = vadd.f32 %v1011_v58, %v816_v14  ;;  %1538 = vmatmul.f32.gmra.mxu1 %v6220_v53  ;;  %v7117_v38 = vand.u32 4294901760, %v1725_v59  ;;  %v243_v59 = vld [vmem:[#allocation9 + $0x78] sm:$0xff] }
 0x1ba   :  { %2056 = vmatmul.f32.gmra.mxu3 %v7068_v61 }
 0x1bb   :  { %v7108_v12 = vadd.f32 %v1223_v55, %v1012_v37  ;;  %1719 = vmatmul.f32.gmra.mxu2 %v7099_v6  ;;  %9558 = vst [vmem:[#allocation178_spill] sm:$0xff] %v7117_v38  ;;  %v7120_v55 = vand.u32 4294901760, %v7115_v24  ;;  %v7122_v37 = vand.u32 4294901760, %v241_v30 }
 0x1bd   :  { %v554_v26 = vpop.f32.mrf.mxu0  ;;  %9559 = vst [vmem:[#allocation179_spill] sm:$0xff] %v7120_v55 }
 0x1be   :  { %v819_v18 = vpop.f32.mrf.mxu1  ;;  %v1016_v58 = vpop.f32.mrf.mxu2  ;;  %9560 = vst [vmem:[#allocation180_spill] sm:$0xff] %v7122_v37 }
 0x1bf   :  { %v820_v14 = vadd.f32 %v819_v18, %v546_v10  ;;  %v1229_v54 = vpop.f32.mrf.mxu3  ;;  %v1733_v18 = vsub.f32 %v7115_v24, %v7120_v55  ;;  %v7133_v10 = vsub.f32 %v241_v30, %v7122_v37 }
 0x1c0   :  { %1385 = vmatmul.f32.gmra.mxu0 %v6290_v43 }
 0x1c1   :  { %v1017_v6 = vadd.f32 %v1016_v58, %v820_v14  ;;  %1542 = vmatmul.f32.gmra.mxu1 %v6257_v1  ;;  %9561 = vst [vmem:[#allocation181_spill] sm:$0xff] %v7133_v10  ;;  %v7135_v3 = vand.u32 4294901760, %v1733_v18  ;;  %v245_v18 = vld [vmem:[#allocation9 + $0x88] sm:$0xff] }
 0x1c2   :  { %2060 = vmatmul.f32.gmra.mxu3 %v7086_v9 }
 0x1c3   :  { %v7126_v13 = vadd.f32 %v1229_v54, %v1017_v6  ;;  %1727 = vmatmul.f32.gmra.mxu2 %v7117_v38  ;;  %9562 = vst [vmem:[#allocation182_spill] sm:$0xff] %v7135_v3  ;;  %v7138_v54 = vand.u32 4294901760, %v7133_v10  ;;  %v7140_v6 = vand.u32 4294901760, %v243_v59 }
 0x1c5   :  { %v562_v41 = vpop.f32.mrf.mxu0  ;;  %9563 = vst [vmem:[#allocation183_spill] sm:$0xff] %v7138_v54 }
 0x1c6   :  { %v823_v20 = vpop.f32.mrf.mxu1  ;;  %v1021_v58 = vpop.f32.mrf.mxu2  ;;  %9564 = vst [vmem:[#allocation184_spill] sm:$0xff] %v7140_v6 }
 0x1c7   :  { %v824_v14 = vadd.f32 %v823_v20, %v554_v26  ;;  %v1235_v33 = vpop.f32.mrf.mxu3  ;;  %v1741_v26 = vsub.f32 %v7133_v10, %v7138_v54  ;;  %v7151_v20 = vsub.f32 %v243_v59, %v7140_v6 }
 0x1c8   :  { %1389 = vmatmul.f32.gmra.mxu0 %v6316_v28 }
 0x1c9   :  { %v1022_v38 = vadd.f32 %v1021_v58, %v824_v14  ;;  %1546 = vmatmul.f32.gmra.mxu1 %v6290_v43  ;;  %9565 = vst [vmem:[#allocation185_spill] sm:$0xff] %v7151_v20  ;;  %v7153_v57 = vand.u32 4294901760, %v1741_v26  ;;  %v247_v26 = vld [vmem:[#allocation9 + $0x98] sm:$0xff] }
 0x1ca   :  { %2064 = vmatmul.f32.gmra.mxu3 %v7104_v49 }
 0x1cb   :  { %v7144_v30 = vadd.f32 %v1235_v33, %v1022_v38  ;;  %1735 = vmatmul.f32.gmra.mxu2 %v7135_v3  ;;  %9566 = vst [vmem:[#allocation186_spill] sm:$0xff] %v7153_v57  ;;  %v7156_v33 = vand.u32 4294901760, %v7151_v20  ;;  %v7158_v38 = vand.u32 4294901760, %v245_v18 }
 0x1cd   :  { %v570_v32 = vpop.f32.mrf.mxu0  ;;  %9567 = vst [vmem:[#allocation187_spill] sm:$0xff] %v7156_v33 }
 0x1ce   :  { %v827_v39 = vpop.f32.mrf.mxu1  ;;  %v1026_v58 = vpop.f32.mrf.mxu2  ;;  %9568 = vst [vmem:[#allocation188_spill] sm:$0xff] %v7158_v38 }
 0x1cf   :  { %v828_v14 = vadd.f32 %v827_v39, %v562_v41  ;;  %v1241_v21 = vpop.f32.mrf.mxu3  ;;  %v1749_v39 = vsub.f32 %v7151_v20, %v7156_v33  ;;  %v7169_v41 = vsub.f32 %v245_v18, %v7158_v38 }
 0x1d0   :  { %1393 = vmatmul.f32.gmra.mxu0 %v6353_v44 }
 0x1d1   :  { %v1027_v3 = vadd.f32 %v1026_v58, %v828_v14  ;;  %1550 = vmatmul.f32.gmra.mxu1 %v6316_v28  ;;  %9569 = vst [vmem:[#allocation189_spill] sm:$0xff] %v7169_v41  ;;  %v7171_v53 = vand.u32 4294901760, %v1749_v39  ;;  %v249_v39 = vld [vmem:[#allocation9 + $0xa8] sm:$0xff] }
 0x1d2   :  { %2068 = vmatmul.f32.gmra.mxu3 %v7122_v37 }
 0x1d3   :  { %v7162_v59 = vadd.f32 %v1241_v21, %v1027_v3  ;;  %1743 = vmatmul.f32.gmra.mxu2 %v7153_v57  ;;  %9570 = vst [vmem:[#allocation190_spill] sm:$0xff] %v7171_v53  ;;  %v7174_v21 = vand.u32 4294901760, %v7169_v41  ;;  %v7176_v3 = vand.u32 4294901760, %v247_v26 }
 0x1d5   :  { %v578_v15 = vpop.f32.mrf.mxu0  ;;  %9571 = vst [vmem:[#allocation191_spill] sm:$0xff] %v7174_v21 }
 0x1d6   :  { %v831_v43 = vpop.f32.mrf.mxu1  ;;  %v1031_v58 = vpop.f32.mrf.mxu2  ;;  %9572 = vst [vmem:[#allocation192_spill] sm:$0xff] %v7176_v3 }
 0x1d7   :  { %v832_v14 = vadd.f32 %v831_v43, %v570_v32  ;;  %v1247_v1 = vpop.f32.mrf.mxu3  ;;  %v1757_v43 = vsub.f32 %v7169_v41, %v7174_v21  ;;  %v7187_v32 = vsub.f32 %v247_v26, %v7176_v3 }
 0x1d8   :  { %1397 = vmatmul.f32.gmra.mxu0 %v6379_v5 }
 0x1d9   :  { %v1032_v57 = vadd.f32 %v1031_v58, %v832_v14  ;;  %1554 = vmatmul.f32.gmra.mxu1 %v6353_v44  ;;  %9573 = vst [vmem:[#allocation193_spill] sm:$0xff] %v7187_v32  ;;  %v7189_v33 = vand.u32 4294901760, %v1757_v43  ;;  %v251_v43 = vld [vmem:[#allocation9 + $0xb8] sm:$0xff] }
 0x1da   :  { %2072 = vmatmul.f32.gmra.mxu3 %v7140_v6 }
 0x1db   :  { %v7180_v18 = vadd.f32 %v1247_v1, %v1032_v57  ;;  %1751 = vmatmul.f32.gmra.mxu2 %v7171_v53  ;;  %9574 = vst [vmem:[#allocation194_spill] sm:$0xff] %v7189_v33  ;;  %v7192_v1 = vand.u32 4294901760, %v7187_v32  ;;  %v7194_v57 = vand.u32 4294901760, %v249_v39 }
 0x1dd   :  { %v586_v28 = vpop.f32.mrf.mxu0  ;;  %9575 = vst [vmem:[#allocation195_spill] sm:$0xff] %v7192_v1 }
 0x1de   :  { %v835_v51 = vpop.f32.mrf.mxu1  ;;  %v1036_v58 = vpop.f32.mrf.mxu2  ;;  %9576 = vst [vmem:[#allocation196_spill] sm:$0xff] %v7194_v57 }
 0x1df   :  { %v836_v14 = vadd.f32 %v835_v51, %v578_v15  ;;  %v1253_v7 = vpop.f32.mrf.mxu3  ;;  %v1765_v51 = vsub.f32 %v7187_v32, %v7192_v1  ;;  %v7205_v15 = vsub.f32 %v249_v39, %v7194_v57 }
 0x1e0   :  { %1401 = vmatmul.f32.gmra.mxu0 %v6416_v8 }
 0x1e1   :  { %v1037_v53 = vadd.f32 %v1036_v58, %v836_v14  ;;  %1558 = vmatmul.f32.gmra.mxu1 %v6379_v5  ;;  %9577 = vst [vmem:[#allocation197_spill] sm:$0xff] %v7205_v15  ;;  %v7207_v6 = vand.u32 4294901760, %v1765_v51  ;;  %v253_v51 = vld [vmem:[#allocation9 + $0xc8] sm:$0xff] }
 0x1e2   :  { %2076 = vmatmul.f32.gmra.mxu3 %v7158_v38 }
 0x1e3   :  { %v7198_v26 = vadd.f32 %v1253_v7, %v1037_v53  ;;  %1759 = vmatmul.f32.gmra.mxu2 %v7189_v33  ;;  %9578 = vst [vmem:[#allocation198_spill] sm:$0xff] %v7207_v6  ;;  %v7210_v53 = vand.u32 4294901760, %v7205_v15  ;;  %v7212_v7 = vand.u32 4294901760, %v251_v43 }
 0x1e5   :  { %v594_v44 = vpop.f32.mrf.mxu0  ;;  %9579 = vst [vmem:[#allocation199_spill] sm:$0xff] %v7210_v53 }
 0x1e6   :  { %v839_v21 = vpop.f32.mrf.mxu1  ;;  %v1041_v58 = vpop.f32.mrf.mxu2  ;;  %9580 = vst [vmem:[#allocation200_spill] sm:$0xff] %v7212_v7 }
 0x1e7   :  { %v840_v14 = vadd.f32 %v839_v21, %v586_v28  ;;  %v1259_v41 = vpop.f32.mrf.mxu3  ;;  %v1773_v28 = vsub.f32 %v7205_v15, %v7210_v53  ;;  %v7223_v21 = vsub.f32 %v251_v43, %v7212_v7 }
 0x1e8   :  { %1405 = vmatmul.f32.gmra.mxu0 %v6439_v29 }
 0x1e9   :  { %v1042_v33 = vadd.f32 %v1041_v58, %v840_v14  ;;  %1562 = vmatmul.f32.gmra.mxu1 %v6416_v8  ;;  %9581 = vst [vmem:[#allocation201_spill] sm:$0xff] %v7223_v21  ;;  %v7225_v38 = vand.u32 4294901760, %v1773_v28  ;;  %v255_v28 = vld [vmem:[#allocation9 + $0xd8] sm:$0xff] }
 0x1ea   :  { %2080 = vmatmul.f32.gmra.mxu3 %v7176_v3 }
 0x1eb   :  { %v7216_v39 = vadd.f32 %v1259_v41, %v1042_v33  ;;  %1767 = vmatmul.f32.gmra.mxu2 %v7207_v6  ;;  %9582 = vst [vmem:[#allocation202_spill] sm:$0xff] %v7225_v38  ;;  %v7228_v33 = vand.u32 4294901760, %v7223_v21  ;;  %v7230_v41 = vand.u32 4294901760, %v253_v51 }
 0x1ed   :  { %v602_v5 = vpop.f32.mrf.mxu0  ;;  %9583 = vst [vmem:[#allocation203_spill] sm:$0xff] %v7228_v33 }
 0x1ee   :  { %v843_v1 = vpop.f32.mrf.mxu1  ;;  %v1046_v58 = vpop.f32.mrf.mxu2  ;;  %9584 = vst [vmem:[#allocation204_spill] sm:$0xff] %v7230_v41 }
 0x1ef   :  { %v844_v14 = vadd.f32 %v843_v1, %v594_v44  ;;  %v1265_v32 = vpop.f32.mrf.mxu3  ;;  %v1781_v44 = vsub.f32 %v7223_v21, %v7228_v33  ;;  %v7241_v1 = vsub.f32 %v253_v51, %v7230_v41 }
 0x1f0   :  { %1409 = vmatmul.f32.gmra.mxu0 %v6468_v11 }
 0x1f1   :  { %v1047_v6 = vadd.f32 %v1046_v58, %v844_v14  ;;  %1566 = vmatmul.f32.gmra.mxu1 %v6439_v29  ;;  %9586 = vst [vmem:[#allocation206_spill] sm:$0xff] %v7241_v1  ;;  %v7243_v3 = vand.u32 4294901760, %v1781_v44  ;;  %v9590_v29 = vld [vmem:[#allocation61_spill] sm:$0xff]  ;;  %v257_v44 = vld [vmem:[#allocation9 + $0xe8] sm:$0xff] }
 0x1f2   :  { %2084 = vmatmul.f32.gmra.mxu3 %v7194_v57 }
 0x1f3   :  { %v7234_v43 = vadd.f32 %v1265_v32, %v1047_v6  ;;  %1775 = vmatmul.f32.gmra.mxu2 %v7225_v38  ;;  %9587 = vst [vmem:[#allocation207_spill] sm:$0xff] %v7243_v3  ;;  %v7246_v6 = vand.u32 4294901760, %v7241_v1  ;;  %v7248_v32 = vand.u32 4294901760, %v255_v28 }
 0x1f5   :  { %9585 = vst [vmem:[#allocation205_spill] sm:$0xff] %v7234_v43  ;;  %v610_v8 = vpop.f32.mrf.mxu0 }
 0x1f6   :  { %v847_v53 = vpop.f32.mrf.mxu1  ;;  %v1051_v58 = vpop.f32.mrf.mxu2  ;;  %9588 = vst [vmem:[#allocation208_spill] sm:$0xff] %v7246_v6 }
 0x1f7   :  { %v848_v14 = vadd.f32 %v847_v53, %v602_v5  ;;  %v1271_v15 = vpop.f32.mrf.mxu3  ;;  %9589 = vst [vmem:[#allocation209_spill] sm:$0xff] %v7248_v32  ;;  %v1789_v5 = vsub.f32 %v7241_v1, %v7246_v6  ;;  %v7259_v53 = vsub.f32 %v255_v28, %v7248_v32 }
 0x1f8   :  { %1413 = vmatmul.f32.gmra.mxu0 %v9590_v29 }
 0x1f9   :  { %v1052_v38 = vadd.f32 %v1051_v58, %v848_v14  ;;  %1570 = vmatmul.f32.gmra.mxu1 %v6468_v11  ;;  %9592 = vst [vmem:[#allocation211_spill] sm:$0xff] %v7259_v53  ;;  %v7261_v43 = vand.u32 4294901760, %v1789_v5  ;;  %v9596_v11 = vld [vmem:[#allocation65_spill] sm:$0xff] }
 0x1fa   :  { %2088 = vmatmul.f32.gmra.mxu3 %v7212_v7  ;;  %v259_v5 = vld [vmem:[#allocation9 + $0xf8] sm:$0xff] }
 0x1fb   :  { %v7252_v51 = vadd.f32 %v1271_v15, %v1052_v38  ;;  %1783 = vmatmul.f32.gmra.mxu2 %v7243_v3  ;;  %9593 = vst [vmem:[#allocation212_spill] sm:$0xff] %v7261_v43  ;;  %v7264_v38 = vand.u32 4294901760, %v7259_v53  ;;  %v7266_v15 = vand.u32 4294901760, %v257_v44 }
 0x1fd   :  { %9591 = vst [vmem:[#allocation210_spill] sm:$0xff] %v7252_v51  ;;  %v618_v33 = vpop.f32.mrf.mxu0 }
 0x1fe   :  { %v851_v21 = vpop.f32.mrf.mxu1  ;;  %v1056_v58 = vpop.f32.mrf.mxu2  ;;  %9594 = vst [vmem:[#allocation213_spill] sm:$0xff] %v7264_v38 }
 0x1ff   :  { %v852_v14 = vadd.f32 %v851_v21, %v610_v8  ;;  %v1277_v57 = vpop.f32.mrf.mxu3  ;;  %9595 = vst [vmem:[#allocation214_spill] sm:$0xff] %v7266_v15  ;;  %v1797_v8 = vsub.f32 %v7259_v53, %v7264_v38  ;;  %v7277_v21 = vsub.f32 %v257_v44, %v7266_v15 }
 0x200   :  { %1417 = vmatmul.f32.gmra.mxu0 %v9596_v11 }
 0x201   :  { %v1057_v3 = vadd.f32 %v1056_v58, %v852_v14  ;;  %1574 = vmatmul.f32.gmra.mxu1 %v9590_v29  ;;  %9598 = vst [vmem:[#allocation216_spill] sm:$0xff] %v7277_v21  ;;  %v7279_v51 = vand.u32 4294901760, %v1797_v8  ;;  %v9602_v29 = vld [vmem:[#allocation69_spill] sm:$0xff]  ;;  %v261_v8 = vld [vmem:[#allocation9 + $0x108] sm:$0xff] }
 0x202   :  { %2092 = vmatmul.f32.gmra.mxu3 %v7230_v41 }
 0x203   :  { %v7270_v28 = vadd.f32 %v1277_v57, %v1057_v3  ;;  %1791 = vmatmul.f32.gmra.mxu2 %v7261_v43  ;;  %9599 = vst [vmem:[#allocation217_spill] sm:$0xff] %v7279_v51  ;;  %v7282_v3 = vand.u32 4294901760, %v7277_v21  ;;  %v7284_v57 = vand.u32 4294901760, %v259_v5 }
 0x205   :  { %9597 = vst [vmem:[#allocation215_spill] sm:$0xff] %v7270_v28  ;;  %v626_v6 = vpop.f32.mrf.mxu0 }
 0x206   :  { %v855_v1 = vpop.f32.mrf.mxu1  ;;  %v1061_v58 = vpop.f32.mrf.mxu2  ;;  %9600 = vst [vmem:[#allocation218_spill] sm:$0xff] %v7282_v3 }
 0x207   :  { %v856_v14 = vadd.f32 %v855_v1, %v618_v33  ;;  %v1283_v7 = vpop.f32.mrf.mxu3  ;;  %9601 = vst [vmem:[#allocation219_spill] sm:$0xff] %v7284_v57  ;;  %v1805_v33 = vsub.f32 %v7277_v21, %v7282_v3  ;;  %v7295_v1 = vsub.f32 %v259_v5, %v7284_v57 }
 0x208   :  { %1421 = vmatmul.f32.gmra.mxu0 %v9602_v29 }
 0x209   :  { %v1062_v43 = vadd.f32 %v1061_v58, %v856_v14  ;;  %1578 = vmatmul.f32.gmra.mxu1 %v9596_v11  ;;  %9604 = vst [vmem:[#allocation221_spill] sm:$0xff] %v7295_v1  ;;  %v7297_v28 = vand.u32 4294901760, %v1805_v33  ;;  %v9608_v11 = vld [vmem:[#allocation73_spill] sm:$0xff] }
 0x20a   :  { %2096 = vmatmul.f32.gmra.mxu3 %v7248_v32  ;;  %v263_v33 = vld [vmem:[#allocation9 + $0x118] sm:$0xff] }
 0x20b   :  { %v7288_v44 = vadd.f32 %v1283_v7, %v1062_v43  ;;  %1799 = vmatmul.f32.gmra.mxu2 %v7279_v51  ;;  %9605 = vst [vmem:[#allocation222_spill] sm:$0xff] %v7297_v28  ;;  %v7300_v7 = vand.u32 4294901760, %v7295_v1  ;;  %v7302_v43 = vand.u32 4294901760, %v261_v8 }
 0x20d   :  { %9603 = vst [vmem:[#allocation220_spill] sm:$0xff] %v7288_v44  ;;  %v634_v38 = vpop.f32.mrf.mxu0 }
 0x20e   :  { %v859_v53 = vpop.f32.mrf.mxu1  ;;  %v1066_v58 = vpop.f32.mrf.mxu2  ;;  %9606 = vst [vmem:[#allocation223_spill] sm:$0xff] %v7300_v7 }
 0x20f   :  { %v860_v14 = vadd.f32 %v859_v53, %v626_v6  ;;  %v1289_v41 = vpop.f32.mrf.mxu3  ;;  %9607 = vst [vmem:[#allocation224_spill] sm:$0xff] %v7302_v43  ;;  %v1813_v6 = vsub.f32 %v7295_v1, %v7300_v7  ;;  %v7313_v53 = vsub.f32 %v261_v8, %v7302_v43 }
 0x210   :  { %1425 = vmatmul.f32.gmra.mxu0 %v9608_v11 }
 0x211   :  { %v1067_v51 = vadd.f32 %v1066_v58, %v860_v14  ;;  %1582 = vmatmul.f32.gmra.mxu1 %v9602_v29  ;;  %9610 = vst [vmem:[#allocation226_spill] sm:$0xff] %v7313_v53  ;;  %v7315_v44 = vand.u32 4294901760, %v1813_v6  ;;  %v9614_v29 = vld [vmem:[#allocation77_spill] sm:$0xff]  ;;  %v265_v6 = vld [vmem:[#allocation9 + $0x128] sm:$0xff] }
 0x212   :  { %2100 = vmatmul.f32.gmra.mxu3 %v7266_v15 }
 0x213   :  { %v7306_v5 = vadd.f32 %v1289_v41, %v1067_v51  ;;  %1807 = vmatmul.f32.gmra.mxu2 %v7297_v28  ;;  %9611 = vst [vmem:[#allocation227_spill] sm:$0xff] %v7315_v44  ;;  %v7318_v41 = vand.u32 4294901760, %v7313_v53  ;;  %v7320_v51 = vand.u32 4294901760, %v263_v33 }
 0x215   :  { %9609 = vst [vmem:[#allocation225_spill] sm:$0xff] %v7306_v5  ;;  %v642_v3 = vpop.f32.mrf.mxu0 }
 0x216   :  { %v863_v21 = vpop.f32.mrf.mxu1  ;;  %v1071_v58 = vpop.f32.mrf.mxu2  ;;  %9612 = vst [vmem:[#allocation228_spill] sm:$0xff] %v7318_v41 }
 0x217   :  { %v864_v14 = vadd.f32 %v863_v21, %v634_v38  ;;  %v1295_v32 = vpop.f32.mrf.mxu3  ;;  %9613 = vst [vmem:[#allocation229_spill] sm:$0xff] %v7320_v51  ;;  %v1821_v38 = vsub.f32 %v7313_v53, %v7318_v41  ;;  %v7331_v21 = vsub.f32 %v263_v33, %v7320_v51  ;;  %v267_v53 = vld [vmem:[#allocation9 + $0x138] sm:$0xff] }
 0x218   :  { %1429 = vmatmul.f32.gmra.mxu0 %v9614_v29 }
 0x219   :  { %v1072_v28 = vadd.f32 %v1071_v58, %v864_v14  ;;  %1586 = vmatmul.f32.gmra.mxu1 %v9608_v11  ;;  %9616 = vst [vmem:[#allocation231_spill] sm:$0xff] %v7331_v21  ;;  %v7333_v5 = vand.u32 4294901760, %v1821_v38  ;;  %v9620_v11 = vld [vmem:[#allocation81_spill] sm:$0xff]  ;;  %v9623_v38 = vld [vmem:[#allocation95_spill] sm:$0xff] }
 0x21a   :  { %2104 = vmatmul.f32.gmra.mxu3 %v7284_v57 }
 0x21b   :  { %v7324_v8 = vadd.f32 %v1295_v32, %v1072_v28  ;;  %1815 = vmatmul.f32.gmra.mxu2 %v7315_v44  ;;  %9617 = vst [vmem:[#allocation232_spill] sm:$0xff] %v7333_v5  ;;  %v7336_v32 = vand.u32 4294901760, %v7331_v21  ;;  %v7338_v28 = vand.u32 4294901760, %v265_v6 }
 0x21d   :  { %9615 = vst [vmem:[#allocation230_spill] sm:$0xff] %v7324_v8  ;;  %v1370_v1 = vpop.f32.mrf.mxu0 }
 0x21e   :  { %v867_v7 = vpop.f32.mrf.mxu1  ;;  %v1076_v58 = vpop.f32.mrf.mxu2  ;;  %9618 = vst [vmem:[#allocation233_spill] sm:$0xff] %v7336_v32  ;;  %v1371_v41 = vadd.f32 %v1370_v1, %v9623_v38 }
 0x21f   :  { %v868_v14 = vadd.f32 %v867_v7, %v642_v3  ;;  %v1301_v15 = vpop.f32.mrf.mxu3  ;;  %9619 = vst [vmem:[#allocation234_spill] sm:$0xff] %v7338_v28  ;;  %v1829_v3 = vsub.f32 %v7331_v21, %v7336_v32  ;;  %v7349_v7 = vsub.f32 %v265_v6, %v7338_v28  ;;  %v9627_v32 = vld [vmem:[#allocation85_spill] sm:$0xff] }
 0x220   :  { %1433 = vmatmul.f32.gmra.mxu0 %v9620_v11 }
 0x221   :  { %v1077_v44 = vadd.f32 %v1076_v58, %v868_v14  ;;  %1590 = vmatmul.f32.gmra.mxu1 %v9614_v29  ;;  %9622 = vst [vmem:[#allocation236_spill] sm:$0xff] %v7349_v7 }
 0x222   :  { %2108 = vmatmul.f32.gmra.mxu3 %v7302_v43 }
 0x223   :  { %v7342_v33 = vadd.f32 %v1301_v15, %v1077_v44  ;;  %1823 = vmatmul.f32.gmra.mxu2 %v7333_v5  ;;  %v7352_v15 = vand.u32 4294901760, %v1829_v3  ;;  %v7355_v44 = vand.u32 4294901760, %v7349_v7  ;;  %v7357_v5 = vand.u32 4294901760, %v267_v53  ;;  %v9630_v3 = vld [vmem:[#allocation100_spill] sm:$0xff] }
 0x225   :  { %9621 = vst [vmem:[#allocation235_spill] sm:$0xff] %v7342_v33  ;;  %v1374_v14 = vpop.f32.mrf.mxu0  ;;  %v1837_v1 = vsub.f32 %v7349_v7, %v7355_v44 }
 0x226   :  { %v1531_v58 = vpop.f32.mrf.mxu1  ;;  %v1696_v8 = vpop.f32.mrf.mxu2  ;;  %9624 = vst [vmem:[#allocation95_spill] sm:$0xff] %v7352_v15  ;;  %v1375_v38 = vadd.f32 %v1374_v14, %v9630_v3  ;;  %v9637_v3 = vld [vmem:[#allocation105_spill] sm:$0xff] }
 0x227   :  { %v1532_v57 = vadd.f32 %v1531_v58, %v1371_v41  ;;  %v2045_v29 = vpop.f32.mrf.mxu3  ;;  %9625 = vst [vmem:[#allocation237_spill] sm:$0xff] %v7355_v44  ;;  %v7368_v41 = vsub.f32 %v267_v53, %v7357_v5  ;;  %v269_v58 = vld [vmem:[#allocation9 + $0x148] sm:$0xff]  ;;  %v9634_v44 = vld [vmem:[#allocation89_spill] sm:$0xff] }
 0x228   :  { %9626 = vst [vmem:[#allocation238_spill] sm:$0xff] %v7357_v5  ;;  %1437 = vmatmul.f32.gmra.mxu0 %v9627_v32 }
 0x229   :  { %v1697_v43 = vadd.f32 %v1696_v8, %v1532_v57  ;;  %1594 = vmatmul.f32.gmra.mxu1 %v9620_v11  ;;  %9629 = vst [vmem:[#allocation240_spill] sm:$0xff] %v7368_v41 }
 0x22a   :  { %2112 = vmatmul.f32.gmra.mxu3 %v7320_v51 }
 0x22b   :  { %v7361_v6 = vadd.f32 %v2045_v29, %v1697_v43  ;;  %1831 = vmatmul.f32.gmra.mxu2 %v7352_v15  ;;  %v7371_v29 = vand.u32 4294901760, %v1837_v1  ;;  %v7374_v43 = vand.u32 4294901760, %v7368_v41  ;;  %v7376_v15 = vand.u32 4294901760, %v269_v58 }
 0x22d   :  { %9628 = vst [vmem:[#allocation239_spill] sm:$0xff] %v7361_v6  ;;  %v1378_v57 = vpop.f32.mrf.mxu0  ;;  %v1845_v14 = vsub.f32 %v7368_v41, %v7374_v43  ;;  %v7387_v1 = vsub.f32 %v269_v58, %v7376_v15 }
 0x22e   :  { %v1535_v8 = vpop.f32.mrf.mxu1  ;;  %v1704_v33 = vpop.f32.mrf.mxu2  ;;  %9631 = vst [vmem:[#allocation100_spill] sm:$0xff] %v7371_v29 }
 0x22f   :  { %v1536_v21 = vadd.f32 %v1535_v8, %v1375_v38  ;;  %v2049_v11 = vpop.f32.mrf.mxu3  ;;  %9632 = vst [vmem:[#allocation241_spill] sm:$0xff] %v7374_v43  ;;  %v1379_v38 = vadd.f32 %v1378_v57, %v9637_v3  ;;  %v271_v8 = vld [vmem:[#allocation9 + $0x158] sm:$0xff]  ;;  %v9644_v3 = vld [vmem:[#allocation110_spill] sm:$0xff] }
 0x230   :  { %9633 = vst [vmem:[#allocation242_spill] sm:$0xff] %v7376_v15  ;;  %1441 = vmatmul.f32.gmra.mxu0 %v9634_v44  ;;  %v9641_v43 = vld [vmem:[#allocation93_spill] sm:$0xff] }
 0x231   :  { %v1705_v51 = vadd.f32 %v1704_v33, %v1536_v21  ;;  %1598 = vmatmul.f32.gmra.mxu1 %v9627_v32  ;;  %9636 = vst [vmem:[#allocation244_spill] sm:$0xff] %v7387_v1 }
 0x232   :  { %2116 = vmatmul.f32.gmra.mxu3 %v7338_v28 }
 0x233   :  { %v7380_v53 = vadd.f32 %v2049_v11, %v1705_v51  ;;  %1839 = vmatmul.f32.gmra.mxu2 %v7371_v29  ;;  %v7390_v11 = vand.u32 4294901760, %v1845_v14  ;;  %v7393_v51 = vand.u32 4294901760, %v7387_v1  ;;  %v7395_v29 = vand.u32 4294901760, %v271_v8 }
 0x235   :  { %9635 = vst [vmem:[#allocation243_spill] sm:$0xff] %v7380_v53  ;;  %v1382_v21 = vpop.f32.mrf.mxu0  ;;  %v1853_v57 = vsub.f32 %v7387_v1, %v7393_v51  ;;  %v7406_v14 = vsub.f32 %v271_v8, %v7395_v29 }
 0x236   :  { %v1539_v33 = vpop.f32.mrf.mxu1  ;;  %v1712_v6 = vpop.f32.mrf.mxu2  ;;  %9638 = vst [vmem:[#allocation105_spill] sm:$0xff] %v7390_v11 }
 0x237   :  { %v1540_v7 = vadd.f32 %v1539_v33, %v1379_v38  ;;  %v2053_v32 = vpop.f32.mrf.mxu3  ;;  %9639 = vst [vmem:[#allocation245_spill] sm:$0xff] %v7393_v51  ;;  %v1383_v38 = vadd.f32 %v1382_v21, %v9644_v3  ;;  %v273_v33 = vld [vmem:[#allocation9 + $0x168] sm:$0xff]  ;;  %v9648_v51 = vld [vmem:[#allocation98_spill] sm:$0xff] }
 0x238   :  { %9640 = vst [vmem:[#allocation246_spill] sm:$0xff] %v7395_v29  ;;  %1445 = vmatmul.f32.gmra.mxu0 %v9641_v43  ;;  %v9651_v3 = vld [vmem:[#allocation115_spill] sm:$0xff] }
 0x239   :  { %v1713_v28 = vadd.f32 %v1712_v6, %v1540_v7  ;;  %1602 = vmatmul.f32.gmra.mxu1 %v9634_v44  ;;  %9643 = vst [vmem:[#allocation248_spill] sm:$0xff] %v7406_v14 }
 0x23a   :  { %2120 = vmatmul.f32.gmra.mxu3 %v7357_v5 }
 0x23b   :  { %v7399_v58 = vadd.f32 %v2053_v32, %v1713_v28  ;;  %1847 = vmatmul.f32.gmra.mxu2 %v7390_v11  ;;  %v7409_v32 = vand.u32 4294901760, %v1853_v57  ;;  %v7412_v28 = vand.u32 4294901760, %v7406_v14  ;;  %v7414_v11 = vand.u32 4294901760, %v273_v33 }
 0x23d   :  { %9642 = vst [vmem:[#allocation247_spill] sm:$0xff] %v7399_v58  ;;  %v1386_v7 = vpop.f32.mrf.mxu0  ;;  %v1861_v21 = vsub.f32 %v7406_v14, %v7412_v28  ;;  %v7425_v57 = vsub.f32 %v273_v33, %v7414_v11 }
 0x23e   :  { %v1543_v6 = vpop.f32.mrf.mxu1  ;;  %v1720_v53 = vpop.f32.mrf.mxu2  ;;  %9645 = vst [vmem:[#allocation110_spill] sm:$0xff] %v7409_v32 }
 0x23f   :  { %v1544_v41 = vadd.f32 %v1543_v6, %v1383_v38  ;;  %v2057_v44 = vpop.f32.mrf.mxu3  ;;  %9646 = vst [vmem:[#allocation249_spill] sm:$0xff] %v7412_v28  ;;  %v1387_v38 = vadd.f32 %v1386_v7, %v9651_v3  ;;  %v275_v6 = vld [vmem:[#allocation9 + $0x178] sm:$0xff]  ;;  %v9655_v28 = vld [vmem:[#allocation103_spill] sm:$0xff]  ;;  %v9658_v3 = vld [vmem:[#allocation120_spill] sm:$0xff] }
 0x240   :  { %9647 = vst [vmem:[#allocation250_spill] sm:$0xff] %v7414_v11  ;;  %1449 = vmatmul.f32.gmra.mxu0 %v9648_v51 }
 0x241   :  { %v1721_v5 = vadd.f32 %v1720_v53, %v1544_v41  ;;  %1606 = vmatmul.f32.gmra.mxu1 %v9641_v43  ;;  %9650 = vst [vmem:[#allocation252_spill] sm:$0xff] %v7425_v57 }
 0x242   :  { %2124 = vmatmul.f32.gmra.mxu3 %v7376_v15 }
 0x243   :  { %v7418_v8 = vadd.f32 %v2057_v44, %v1721_v5  ;;  %1855 = vmatmul.f32.gmra.mxu2 %v7409_v32  ;;  %v7428_v5 = vand.u32 4294901760, %v1861_v21  ;;  %v7431_v44 = vand.u32 4294901760, %v7425_v57  ;;  %v7433_v32 = vand.u32 4294901760, %v275_v6 }
 0x245   :  { %9649 = vst [vmem:[#allocation251_spill] sm:$0xff] %v7418_v8  ;;  %v1390_v41 = vpop.f32.mrf.mxu0  ;;  %v1869_v7 = vsub.f32 %v7425_v57, %v7431_v44  ;;  %v7444_v21 = vsub.f32 %v275_v6, %v7433_v32 }
 0x246   :  { %v1547_v53 = vpop.f32.mrf.mxu1  ;;  %v1728_v58 = vpop.f32.mrf.mxu2  ;;  %9652 = vst [vmem:[#allocation115_spill] sm:$0xff] %v7428_v5 }
 0x247   :  { %v1548_v1 = vadd.f32 %v1547_v53, %v1387_v38  ;;  %v2061_v43 = vpop.f32.mrf.mxu3  ;;  %9653 = vst [vmem:[#allocation253_spill] sm:$0xff] %v7431_v44  ;;  %v1391_v38 = vadd.f32 %v1390_v41, %v9658_v3  ;;  %v277_v53 = vld [vmem:[#allocation9 + $0x188] sm:$0xff]  ;;  %v9662_v44 = vld [vmem:[#allocation108_spill] sm:$0xff]  ;;  %v9665_v3 = vld [vmem:[#allocation125_spill] sm:$0xff] }
 0x248   :  { %9654 = vst [vmem:[#allocation254_spill] sm:$0xff] %v7433_v32  ;;  %1453 = vmatmul.f32.gmra.mxu0 %v9655_v28 }
 0x249   :  { %v1729_v15 = vadd.f32 %v1728_v58, %v1548_v1  ;;  %1610 = vmatmul.f32.gmra.mxu1 %v9648_v51  ;;  %9657 = vst [vmem:[#allocation256_spill] sm:$0xff] %v7444_v21 }
 0x24a   :  { %2128 = vmatmul.f32.gmra.mxu3 %v7395_v29 }
 0x24b   :  { %v7437_v33 = vadd.f32 %v2061_v43, %v1729_v15  ;;  %1863 = vmatmul.f32.gmra.mxu2 %v7428_v5  ;;  %v7447_v15 = vand.u32 4294901760, %v1869_v7  ;;  %v7450_v43 = vand.u32 4294901760, %v7444_v21  ;;  %v7452_v5 = vand.u32 4294901760, %v277_v53 }
 0x24d   :  { %9656 = vst [vmem:[#allocation255_spill] sm:$0xff] %v7437_v33  ;;  %v1394_v1 = vpop.f32.mrf.mxu0  ;;  %v1877_v41 = vsub.f32 %v7444_v21, %v7450_v43  ;;  %v7463_v7 = vsub.f32 %v277_v53, %v7452_v5 }
 0x24e   :  { %v1551_v58 = vpop.f32.mrf.mxu1  ;;  %v1736_v8 = vpop.f32.mrf.mxu2  ;;  %9659 = vst [vmem:[#allocation120_spill] sm:$0xff] %v7447_v15 }
 0x24f   :  { %v1552_v14 = vadd.f32 %v1551_v58, %v1391_v38  ;;  %v2065_v51 = vpop.f32.mrf.mxu3  ;;  %9660 = vst [vmem:[#allocation257_spill] sm:$0xff] %v7450_v43  ;;  %v1395_v38 = vadd.f32 %v1394_v1, %v9665_v3  ;;  %v279_v58 = vld [vmem:[#allocation9 + $0x198] sm:$0xff]  ;;  %v9672_v3 = vld [vmem:[#allocation130_spill] sm:$0xff] }
 0x250   :  { %9661 = vst [vmem:[#allocation258_spill] sm:$0xff] %v7452_v5  ;;  %1457 = vmatmul.f32.gmra.mxu0 %v9662_v44  ;;  %v9669_v43 = vld [vmem:[#allocation113_spill] sm:$0xff] }
 0x251   :  { %v1737_v29 = vadd.f32 %v1736_v8, %v1552_v14  ;;  %1614 = vmatmul.f32.gmra.mxu1 %v9655_v28  ;;  %9664 = vst [vmem:[#allocation260_spill] sm:$0xff] %v7463_v7 }
 0x252   :  { %2132 = vmatmul.f32.gmra.mxu3 %v7414_v11 }
 0x253   :  { %v7456_v6 = vadd.f32 %v2065_v51, %v1737_v29  ;;  %1871 = vmatmul.f32.gmra.mxu2 %v7447_v15  ;;  %v7466_v29 = vand.u32 4294901760, %v1877_v41  ;;  %v7469_v51 = vand.u32 4294901760, %v7463_v7  ;;  %v7471_v15 = vand.u32 4294901760, %v279_v58 }
 0x255   :  { %9663 = vst [vmem:[#allocation259_spill] sm:$0xff] %v7456_v6  ;;  %v1398_v14 = vpop.f32.mrf.mxu0  ;;  %v1885_v1 = vsub.f32 %v7463_v7, %v7469_v51  ;;  %v7482_v41 = vsub.f32 %v279_v58, %v7471_v15 }
 0x256   :  { %v1555_v8 = vpop.f32.mrf.mxu1  ;;  %v1744_v33 = vpop.f32.mrf.mxu2  ;;  %9666 = vst [vmem:[#allocation125_spill] sm:$0xff] %v7466_v29 }
 0x257   :  { %v1556_v57 = vadd.f32 %v1555_v8, %v1395_v38  ;;  %v2069_v28 = vpop.f32.mrf.mxu3  ;;  %9667 = vst [vmem:[#allocation261_spill] sm:$0xff] %v7469_v51  ;;  %v1399_v38 = vadd.f32 %v1398_v14, %v9672_v3  ;;  %v281_v8 = vld [vmem:[#allocation9 + $0x1a8] sm:$0xff]  ;;  %v9676_v51 = vld [vmem:[#allocation118_spill] sm:$0xff] }
 0x258   :  { %9668 = vst [vmem:[#allocation262_spill] sm:$0xff] %v7471_v15  ;;  %1461 = vmatmul.f32.gmra.mxu0 %v9669_v43  ;;  %v9679_v3 = vld [vmem:[#allocation135_spill] sm:$0xff] }
 0x259   :  { %v1745_v11 = vadd.f32 %v1744_v33, %v1556_v57  ;;  %1618 = vmatmul.f32.gmra.mxu1 %v9662_v44  ;;  %9671 = vst [vmem:[#allocation264_spill] sm:$0xff] %v7482_v41 }
 0x25a   :  { %2136 = vmatmul.f32.gmra.mxu3 %v7433_v32 }
 0x25b   :  { %v7475_v53 = vadd.f32 %v2069_v28, %v1745_v11  ;;  %1879 = vmatmul.f32.gmra.mxu2 %v7466_v29  ;;  %v7485_v11 = vand.u32 4294901760, %v1885_v1  ;;  %v7488_v28 = vand.u32 4294901760, %v7482_v41  ;;  %v7490_v29 = vand.u32 4294901760, %v281_v8 }
 0x25d   :  { %9670 = vst [vmem:[#allocation263_spill] sm:$0xff] %v7475_v53  ;;  %v1402_v57 = vpop.f32.mrf.mxu0  ;;  %v1893_v14 = vsub.f32 %v7482_v41, %v7488_v28  ;;  %v7501_v1 = vsub.f32 %v281_v8, %v7490_v29 }
 0x25e   :  { %v1559_v33 = vpop.f32.mrf.mxu1  ;;  %v1752_v6 = vpop.f32.mrf.mxu2  ;;  %9673 = vst [vmem:[#allocation130_spill] sm:$0xff] %v7485_v11 }
 0x25f   :  { %v1560_v21 = vadd.f32 %v1559_v33, %v1399_v38  ;;  %v2073_v44 = vpop.f32.mrf.mxu3  ;;  %9674 = vst [vmem:[#allocation265_spill] sm:$0xff] %v7488_v28  ;;  %v1403_v38 = vadd.f32 %v1402_v57, %v9679_v3  ;;  %v283_v33 = vld [vmem:[#allocation9 + $0x1b8] sm:$0xff]  ;;  %v9683_v28 = vld [vmem:[#allocation123_spill] sm:$0xff]  ;;  %v9685_v3 = vld [vmem:[#allocation140_spill] sm:$0xff] }
 0x260   :  { %9675 = vst [vmem:[#allocation266_spill] sm:$0xff] %v7490_v29  ;;  %1465 = vmatmul.f32.gmra.mxu0 %v9676_v51 }
 0x261   :  { %v1753_v32 = vadd.f32 %v1752_v6, %v1560_v21  ;;  %1622 = vmatmul.f32.gmra.mxu1 %v9669_v43  ;;  %9678 = vst [vmem:[#allocation268_spill] sm:$0xff] %v7501_v1 }
 0x262   :  { %2140 = vmatmul.f32.gmra.mxu3 %v7452_v5 }
 0x263   :  { %v7494_v58 = vadd.f32 %v2073_v44, %v1753_v32  ;;  %1887 = vmatmul.f32.gmra.mxu2 %v7485_v11  ;;  %v7504_v32 = vand.u32 4294901760, %v1893_v14  ;;  %v7507_v44 = vand.u32 4294901760, %v7501_v1  ;;  %v7509_v11 = vand.u32 4294901760, %v283_v33 }
 0x265   :  { %9677 = vst [vmem:[#allocation267_spill] sm:$0xff] %v7494_v58  ;;  %v1406_v21 = vpop.f32.mrf.mxu0  ;;  %v1901_v57 = vsub.f32 %v7501_v1, %v7507_v44  ;;  %v7520_v14 = vsub.f32 %v283_v33, %v7509_v11 }
 0x266   :  { %v1563_v6 = vpop.f32.mrf.mxu1  ;;  %v1760_v53 = vpop.f32.mrf.mxu2  ;;  %9680 = vst [vmem:[#allocation135_spill] sm:$0xff] %v7504_v32 }
 0x267   :  { %v1564_v7 = vadd.f32 %v1563_v6, %v1403_v38  ;;  %v2077_v43 = vpop.f32.mrf.mxu3  ;;  %9681 = vst [vmem:[#allocation269_spill] sm:$0xff] %v7507_v44  ;;  %v1407_v38 = vadd.f32 %v1406_v21, %v9685_v3  ;;  %v285_v6 = vld [vmem:[#allocation9 + $0x1c8] sm:$0xff]  ;;  %v9690_v3 = vld [vmem:[#allocation145_spill] sm:$0xff] }
 0x268   :  { %9682 = vst [vmem:[#allocation270_spill] sm:$0xff] %v7509_v11  ;;  %1469 = vmatmul.f32.gmra.mxu0 %v9683_v28 }
 0x269   :  { %v1761_v5 = vadd.f32 %v1760_v53, %v1564_v7  ;;  %1626 = vmatmul.f32.gmra.mxu1 %v9676_v51  ;;  %9684 = vst [vmem:[#allocation271_spill] sm:$0xff] %v7520_v14 }
 0x26a   :  { %2144 = vmatmul.f32.gmra.mxu3 %v7471_v15 }
 0x26b   :  { %v7513_v8 = vadd.f32 %v2077_v43, %v1761_v5  ;;  %1895 = vmatmul.f32.gmra.mxu2 %v7504_v32  ;;  %v7523_v5 = vand.u32 4294901760, %v1901_v57  ;;  %v7526_v43 = vand.u32 4294901760, %v7520_v14  ;;  %v7528_v32 = vand.u32 4294901760, %v285_v6 }
 0x26d   :  { %v1410_v7 = vpop.f32.mrf.mxu0  ;;  %9686 = vst [vmem:[#allocation140_spill] sm:$0xff] %v7523_v5  ;;  %v1909_v21 = vsub.f32 %v7520_v14, %v7526_v43  ;;  %v7539_v57 = vsub.f32 %v285_v6, %v7528_v32 }
 0x26e   :  { %v1567_v53 = vpop.f32.mrf.mxu1  ;;  %v1768_v58 = vpop.f32.mrf.mxu2  ;;  %9687 = vst [vmem:[#allocation272_spill] sm:$0xff] %v7526_v43 }
 0x26f   :  { %v1568_v41 = vadd.f32 %v1567_v53, %v1407_v38  ;;  %v2081_v51 = vpop.f32.mrf.mxu3  ;;  %9688 = vst [vmem:[#allocation273_spill] sm:$0xff] %v7528_v32  ;;  %v1411_v38 = vadd.f32 %v1410_v7, %v9690_v3  ;;  %v287_v53 = vld [vmem:[#allocation9 + $0x1d8] sm:$0xff] }
 0x270   :  { %1473 = vmatmul.f32.gmra.mxu0 %v6834_v23  ;;  %9689 = vst [vmem:[#allocation274_spill] sm:$0xff] %v7539_v57 }
 0x271   :  { %v1769_v15 = vadd.f32 %v1768_v58, %v1568_v41  ;;  %1630 = vmatmul.f32.gmra.mxu1 %v9683_v28 }
 0x272   :  { %2148 = vmatmul.f32.gmra.mxu3 %v7490_v29 }
 0x273   :  { %v7532_v33 = vadd.f32 %v2081_v51, %v1769_v15  ;;  %1903 = vmatmul.f32.gmra.mxu2 %v7523_v5  ;;  %v7542_v15 = vand.u32 4294901760, %v1909_v21  ;;  %v7545_v51 = vand.u32 4294901760, %v7539_v57  ;;  %v7547_v5 = vand.u32 4294901760, %v287_v53 }
 0x275   :  { %v1414_v41 = vpop.f32.mrf.mxu0  ;;  %9691 = vst [vmem:[#allocation145_spill] sm:$0xff] %v7542_v15  ;;  %v1917_v7 = vsub.f32 %v7539_v57, %v7545_v51  ;;  %v7558_v21 = vsub.f32 %v287_v53, %v7547_v5 }
 0x276   :  { %v1571_v58 = vpop.f32.mrf.mxu1  ;;  %v1776_v1 = vpop.f32.mrf.mxu2  ;;  %9692 = vst [vmem:[#allocation275_spill] sm:$0xff] %v7545_v51  ;;  %v1415_v3 = vadd.f32 %v1414_v41, %v6951_v22 }
 0x277   :  { %v1572_v44 = vadd.f32 %v1571_v58, %v1411_v38  ;;  %v2085_v28 = vpop.f32.mrf.mxu3  ;;  %9693 = vst [vmem:[#allocation276_spill] sm:$0xff] %v7547_v5  ;;  %v289_v38 = vld [vmem:[#allocation9 + $0x1e8] sm:$0xff] }
 0x278   :  { %1477 = vmatmul.f32.gmra.mxu0 %v6852_v46  ;;  %9694 = vst [vmem:[#allocation277_spill] sm:$0xff] %v7558_v21 }
 0x279   :  { %v1777_v29 = vadd.f32 %v1776_v1, %v1572_v44  ;;  %1634 = vmatmul.f32.gmra.mxu1 %v6834_v23 }
 0x27a   :  { %2152 = vmatmul.f32.gmra.mxu3 %v7509_v11 }
 0x27b   :  { %v7551_v6 = vadd.f32 %v2085_v28, %v1777_v29  ;;  %1911 = vmatmul.f32.gmra.mxu2 %v7542_v15  ;;  %v7561_v29 = vand.u32 4294901760, %v1917_v7  ;;  %v7564_v28 = vand.u32 4294901760, %v7558_v21  ;;  %v7566_v15 = vand.u32 4294901760, %v289_v38  ;;  %v323_v7 = vld [vmem:[#allocation12 + $0xf8] sm:$0xff] }
 0x27d   :  { %v1418_v1 = vpop.f32.mrf.mxu0  ;;  %9695 = vst [vmem:[#allocation278_spill] sm:$0xff] %v7561_v29  ;;  %v1925_v22 = vsub.f32 %v7558_v21, %v7564_v28  ;;  %v7577_v41 = vsub.f32 %v289_v38, %v7566_v15 }
 0x27e   :  { %v1575_v44 = vpop.f32.mrf.mxu1  ;;  %v1784_v43 = vpop.f32.mrf.mxu2  ;;  %9696 = vst [vmem:[#allocation279_spill] sm:$0xff] %v7564_v28 }
 0x27f   :  { %v1576_v58 = vadd.f32 %v1575_v44, %v1415_v3  ;;  %v2089_v23 = vpop.f32.mrf.mxu3  ;;  %9697 = vst [vmem:[#allocation280_spill] sm:$0xff] %v7566_v15  ;;  %v1419_v3 = vadd.f32 %v1418_v1, %v6979_v52  ;;  %v7580_v44 = vand.u32 4294901760, %v323_v7  ;;  %v7587_v38 = vand.u32 4294901760, %v1925_v22 }
 0x280   :  { %1481 = vmatmul.f32.gmra.mxu0 %v6882_v35  ;;  %9698 = vst [vmem:[#allocation281_spill] sm:$0xff] %v7577_v41 }
 0x281   :  { %v1785_v11 = vadd.f32 %v1784_v43, %v1576_v58  ;;  %1638 = vmatmul.f32.gmra.mxu1 %v6852_v46  ;;  %v291_v43 = vld [vmem:[#allocation9 + $0x1f8] sm:$0xff]  ;;  %2961 = vmatpush.msrb.mxu0 %v7580_v44  ;;  %9699 = vst [vmem:[#allocation282_spill] sm:$0xff] %v7587_v38 }
 0x282   :  { %2156 = vmatmul.f32.gmra.mxu3 %v7528_v32  ;;  %v7583_v32 = vsub.f32 %v323_v7, %v7580_v44  ;;  %v7592_v52 = vand.u32 4294901760, %v291_v43 }
 0x283   :  { %v7570_v53 = vadd.f32 %v2089_v23, %v1785_v11  ;;  %1919 = vmatmul.f32.gmra.mxu2 %v7561_v29  ;;  %3684 = vmatpush.msrb.mxu3 %v7580_v44  ;;  %v7590_v29 = vand.u32 4294901760, %v7577_v41 }
 0x284   :  { %9701 = vst [vmem:[#allocation284_spill] sm:$0xff] %v7592_v52  ;;  %3476 = vmatpush.msrb.mxu2 %v7583_v32 }
 0x285   :  { %v1422_v58 = vpop.f32.mrf.mxu0  ;;  %9700 = vst [vmem:[#allocation283_spill] sm:$0xff] %v7590_v29 }
 0x286   :  { %v1579_v46 = vpop.f32.mrf.mxu1  ;;  %v1792_v11 = vpop.f32.mrf.mxu2 }
 0x287   :  { %v1580_v23 = vadd.f32 %v1579_v46, %v1419_v3  ;;  %v2093_v51 = vpop.f32.mrf.mxu3  ;;  %v9267_v46 = vand.u32 4294901760, %v7583_v32  ;;  %v1933_v3 = vsub.f32 %v7577_v41, %v7590_v29 }
 0x288   :  { %1485 = vmatmul.f32.gmra.mxu0 %v6900_v62 }
 0x289   :  { %v1793_v1 = vadd.f32 %v1792_v11, %v1580_v23  ;;  %1642 = vmatmul.f32.gmra.mxu1 %v6882_v35  ;;  %v3252_v22 = vsub.f32 %v7583_v32, %v9267_v46  ;;  %v7608_v23 = vsub.f32 %v291_v43, %v7592_v52  ;;  %v1423_v11 = vadd.f32 %v1422_v58, %v7004_v27 }
 0x28a   :  { %2160 = vmatmul.f32.gmra.mxu3 %v7547_v5 }
 0x28b   :  { %v7598_v7 = vadd.f32 %v2093_v51, %v1793_v1  ;;  %1927 = vmatmul.f32.gmra.mxu2 %v7587_v38  ;;  %9703 = vst [vmem:[#allocation286_spill] sm:$0xff] %v7608_v23  ;;  %v3253_v35 = vand.u32 4294901760, %v3252_v22  ;;  %v7614_v46 = vand.u32 4294901760, %v7608_v23 }
 0x28d   :  { %9702 = vst [vmem:[#allocation285_spill] sm:$0xff] %v7598_v7  ;;  %v1426_v28 = vpop.f32.mrf.mxu0  ;;  %3254 = vmatpush.msrb.mxu1 %v3253_v35  ;;  %v7611_v7 = vand.u32 4294901760, %v1933_v3  ;;  %v1941_v27 = vsub.f32 %v7608_v23, %v7614_v46  ;;  %v321_v35 = vld [vmem:[#allocation12 + $0xe8] sm:$0xff] }
 0x28e   :  { %v1583_v51 = vpop.f32.mrf.mxu1  ;;  %v1800_v21 = vpop.f32.mrf.mxu2  ;;  %9705 = vst [vmem:[#allocation288_spill] sm:$0xff] %v7614_v46  ;;  %v1427_v58 = vadd.f32 %v1426_v28, %v7030_v17  ;;  %v7625_v22 = vand.u32 4294901760, %v321_v35 }
 0x28f   :  { %v1584_v1 = vadd.f32 %v1583_v51, %v1423_v11  ;;  %v2097_v5 = vpop.f32.mrf.mxu3  ;;  %9704 = vst [vmem:[#allocation287_spill] sm:$0xff] %v7611_v7 }
 0x290   :  { %1489 = vmatmul.f32.gmra.mxu0 %v6934_v50  ;;  %3686 = vmatpush.msrb.mxu3 %v7625_v22 }
 0x291   :  { %v1801_v38 = vadd.f32 %v1800_v21, %v1584_v1  ;;  %1646 = vmatmul.f32.gmra.mxu1 %v6900_v62  ;;  %2963 = vmatpush.msrb.mxu0 %v7625_v22 }
 0x292   :  { %2164 = vmatmul.f32.gmra.mxu3 %v7566_v15 }
 0x293   :  { %v7618_v43 = vadd.f32 %v2097_v5, %v1801_v38  ;;  %1935 = vmatmul.f32.gmra.mxu2 %v7611_v7  ;;  %v7628_v5 = vsub.f32 %v321_v35, %v7625_v22  ;;  %v7632_v38 = vand.u32 4294901760, %v1941_v27 }
 0x295   :  { %v1430_v3 = vpop.f32.mrf.mxu0  ;;  %9706 = vst [vmem:[#allocation289_spill] sm:$0xff] %v7632_v38  ;;  %v9276_v17 = vand.u32 4294901760, %v7628_v5  ;;  %3479 = vmatpush.msrb.mxu2 %v7628_v5 }
 0x296   :  { %v1587_v21 = vpop.f32.mrf.mxu1  ;;  %v1808_v51 = vpop.f32.mrf.mxu2  ;;  %v1431_v27 = vadd.f32 %v1430_v3, %v7054_v2 }
 0x297   :  { %v1588_v11 = vadd.f32 %v1587_v21, %v1427_v58  ;;  %v2101_v1 = vpop.f32.mrf.mxu3  ;;  %v3258_v35 = vsub.f32 %v7628_v5, %v9276_v17 }
 0x298   :  { %1493 = vmatmul.f32.gmra.mxu0 %v6961_v4 }
 0x299   :  { %v1809_v7 = vadd.f32 %v1808_v51, %v1588_v11  ;;  %1650 = vmatmul.f32.gmra.mxu1 %v6934_v50  ;;  %v3259_v58 = vand.u32 4294901760, %v3258_v35 }
 0x29a   :  { %2168 = vmatmul.f32.gmra.mxu3 %v7592_v52 }
 0x29b   :  { %v7638_v28 = vadd.f32 %v2101_v1, %v1809_v7  ;;  %1943 = vmatmul.f32.gmra.mxu2 %v7632_v38  ;;  %3260 = vmatpush.msrb.mxu1 %v3259_v58  ;;  %v319_v1 = vld [vmem:[#allocation12 + $0xd8] sm:$0xff]  ;;  %v9723_v38 = vld [vmem:[#allocation196_spill] sm:$0xff] }
 0x29c   :  { %v7653_v3 = vand.u32 4294901760, %v319_v1 }
 0x29d   :  { %v1434_v21 = vpop.f32.mrf.mxu0 }
 0x29e   :  { %v1591_v11 = vpop.f32.mrf.mxu1  ;;  %v1816_v50 = vpop.f32.mrf.mxu2  ;;  %v1435_v2 = vadd.f32 %v1434_v21, %v7072_v16  ;;  %2965 = vmatpush.msrb.mxu0 %v7653_v3  ;;  %3688 = vmatpush.msrb.mxu3 %v7653_v3 }
 0x29f   :  { %v1592_v51 = vadd.f32 %v1591_v11, %v1431_v27  ;;  %v2105_v62 = vpop.f32.mrf.mxu3 }
 0x2a0   :  { %2222 = vmatmul.f32.vlgmr.msra.gmra.mxu0 %v7009_v45 }
 0x2a1   :  { %v1817_v46 = vadd.f32 %v1816_v50, %v1592_v51  ;;  %1654 = vmatmul.f32.gmra.mxu1 %v6961_v4  ;;  %v7656_v51 = vsub.f32 %v319_v1, %v7653_v3 }
 0x2a2   :  { %2832 = vmatmul.f32.vlgmr.msra.gmra.mxu3 %v6994_v42 }
 0x2a3   :  { %v7648_v7 = vadd.f32 %v2105_v62, %v1817_v46  ;;  %2671 = vmatmul.f32.vlgmr.msra.gmra.mxu2 %v6994_v42  ;;  %v9279_v16 = vand.u32 4294901760, %v7656_v51  ;;  %v305_v42 = vld [vmem:[#allocation12 + $0x68] sm:$0xff] }
 0x2a4   :  { %3482 = vmatpush.msrb.mxu2 %v7656_v51 }
 0x2a5   :  { %v1438_v35 = vpop.f32.mrf.mxu0  ;;  %v3264_v21 = vsub.f32 %v7656_v51, %v9279_v16 }
 0x2a6   :  { %v1595_v27 = vpop.f32.mrf.mxu1  ;;  %v1824_v58 = vpop.f32.mrf.mxu2  ;;  %v1439_v1 = vadd.f32 %v1438_v35, %v7090_v25 }
 0x2a7   :  { %v1596_v11 = vadd.f32 %v1595_v27, %v1435_v2  ;;  %v2109_v50 = vpop.f32.mrf.mxu3  ;;  %v3265_v2 = vand.u32 4294901760, %v3264_v21 }
 0x2a8   :  { %2227 = vmatmul.f32.gmra.mxu0 %v7037_v31 }
 0x2a9   :  { %v1825_v62 = vadd.f32 %v1824_v58, %v1596_v11  ;;  %2416 = vmatmul.f32.vlgmr.msra.gmra.mxu1 %v7020_v63 }
 0x2aa   :  { %2836 = vmatmul.f32.gmra.mxu3 %v7022_v47  ;;  %3266 = vmatpush.msrb.mxu1 %v3265_v2 }
 0x2ab   :  { %v7664_v46 = vadd.f32 %v2109_v50, %v1825_v62  ;;  %2675 = vmatmul.f32.gmra.mxu2 %v7022_v47  ;;  %v317_v62 = vld [vmem:[#allocation12 + $0xc8] sm:$0xff]  ;;  %v9743_v47 = vld [vmem:[#allocation214_spill] sm:$0xff] }
 0x2ac   :  { %v7679_v35 = vand.u32 4294901760, %v317_v62 }
 0x2ad   :  { %v1442_v27 = vpop.f32.mrf.mxu0 }
 0x2ae   :  { %v1599_v11 = vpop.f32.mrf.mxu1  ;;  %v1832_v17 = vpop.f32.mrf.mxu2  ;;  %v1443_v25 = vadd.f32 %v1442_v27, %v7108_v12  ;;  %2967 = vmatpush.msrb.mxu0 %v7679_v35  ;;  %3690 = vmatpush.msrb.mxu3 %v7679_v35 }
 0x2af   :  { %v1600_v58 = vadd.f32 %v1599_v11, %v1439_v1  ;;  %v2113_v63 = vpop.f32.mrf.mxu3 }
 0x2b0   :  { %2232 = vmatmul.f32.gmra.mxu0 %v7061_v56 }
 0x2b1   :  { %v1833_v31 = vadd.f32 %v1832_v17, %v1600_v58  ;;  %2422 = vmatmul.f32.gmra.mxu1 %v7048_v36  ;;  %v7682_v58 = vsub.f32 %v317_v62, %v7679_v35 }
 0x2b2   :  { %2840 = vmatmul.f32.gmra.mxu3 %v7050_v60 }
 0x2b3   :  { %v7674_v50 = vadd.f32 %v2113_v63, %v1833_v31  ;;  %2679 = vmatmul.f32.gmra.mxu2 %v7050_v60  ;;  %v9282_v31 = vand.u32 4294901760, %v7682_v58 }
 0x2b4   :  { %3485 = vmatpush.msrb.mxu2 %v7682_v58 }
 0x2b5   :  { %v1446_v21 = vpop.f32.mrf.mxu0  ;;  %v3270_v27 = vsub.f32 %v7682_v58, %v9282_v31 }
 0x2b6   :  { %v1603_v1 = vpop.f32.mrf.mxu1  ;;  %v1840_v2 = vpop.f32.mrf.mxu2  ;;  %v1447_v62 = vadd.f32 %v1446_v21, %v7126_v13 }
 0x2b7   :  { %v1604_v11 = vadd.f32 %v1603_v1, %v1443_v25  ;;  %v2117_v17 = vpop.f32.mrf.mxu3  ;;  %v3271_v25 = vand.u32 4294901760, %v3270_v27 }
 0x2b8   :  { %2237 = vmatmul.f32.gmra.mxu0 %v7079_v0 }
 0x2b9   :  { %v1841_v63 = vadd.f32 %v1840_v2, %v1604_v11  ;;  %2428 = vmatmul.f32.gmra.mxu1 %v7066_v40 }
 0x2ba   :  { %2844 = vmatmul.f32.gmra.mxu3 %v7068_v61  ;;  %3272 = vmatpush.msrb.mxu1 %v3271_v25 }
 0x2bb   :  { %v7690_v12 = vadd.f32 %v2117_v17, %v1841_v63  ;;  %2683 = vmatmul.f32.gmra.mxu2 %v7068_v61  ;;  %v315_v63 = vld [vmem:[#allocation12 + $0xb8] sm:$0xff] }
 0x2bc   :  { %v7705_v21 = vand.u32 4294901760, %v315_v63 }
 0x2bd   :  { %v1450_v1 = vpop.f32.mrf.mxu0 }
 0x2be   :  { %v1607_v11 = vpop.f32.mrf.mxu1  ;;  %v1848_v16 = vpop.f32.mrf.mxu2  ;;  %v1451_v13 = vadd.f32 %v1450_v1, %v7144_v30  ;;  %2969 = vmatpush.msrb.mxu0 %v7705_v21  ;;  %3692 = vmatpush.msrb.mxu3 %v7705_v21 }
 0x2bf   :  { %v1608_v2 = vadd.f32 %v1607_v11, %v1447_v62  ;;  %v2121_v40 = vpop.f32.mrf.mxu3 }
 0x2c0   :  { %2242 = vmatmul.f32.gmra.mxu0 %v7097_v34 }
 0x2c1   :  { %v1849_v0 = vadd.f32 %v1848_v16, %v1608_v2  ;;  %2434 = vmatmul.f32.gmra.mxu1 %v7084_v48  ;;  %v7708_v2 = vsub.f32 %v315_v63, %v7705_v21  ;;  %v9714_v48 = vld [vmem:[#allocation188_spill] sm:$0xff] }
 0x2c2   :  { %2848 = vmatmul.f32.gmra.mxu3 %v7086_v9 }
 0x2c3   :  { %v7700_v17 = vadd.f32 %v2121_v40, %v1849_v0  ;;  %2687 = vmatmul.f32.gmra.mxu2 %v7086_v9  ;;  %v9285_v0 = vand.u32 4294901760, %v7708_v2 }
 0x2c4   :  { %3488 = vmatpush.msrb.mxu2 %v7708_v2 }
 0x2c5   :  { %v1454_v27 = vpop.f32.mrf.mxu0  ;;  %v3276_v1 = vsub.f32 %v7708_v2, %v9285_v0 }
 0x2c6   :  { %v1611_v62 = vpop.f32.mrf.mxu1  ;;  %v1856_v25 = vpop.f32.mrf.mxu2  ;;  %v1455_v63 = vadd.f32 %v1454_v27, %v7162_v59 }
 0x2c7   :  { %v1612_v11 = vadd.f32 %v1611_v62, %v1451_v13  ;;  %v2125_v16 = vpop.f32.mrf.mxu3  ;;  %v3277_v13 = vand.u32 4294901760, %v3276_v1 }
 0x2c8   :  { %2247 = vmatmul.f32.gmra.mxu0 %v7115_v24 }
 0x2c9   :  { %v1857_v40 = vadd.f32 %v1856_v25, %v1612_v11  ;;  %2440 = vmatmul.f32.gmra.mxu1 %v7102_v19 }
 0x2ca   :  { %2852 = vmatmul.f32.gmra.mxu3 %v7104_v49  ;;  %3278 = vmatpush.msrb.mxu1 %v3277_v13 }
 0x2cb   :  { %v7716_v30 = vadd.f32 %v2125_v16, %v1857_v40  ;;  %2691 = vmatmul.f32.gmra.mxu2 %v7104_v49  ;;  %v313_v40 = vld [vmem:[#allocation12 + $0xa8] sm:$0xff]  ;;  %v9733_v49 = vld [vmem:[#allocation204_spill] sm:$0xff] }
 0x2cc   :  { %v7731_v27 = vand.u32 4294901760, %v313_v40 }
 0x2cd   :  { %9707 = vst [vmem:[#allocation290_spill] sm:$0xff] %v7716_v30  ;;  %v1458_v62 = vpop.f32.mrf.mxu0  ;;  %v9786_v30 = vld [vmem:[#allocation264_spill] sm:$0xff] }
 0x2ce   :  { %v1615_v11 = vpop.f32.mrf.mxu1  ;;  %v1864_v31 = vpop.f32.mrf.mxu2  ;;  %v1459_v59 = vadd.f32 %v1458_v62, %v7180_v18  ;;  %2971 = vmatpush.msrb.mxu0 %v7731_v27  ;;  %3694 = vmatpush.msrb.mxu3 %v7731_v27  ;;  %v9710_v62 = vld [vmem:[#allocation184_spill] sm:$0xff] }
 0x2cf   :  { %v1616_v25 = vadd.f32 %v1615_v11, %v1455_v63  ;;  %v2129_v19 = vpop.f32.mrf.mxu3 }
 0x2d0   :  { %2252 = vmatmul.f32.gmra.mxu0 %v7133_v10 }
 0x2d1   :  { %v1865_v24 = vadd.f32 %v1864_v31, %v1616_v25  ;;  %2446 = vmatmul.f32.gmra.mxu1 %v7120_v55  ;;  %v7734_v25 = vsub.f32 %v313_v40, %v7731_v27 }
 0x2d2   :  { %2856 = vmatmul.f32.gmra.mxu3 %v7122_v37 }
 0x2d3   :  { %v7726_v16 = vadd.f32 %v2129_v19, %v1865_v24  ;;  %2695 = vmatmul.f32.gmra.mxu2 %v7122_v37  ;;  %v9291_v24 = vand.u32 4294901760, %v7734_v25 }
 0x2d4   :  { %3491 = vmatpush.msrb.mxu2 %v7734_v25 }
 0x2d5   :  { %9708 = vst [vmem:[#allocation291_spill] sm:$0xff] %v7726_v16  ;;  %v1462_v1 = vpop.f32.mrf.mxu0  ;;  %v3282_v40 = vsub.f32 %v7734_v25, %v9291_v24  ;;  %v311_v24 = vld [vmem:[#allocation12 + $0x98] sm:$0xff]  ;;  %v9779_v16 = vld [vmem:[#allocation256_spill] sm:$0xff] }
 0x2d6   :  { %v1619_v63 = vpop.f32.mrf.mxu1  ;;  %v1872_v13 = vpop.f32.mrf.mxu2 }
 0x2d7   :  { %v1620_v11 = vadd.f32 %v1619_v63, %v1459_v59  ;;  %v2133_v31 = vpop.f32.mrf.mxu3  ;;  %v1463_v59 = vadd.f32 %v1462_v1, %v7198_v26  ;;  %v3283_v63 = vand.u32 4294901760, %v3282_v40  ;;  %v7757_v1 = vand.u32 4294901760, %v311_v24 }
 0x2d8   :  { %2257 = vmatmul.f32.gmra.mxu0 %v7151_v20 }
 0x2d9   :  { %v1873_v19 = vadd.f32 %v1872_v13, %v1620_v11  ;;  %2452 = vmatmul.f32.gmra.mxu1 %v7138_v54  ;;  %2973 = vmatpush.msrb.mxu0 %v7757_v1 }
 0x2da   :  { %2860 = vmatmul.f32.gmra.mxu3 %v9710_v62  ;;  %3284 = vmatpush.msrb.mxu1 %v3283_v63 }
 0x2db   :  { %v7742_v18 = vadd.f32 %v2133_v31, %v1873_v19  ;;  %2699 = vmatmul.f32.gmra.mxu2 %v9710_v62  ;;  %v9711_v31 = vld [vmem:[#allocation189_spill] sm:$0xff]  ;;  %v9712_v19 = vld [vmem:[#allocation187_spill] sm:$0xff]  ;;  %3696 = vmatpush.msrb.mxu3 %v7757_v1 }
 0x2dd   :  { %9709 = vst [vmem:[#allocation292_spill] sm:$0xff] %v7742_v18  ;;  %v1466_v11 = vpop.f32.mrf.mxu0 }
 0x2de   :  { %v1623_v13 = vpop.f32.mrf.mxu1  ;;  %v1880_v54 = vpop.f32.mrf.mxu2  ;;  %v1467_v26 = vadd.f32 %v1466_v11, %v7216_v39 }
 0x2df   :  { %v1624_v0 = vadd.f32 %v1623_v13, %v1463_v59  ;;  %v2137_v20 = vpop.f32.mrf.mxu3 }
 0x2e0   :  { %2262 = vmatmul.f32.gmra.mxu0 %v9711_v31 }
 0x2e1   :  { %v1881_v55 = vadd.f32 %v1880_v54, %v1624_v0  ;;  %2458 = vmatmul.f32.gmra.mxu1 %v9712_v19  ;;  %v7760_v0 = vsub.f32 %v311_v24, %v7757_v1  ;;  %v9716_v19 = vld [vmem:[#allocation191_spill] sm:$0xff] }
 0x2e2   :  { %2864 = vmatmul.f32.gmra.mxu3 %v9714_v48 }
 0x2e3   :  { %v7752_v10 = vadd.f32 %v2137_v20, %v1881_v55  ;;  %2703 = vmatmul.f32.gmra.mxu2 %v9714_v48  ;;  %v9715_v20 = vld [vmem:[#allocation193_spill] sm:$0xff]  ;;  %v9297_v39 = vand.u32 4294901760, %v7760_v0 }
 0x2e4   :  { %3494 = vmatpush.msrb.mxu2 %v7760_v0 }
 0x2e5   :  { %9713 = vst [vmem:[#allocation293_spill] sm:$0xff] %v7752_v10  ;;  %v1470_v40 = vpop.f32.mrf.mxu0  ;;  %v3288_v24 = vsub.f32 %v7760_v0, %v9297_v39  ;;  %v309_v39 = vld [vmem:[#allocation12 + $0x88] sm:$0xff]  ;;  %v9771_v10 = vld [vmem:[#allocation248_spill] sm:$0xff] }
 0x2e6   :  { %v1627_v59 = vpop.f32.mrf.mxu1  ;;  %v1888_v63 = vpop.f32.mrf.mxu2 }
 0x2e7   :  { %v1628_v13 = vadd.f32 %v1627_v59, %v1467_v26  ;;  %v2141_v54 = vpop.f32.mrf.mxu3  ;;  %v9718_v26 = vld [vmem:[#allocation192_spill] sm:$0xff]  ;;  %v9719_v59 = vld [vmem:[#allocation205_spill] sm:$0xff] }
 0x2e8   :  { %2267 = vmatmul.f32.gmra.mxu0 %v9715_v20 }
 0x2e9   :  { %v1889_v55 = vadd.f32 %v1888_v63, %v1628_v13  ;;  %2464 = vmatmul.f32.gmra.mxu1 %v9716_v19  ;;  %v1471_v13 = vadd.f32 %v1470_v40, %v9719_v59  ;;  %v3289_v63 = vand.u32 4294901760, %v3288_v24  ;;  %v9724_v40 = vld [vmem:[#allocation210_spill] sm:$0xff]  ;;  %v7783_v59 = vand.u32 4294901760, %v309_v39 }
 0x2ea   :  { %2868 = vmatmul.f32.gmra.mxu3 %v9718_v26 }
 0x2eb   :  { %v7768_v11 = vadd.f32 %v2141_v54, %v1889_v55  ;;  %2707 = vmatmul.f32.gmra.mxu2 %v9718_v26  ;;  %3290 = vmatpush.msrb.mxu1 %v3289_v63  ;;  %v9720_v54 = vld [vmem:[#allocation197_spill] sm:$0xff]  ;;  %v9721_v55 = vld [vmem:[#allocation195_spill] sm:$0xff] }
 0x2ec   :  { %2975 = vmatpush.msrb.mxu0 %v7783_v59  ;;  %3698 = vmatpush.msrb.mxu3 %v7783_v59 }
 0x2ed   :  { %9717 = vst [vmem:[#allocation294_spill] sm:$0xff] %v7768_v11  ;;  %v1474_v20 = vpop.f32.mrf.mxu0 }
 0x2ee   :  { %v1631_v31 = vpop.f32.mrf.mxu1  ;;  %v1896_v34 = vpop.f32.mrf.mxu2  ;;  %v1475_v24 = vadd.f32 %v1474_v20, %v9724_v40 }
 0x2ef   :  { %v1632_v19 = vadd.f32 %v1631_v31, %v1471_v13  ;;  %v2145_v36 = vpop.f32.mrf.mxu3 }
 0x2f0   :  { %2272 = vmatmul.f32.gmra.mxu0 %v9720_v54 }
 0x2f1   :  { %v1897_v56 = vadd.f32 %v1896_v34, %v1632_v19  ;;  %2470 = vmatmul.f32.gmra.mxu1 %v9721_v55  ;;  %v7786_v19 = vsub.f32 %v309_v39, %v7783_v59  ;;  %v9726_v55 = vld [vmem:[#allocation199_spill] sm:$0xff] }
 0x2f2   :  { %2872 = vmatmul.f32.gmra.mxu3 %v9723_v38 }
 0x2f3   :  { %v7778_v45 = vadd.f32 %v2145_v36, %v1897_v56  ;;  %2711 = vmatmul.f32.gmra.mxu2 %v9723_v38  ;;  %v9725_v56 = vld [vmem:[#allocation201_spill] sm:$0xff]  ;;  %v9306_v20 = vand.u32 4294901760, %v7786_v19 }
 0x2f4   :  { %3497 = vmatpush.msrb.mxu2 %v7786_v19 }
 0x2f5   :  { %9722 = vst [vmem:[#allocation205_spill] sm:$0xff] %v7778_v45  ;;  %v1478_v31 = vpop.f32.mrf.mxu0  ;;  %v3294_v39 = vsub.f32 %v7786_v19, %v9306_v20  ;;  %v307_v20 = vld [vmem:[#allocation12 + $0x78] sm:$0xff]  ;;  %v9763_v45 = vld [vmem:[#allocation240_spill] sm:$0xff] }
 0x2f6   :  { %v1635_v13 = vpop.f32.mrf.mxu1  ;;  %v1904_v63 = vpop.f32.mrf.mxu2 }
 0x2f7   :  { %v1636_v26 = vadd.f32 %v1635_v13, %v1475_v24  ;;  %v2149_v34 = vpop.f32.mrf.mxu3  ;;  %v9728_v24 = vld [vmem:[#allocation200_spill] sm:$0xff]  ;;  %v9729_v13 = vld [vmem:[#allocation215_spill] sm:$0xff] }
 0x2f8   :  { %2277 = vmatmul.f32.gmra.mxu0 %v9725_v56 }
 0x2f9   :  { %v1905_v36 = vadd.f32 %v1904_v63, %v1636_v26  ;;  %2476 = vmatmul.f32.gmra.mxu1 %v9726_v55  ;;  %v1479_v26 = vadd.f32 %v1478_v31, %v9729_v13  ;;  %v3295_v63 = vand.u32 4294901760, %v3294_v39  ;;  %v9734_v31 = vld [vmem:[#allocation220_spill] sm:$0xff]  ;;  %v7809_v13 = vand.u32 4294901760, %v307_v20 }
 0x2fa   :  { %2876 = vmatmul.f32.gmra.mxu3 %v9728_v24 }
 0x2fb   :  { %v7794_v40 = vadd.f32 %v2149_v34, %v1905_v36  ;;  %2715 = vmatmul.f32.gmra.mxu2 %v9728_v24  ;;  %3296 = vmatpush.msrb.mxu1 %v3295_v63  ;;  %v9730_v34 = vld [vmem:[#allocation206_spill] sm:$0xff]  ;;  %v9731_v36 = vld [vmem:[#allocation203_spill] sm:$0xff] }
 0x2fc   :  { %2977 = vmatpush.msrb.mxu0 %v7809_v13  ;;  %3700 = vmatpush.msrb.mxu3 %v7809_v13 }
 0x2fd   :  { %9727 = vst [vmem:[#allocation210_spill] sm:$0xff] %v7794_v40  ;;  %v1482_v56 = vpop.f32.mrf.mxu0 }
 0x2fe   :  { %v1639_v54 = vpop.f32.mrf.mxu1  ;;  %v1912_v38 = vpop.f32.mrf.mxu2  ;;  %v1483_v39 = vadd.f32 %v1482_v56, %v9734_v31 }
 0x2ff   :  { %v1640_v55 = vadd.f32 %v1639_v54, %v1479_v26  ;;  %v2153_v48 = vpop.f32.mrf.mxu3 }
 0x300   :  { %2282 = vmatmul.f32.gmra.mxu0 %v9730_v34 }
 0x301   :  { %v1913_v62 = vadd.f32 %v1912_v38, %v1640_v55  ;;  %2482 = vmatmul.f32.gmra.mxu1 %v9731_v36  ;;  %v7812_v55 = vsub.f32 %v307_v20, %v7809_v13  ;;  %v9736_v36 = vld [vmem:[#allocation208_spill] sm:$0xff] }
 0x302   :  { %2880 = vmatmul.f32.gmra.mxu3 %v9733_v49 }
 0x303   :  { %v7804_v37 = vadd.f32 %v2153_v48, %v1913_v62  ;;  %2719 = vmatmul.f32.gmra.mxu2 %v9733_v49  ;;  %v9735_v62 = vld [vmem:[#allocation211_spill] sm:$0xff]  ;;  %v9317_v56 = vand.u32 4294901760, %v7812_v55 }
 0x304   :  { %3500 = vmatpush.msrb.mxu2 %v7812_v55 }
 0x305   :  { %9732 = vst [vmem:[#allocation215_spill] sm:$0xff] %v7804_v37  ;;  %v1486_v54 = vpop.f32.mrf.mxu0  ;;  %v3300_v20 = vsub.f32 %v7812_v55, %v9317_v56  ;;  %v9744_v56 = vld [vmem:[#allocation230_spill] sm:$0xff]  ;;  %v9760_v37 = vld [vmem:[#allocation233_spill] sm:$0xff] }
 0x306   :  { %v1643_v26 = vpop.f32.mrf.mxu1  ;;  %v1920_v63 = vpop.f32.mrf.mxu2 }
 0x307   :  { %v1644_v24 = vadd.f32 %v1643_v26, %v1483_v39  ;;  %v2157_v38 = vpop.f32.mrf.mxu3  ;;  %v9738_v39 = vld [vmem:[#allocation209_spill] sm:$0xff] }
 0x308   :  { %2287 = vmatmul.f32.gmra.mxu0 %v9735_v62  ;;  %v9739_v26 = vld [vmem:[#allocation225_spill] sm:$0xff] }
 0x309   :  { %v1921_v48 = vadd.f32 %v1920_v63, %v1644_v24  ;;  %2488 = vmatmul.f32.gmra.mxu1 %v9736_v36  ;;  %v1487_v24 = vadd.f32 %v1486_v54, %v9739_v26  ;;  %v3301_v63 = vand.u32 4294901760, %v3300_v20 }
 0x30a   :  { %2884 = vmatmul.f32.gmra.mxu3 %v9738_v39 }
 0x30b   :  { %v7820_v31 = vadd.f32 %v2157_v38, %v1921_v48  ;;  %2723 = vmatmul.f32.gmra.mxu2 %v9738_v39  ;;  %3302 = vmatpush.msrb.mxu1 %v3301_v63  ;;  %v9740_v38 = vld [vmem:[#allocation216_spill] sm:$0xff]  ;;  %v9741_v48 = vld [vmem:[#allocation213_spill] sm:$0xff]  ;;  %v7835_v63 = vand.u32 4294901760, %v305_v42 }
 0x30d   :  { %9737 = vst [vmem:[#allocation220_spill] sm:$0xff] %v7820_v31  ;;  %v1490_v62 = vpop.f32.mrf.mxu0  ;;  %2979 = vmatpush.msrb.mxu0 %v7835_v63  ;;  %3702 = vmatpush.msrb.mxu3 %v7835_v63 }
 0x30e   :  { %v1647_v34 = vpop.f32.mrf.mxu1  ;;  %v1928_v49 = vpop.f32.mrf.mxu2  ;;  %v1491_v54 = vadd.f32 %v1490_v62, %v9744_v56  ;;  %v9748_v62 = vld [vmem:[#allocation219_spill] sm:$0xff] }
 0x30f   :  { %v1648_v36 = vadd.f32 %v1647_v34, %v1487_v24  ;;  %v2161_v9 = vpop.f32.mrf.mxu3 }
 0x310   :  { %2292 = vmatmul.f32.gmra.mxu0 %v9740_v38 }
 0x311   :  { %v1929_v61 = vadd.f32 %v1928_v49, %v1648_v36  ;;  %2494 = vmatmul.f32.gmra.mxu1 %v9741_v48  ;;  %v9745_v36 = vld [vmem:[#allocation221_spill] sm:$0xff]  ;;  %v9746_v48 = vld [vmem:[#allocation218_spill] sm:$0xff] }
 0x312   :  { %2888 = vmatmul.f32.gmra.mxu3 %v9743_v47 }
 0x313   :  { %v7830_v60 = vadd.f32 %v2161_v9, %v1929_v61  ;;  %2727 = vmatmul.f32.gmra.mxu2 %v9743_v47  ;;  %v7840_v61 = vsub.f32 %v305_v42, %v7835_v63  ;;  %v9750_v47 = vld [vmem:[#allocation226_spill] sm:$0xff] }
 0x315   :  { %9742 = vst [vmem:[#allocation225_spill] sm:$0xff] %v7830_v60  ;;  %v1494_v20 = vpop.f32.mrf.mxu0  ;;  %v9325_v56 = vand.u32 4294901760, %v7840_v61  ;;  %3503 = vmatpush.msrb.mxu2 %v7840_v61 }
 0x316   :  { %v1651_v26 = vpop.f32.mrf.mxu1  ;;  %v1936_v34 = vpop.f32.mrf.mxu2 }
 0x317   :  { %v1652_v39 = vadd.f32 %v1651_v26, %v1491_v54  ;;  %v2165_v24 = vpop.f32.mrf.mxu3  ;;  %v3306_v42 = vsub.f32 %v7840_v61, %v9325_v56 }
 0x318   :  { %2297 = vmatmul.f32.gmra.mxu0 %v9745_v36 }
 0x319   :  { %v1937_v49 = vadd.f32 %v1936_v34, %v1652_v39  ;;  %2500 = vmatmul.f32.gmra.mxu1 %v9746_v48  ;;  %v9749_v39 = vld [vmem:[#allocation235_spill] sm:$0xff] }
 0x31a   :  { %2892 = vmatmul.f32.gmra.mxu3 %v9748_v62  ;;  %v1495_v54 = vadd.f32 %v1494_v20, %v9749_v39  ;;  %v9753_v20 = vld [vmem:[#allocation224_spill] sm:$0xff]  ;;  %v9754_v39 = vld [vmem:[#allocation239_spill] sm:$0xff] }
 0x31b   :  { %v7844_v9 = vadd.f32 %v2165_v24, %v1937_v49  ;;  %2731 = vmatmul.f32.gmra.mxu2 %v9748_v62  ;;  %v3307_v49 = vand.u32 4294901760, %v3306_v42  ;;  %v9751_v62 = vld [vmem:[#allocation223_spill] sm:$0xff]  ;;  %v303_v42 = vld [vmem:[#allocation12 + $0x58] sm:$0xff] }
 0x31d   :  { %9747 = vst [vmem:[#allocation230_spill] sm:$0xff] %v7844_v9  ;;  %v2223_v34 = vpop.f32.mrf.mxu0  ;;  %3308 = vmatpush.msrb.mxu1 %v3307_v49  ;;  %v9756_v49 = vld [vmem:[#allocation228_spill] sm:$0xff] }
 0x31e   :  { %v1655_v26 = vpop.f32.mrf.mxu1  ;;  %v1944_v36 = vpop.f32.mrf.mxu2  ;;  %v2224_v9 = vadd.f32 %v2223_v34, %v9754_v39  ;;  %v9758_v39 = vld [vmem:[#allocation243_spill] sm:$0xff] }
 0x31f   :  { %v1656_v48 = vadd.f32 %v1655_v26, %v1495_v54  ;;  %v2169_v24 = vpop.f32.mrf.mxu3 }
 0x320   :  { %2302 = vmatmul.f32.gmra.mxu0 %v9750_v47  ;;  %v9755_v47 = vld [vmem:[#allocation231_spill] sm:$0xff] }
 0x321   :  { %v1945_v38 = vadd.f32 %v1944_v36, %v1656_v48  ;;  %2506 = vmatmul.f32.gmra.mxu1 %v9751_v62  ;;  %v7861_v48 = vand.u32 4294901760, %v303_v42 }
 0x322   :  { %2896 = vmatmul.f32.gmra.mxu3 %v9753_v20 }
 0x323   :  { %v7856_v4 = vadd.f32 %v2169_v24, %v1945_v38  ;;  %2735 = vmatmul.f32.gmra.mxu2 %v9753_v20  ;;  %v164_v38 = vld [vmem:[#allocation14] sm:$0xff]  ;;  %v7866_v24 = vsub.f32 %v303_v42, %v7861_v48  ;;  %2981 = vmatpush.msrb.mxu0 %v7861_v48 }
 0x324   :  { %3704 = vmatpush.msrb.mxu3 %v7861_v48 }
 0x325   :  { %9752 = vst [vmem:[#allocation235_spill] sm:$0xff] %v7856_v4  ;;  %v2228_v60 = vpop.f32.mrf.mxu0  ;;  %3506 = vmatpush.msrb.mxu2 %v7866_v24 }
 0x326   :  { %v2417_v56 = vpop.f32.mrf.mxu1  ;;  %v2672_v26 = vpop.f32.mrf.mxu2 }
 0x327   :  { %v2418_v54 = vadd.f32 %v2417_v56, %v2224_v9  ;;  %v2833_v31 = vpop.f32.mrf.mxu3  ;;  %v9757_v9 = vld [vmem:[#allocation229_spill] sm:$0xff]  ;;  %v9328_v56 = vand.u32 4294901760, %v7866_v24 }
 0x328   :  { %2307 = vmatmul.f32.gmra.mxu0 %v9755_v47 }
 0x329   :  { %v2673_v36 = vadd.f32 %v2672_v26, %v2418_v54  ;;  %2512 = vmatmul.f32.gmra.mxu1 %v9756_v49  ;;  %v2229_v54 = vadd.f32 %v2228_v60, %v9758_v39  ;;  %v3312_v42 = vsub.f32 %v7866_v24, %v9328_v56  ;;  %v166_v60 = vld [vmem:[#allocation14 + $0x10] sm:$0xff]  ;;  %v9762_v39 = vld [vmem:[#allocation247_spill] sm:$0xff] }
 0x32a   :  { %2900 = vmatmul.f32.gmra.mxu3 %v9757_v9 }
 0x32b   :  { %v2834_v34 = vadd.f32 %v2833_v31, %v2673_v36  ;;  %2739 = vmatmul.f32.gmra.mxu2 %v9757_v9  ;;  %v3313_v20 = vand.u32 4294901760, %v3312_v42  ;;  %v9759_v9 = vld [vmem:[#allocation236_spill] sm:$0xff] }
 0x32d   :  { %v5564_v26 = vadd.f32 %v2834_v34, %v164_v38  ;;  %v2233_v49 = vpop.f32.mrf.mxu0  ;;  %3314 = vmatpush.msrb.mxu1 %v3313_v20  ;;  %v9761_v34 = vld [vmem:[#allocation234_spill] sm:$0xff] }
 0x32e   :  { %v2423_v47 = vpop.f32.mrf.mxu1  ;;  %v2676_v31 = vpop.f32.mrf.mxu2  ;;  %v2234_v40 = vadd.f32 %v2233_v49, %v9762_v39  ;;  %v168_v20 = vld [vmem:[#allocation14 + $0x20] sm:$0xff] }
 0x32f   :  { %5628 = vst [vmem:[#allocation14] sm:$0xff] %v5564_v26  ;;  %v2424_v62 = vadd.f32 %v2423_v47, %v2229_v54  ;;  %v2837_v36 = vpop.f32.mrf.mxu3 }
 0x330   :  { %2312 = vmatmul.f32.gmra.mxu0 %v9759_v9 }
 0x331   :  { %v2677_v4 = vadd.f32 %v2676_v31, %v2424_v62  ;;  %2518 = vmatmul.f32.gmra.mxu1 %v9760_v37  ;;  %v301_v31 = vld [vmem:[#allocation12 + $0x48] sm:$0xff] }
 0x332   :  { %2904 = vmatmul.f32.gmra.mxu3 %v9761_v34  ;;  %v7883_v9 = vand.u32 4294901760, %v301_v31 }
 0x333   :  { %v2838_v38 = vadd.f32 %v2837_v36, %v2677_v4  ;;  %2743 = vmatmul.f32.gmra.mxu2 %v9761_v34  ;;  %v9764_v4 = vld [vmem:[#allocation237_spill] sm:$0xff] }
 0x334   :  { %v7888_v36 = vsub.f32 %v301_v31, %v7883_v9  ;;  %2983 = vmatpush.msrb.mxu0 %v7883_v9  ;;  %3706 = vmatpush.msrb.mxu3 %v7883_v9  ;;  %v9768_v34 = vld [vmem:[#allocation241_spill] sm:$0xff] }
 0x335   :  { %v5566_v56 = vadd.f32 %v2838_v38, %v166_v60  ;;  %v2238_v26 = vpop.f32.mrf.mxu0  ;;  %v9766_v60 = vld [vmem:[#allocation251_spill] sm:$0xff] }
 0x336   :  { %v2429_v47 = vpop.f32.mrf.mxu1  ;;  %v2680_v42 = vpop.f32.mrf.mxu2  ;;  %v2239_v38 = vadd.f32 %v2238_v26, %v9766_v60  ;;  %3509 = vmatpush.msrb.mxu2 %v7888_v36  ;;  %v170_v26 = vld [vmem:[#allocation14 + $0x30] sm:$0xff]  ;;  %v9770_v60 = vld [vmem:[#allocation255_spill] sm:$0xff] }
 0x337   :  { %5630 = vst [vmem:[#allocation14 + $0x10] sm:$0xff] %v5566_v56  ;;  %v2430_v54 = vadd.f32 %v2429_v47, %v2234_v40  ;;  %v2841_v62 = vpop.f32.mrf.mxu3  ;;  %v9765_v40 = vld [vmem:[#allocation238_spill] sm:$0xff]  ;;  %v9331_v56 = vand.u32 4294901760, %v7888_v36 }
 0x338   :  { %2317 = vmatmul.f32.gmra.mxu0 %v9763_v45 }
 0x339   :  { %v2681_v37 = vadd.f32 %v2680_v42, %v2430_v54  ;;  %2524 = vmatmul.f32.gmra.mxu1 %v9764_v4  ;;  %v3318_v42 = vsub.f32 %v7888_v36, %v9331_v56 }
 0x33a   :  { %2908 = vmatmul.f32.gmra.mxu3 %v9765_v40 }
 0x33b   :  { %v2842_v49 = vadd.f32 %v2841_v62, %v2681_v37  ;;  %2747 = vmatmul.f32.gmra.mxu2 %v9765_v40  ;;  %v3319_v4 = vand.u32 4294901760, %v3318_v42  ;;  %v9767_v40 = vld [vmem:[#allocation244_spill] sm:$0xff] }
 0x33d   :  { %v5568_v39 = vadd.f32 %v2842_v49, %v168_v20  ;;  %v2243_v47 = vpop.f32.mrf.mxu0  ;;  %3320 = vmatpush.msrb.mxu1 %v3319_v4  ;;  %v9769_v49 = vld [vmem:[#allocation242_spill] sm:$0xff] }
 0x33e   :  { %v2435_v54 = vpop.f32.mrf.mxu1  ;;  %v2684_v37 = vpop.f32.mrf.mxu2  ;;  %v2244_v11 = vadd.f32 %v2243_v47, %v9770_v60  ;;  %v172_v4 = vld [vmem:[#allocation14 + $0x40] sm:$0xff] }
 0x33f   :  { %5632 = vst [vmem:[#allocation14 + $0x20] sm:$0xff] %v5568_v39  ;;  %v2436_v31 = vadd.f32 %v2435_v54, %v2239_v38  ;;  %v2845_v62 = vpop.f32.mrf.mxu3 }
 0x340   :  { %2322 = vmatmul.f32.gmra.mxu0 %v9767_v40 }
 0x341   :  { %v2685_v45 = vadd.f32 %v2684_v37, %v2436_v31  ;;  %2530 = vmatmul.f32.gmra.mxu1 %v9768_v34  ;;  %v299_v37 = vld [vmem:[#allocation12 + $0x38] sm:$0xff] }
 0x342   :  { %2912 = vmatmul.f32.gmra.mxu3 %v9769_v49  ;;  %v7905_v40 = vand.u32 4294901760, %v299_v37 }
 0x343   :  { %v2846_v20 = vadd.f32 %v2845_v62, %v2685_v45  ;;  %2751 = vmatmul.f32.gmra.mxu2 %v9769_v49  ;;  %v9772_v45 = vld [vmem:[#allocation245_spill] sm:$0xff] }
 0x344   :  { %v7910_v62 = vsub.f32 %v299_v37, %v7905_v40  ;;  %2985 = vmatpush.msrb.mxu0 %v7905_v40  ;;  %3708 = vmatpush.msrb.mxu3 %v7905_v40  ;;  %v9776_v49 = vld [vmem:[#allocation249_spill] sm:$0xff] }
 0x345   :  { %v5570_v56 = vadd.f32 %v2846_v20, %v170_v26  ;;  %v2248_v39 = vpop.f32.mrf.mxu0  ;;  %v9774_v26 = vld [vmem:[#allocation259_spill] sm:$0xff] }
 0x346   :  { %v2441_v38 = vpop.f32.mrf.mxu1  ;;  %v2688_v42 = vpop.f32.mrf.mxu2  ;;  %v9334_v47 = vand.u32 4294901760, %v7910_v62  ;;  %v2249_v20 = vadd.f32 %v2248_v39, %v9774_v26  ;;  %3512 = vmatpush.msrb.mxu2 %v7910_v62  ;;  %v174_v39 = vld [vmem:[#allocation14 + $0x50] sm:$0xff]  ;;  %v9778_v26 = vld [vmem:[#allocation263_spill] sm:$0xff] }
 0x347   :  { %5634 = vst [vmem:[#allocation14 + $0x30] sm:$0xff] %v5570_v56  ;;  %v2442_v54 = vadd.f32 %v2441_v38, %v2244_v11  ;;  %v2849_v31 = vpop.f32.mrf.mxu3  ;;  %v9773_v11 = vld [vmem:[#allocation246_spill] sm:$0xff] }
 0x348   :  { %2327 = vmatmul.f32.gmra.mxu0 %v9771_v10 }
 0x349   :  { %v2689_v34 = vadd.f32 %v2688_v42, %v2442_v54  ;;  %2536 = vmatmul.f32.gmra.mxu1 %v9772_v45  ;;  %v3324_v42 = vsub.f32 %v7910_v62, %v9334_v47 }
 0x34a   :  { %2916 = vmatmul.f32.gmra.mxu3 %v9773_v11 }
 0x34b   :  { %v2850_v56 = vadd.f32 %v2849_v31, %v2689_v34  ;;  %2755 = vmatmul.f32.gmra.mxu2 %v9773_v11  ;;  %v3325_v45 = vand.u32 4294901760, %v3324_v42  ;;  %v9775_v11 = vld [vmem:[#allocation252_spill] sm:$0xff] }
 0x34d   :  { %v5572_v60 = vadd.f32 %v2850_v56, %v172_v4  ;;  %v2253_v38 = vpop.f32.mrf.mxu0  ;;  %3326 = vmatpush.msrb.mxu1 %v3325_v45  ;;  %v9777_v56 = vld [vmem:[#allocation250_spill] sm:$0xff] }
 0x34e   :  { %v2447_v54 = vpop.f32.mrf.mxu1  ;;  %v2692_v34 = vpop.f32.mrf.mxu2  ;;  %v2254_v18 = vadd.f32 %v2253_v38, %v9778_v26  ;;  %v176_v45 = vld [vmem:[#allocation14 + $0x60] sm:$0xff] }
 0x34f   :  { %5636 = vst [vmem:[#allocation14 + $0x40] sm:$0xff] %v5572_v60  ;;  %v2448_v37 = vadd.f32 %v2447_v54, %v2249_v20  ;;  %v2853_v31 = vpop.f32.mrf.mxu3 }
 0x350   :  { %2332 = vmatmul.f32.gmra.mxu0 %v9775_v11 }
 0x351   :  { %v2693_v10 = vadd.f32 %v2692_v34, %v2448_v37  ;;  %2542 = vmatmul.f32.gmra.mxu1 %v9776_v49  ;;  %v297_v34 = vld [vmem:[#allocation12 + $0x28] sm:$0xff] }
 0x352   :  { %2920 = vmatmul.f32.gmra.mxu3 %v9777_v56  ;;  %v7927_v11 = vand.u32 4294901760, %v297_v34 }
 0x353   :  { %v2854_v4 = vadd.f32 %v2853_v31, %v2693_v10  ;;  %2759 = vmatmul.f32.gmra.mxu2 %v9777_v56  ;;  %v9780_v10 = vld [vmem:[#allocation253_spill] sm:$0xff] }
 0x354   :  { %v7932_v31 = vsub.f32 %v297_v34, %v7927_v11  ;;  %2987 = vmatpush.msrb.mxu0 %v7927_v11  ;;  %3710 = vmatpush.msrb.mxu3 %v7927_v11  ;;  %v9784_v56 = vld [vmem:[#allocation257_spill] sm:$0xff] }
 0x355   :  { %v5574_v47 = vadd.f32 %v2854_v4, %v174_v39  ;;  %v2258_v60 = vpop.f32.mrf.mxu0  ;;  %v9782_v39 = vld [vmem:[#allocation267_spill] sm:$0xff] }
 0x356   :  { %v2453_v20 = vpop.f32.mrf.mxu1  ;;  %v2696_v42 = vpop.f32.mrf.mxu2  ;;  %v9337_v38 = vand.u32 4294901760, %v7932_v31  ;;  %v2259_v4 = vadd.f32 %v2258_v60, %v9782_v39  ;;  %3515 = vmatpush.msrb.mxu2 %v7932_v31  ;;  %v178_v60 = vld [vmem:[#allocation14 + $0x70] sm:$0xff] }
 0x357   :  { %5638 = vst [vmem:[#allocation14 + $0x50] sm:$0xff] %v5574_v47  ;;  %v2454_v54 = vadd.f32 %v2453_v20, %v2254_v18  ;;  %v2857_v37 = vpop.f32.mrf.mxu3  ;;  %v9781_v18 = vld [vmem:[#allocation254_spill] sm:$0xff] }
 0x358   :  { %2337 = vmatmul.f32.gmra.mxu0 %v9779_v16 }
 0x359   :  { %v2697_v49 = vadd.f32 %v2696_v42, %v2454_v54  ;;  %2548 = vmatmul.f32.gmra.mxu1 %v9780_v10  ;;  %v3330_v42 = vsub.f32 %v7932_v31, %v9337_v38 }
 0x35a   :  { %2924 = vmatmul.f32.gmra.mxu3 %v9781_v18 }
 0x35b   :  { %v2858_v47 = vadd.f32 %v2857_v37, %v2697_v49  ;;  %2763 = vmatmul.f32.gmra.mxu2 %v9781_v18  ;;  %v3331_v10 = vand.u32 4294901760, %v3330_v42  ;;  %v9783_v18 = vld [vmem:[#allocation260_spill] sm:$0xff] }
 0x35d   :  { %v5576_v26 = vadd.f32 %v2858_v47, %v176_v45  ;;  %v2263_v20 = vpop.f32.mrf.mxu0  ;;  %3332 = vmatpush.msrb.mxu1 %v3331_v10  ;;  %v9785_v47 = vld [vmem:[#allocation258_spill] sm:$0xff] }
 0x35e   :  { %v2459_v54 = vpop.f32.mrf.mxu1  ;;  %v2700_v49 = vpop.f32.mrf.mxu2  ;;  %v2264_v39 = vadd.f32 %v2263_v20, %v7513_v8  ;;  %v180_v10 = vld [vmem:[#allocation14 + $0x80] sm:$0xff] }
 0x35f   :  { %5640 = vst [vmem:[#allocation14 + $0x60] sm:$0xff] %v5576_v26  ;;  %v2460_v34 = vadd.f32 %v2459_v54, %v2259_v4  ;;  %v2861_v37 = vpop.f32.mrf.mxu3 }
 0x360   :  { %2342 = vmatmul.f32.gmra.mxu0 %v9783_v18 }
 0x361   :  { %v2701_v16 = vadd.f32 %v2700_v49, %v2460_v34  ;;  %2554 = vmatmul.f32.gmra.mxu1 %v9784_v56  ;;  %v295_v49 = vld [vmem:[#allocation12 + $0x18] sm:$0xff] }
 0x362   :  { %2928 = vmatmul.f32.gmra.mxu3 %v9785_v47  ;;  %v7949_v18 = vand.u32 4294901760, %v295_v49 }
 0x363   :  { %v2862_v45 = vadd.f32 %v2861_v37, %v2701_v16  ;;  %2767 = vmatmul.f32.gmra.mxu2 %v9785_v47  ;;  %v9787_v16 = vld [vmem:[#allocation261_spill] sm:$0xff] }
 0x364   :  { %v7954_v37 = vsub.f32 %v295_v49, %v7949_v18  ;;  %2989 = vmatpush.msrb.mxu0 %v7949_v18  ;;  %3712 = vmatpush.msrb.mxu3 %v7949_v18 }
 0x365   :  { %v5578_v38 = vadd.f32 %v2862_v45, %v178_v60  ;;  %v2268_v26 = vpop.f32.mrf.mxu0 }
 0x366   :  { %v2465_v4 = vpop.f32.mrf.mxu1  ;;  %v2704_v42 = vpop.f32.mrf.mxu2  ;;  %v9339_v20 = vand.u32 4294901760, %v7954_v37  ;;  %v2269_v60 = vadd.f32 %v2268_v26, %v7532_v33  ;;  %3518 = vmatpush.msrb.mxu2 %v7954_v37  ;;  %v182_v33 = vld [vmem:[#allocation14 + $0x90] sm:$0xff] }
 0x367   :  { %5642 = vst [vmem:[#allocation14 + $0x70] sm:$0xff] %v5578_v38  ;;  %v2466_v54 = vadd.f32 %v2465_v4, %v2264_v39  ;;  %v2865_v34 = vpop.f32.mrf.mxu3  ;;  %v9788_v38 = vld [vmem:[#allocation262_spill] sm:$0xff] }
 0x368   :  { %2347 = vmatmul.f32.gmra.mxu0 %v9786_v30  ;;  %v9789_v30 = vld [vmem:[#allocation268_spill] sm:$0xff] }
 0x369   :  { %v2705_v56 = vadd.f32 %v2704_v42, %v2466_v54  ;;  %2560 = vmatmul.f32.gmra.mxu1 %v9787_v16  ;;  %v3336_v54 = vsub.f32 %v7954_v37, %v9339_v20 }
 0x36a   :  { %2932 = vmatmul.f32.gmra.mxu3 %v9788_v38 }
 0x36b   :  { %v2866_v8 = vadd.f32 %v2865_v34, %v2705_v56  ;;  %2771 = vmatmul.f32.gmra.mxu2 %v9788_v38  ;;  %v3337_v49 = vand.u32 4294901760, %v3336_v54  ;;  %v9790_v38 = vld [vmem:[#allocation265_spill] sm:$0xff] }
 0x36d   :  { %v5580_v45 = vadd.f32 %v2866_v8, %v180_v10  ;;  %v2273_v39 = vpop.f32.mrf.mxu0  ;;  %3338 = vmatpush.msrb.mxu1 %v3337_v49  ;;  %v9791_v10 = vld [vmem:[#allocation266_spill] sm:$0xff] }
 0x36e   :  { %v2471_v4 = vpop.f32.mrf.mxu1  ;;  %v2708_v56 = vpop.f32.mrf.mxu2  ;;  %v2274_v8 = vadd.f32 %v2273_v39, %v7551_v6  ;;  %v9794_v39 = vand.u32 4294901760, %v7583_v32 }
 0x36f   :  { %5644 = vst [vmem:[#allocation14 + $0x80] sm:$0xff] %v5580_v45  ;;  %v2472_v42 = vadd.f32 %v2471_v4, %v2269_v60  ;;  %v2869_v34 = vpop.f32.mrf.mxu3 }
 0x370   :  { %2352 = vmatmul.f32.gmra.mxu0 %v9789_v30 }
 0x371   :  { %v2709_v16 = vadd.f32 %v2708_v56, %v2472_v42  ;;  %2566 = vmatmul.f32.gmra.mxu1 %v9790_v38  ;;  %v293_v56 = vld [vmem:[#allocation12 + $0x8] sm:$0xff] }
 0x372   :  { %2936 = vmatmul.f32.gmra.mxu3 %v9791_v10  ;;  %v7971_v30 = vand.u32 4294901760, %v293_v56 }
 0x373   :  { %v2870_v26 = vadd.f32 %v2869_v34, %v2709_v16  ;;  %2775 = vmatmul.f32.gmra.mxu2 %v9791_v10  ;;  %v9792_v16 = vld [vmem:[#allocation269_spill] sm:$0xff]  ;;  %v184_v34 = vld [vmem:[#allocation14 + $0xa0] sm:$0xff] }
 0x374   :  { %v7976_v49 = vsub.f32 %v293_v56, %v7971_v30  ;;  %2991 = vmatpush.msrb.mxu0 %v7971_v30  ;;  %3714 = vmatpush.msrb.mxu3 %v7971_v30 }
 0x375   :  { %v5582_v20 = vadd.f32 %v2870_v26, %v182_v33  ;;  %v2278_v45 = vpop.f32.mrf.mxu0 }
 0x376   :  { %v2477_v60 = vpop.f32.mrf.mxu1  ;;  %v2712_v54 = vpop.f32.mrf.mxu2  ;;  %3911 = vmatpush.msra.mxu0 %v9794_v39  ;;  %v9340_v33 = vand.u32 4294901760, %v7976_v49  ;;  %v2279_v26 = vadd.f32 %v2278_v45, %v7570_v53  ;;  %3521 = vmatpush.msrb.mxu2 %v7976_v49  ;;  %v9796_v39 = vand.u32 4294901760, %v7656_v51  ;;  %v9800_v51 = vand.u32 4294901760, %v7708_v2 }
 0x377   :  { %5646 = vst [vmem:[#allocation14 + $0x90] sm:$0xff] %v5582_v20  ;;  %v2478_v4 = vadd.f32 %v2477_v60, %v2274_v8  ;;  %v2873_v42 = vpop.f32.mrf.mxu3  ;;  %v9793_v20 = vld [vmem:[#allocation270_spill] sm:$0xff]  ;;  %v9795_v60 = vand.u32 4294901760, %v7628_v5  ;;  %v186_v5 = vld [vmem:[#allocation14 + $0xb0] sm:$0xff]  ;;  %v9803_v2 = vand.u32 4294901760, %v7760_v0 }
 0x378   :  { %2357 = vmatmul.f32.gmra.mxu0 %v7520_v14 }
 0x379   :  { %v2713_v38 = vadd.f32 %v2712_v54, %v2478_v4  ;;  %2572 = vmatmul.f32.gmra.mxu1 %v9792_v16  ;;  %3915 = vmatpush.msra.mxu0 %v9795_v60  ;;  %v9906_v16 = vld [vmem:[#allocation90_spill] sm:$0xff] }
 0x37a   :  { %2940 = vmatmul.f32.gmra.mxu3 %v9793_v20 }
 0x37b   :  { %v2874_v6 = vadd.f32 %v2873_v42, %v2713_v38  ;;  %2779 = vmatmul.f32.gmra.mxu2 %v9793_v20  ;;  %v3342_v38 = vsub.f32 %v7976_v49, %v9340_v33  ;;  %3919 = vmatpush.msra.mxu0 %v9796_v39  ;;  %v9799_v33 = vld [vmem:[#allocation273_spill] sm:$0xff]  ;;  %v9916_v20 = vld [vmem:[#allocation99_spill] sm:$0xff] }
 0x37d   :  { %v5584_v8 = vadd.f32 %v2874_v6, %v184_v34  ;;  %v2283_v4 = vpop.f32.mrf.mxu0  ;;  %v3343_v53 = vand.u32 4294901760, %v3342_v38  ;;  %v9797_v34 = vld [vmem:[#allocation272_spill] sm:$0xff]  ;;  %v9798_v6 = vand.u32 4294901760, %v7682_v58  ;;  %v9802_v58 = vand.u32 4294901760, %v7734_v25 }
 0x37e   :  { %v2483_v54 = vpop.f32.mrf.mxu1  ;;  %v2716_v42 = vpop.f32.mrf.mxu2 }
 0x37f   :  { %5648 = vst [vmem:[#allocation14 + $0xa0] sm:$0xff] %v5584_v8  ;;  %v2484_v32 = vadd.f32 %v2483_v54, %v2279_v26  ;;  %v2877_v56 = vpop.f32.mrf.mxu3  ;;  %3344 = vmatpush.msrb.mxu1 %v3343_v53  ;;  %3923 = vmatpush.msra.mxu0 %v9798_v6  ;;  %v9801_v26 = vld [vmem:[#allocation285_spill] sm:$0xff] }
 0x380   :  { %2362 = vmatmul.f32.gmra.mxu0 %v7539_v57  ;;  %v2284_v8 = vadd.f32 %v2283_v4, %v9801_v26  ;;  %v9895_v57 = vld [vmem:[#allocation84_spill] sm:$0xff] }
 0x381   :  { %v2717_v45 = vadd.f32 %v2716_v42, %v2484_v32  ;;  %2578 = vmatmul.f32.gmra.mxu1 %v9797_v34  ;;  %3927 = vmatpush.msra.mxu0 %v9800_v51  ;;  %v226_v34 = vld [vmem:[#allocation14 + $0x1f0] sm:$0xff] }
 0x382   :  { %2944 = vmatmul.f32.gmra.mxu3 %v9799_v33  ;;  %4102 = vmatpush.msra.mxu1 %v7580_v44  ;;  %v355_v44 = vld [vmem:[#allocation12 + $0x1f8] sm:$0xff] }
 0x383   :  { %v2878_v60 = vadd.f32 %v2877_v56, %v2717_v45  ;;  %2783 = vmatmul.f32.gmra.mxu2 %v9799_v33  ;;  %3931 = vmatpush.msra.mxu0 %v9802_v58  ;;  %v8008_v53 = vand.u32 4294901760, %v355_v44  ;;  %v9804_v45 = vld [vmem:[#allocation277_spill] sm:$0xff]  ;;  %v9912_v33 = vld [vmem:[#allocation106_spill] sm:$0xff] }
 0x384   :  { %4104 = vmatpush.msra.mxu1 %v7625_v22  ;;  %v9805_v22 = vld [vmem:[#allocation275_spill] sm:$0xff] }
 0x385   :  { %v5586_v54 = vadd.f32 %v2878_v60, %v186_v5  ;;  %v2288_v38 = vpop.f32.mrf.mxu0  ;;  %3935 = vmatpush.msra.mxu0 %v9803_v2  ;;  %v188_v5 = vld [vmem:[#allocation14 + $0xc0] sm:$0xff]  ;;  %4263 = vmatpush.msra.mxu2 %v8008_v53  ;;  %v8016_v25 = vsub.f32 %v355_v44, %v8008_v53  ;;  %v9807_v60 = vand.u32 4294901760, %v7786_v19  ;;  %v9812_v44 = vand.u32 4294901760, %v7888_v36 }
 0x386   :  { %v2489_v32 = vpop.f32.mrf.mxu1  ;;  %v2720_v56 = vpop.f32.mrf.mxu2  ;;  %4106 = vmatpush.msra.mxu1 %v7653_v3  ;;  %v9806_v3 = vld [vmem:[#allocation276_spill] sm:$0xff]  ;;  %v2289_v51 = vadd.f32 %v2288_v38, %v7618_v43  ;;  %v9810_v38 = vld [vmem:[#allocation279_spill] sm:$0xff] }
 0x387   :  { %5650 = vst [vmem:[#allocation14 + $0xb0] sm:$0xff] %v5586_v54  ;;  %v2490_v42 = vadd.f32 %v2489_v32, %v2284_v8  ;;  %v2881_v39 = vpop.f32.mrf.mxu3  ;;  %3939 = vmatpush.msra.mxu0 %v9807_v60  ;;  %v9347_v0 = vand.u32 4294901760, %v8016_v25  ;;  %v9808_v8 = vand.u32 4294901760, %v7812_v55  ;;  %v9813_v60 = vand.u32 4294901760, %v7910_v62 }
 0x388   :  { %2367 = vmatmul.f32.gmra.mxu0 %v9804_v45  ;;  %4108 = vmatpush.msra.mxu1 %v7679_v35  ;;  %v9814_v62 = vand.u32 4294901760, %v7932_v31 }
 0x389   :  { %v2721_v4 = vadd.f32 %v2720_v56, %v2490_v42  ;;  %2584 = vmatmul.f32.gmra.mxu1 %v9805_v22  ;;  %3943 = vmatpush.msra.mxu0 %v9808_v8  ;;  %v4554_v32 = vsub.f32 %v8016_v25, %v9347_v0  ;;  %v190_v56 = vld [vmem:[#allocation14 + $0xd0] sm:$0xff] }
 0x38a   :  { %2948 = vmatmul.f32.gmra.mxu3 %v9806_v3  ;;  %4110 = vmatpush.msra.mxu1 %v7705_v21  ;;  %v9809_v21 = vand.u32 4294901760, %v7840_v61 }
 0x38b   :  { %v2882_v6 = vadd.f32 %v2881_v39, %v2721_v4  ;;  %2787 = vmatmul.f32.gmra.mxu2 %v9806_v3  ;;  %v4555_v43 = vand.u32 4294901760, %v4554_v32  ;;  %v9811_v39 = vand.u32 4294901760, %v7866_v24  ;;  %v353_v24 = vld [vmem:[#allocation12 + $0x1e8] sm:$0xff] }
 0x38c   :  { %4112 = vmatpush.msra.mxu1 %v7731_v27  ;;  %3947 = vmatpush.msra.mxu0 %v9809_v21  ;;  %v9818_v21 = vld [vmem:[#allocation23_spill] sm:$0xff] }
 0x38d   :  { %v5588_v26 = vadd.f32 %v2882_v6, %v188_v5  ;;  %v2293_v54 = vpop.f32.mrf.mxu0  ;;  %4556 = vmatpush.msra.mxu3 %v4555_v43  ;;  %v194_v43 = vld [vmem:[#allocation14 + $0xf0] sm:$0xff] }
 0x38e   :  { %v2495_v35 = vpop.f32.mrf.mxu1  ;;  %v2724_v58 = vpop.f32.mrf.mxu2  ;;  %4114 = vmatpush.msra.mxu1 %v7757_v1  ;;  %3951 = vmatpush.msra.mxu0 %v9811_v39  ;;  %v2294_v1 = vadd.f32 %v2293_v54, %v7638_v28  ;;  %v9815_v54 = vand.u32 4294901760, %v7954_v37 }
 0x38f   :  { %5652 = vst [vmem:[#allocation14 + $0xc0] sm:$0xff] %v5588_v26  ;;  %v2496_v19 = vadd.f32 %v2495_v35, %v2289_v51  ;;  %v2885_v42 = vpop.f32.mrf.mxu3  ;;  %v8049_v51 = vand.u32 4294901760, %v353_v24 }
 0x390   :  { %2372 = vmatmul.f32.gmra.mxu0 %v7577_v41  ;;  %4116 = vmatpush.msra.mxu1 %v7783_v59 }
 0x391   :  { %v2725_v55 = vadd.f32 %v2724_v58, %v2496_v19  ;;  %2590 = vmatmul.f32.gmra.mxu1 %v9810_v38  ;;  %3955 = vmatpush.msra.mxu0 %v9812_v44  ;;  %v9887_v38 = vld [vmem:[#allocation230_spill] sm:$0xff] }
 0x392   :  { %2952 = vmatmul.f32.gmra.mxu3 %v7566_v15  ;;  %4118 = vmatpush.msra.mxu1 %v7809_v13  ;;  %v192_v13 = vld [vmem:[#allocation14 + $0xe0] sm:$0xff] }
 0x393   :  { %v2886_v27 = vadd.f32 %v2885_v42, %v2725_v55  ;;  %2791 = vmatmul.f32.gmra.mxu2 %v7566_v15  ;;  %3959 = vmatpush.msra.mxu0 %v9813_v60  ;;  %v9817_v42 = vld [vmem:[#allocation288_spill] sm:$0xff] }
 0x394   :  { %4120 = vmatpush.msra.mxu1 %v7835_v63  ;;  %4265 = vmatpush.msra.mxu2 %v8049_v51  ;;  %v8056_v63 = vsub.f32 %v353_v24, %v8049_v51  ;;  %v9819_v55 = vld [vmem:[#allocation20_spill] sm:$0xff] }
 0x395   :  { %v5590_v61 = vadd.f32 %v2886_v27, %v190_v56  ;;  %v2298_v2 = vpop.f32.mrf.mxu0  ;;  %3963 = vmatpush.msra.mxu0 %v9814_v62  ;;  %v9820_v56 = vld [vmem:[#allocation19_spill] sm:$0xff]  ;;  %v9823_v60 = vld [vmem:[#allocation24_spill] sm:$0xff] }
 0x396   :  { %v2501_v4 = vpop.f32.mrf.mxu1  ;;  %v2728_v5 = vpop.f32.mrf.mxu2  ;;  %4122 = vmatpush.msra.mxu1 %v7861_v48  ;;  %v9346_v48 = vand.u32 4294901760, %v8056_v63  ;;  %v2299_v26 = vadd.f32 %v2298_v2, %v7648_v7  ;;  %v351_v2 = vld [vmem:[#allocation12 + $0x1d8] sm:$0xff] }
 0x397   :  { %5654 = vst [vmem:[#allocation14 + $0xd0] sm:$0xff] %v5590_v61  ;;  %v2502_v59 = vadd.f32 %v2501_v4, %v2294_v1  ;;  %v2889_v6 = vpop.f32.mrf.mxu3  ;;  %3967 = vmatpush.msra.mxu0 %v9815_v54 }
 0x398   :  { %2377 = vmatmul.f32.gmra.mxu0 %v7608_v23  ;;  %4124 = vmatpush.msra.mxu1 %v7883_v9  ;;  %v4560_v32 = vsub.f32 %v8056_v63, %v9346_v48  ;;  %v218_v48 = vld [vmem:[#allocation14 + $0x1b0] sm:$0xff] }
 0x399   :  { %v2729_v28 = vadd.f32 %v2728_v5, %v2502_v59  ;;  %2596 = vmatmul.f32.gmra.mxu1 %v7590_v29  ;;  %v9821_v59 = vld [vmem:[#allocation27_spill] sm:$0xff]  ;;  %v9822_v5 = vld [vmem:[#allocation18_spill] sm:$0xff]  ;;  %v222_v23 = vld [vmem:[#allocation14 + $0x1d0] sm:$0xff] }
 0x39a   :  { %2956 = vmatmul.f32.gmra.mxu3 %v7592_v52  ;;  %4126 = vmatpush.msra.mxu1 %v7905_v40  ;;  %v9816_v40 = vand.u32 4294901760, %v7976_v49  ;;  %v4561_v7 = vand.u32 4294901760, %v4560_v32  ;;  %v9878_v29 = vld [vmem:[#allocation75_spill] sm:$0xff] }
 0x39b   :  { %v2890_v36 = vadd.f32 %v2889_v6, %v2729_v28  ;;  %2795 = vmatmul.f32.gmra.mxu2 %v7592_v52  ;;  %v196_v6 = vld [vmem:[#allocation14 + $0x100] sm:$0xff] }
 0x39c   :  { %4128 = vmatpush.msra.mxu1 %v7927_v11  ;;  %3971 = vmatpush.msra.mxu0 %v9816_v40  ;;  %v9824_v28 = vld [vmem:[#allocation22_spill] sm:$0xff]  ;;  %v198_v40 = vld [vmem:[#allocation14 + $0x110] sm:$0xff] }
 0x39d   :  { %v5592_v8 = vadd.f32 %v2890_v36, %v192_v13  ;;  %v2303_v35 = vpop.f32.mrf.mxu0  ;;  %4562 = vmatpush.msra.mxu3 %v4561_v7 }
 0x39e   :  { %v2507_v9 = vpop.f32.mrf.mxu1  ;;  %v2732_v19 = vpop.f32.mrf.mxu2  ;;  %4130 = vmatpush.msra.mxu1 %v7949_v18  ;;  %v2304_v49 = vadd.f32 %v2303_v35, %v7664_v46 }
 0x39f   :  { %5656 = vst [vmem:[#allocation14 + $0xe0] sm:$0xff] %v5592_v8  ;;  %v2508_v31 = vadd.f32 %v2507_v9, %v2299_v26  ;;  %v2893_v58 = vpop.f32.mrf.mxu3 }
 0x3a0   :  { %2997 = vmatmul.f32.vlgmr.msrb.gmra.mxu0 %v9818_v21  ;;  %4132 = vmatpush.msra.mxu1 %v7971_v30  ;;  %v8083_v30 = vand.u32 4294901760, %v351_v2  ;;  %v9828_v21 = vld [vmem:[#allocation26_spill] sm:$0xff] }
 0x3a1   :  { %v2733_v37 = vadd.f32 %v2732_v19, %v2508_v31  ;;  %2602 = vmatmul.f32.gmra.mxu1 %v9817_v42  ;;  %4778 = vmatpush.msrb.mxu0 %v8016_v25 }
 0x3a2   :  { %3718 = vmatmul.f32.vlgmr.msrb.gmra.mxu3 %v9819_v55  ;;  %4267 = vmatpush.msra.mxu2 %v8083_v30  ;;  %v8089_v46 = vsub.f32 %v351_v2, %v8083_v30  ;;  %v9830_v2 = vld [vmem:[#allocation25_spill] sm:$0xff] }
 0x3a3   :  { %v2894_v11 = vadd.f32 %v2893_v58, %v2733_v37  ;;  %3524 = vmatmul.f32.vlgmr.msrb.gmra.mxu2 %v9820_v56  ;;  %4781 = vmatpush.msrb.mxu0 %v8056_v63  ;;  %v9825_v58 = vld [vmem:[#allocation31_spill] sm:$0xff]  ;;  %v9827_v37 = vld [vmem:[#allocation28_spill] sm:$0xff] }
 0x3a4   :  { %v9345_v13 = vand.u32 4294901760, %v8089_v46 }
 0x3a5   :  { %v5594_v27 = vadd.f32 %v2894_v11, %v194_v43  ;;  %v2308_v18 = vpop.f32.mrf.mxu0  ;;  %4784 = vmatpush.msrb.mxu0 %v8089_v46 }
 0x3a6   :  { %v2513_v39 = vpop.f32.mrf.mxu1  ;;  %v2736_v61 = vpop.f32.mrf.mxu2  ;;  %v2309_v36 = vadd.f32 %v2308_v18, %v7674_v50  ;;  %v4566_v54 = vsub.f32 %v8089_v46, %v9345_v13  ;;  %v9826_v50 = vld [vmem:[#allocation21_spill] sm:$0xff]  ;;  %v9868_v13 = vld [vmem:[#allocation67_spill] sm:$0xff] }
 0x3a7   :  { %5658 = vst [vmem:[#allocation14 + $0xf0] sm:$0xff] %v5594_v27  ;;  %v2514_v1 = vadd.f32 %v2513_v39, %v2304_v49  ;;  %v2897_v44 = vpop.f32.mrf.mxu3  ;;  %v349_v39 = vld [vmem:[#allocation12 + $0x1c8] sm:$0xff] }
 0x3a8   :  { %3005 = vmatmul.f32.gmra.mxu0 %v9821_v59  ;;  %v4567_v31 = vand.u32 4294901760, %v4566_v54 }
 0x3a9   :  { %v2737_v4 = vadd.f32 %v2736_v61, %v2514_v1  ;;  %3346 = vmatmul.f32.vlgmr.msrb.gmra.mxu1 %v9822_v5  ;;  %v8107_v1 = vand.u32 4294901760, %v349_v39 }
 0x3aa   :  { %4986 = vmatpush.msrb.mxu1 %v8008_v53  ;;  %3724 = vmatmul.f32.gmra.mxu3 %v9823_v60 }
 0x3ab   :  { %v2898_v24 = vadd.f32 %v2897_v44, %v2737_v4  ;;  %3529 = vmatmul.f32.gmra.mxu2 %v9824_v28  ;;  %4568 = vmatpush.msra.mxu3 %v4567_v31  ;;  %v9829_v44 = vld [vmem:[#allocation35_spill] sm:$0xff]  ;;  %v200_v4 = vld [vmem:[#allocation14 + $0x120] sm:$0xff] }
 0x3ac   :  { %4988 = vmatpush.msrb.mxu1 %v8049_v51  ;;  %4269 = vmatpush.msra.mxu2 %v8107_v1 }
 0x3ad   :  { %v5596_v62 = vadd.f32 %v2898_v24, %v196_v6  ;;  %v2313_v26 = vpop.f32.mrf.mxu0  ;;  %v9831_v6 = vld [vmem:[#allocation32_spill] sm:$0xff]  ;;  %v9832_v24 = vld [vmem:[#allocation30_spill] sm:$0xff] }
 0x3ae   :  { %v2519_v8 = vpop.f32.mrf.mxu1  ;;  %4990 = vmatpush.msrb.mxu1 %v8083_v30  ;;  %v2740_v9 = vpop.f32.mrf.mxu2  ;;  %v2314_v43 = vadd.f32 %v2313_v26, %v7690_v12  ;;  %v8113_v12 = vsub.f32 %v349_v39, %v8107_v1  ;;  %v347_v39 = vld [vmem:[#allocation12 + $0x1b8] sm:$0xff] }
 0x3af   :  { %5660 = vst [vmem:[#allocation14 + $0x100] sm:$0xff] %v5596_v62  ;;  %v2520_v35 = vadd.f32 %v2519_v8, %v2309_v36  ;;  %v2901_v32 = vpop.f32.mrf.mxu3 }
 0x3b0   :  { %3013 = vmatmul.f32.gmra.mxu0 %v9825_v58  ;;  %4992 = vmatpush.msrb.mxu1 %v8107_v1  ;;  %v9344_v60 = vand.u32 4294901760, %v8113_v12  ;;  %v9834_v58 = vld [vmem:[#allocation29_spill] sm:$0xff] }
 0x3b1   :  { %v2741_v19 = vadd.f32 %v2740_v9, %v2520_v35  ;;  %3350 = vmatmul.f32.gmra.mxu1 %v9826_v50  ;;  %4787 = vmatpush.msrb.mxu0 %v8113_v12 }
 0x3b2   :  { %3730 = vmatmul.f32.gmra.mxu3 %v9827_v37  ;;  %v4572_v8 = vsub.f32 %v8113_v12, %v9344_v60  ;;  %v9836_v37 = vld [vmem:[#allocation34_spill] sm:$0xff] }
 0x3b3   :  { %v2902_v7 = vadd.f32 %v2901_v32, %v2741_v19  ;;  %3534 = vmatmul.f32.gmra.mxu2 %v9828_v21  ;;  %v9833_v19 = vld [vmem:[#allocation39_spill] sm:$0xff]  ;;  %v9837_v21 = vld [vmem:[#allocation290_spill] sm:$0xff] }
 0x3b4   :  { %v4573_v32 = vand.u32 4294901760, %v4572_v8  ;;  %v9842_v8 = vld [vmem:[#allocation291_spill] sm:$0xff] }
 0x3b5   :  { %v5598_v11 = vadd.f32 %v2902_v7, %v198_v40  ;;  %v2318_v55 = vpop.f32.mrf.mxu0  ;;  %v202_v40 = vld [vmem:[#allocation14 + $0x130] sm:$0xff] }
 0x3b6   :  { %v2525_v56 = vpop.f32.mrf.mxu1  ;;  %v2744_v27 = vpop.f32.mrf.mxu2  ;;  %v2319_v28 = vadd.f32 %v2318_v55, %v7700_v17  ;;  %4574 = vmatpush.msra.mxu3 %v4573_v32  ;;  %v9835_v7 = vld [vmem:[#allocation36_spill] sm:$0xff] }
 0x3b7   :  { %5662 = vst [vmem:[#allocation14 + $0x110] sm:$0xff] %v5598_v11  ;;  %v2526_v49 = vadd.f32 %v2525_v56, %v2314_v43  ;;  %v2905_v18 = vpop.f32.mrf.mxu3 }
 0x3b8   :  { %3021 = vmatmul.f32.gmra.mxu0 %v9829_v44 }
 0x3b9   :  { %v2745_v61 = vadd.f32 %v2744_v27, %v2526_v49  ;;  %3354 = vmatmul.f32.gmra.mxu1 %v9830_v2 }
 0x3ba   :  { %3736 = vmatmul.f32.gmra.mxu3 %v9831_v6  ;;  %v204_v6 = vld [vmem:[#allocation14 + $0x140] sm:$0xff] }
 0x3bb   :  { %v2906_v59 = vadd.f32 %v2905_v18, %v2745_v61  ;;  %3539 = vmatmul.f32.gmra.mxu2 %v9832_v24  ;;  %v8129_v61 = vand.u32 4294901760, %v347_v39 }
 0x3bd   :  { %v5600_v36 = vadd.f32 %v2906_v59, %v200_v4  ;;  %v2323_v62 = vpop.f32.mrf.mxu0  ;;  %v9838_v4 = vld [vmem:[#allocation43_spill] sm:$0xff]  ;;  %v9839_v59 = vld [vmem:[#allocation33_spill] sm:$0xff]  ;;  %4271 = vmatpush.msra.mxu2 %v8129_v61  ;;  %v8135_v24 = vsub.f32 %v347_v39, %v8129_v61  ;;  %4994 = vmatpush.msrb.mxu1 %v8129_v61 }
 0x3be   :  { %v2531_v26 = vpop.f32.mrf.mxu1  ;;  %v2748_v35 = vpop.f32.mrf.mxu2  ;;  %v2324_v43 = vadd.f32 %v2323_v62, %v9837_v21  ;;  %v9841_v62 = vld [vmem:[#allocation38_spill] sm:$0xff]  ;;  %v9843_v21 = vld [vmem:[#allocation47_spill] sm:$0xff] }
 0x3bf   :  { %5664 = vst [vmem:[#allocation14 + $0x120] sm:$0xff] %v5600_v36  ;;  %v2532_v54 = vadd.f32 %v2531_v26, %v2319_v28  ;;  %v2909_v9 = vpop.f32.mrf.mxu3  ;;  %v9840_v36 = vld [vmem:[#allocation40_spill] sm:$0xff]  ;;  %v9342_v26 = vand.u32 4294901760, %v8135_v24  ;;  %4790 = vmatpush.msrb.mxu0 %v8135_v24 }
 0x3c0   :  { %3029 = vmatmul.f32.gmra.mxu0 %v9833_v19 }
 0x3c1   :  { %v2749_v31 = vadd.f32 %v2748_v35, %v2532_v54  ;;  %3358 = vmatmul.f32.gmra.mxu1 %v9834_v58 }
 0x3c2   :  { %3742 = vmatmul.f32.gmra.mxu3 %v9835_v7 }
 0x3c3   :  { %v2910_v17 = vadd.f32 %v2909_v9, %v2749_v31  ;;  %3544 = vmatmul.f32.gmra.mxu2 %v9836_v37  ;;  %v4578_v31 = vsub.f32 %v8135_v24, %v9342_v26 }
 0x3c5   :  { %v5602_v11 = vadd.f32 %v2910_v17, %v202_v40  ;;  %v2328_v55 = vpop.f32.mrf.mxu0  ;;  %v4579_v7 = vand.u32 4294901760, %v4578_v31  ;;  %v208_v31 = vld [vmem:[#allocation14 + $0x160] sm:$0xff] }
 0x3c6   :  { %v2537_v56 = vpop.f32.mrf.mxu1  ;;  %v2752_v27 = vpop.f32.mrf.mxu2  ;;  %v2329_v54 = vadd.f32 %v2328_v55, %v9842_v8 }
 0x3c7   :  { %5666 = vst [vmem:[#allocation14 + $0x130] sm:$0xff] %v5602_v11  ;;  %v2538_v49 = vadd.f32 %v2537_v56, %v2324_v43  ;;  %v2913_v18 = vpop.f32.mrf.mxu3  ;;  %v9844_v43 = vld [vmem:[#allocation37_spill] sm:$0xff]  ;;  %v206_v11 = vld [vmem:[#allocation14 + $0x150] sm:$0xff]  ;;  %4580 = vmatpush.msra.mxu3 %v4579_v7 }
 0x3c8   :  { %3037 = vmatmul.f32.gmra.mxu0 %v9838_v4  ;;  %v9845_v56 = vld [vmem:[#allocation44_spill] sm:$0xff] }
 0x3c9   :  { %v2753_v44 = vadd.f32 %v2752_v27, %v2538_v49  ;;  %3362 = vmatmul.f32.gmra.mxu1 %v9839_v59  ;;  %v9846_v49 = vld [vmem:[#allocation42_spill] sm:$0xff]  ;;  %v9847_v27 = vld [vmem:[#allocation292_spill] sm:$0xff] }
 0x3ca   :  { %3748 = vmatmul.f32.gmra.mxu3 %v9840_v36 }
 0x3cb   :  { %v2914_v28 = vadd.f32 %v2913_v18, %v2753_v44  ;;  %3549 = vmatmul.f32.gmra.mxu2 %v9841_v62  ;;  %v345_v62 = vld [vmem:[#allocation12 + $0x1a8] sm:$0xff] }
 0x3cc   :  { %v8151_v8 = vand.u32 4294901760, %v345_v62 }
 0x3cd   :  { %v5604_v35 = vadd.f32 %v2914_v28, %v204_v6  ;;  %v2333_v9 = vpop.f32.mrf.mxu0 }
 0x3ce   :  { %v2543_v32 = vpop.f32.mrf.mxu1  ;;  %v2756_v40 = vpop.f32.mrf.mxu2  ;;  %v2334_v18 = vadd.f32 %v2333_v9, %v9847_v27  ;;  %4273 = vmatpush.msra.mxu2 %v8151_v8  ;;  %v8157_v9 = vsub.f32 %v345_v62, %v8151_v8  ;;  %4996 = vmatpush.msrb.mxu1 %v8151_v8  ;;  %v210_v62 = vld [vmem:[#allocation14 + $0x170] sm:$0xff] }
 0x3cf   :  { %5668 = vst [vmem:[#allocation14 + $0x140] sm:$0xff] %v5604_v35  ;;  %v2544_v19 = vadd.f32 %v2543_v32, %v2329_v54  ;;  %v2917_v17 = vpop.f32.mrf.mxu3  ;;  %v9848_v35 = vld [vmem:[#allocation51_spill] sm:$0xff]  ;;  %v9849_v32 = vld [vmem:[#allocation41_spill] sm:$0xff] }
 0x3d0   :  { %3045 = vmatmul.f32.gmra.mxu0 %v9843_v21  ;;  %v9341_v7 = vand.u32 4294901760, %v8157_v9 }
 0x3d1   :  { %v2757_v37 = vadd.f32 %v2756_v40, %v2544_v19  ;;  %3366 = vmatmul.f32.gmra.mxu1 %v9844_v43  ;;  %v9850_v40 = vld [vmem:[#allocation48_spill] sm:$0xff]  ;;  %4793 = vmatpush.msrb.mxu0 %v8157_v9 }
 0x3d2   :  { %3754 = vmatmul.f32.gmra.mxu3 %v9845_v56 }
 0x3d3   :  { %v2918_v55 = vadd.f32 %v2917_v17, %v2757_v37  ;;  %3554 = vmatmul.f32.gmra.mxu2 %v9846_v49  ;;  %v9851_v17 = vld [vmem:[#allocation46_spill] sm:$0xff]  ;;  %v9852_v37 = vld [vmem:[#allocation293_spill] sm:$0xff]  ;;  %v4584_v49 = vsub.f32 %v8157_v9, %v9341_v7  ;;  %v214_v7 = vld [vmem:[#allocation14 + $0x190] sm:$0xff] }
 0x3d5   :  { %v5606_v39 = vadd.f32 %v2918_v55, %v206_v11  ;;  %v2338_v44 = vpop.f32.mrf.mxu0 }
 0x3d6   :  { %v2549_v4 = vpop.f32.mrf.mxu1  ;;  %v2760_v28 = vpop.f32.mrf.mxu2  ;;  %v2339_v21 = vadd.f32 %v2338_v44, %v9852_v37 }
 0x3d7   :  { %5670 = vst [vmem:[#allocation14 + $0x150] sm:$0xff] %v5606_v39  ;;  %v2550_v6 = vadd.f32 %v2549_v4, %v2334_v18  ;;  %v2921_v36 = vpop.f32.mrf.mxu3  ;;  %v4585_v4 = vand.u32 4294901760, %v4584_v49  ;;  %v343_v49 = vld [vmem:[#allocation12 + $0x198] sm:$0xff] }
 0x3d8   :  { %3053 = vmatmul.f32.gmra.mxu0 %v9848_v35  ;;  %v9856_v35 = vld [vmem:[#allocation50_spill] sm:$0xff] }
 0x3d9   :  { %v2761_v54 = vadd.f32 %v2760_v28, %v2550_v6  ;;  %3370 = vmatmul.f32.gmra.mxu1 %v9849_v32  ;;  %v9853_v28 = vld [vmem:[#allocation55_spill] sm:$0xff]  ;;  %4586 = vmatpush.msra.mxu3 %v4585_v4  ;;  %v212_v4 = vld [vmem:[#allocation14 + $0x180] sm:$0xff] }
 0x3da   :  { %3760 = vmatmul.f32.gmra.mxu3 %v9850_v40 }
 0x3db   :  { %v2922_v19 = vadd.f32 %v2921_v36, %v2761_v54  ;;  %3559 = vmatmul.f32.gmra.mxu2 %v9851_v17  ;;  %v9854_v36 = vld [vmem:[#allocation45_spill] sm:$0xff]  ;;  %v9855_v54 = vld [vmem:[#allocation52_spill] sm:$0xff] }
 0x3dd   :  { %v5608_v11 = vadd.f32 %v2922_v19, %v208_v31  ;;  %v2343_v55 = vpop.f32.mrf.mxu0  ;;  %v9857_v31 = vld [vmem:[#allocation294_spill] sm:$0xff] }
 0x3de   :  { %v2555_v56 = vpop.f32.mrf.mxu1  ;;  %v2764_v18 = vpop.f32.mrf.mxu2  ;;  %v2344_v19 = vadd.f32 %v2343_v55, %v9857_v31 }
 0x3df   :  { %5672 = vst [vmem:[#allocation14 + $0x160] sm:$0xff] %v5608_v11  ;;  %v2556_v27 = vadd.f32 %v2555_v56, %v2339_v21  ;;  %v2925_v39 = vpop.f32.mrf.mxu3 }
 0x3e0   :  { %3061 = vmatmul.f32.gmra.mxu0 %v9853_v28  ;;  %v9858_v28 = vld [vmem:[#allocation59_spill] sm:$0xff] }
 0x3e1   :  { %v2765_v6 = vadd.f32 %v2764_v18, %v2556_v27  ;;  %3374 = vmatmul.f32.gmra.mxu1 %v9854_v36  ;;  %v8173_v27 = vand.u32 4294901760, %v343_v49 }
 0x3e2   :  { %3766 = vmatmul.f32.gmra.mxu3 %v9855_v54 }
 0x3e3   :  { %v2926_v44 = vadd.f32 %v2925_v39, %v2765_v6  ;;  %3564 = vmatmul.f32.gmra.mxu2 %v9856_v35  ;;  %v9859_v39 = vld [vmem:[#allocation49_spill] sm:$0xff]  ;;  %v8179_v55 = vsub.f32 %v343_v49, %v8173_v27  ;;  %4998 = vmatpush.msrb.mxu1 %v8173_v27 }
 0x3e4   :  { %4275 = vmatpush.msra.mxu2 %v8173_v27  ;;  %v9862_v35 = vld [vmem:[#allocation205_spill] sm:$0xff] }
 0x3e5   :  { %v5610_v40 = vadd.f32 %v2926_v44, %v210_v62  ;;  %v2348_v17 = vpop.f32.mrf.mxu0  ;;  %v9860_v62 = vld [vmem:[#allocation56_spill] sm:$0xff]  ;;  %v9861_v44 = vld [vmem:[#allocation54_spill] sm:$0xff]  ;;  %v9343_v54 = vand.u32 4294901760, %v8179_v55  ;;  %4796 = vmatpush.msrb.mxu0 %v8179_v55 }
 0x3e6   :  { %v2561_v37 = vpop.f32.mrf.mxu1  ;;  %v2768_v11 = vpop.f32.mrf.mxu2  ;;  %v2349_v31 = vadd.f32 %v2348_v17, %v9862_v35  ;;  %v9867_v35 = vld [vmem:[#allocation210_spill] sm:$0xff] }
 0x3e7   :  { %5674 = vst [vmem:[#allocation14 + $0x170] sm:$0xff] %v5610_v40  ;;  %v2562_v21 = vadd.f32 %v2561_v37, %v2344_v19  ;;  %v2929_v56 = vpop.f32.mrf.mxu3 }
 0x3e8   :  { %3069 = vmatmul.f32.gmra.mxu0 %v9858_v28 }
 0x3e9   :  { %v2769_v18 = vadd.f32 %v2768_v11, %v2562_v21  ;;  %3378 = vmatmul.f32.gmra.mxu1 %v9859_v39  ;;  %v4590_v21 = vsub.f32 %v8179_v55, %v9343_v54 }
 0x3ea   :  { %3772 = vmatmul.f32.gmra.mxu3 %v9860_v62  ;;  %v9863_v62 = vld [vmem:[#allocation63_spill] sm:$0xff] }
 0x3eb   :  { %v2930_v6 = vadd.f32 %v2929_v56, %v2769_v18  ;;  %3569 = vmatmul.f32.gmra.mxu2 %v9861_v44  ;;  %v4591_v18 = vand.u32 4294901760, %v4590_v21  ;;  %v9864_v44 = vld [vmem:[#allocation53_spill] sm:$0xff] }
 0x3ed   :  { %v5612_v19 = vadd.f32 %v2930_v6, %v212_v4  ;;  %v2353_v40 = vpop.f32.mrf.mxu0  ;;  %4592 = vmatpush.msra.mxu3 %v4591_v18  ;;  %v9865_v4 = vld [vmem:[#allocation60_spill] sm:$0xff]  ;;  %v9866_v6 = vld [vmem:[#allocation58_spill] sm:$0xff] }
 0x3ee   :  { %v2567_v37 = vpop.f32.mrf.mxu1  ;;  %v2772_v56 = vpop.f32.mrf.mxu2  ;;  %v2354_v26 = vadd.f32 %v2353_v40, %v9867_v35  ;;  %v216_v18 = vld [vmem:[#allocation14 + $0x1a0] sm:$0xff] }
 0x3ef   :  { %5676 = vst [vmem:[#allocation14 + $0x180] sm:$0xff] %v5612_v19  ;;  %v2568_v11 = vadd.f32 %v2567_v37, %v2349_v31  ;;  %v2933_v49 = vpop.f32.mrf.mxu3 }
 0x3f0   :  { %3077 = vmatmul.f32.gmra.mxu0 %v9863_v62 }
 0x3f1   :  { %v2773_v28 = vadd.f32 %v2772_v56, %v2568_v11  ;;  %3382 = vmatmul.f32.gmra.mxu1 %v9864_v44  ;;  %v341_v56 = vld [vmem:[#allocation12 + $0x188] sm:$0xff] }
 0x3f2   :  { %3778 = vmatmul.f32.gmra.mxu3 %v9865_v4  ;;  %v8195_v62 = vand.u32 4294901760, %v341_v56 }
 0x3f3   :  { %v2934_v17 = vadd.f32 %v2933_v49, %v2773_v28  ;;  %3574 = vmatmul.f32.gmra.mxu2 %v9866_v6  ;;  %v9869_v49 = vld [vmem:[#allocation57_spill] sm:$0xff] }
 0x3f4   :  { %4277 = vmatpush.msra.mxu2 %v8195_v62  ;;  %v8201_v40 = vsub.f32 %v341_v56, %v8195_v62  ;;  %5000 = vmatpush.msrb.mxu1 %v8195_v62 }
 0x3f5   :  { %v5614_v54 = vadd.f32 %v2934_v17, %v214_v7  ;;  %v2358_v19 = vpop.f32.mrf.mxu0 }
 0x3f6   :  { %v2573_v31 = vpop.f32.mrf.mxu1  ;;  %v2776_v21 = vpop.f32.mrf.mxu2  ;;  %v9348_v28 = vand.u32 4294901760, %v8201_v40  ;;  %4799 = vmatpush.msrb.mxu0 %v8201_v40 }
 0x3f7   :  { %5678 = vst [vmem:[#allocation14 + $0x190] sm:$0xff] %v5614_v54  ;;  %v2574_v37 = vadd.f32 %v2573_v31, %v2354_v26  ;;  %v2937_v11 = vpop.f32.mrf.mxu3  ;;  %v9870_v26 = vld [vmem:[#allocation64_spill] sm:$0xff]  ;;  %v9871_v54 = vld [vmem:[#allocation62_spill] sm:$0xff] }
 0x3f8   :  { %3085 = vmatmul.f32.gmra.mxu0 %v9868_v13  ;;  %v9872_v13 = vld [vmem:[#allocation215_spill] sm:$0xff]  ;;  %v4596_v31 = vsub.f32 %v8201_v40, %v9348_v28 }
 0x3f9   :  { %v2777_v60 = vadd.f32 %v2776_v21, %v2574_v37  ;;  %3386 = vmatmul.f32.gmra.mxu1 %v9869_v49  ;;  %v2359_v17 = vadd.f32 %v2358_v19, %v9872_v13  ;;  %v9877_v13 = vld [vmem:[#allocation220_spill] sm:$0xff] }
 0x3fa   :  { %3784 = vmatmul.f32.gmra.mxu3 %v9870_v26  ;;  %v9873_v26 = vld [vmem:[#allocation71_spill] sm:$0xff] }
 0x3fb   :  { %v2938_v7 = vadd.f32 %v2937_v11, %v2777_v60  ;;  %3579 = vmatmul.f32.gmra.mxu2 %v9871_v54  ;;  %v4597_v11 = vand.u32 4294901760, %v4596_v31  ;;  %v9874_v54 = vld [vmem:[#allocation61_spill] sm:$0xff] }
 0x3fd   :  { %v5616_v4 = vadd.f32 %v2938_v7, %v216_v18  ;;  %v2363_v6 = vpop.f32.mrf.mxu0  ;;  %4598 = vmatpush.msra.mxu3 %v4597_v11  ;;  %v9875_v18 = vld [vmem:[#allocation68_spill] sm:$0xff]  ;;  %v9876_v7 = vld [vmem:[#allocation66_spill] sm:$0xff] }
 0x3fe   :  { %v2579_v35 = vpop.f32.mrf.mxu1  ;;  %v2780_v60 = vpop.f32.mrf.mxu2  ;;  %v2364_v0 = vadd.f32 %v2363_v6, %v9877_v13  ;;  %v220_v11 = vld [vmem:[#allocation14 + $0x1c0] sm:$0xff] }
 0x3ff   :  { %5680 = vst [vmem:[#allocation14 + $0x1a0] sm:$0xff] %v5616_v4  ;;  %v2580_v37 = vadd.f32 %v2579_v35, %v2359_v17  ;;  %v2941_v21 = vpop.f32.mrf.mxu3 }
 0x400   :  { %3093 = vmatmul.f32.gmra.mxu0 %v9873_v26 }
 0x401   :  { %v2781_v56 = vadd.f32 %v2780_v60, %v2580_v37  ;;  %3390 = vmatmul.f32.gmra.mxu1 %v9874_v54  ;;  %v339_v60 = vld [vmem:[#allocation12 + $0x178] sm:$0xff] }
 0x402   :  { %3790 = vmatmul.f32.gmra.mxu3 %v9875_v18  ;;  %v8217_v26 = vand.u32 4294901760, %v339_v60 }
 0x403   :  { %v2942_v19 = vadd.f32 %v2941_v21, %v2781_v56  ;;  %3584 = vmatmul.f32.gmra.mxu2 %v9876_v7  ;;  %v9879_v21 = vld [vmem:[#allocation65_spill] sm:$0xff] }
 0x404   :  { %4279 = vmatpush.msra.mxu2 %v8217_v26  ;;  %v8223_v6 = vsub.f32 %v339_v60, %v8217_v26  ;;  %5002 = vmatpush.msrb.mxu1 %v8217_v26 }
 0x405   :  { %v5618_v28 = vadd.f32 %v2942_v19, %v218_v48  ;;  %v2368_v4 = vpop.f32.mrf.mxu0 }
 0x406   :  { %v2585_v17 = vpop.f32.mrf.mxu1  ;;  %v2784_v31 = vpop.f32.mrf.mxu2  ;;  %v9351_v56 = vand.u32 4294901760, %v8223_v6  ;;  %4802 = vmatpush.msrb.mxu0 %v8223_v6 }
 0x407   :  { %5682 = vst [vmem:[#allocation14 + $0x1b0] sm:$0xff] %v5618_v28  ;;  %v2586_v35 = vadd.f32 %v2585_v17, %v2364_v0  ;;  %v2945_v37 = vpop.f32.mrf.mxu3  ;;  %v9880_v0 = vld [vmem:[#allocation72_spill] sm:$0xff]  ;;  %v9881_v28 = vld [vmem:[#allocation70_spill] sm:$0xff] }
 0x408   :  { %3101 = vmatmul.f32.gmra.mxu0 %v9878_v29  ;;  %v9882_v29 = vld [vmem:[#allocation225_spill] sm:$0xff]  ;;  %v4602_v17 = vsub.f32 %v8223_v6, %v9351_v56 }
 0x409   :  { %v2785_v42 = vadd.f32 %v2784_v31, %v2586_v35  ;;  %3394 = vmatmul.f32.gmra.mxu1 %v9879_v21  ;;  %v2369_v19 = vadd.f32 %v2368_v4, %v9882_v29  ;;  %v337_v29 = vld [vmem:[#allocation12 + $0x168] sm:$0xff] }
 0x40a   :  { %3796 = vmatmul.f32.gmra.mxu3 %v9880_v0  ;;  %v9883_v0 = vld [vmem:[#allocation79_spill] sm:$0xff] }
 0x40b   :  { %v2946_v48 = vadd.f32 %v2945_v37, %v2785_v42  ;;  %3589 = vmatmul.f32.gmra.mxu2 %v9881_v28  ;;  %v4603_v37 = vand.u32 4294901760, %v4602_v17  ;;  %v9884_v28 = vld [vmem:[#allocation69_spill] sm:$0xff] }
 0x40d   :  { %v5620_v18 = vadd.f32 %v2946_v48, %v220_v11  ;;  %v2373_v7 = vpop.f32.mrf.mxu0  ;;  %4604 = vmatpush.msra.mxu3 %v4603_v37  ;;  %v9885_v11 = vld [vmem:[#allocation76_spill] sm:$0xff]  ;;  %v9886_v48 = vld [vmem:[#allocation74_spill] sm:$0xff] }
 0x40e   :  { %v2591_v13 = vpop.f32.mrf.mxu1  ;;  %v2788_v42 = vpop.f32.mrf.mxu2  ;;  %v2374_v56 = vadd.f32 %v2373_v7, %v9887_v38  ;;  %v9889_v38 = vld [vmem:[#allocation73_spill] sm:$0xff]  ;;  %v224_v7 = vld [vmem:[#allocation14 + $0x1e0] sm:$0xff] }
 0x40f   :  { %5684 = vst [vmem:[#allocation14 + $0x1c0] sm:$0xff] %v5620_v18  ;;  %v2592_v35 = vadd.f32 %v2591_v13, %v2369_v19  ;;  %v2949_v31 = vpop.f32.mrf.mxu3  ;;  %v8239_v19 = vand.u32 4294901760, %v337_v29 }
 0x410   :  { %3109 = vmatmul.f32.gmra.mxu0 %v9883_v0 }
 0x411   :  { %v2789_v60 = vadd.f32 %v2788_v42, %v2592_v35  ;;  %3398 = vmatmul.f32.gmra.mxu1 %v9884_v28  ;;  %4281 = vmatpush.msra.mxu2 %v8239_v19 }
 0x412   :  { %3802 = vmatmul.f32.gmra.mxu3 %v9885_v11  ;;  %5004 = vmatpush.msrb.mxu1 %v8239_v19 }
 0x413   :  { %v2950_v4 = vadd.f32 %v2949_v31, %v2789_v60  ;;  %3594 = vmatmul.f32.gmra.mxu2 %v9886_v48  ;;  %v8243_v31 = vsub.f32 %v337_v29, %v8239_v19  ;;  %v9888_v60 = vld [vmem:[#allocation83_spill] sm:$0xff]  ;;  %v9891_v48 = vld [vmem:[#allocation78_spill] sm:$0xff] }
 0x414   :  { %v9892_v29 = vld [vmem:[#allocation235_spill] sm:$0xff] }
 0x415   :  { %v5622_v18 = vadd.f32 %v2950_v4, %v222_v23  ;;  %v2378_v13 = vpop.f32.mrf.mxu0  ;;  %v9353_v23 = vand.u32 4294901760, %v8243_v31  ;;  %4805 = vmatpush.msrb.mxu0 %v8243_v31  ;;  %v9890_v4 = vld [vmem:[#allocation80_spill] sm:$0xff] }
 0x416   :  { %v2597_v17 = vpop.f32.mrf.mxu1  ;;  %v2792_v42 = vpop.f32.mrf.mxu2 }
 0x417   :  { %5686 = vst [vmem:[#allocation14 + $0x1d0] sm:$0xff] %v5622_v18  ;;  %v2598_v35 = vadd.f32 %v2597_v17, %v2374_v56  ;;  %v2953_v0 = vpop.f32.mrf.mxu3  ;;  %v4608_v11 = vsub.f32 %v8243_v31, %v9353_v23  ;;  %v2379_v18 = vadd.f32 %v2378_v13, %v9892_v29  ;;  %v335_v13 = vld [vmem:[#allocation12 + $0x158] sm:$0xff] }
 0x418   :  { %3117 = vmatmul.f32.gmra.mxu0 %v9888_v60 }
 0x419   :  { %v2793_v37 = vadd.f32 %v2792_v42, %v2598_v35  ;;  %3402 = vmatmul.f32.gmra.mxu1 %v9889_v38  ;;  %v4609_v35 = vand.u32 4294901760, %v4608_v11 }
 0x41a   :  { %3808 = vmatmul.f32.gmra.mxu3 %v9890_v4  ;;  %v9894_v4 = vld [vmem:[#allocation77_spill] sm:$0xff] }
 0x41b   :  { %v2954_v56 = vadd.f32 %v2953_v0, %v2793_v37  ;;  %3599 = vmatmul.f32.gmra.mxu2 %v9891_v48  ;;  %4610 = vmatpush.msra.mxu3 %v4609_v35  ;;  %v9893_v37 = vld [vmem:[#allocation87_spill] sm:$0xff]  ;;  %v9896_v48 = vld [vmem:[#allocation82_spill] sm:$0xff]  ;;  %v9898_v35 = vld [vmem:[#allocation81_spill] sm:$0xff] }
 0x41d   :  { %v5624_v17 = vadd.f32 %v2954_v56, %v224_v7  ;;  %v2998_v60 = vpop.f32.mrf.mxu0  ;;  %v8260_v56 = vand.u32 4294901760, %v335_v13 }
 0x41e   :  { %v2603_v42 = vpop.f32.mrf.mxu1  ;;  %v2796_v22 = vpop.f32.mrf.mxu2 }
 0x41f   :  { %5688 = vst [vmem:[#allocation14 + $0x1e0] sm:$0xff] %v5624_v17  ;;  %v2604_v41 = vadd.f32 %v2603_v42, %v2379_v18  ;;  %v2957_v45 = vpop.f32.mrf.mxu3  ;;  %4283 = vmatpush.msra.mxu2 %v8260_v56  ;;  %5006 = vmatpush.msrb.mxu1 %v8260_v56  ;;  %v9900_v42 = vld [vmem:[#allocation88_spill] sm:$0xff] }
 0x420   :  { %3125 = vmatmul.f32.gmra.mxu0 %v9893_v37 }
 0x421   :  { %v2797_v0 = vadd.f32 %v2796_v22, %v2604_v41  ;;  %3406 = vmatmul.f32.gmra.mxu1 %v9894_v4  ;;  %v8264_v22 = vsub.f32 %v335_v13, %v8260_v56 }
 0x422   :  { %3814 = vmatmul.f32.gmra.mxu3 %v9895_v57 }
 0x423   :  { %v2958_v23 = vadd.f32 %v2957_v45, %v2797_v0  ;;  %3604 = vmatmul.f32.gmra.mxu2 %v9896_v48  ;;  %v9897_v45 = vld [vmem:[#allocation91_spill] sm:$0xff]  ;;  %4808 = vmatpush.msrb.mxu0 %v8264_v22  ;;  %v9901_v0 = vld [vmem:[#allocation86_spill] sm:$0xff] }
 0x425   :  { %v5626_v7 = vadd.f32 %v2958_v23, %v226_v34  ;;  %v3006_v11 = vpop.f32.mrf.mxu0  ;;  %v9355_v34 = vand.u32 4294901760, %v8264_v22 }
 0x426   :  { %v3347_v29 = vpop.f32.mrf.mxu1  ;;  %v3525_v17 = vpop.f32.mrf.mxu2 }
 0x427   :  { %5690 = vst [vmem:[#allocation14 + $0x1f0] sm:$0xff] %v5626_v7  ;;  %v3348_v18 = vadd.f32 %v3347_v29, %v2998_v60  ;;  %v3719_v41 = vpop.f32.mrf.mxu3  ;;  %v4614_v60 = vsub.f32 %v8264_v22, %v9355_v34  ;;  %v333_v34 = vld [vmem:[#allocation12 + $0x148] sm:$0xff] }
 0x428   :  { %3133 = vmatmul.f32.gmra.mxu0 %v9897_v45  ;;  %v9902_v45 = vld [vmem:[#allocation96_spill] sm:$0xff] }
 0x429   :  { %v3526_v57 = vadd.f32 %v3525_v17, %v3348_v18  ;;  %3410 = vmatmul.f32.gmra.mxu1 %v9898_v35  ;;  %v4615_v37 = vand.u32 4294901760, %v4614_v60 }
 0x42a   :  { %3820 = vmatmul.f32.gmra.mxu3 %v9900_v42  ;;  %v9905_v42 = vld [vmem:[#allocation92_spill] sm:$0xff] }
 0x42b   :  { %v8271_v23 = vadd.f32 %v3719_v41, %v3526_v57  ;;  %3609 = vmatmul.f32.gmra.mxu2 %v9901_v0  ;;  %4616 = vmatpush.msra.mxu3 %v4615_v37  ;;  %v9903_v41 = vld [vmem:[#allocation85_spill] sm:$0xff]  ;;  %v8284_v0 = vand.u32 4294901760, %v333_v34 }
 0x42d   :  { %9899 = vst [vmem:[#allocation239_spill] sm:$0xff] %v8271_v23  ;;  %v3014_v48 = vpop.f32.mrf.mxu0  ;;  %4285 = vmatpush.msra.mxu2 %v8284_v0  ;;  %v8288_v37 = vsub.f32 %v333_v34, %v8284_v0  ;;  %5008 = vmatpush.msrb.mxu1 %v8284_v0 }
 0x42e   :  { %v3351_v13 = vpop.f32.mrf.mxu1  ;;  %v3530_v29 = vpop.f32.mrf.mxu2 }
 0x42f   :  { %v3352_v7 = vadd.f32 %v3351_v13, %v3006_v11  ;;  %v3725_v18 = vpop.f32.mrf.mxu3  ;;  %4811 = vmatpush.msrb.mxu0 %v8288_v37 }
 0x430   :  { %3141 = vmatmul.f32.gmra.mxu0 %v9902_v45 }
 0x431   :  { %v3531_v17 = vadd.f32 %v3530_v29, %v3352_v7  ;;  %3414 = vmatmul.f32.gmra.mxu1 %v9903_v41  ;;  %v9907_v29 = vld [vmem:[#allocation101_spill] sm:$0xff] }
 0x432   :  { %3826 = vmatmul.f32.gmra.mxu3 %v9905_v42 }
 0x433   :  { %v8280_v57 = vadd.f32 %v3725_v18, %v3531_v17  ;;  %3614 = vmatmul.f32.gmra.mxu2 %v9906_v16  ;;  %v9908_v18 = vld [vmem:[#allocation89_spill] sm:$0xff]  ;;  %v9364_v16 = vand.u32 4294901760, %v8288_v37 }
 0x435   :  { %9904 = vst [vmem:[#allocation243_spill] sm:$0xff] %v8280_v57  ;;  %v3022_v60 = vpop.f32.mrf.mxu0  ;;  %v4620_v34 = vsub.f32 %v8288_v37, %v9364_v16  ;;  %v331_v16 = vld [vmem:[#allocation12 + $0x138] sm:$0xff] }
 0x436   :  { %v3355_v14 = vpop.f32.mrf.mxu1  ;;  %v3535_v13 = vpop.f32.mrf.mxu2 }
 0x437   :  { %v3356_v11 = vadd.f32 %v3355_v14, %v3014_v48  ;;  %v3731_v52 = vpop.f32.mrf.mxu3  ;;  %v9910_v14 = vld [vmem:[#allocation97_spill] sm:$0xff]  ;;  %v9911_v48 = vld [vmem:[#allocation94_spill] sm:$0xff]  ;;  %v4621_v45 = vand.u32 4294901760, %v4620_v34 }
 0x438   :  { %3149 = vmatmul.f32.gmra.mxu0 %v9907_v29 }
 0x439   :  { %v3536_v7 = vadd.f32 %v3535_v13, %v3356_v11  ;;  %3418 = vmatmul.f32.gmra.mxu1 %v9908_v18  ;;  %4622 = vmatpush.msra.mxu3 %v4621_v45  ;;  %v9918_v45 = vld [vmem:[#allocation98_spill] sm:$0xff] }
 0x43a   :  { %3832 = vmatmul.f32.gmra.mxu3 %v9910_v14  ;;  %v9915_v14 = vld [vmem:[#allocation102_spill] sm:$0xff] }
 0x43b   :  { %v8295_v17 = vadd.f32 %v3731_v52, %v3536_v7  ;;  %3619 = vmatmul.f32.gmra.mxu2 %v9911_v48  ;;  %v9913_v52 = vld [vmem:[#allocation93_spill] sm:$0xff]  ;;  %v8308_v48 = vand.u32 4294901760, %v331_v16 }
 0x43d   :  { %9909 = vst [vmem:[#allocation247_spill] sm:$0xff] %v8295_v17  ;;  %v3030_v42 = vpop.f32.mrf.mxu0  ;;  %4287 = vmatpush.msra.mxu2 %v8308_v48  ;;  %5010 = vmatpush.msrb.mxu1 %v8308_v48 }
 0x43e   :  { %v3359_v11 = vpop.f32.mrf.mxu1  ;;  %v3540_v29 = vpop.f32.mrf.mxu2 }
 0x43f   :  { %v3360_v13 = vadd.f32 %v3359_v11, %v3022_v60  ;;  %v3737_v15 = vpop.f32.mrf.mxu3 }
 0x440   :  { %3157 = vmatmul.f32.gmra.mxu0 %v9912_v33  ;;  %v8312_v33 = vsub.f32 %v331_v16, %v8308_v48 }
 0x441   :  { %v3541_v3 = vadd.f32 %v3540_v29, %v3360_v13  ;;  %3422 = vmatmul.f32.gmra.mxu1 %v9913_v52  ;;  %v9922_v52 = vld [vmem:[#allocation116_spill] sm:$0xff] }
 0x442   :  { %3838 = vmatmul.f32.gmra.mxu3 %v9915_v14  ;;  %4814 = vmatpush.msrb.mxu0 %v8312_v33 }
 0x443   :  { %v8304_v7 = vadd.f32 %v3737_v15, %v3541_v3  ;;  %3624 = vmatmul.f32.gmra.mxu2 %v9916_v20  ;;  %v9917_v3 = vld [vmem:[#allocation111_spill] sm:$0xff]  ;;  %v9367_v20 = vand.u32 4294901760, %v8312_v33 }
 0x445   :  { %9914 = vst [vmem:[#allocation251_spill] sm:$0xff] %v8304_v7  ;;  %v3038_v34 = vpop.f32.mrf.mxu0  ;;  %v4626_v16 = vsub.f32 %v8312_v33, %v9367_v20  ;;  %v329_v20 = vld [vmem:[#allocation12 + $0x128] sm:$0xff] }
 0x446   :  { %v3363_v10 = vpop.f32.mrf.mxu1  ;;  %v3545_v11 = vpop.f32.mrf.mxu2 }
 0x447   :  { %v3364_v60 = vadd.f32 %v3363_v10, %v3030_v42  ;;  %v3743_v47 = vpop.f32.mrf.mxu3  ;;  %v9920_v10 = vld [vmem:[#allocation107_spill] sm:$0xff]  ;;  %v9921_v42 = vld [vmem:[#allocation104_spill] sm:$0xff]  ;;  %v4627_v29 = vand.u32 4294901760, %v4626_v16 }
 0x448   :  { %3165 = vmatmul.f32.gmra.mxu0 %v9917_v3 }
 0x449   :  { %v3546_v15 = vadd.f32 %v3545_v11, %v3364_v60  ;;  %3426 = vmatmul.f32.gmra.mxu1 %v9918_v45  ;;  %4628 = vmatpush.msra.mxu3 %v4627_v29  ;;  %v9928_v29 = vld [vmem:[#allocation108_spill] sm:$0xff] }
 0x44a   :  { %3844 = vmatmul.f32.gmra.mxu3 %v9920_v10  ;;  %v9925_v10 = vld [vmem:[#allocation112_spill] sm:$0xff] }
 0x44b   :  { %v8319_v13 = vadd.f32 %v3743_v47, %v3546_v15  ;;  %3629 = vmatmul.f32.gmra.mxu2 %v9921_v42  ;;  %v9923_v47 = vld [vmem:[#allocation103_spill] sm:$0xff]  ;;  %v8332_v42 = vand.u32 4294901760, %v329_v20 }
 0x44d   :  { %9919 = vst [vmem:[#allocation255_spill] sm:$0xff] %v8319_v13  ;;  %v3046_v14 = vpop.f32.mrf.mxu0  ;;  %v9926_v13 = vld [vmem:[#allocation109_spill] sm:$0xff]  ;;  %4289 = vmatpush.msra.mxu2 %v8332_v42  ;;  %5012 = vmatpush.msrb.mxu1 %v8332_v42 }
 0x44e   :  { %v3367_v60 = vpop.f32.mrf.mxu1  ;;  %v3550_v3 = vpop.f32.mrf.mxu2 }
 0x44f   :  { %v3368_v11 = vadd.f32 %v3367_v60, %v3038_v34  ;;  %v3749_v45 = vpop.f32.mrf.mxu3 }
 0x450   :  { %3173 = vmatmul.f32.gmra.mxu0 %v9922_v52  ;;  %v8336_v52 = vsub.f32 %v329_v20, %v8332_v42 }
 0x451   :  { %v3551_v7 = vadd.f32 %v3550_v3, %v3368_v11  ;;  %3430 = vmatmul.f32.gmra.mxu1 %v9923_v47  ;;  %v9932_v47 = vld [vmem:[#allocation126_spill] sm:$0xff] }
 0x452   :  { %3850 = vmatmul.f32.gmra.mxu3 %v9925_v10  ;;  %4817 = vmatpush.msrb.mxu0 %v8336_v52 }
 0x453   :  { %v8328_v15 = vadd.f32 %v3749_v45, %v3551_v7  ;;  %3634 = vmatmul.f32.gmra.mxu2 %v9926_v13  ;;  %v9927_v45 = vld [vmem:[#allocation121_spill] sm:$0xff]  ;;  %v9368_v13 = vand.u32 4294901760, %v8336_v52 }
 0x455   :  { %9924 = vst [vmem:[#allocation259_spill] sm:$0xff] %v8328_v15  ;;  %v3054_v16 = vpop.f32.mrf.mxu0  ;;  %v4632_v20 = vsub.f32 %v8336_v52, %v9368_v13  ;;  %v327_v13 = vld [vmem:[#allocation12 + $0x118] sm:$0xff] }
 0x456   :  { %v3371_v17 = vpop.f32.mrf.mxu1  ;;  %v3555_v60 = vpop.f32.mrf.mxu2 }
 0x457   :  { %v3372_v34 = vadd.f32 %v3371_v17, %v3046_v14  ;;  %v3755_v18 = vpop.f32.mrf.mxu3  ;;  %v9930_v17 = vld [vmem:[#allocation117_spill] sm:$0xff]  ;;  %v9931_v14 = vld [vmem:[#allocation114_spill] sm:$0xff]  ;;  %v4633_v3 = vand.u32 4294901760, %v4632_v20 }
 0x458   :  { %3181 = vmatmul.f32.gmra.mxu0 %v9927_v45 }
 0x459   :  { %v3556_v7 = vadd.f32 %v3555_v60, %v3372_v34  ;;  %3434 = vmatmul.f32.gmra.mxu1 %v9928_v29  ;;  %4634 = vmatpush.msra.mxu3 %v4633_v3  ;;  %v9938_v3 = vld [vmem:[#allocation118_spill] sm:$0xff] }
 0x45a   :  { %3856 = vmatmul.f32.gmra.mxu3 %v9930_v17  ;;  %v9935_v17 = vld [vmem:[#allocation122_spill] sm:$0xff] }
 0x45b   :  { %v8343_v11 = vadd.f32 %v3755_v18, %v3556_v7  ;;  %3639 = vmatmul.f32.gmra.mxu2 %v9931_v14  ;;  %v9933_v18 = vld [vmem:[#allocation113_spill] sm:$0xff]  ;;  %v8356_v14 = vand.u32 4294901760, %v327_v13 }
 0x45d   :  { %9929 = vst [vmem:[#allocation263_spill] sm:$0xff] %v8343_v11  ;;  %v3062_v10 = vpop.f32.mrf.mxu0  ;;  %v9936_v11 = vld [vmem:[#allocation119_spill] sm:$0xff]  ;;  %4291 = vmatpush.msra.mxu2 %v8356_v14  ;;  %5014 = vmatpush.msrb.mxu1 %v8356_v14 }
 0x45e   :  { %v3375_v34 = vpop.f32.mrf.mxu1  ;;  %v3560_v45 = vpop.f32.mrf.mxu2 }
 0x45f   :  { %v3376_v60 = vadd.f32 %v3375_v34, %v3054_v16  ;;  %v3761_v29 = vpop.f32.mrf.mxu3 }
 0x460   :  { %3189 = vmatmul.f32.gmra.mxu0 %v9932_v47  ;;  %v8360_v47 = vsub.f32 %v327_v13, %v8356_v14 }
 0x461   :  { %v3561_v15 = vadd.f32 %v3560_v45, %v3376_v60  ;;  %3438 = vmatmul.f32.gmra.mxu1 %v9933_v18  ;;  %v9942_v18 = vld [vmem:[#allocation136_spill] sm:$0xff] }
 0x462   :  { %3862 = vmatmul.f32.gmra.mxu3 %v9935_v17  ;;  %4820 = vmatpush.msrb.mxu0 %v8360_v47 }
 0x463   :  { %v8352_v7 = vadd.f32 %v3761_v29, %v3561_v15  ;;  %3644 = vmatmul.f32.gmra.mxu2 %v9936_v11  ;;  %v9937_v29 = vld [vmem:[#allocation131_spill] sm:$0xff]  ;;  %v9369_v11 = vand.u32 4294901760, %v8360_v47 }
 0x465   :  { %9934 = vst [vmem:[#allocation267_spill] sm:$0xff] %v8352_v7  ;;  %v3070_v20 = vpop.f32.mrf.mxu0  ;;  %v4638_v13 = vsub.f32 %v8360_v47, %v9369_v11  ;;  %v325_v11 = vld [vmem:[#allocation12 + $0x108] sm:$0xff] }
 0x466   :  { %v3379_v57 = vpop.f32.mrf.mxu1  ;;  %v3565_v34 = vpop.f32.mrf.mxu2 }
 0x467   :  { %v3380_v16 = vadd.f32 %v3379_v57, %v3062_v10  ;;  %v3767_v41 = vpop.f32.mrf.mxu3  ;;  %v9940_v57 = vld [vmem:[#allocation127_spill] sm:$0xff]  ;;  %v9941_v10 = vld [vmem:[#allocation124_spill] sm:$0xff]  ;;  %v4639_v45 = vand.u32 4294901760, %v4638_v13 }
 0x468   :  { %3197 = vmatmul.f32.gmra.mxu0 %v9937_v29 }
 0x469   :  { %v3566_v15 = vadd.f32 %v3565_v34, %v3380_v16  ;;  %3442 = vmatmul.f32.gmra.mxu1 %v9938_v3  ;;  %4640 = vmatpush.msra.mxu3 %v4639_v45  ;;  %v9948_v45 = vld [vmem:[#allocation128_spill] sm:$0xff] }
 0x46a   :  { %3868 = vmatmul.f32.gmra.mxu3 %v9940_v57  ;;  %v9944_v57 = vld [vmem:[#allocation132_spill] sm:$0xff] }
 0x46b   :  { %v8367_v60 = vadd.f32 %v3767_v41, %v3566_v15  ;;  %3649 = vmatmul.f32.gmra.mxu2 %v9941_v10  ;;  %v9943_v41 = vld [vmem:[#allocation123_spill] sm:$0xff]  ;;  %v8380_v10 = vand.u32 4294901760, %v325_v11 }
 0x46d   :  { %9939 = vst [vmem:[#allocation285_spill] sm:$0xff] %v8367_v60  ;;  %v3078_v17 = vpop.f32.mrf.mxu0  ;;  %v9945_v60 = vld [vmem:[#allocation129_spill] sm:$0xff]  ;;  %4293 = vmatpush.msra.mxu2 %v8380_v10  ;;  %5016 = vmatpush.msrb.mxu1 %v8380_v10 }
 0x46e   :  { %v3383_v16 = vpop.f32.mrf.mxu1  ;;  %v3570_v29 = vpop.f32.mrf.mxu2 }
 0x46f   :  { %v3384_v34 = vadd.f32 %v3383_v16, %v3070_v20  ;;  %v3773_v3 = vpop.f32.mrf.mxu3 }
 0x470   :  { %3205 = vmatmul.f32.gmra.mxu0 %v9942_v18  ;;  %v8384_v18 = vsub.f32 %v325_v11, %v8380_v10  ;;  %v9950_v11 = vld [vmem:[#allocation137_spill] sm:$0xff] }
 0x471   :  { %v3571_v7 = vadd.f32 %v3570_v29, %v3384_v34  ;;  %3446 = vmatmul.f32.gmra.mxu1 %v9943_v41  ;;  %v9951_v29 = vld [vmem:[#allocation134_spill] sm:$0xff] }
 0x472   :  { %3874 = vmatmul.f32.gmra.mxu3 %v9944_v57  ;;  %v9370_v34 = vand.u32 4294901760, %v8384_v18  ;;  %4823 = vmatpush.msrb.mxu0 %v8384_v18 }
 0x473   :  { %v8376_v15 = vadd.f32 %v3773_v3, %v3571_v7  ;;  %3654 = vmatmul.f32.gmra.mxu2 %v9945_v60  ;;  %v9946_v7 = vand.u32 4294901760, %v8016_v25  ;;  %v9947_v60 = vld [vmem:[#allocation141_spill] sm:$0xff] }
 0x474   :  { %v4644_v25 = vsub.f32 %v8384_v18, %v9370_v34  ;;  %v9955_v34 = vld [vmem:[#allocation133_spill] sm:$0xff] }
 0x475   :  { %v3086_v13 = vpop.f32.mrf.mxu0  ;;  %5213 = vmatpush.msrb.mxu2 %v9946_v7 }
 0x476   :  { %v3387_v23 = vpop.f32.mrf.mxu1  ;;  %v3575_v16 = vpop.f32.mrf.mxu2  ;;  %v4645_v57 = vand.u32 4294901760, %v4644_v25 }
 0x477   :  { %v3388_v20 = vadd.f32 %v3387_v23, %v3078_v17  ;;  %v3779_v35 = vpop.f32.mrf.mxu3  ;;  %v9949_v23 = vand.u32 4294901760, %v8056_v63 }
 0x478   :  { %3213 = vmatmul.f32.gmra.mxu0 %v9947_v60  ;;  %4646 = vmatpush.msra.mxu3 %v4645_v57 }
 0x479   :  { %v3576_v3 = vadd.f32 %v3575_v16, %v3388_v20  ;;  %3450 = vmatmul.f32.gmra.mxu1 %v9948_v45  ;;  %5217 = vmatpush.msrb.mxu2 %v9949_v23  ;;  %v9952_v20 = vand.u32 4294901760, %v8089_v46  ;;  %v9956_v46 = vand.u32 4294901760, %v8135_v24  ;;  %v9960_v24 = vand.u32 4294901760, %v8179_v55 }
 0x47a   :  { %3880 = vmatmul.f32.gmra.mxu3 %v9950_v11  ;;  %v9954_v11 = vld [vmem:[#allocation146_spill] sm:$0xff] }
 0x47b   :  { %v8395_v17 = vadd.f32 %v3779_v35, %v3576_v3  ;;  %3659 = vmatmul.f32.gmra.mxu2 %v9951_v29  ;;  %v9953_v35 = vand.u32 4294901760, %v8113_v12  ;;  %5404 = vmatpush.msrb.mxu3 %v8008_v53  ;;  %v9958_v29 = vld [vmem:[#allocation139_spill] sm:$0xff]  ;;  %v9959_v53 = vand.u32 4294901760, %v8157_v9 }
 0x47c   :  { %5221 = vmatpush.msrb.mxu2 %v9952_v20 }
 0x47d   :  { %v3094_v16 = vpop.f32.mrf.mxu0  ;;  %5406 = vmatpush.msrb.mxu3 %v8049_v51 }
 0x47e   :  { %v3391_v7 = vpop.f32.mrf.mxu1  ;;  %v3580_v60 = vpop.f32.mrf.mxu2  ;;  %5225 = vmatpush.msrb.mxu2 %v9953_v35 }
 0x47f   :  { %v3392_v63 = vadd.f32 %v3391_v7, %v3086_v13  ;;  %v3785_v23 = vpop.f32.mrf.mxu3  ;;  %v9957_v13 = vld [vmem:[#allocation142_spill] sm:$0xff]  ;;  %5408 = vmatpush.msrb.mxu3 %v8083_v30  ;;  %v9963_v30 = vand.u32 4294901760, %v8201_v40  ;;  %v9967_v40 = vand.u32 4294901760, %v8243_v31 }
 0x480   :  { %3221 = vmatmul.f32.gmra.mxu0 %v9954_v11  ;;  %5229 = vmatpush.msrb.mxu2 %v9956_v46 }
 0x481   :  { %v3581_v3 = vadd.f32 %v3580_v60, %v3392_v63  ;;  %3454 = vmatmul.f32.gmra.mxu1 %v9955_v34  ;;  %5410 = vmatpush.msrb.mxu3 %v8107_v1  ;;  %v9961_v60 = vld [vmem:[#allocation150_spill] sm:$0xff]  ;;  %v9964_v1 = vld [vmem:[#allocation147_spill] sm:$0xff] }
 0x482   :  { %3886 = vmatmul.f32.gmra.mxu3 %v9957_v13  ;;  %5233 = vmatpush.msrb.mxu2 %v9959_v53  ;;  %v9968_v13 = vld [vmem:[#allocation154_spill] sm:$0xff]  ;;  %v9972_v53 = vld [vmem:[#allocation149_spill] sm:$0xff] }
 0x483   :  { %v8412_v25 = vadd.f32 %v3785_v23, %v3581_v3  ;;  %3664 = vmatmul.f32.gmra.mxu2 %v9958_v29  ;;  %5412 = vmatpush.msrb.mxu3 %v8129_v61  ;;  %v9962_v23 = vld [vmem:[#allocation138_spill] sm:$0xff]  ;;  %v9966_v61 = vand.u32 4294901760, %v8223_v6  ;;  %v9969_v29 = vld [vmem:[#allocation143_spill] sm:$0xff] }
 0x484   :  { %5237 = vmatpush.msrb.mxu2 %v9960_v24  ;;  %v9976_v24 = vld [vmem:[#allocation148_spill] sm:$0xff] }
 0x485   :  { %v3102_v12 = vpop.f32.mrf.mxu0  ;;  %5414 = vmatpush.msrb.mxu3 %v8151_v8 }
 0x486   :  { %v3395_v57 = vpop.f32.mrf.mxu1  ;;  %v3585_v51 = vpop.f32.mrf.mxu2  ;;  %5241 = vmatpush.msrb.mxu2 %v9963_v30 }
 0x487   :  { %v3396_v20 = vadd.f32 %v3395_v57, %v3094_v16  ;;  %v3791_v7 = vpop.f32.mrf.mxu3  ;;  %v9965_v16 = vld [vmem:[#allocation144_spill] sm:$0xff]  ;;  %5416 = vmatpush.msrb.mxu3 %v8173_v27  ;;  %v9970_v27 = vand.u32 4294901760, %v8264_v22  ;;  %v9974_v22 = vand.u32 4294901760, %v8312_v33 }
 0x488   :  { %3229 = vmatmul.f32.gmra.mxu0 %v9961_v60  ;;  %5245 = vmatpush.msrb.mxu2 %v9966_v61  ;;  %v9982_v61 = vld [vmem:[#allocation152_spill] sm:$0xff] }
 0x489   :  { %v3586_v63 = vadd.f32 %v3585_v51, %v3396_v20  ;;  %3458 = vmatmul.f32.gmra.mxu1 %v9962_v23  ;;  %5418 = vmatpush.msrb.mxu3 %v8195_v62  ;;  %v9971_v62 = vld [vmem:[#allocation151_spill] sm:$0xff] }
 0x48a   :  { %3892 = vmatmul.f32.gmra.mxu3 %v9964_v1  ;;  %5249 = vmatpush.msrb.mxu2 %v9967_v40 }
 0x48b   :  { %v8428_v9 = vadd.f32 %v3791_v7, %v3586_v63  ;;  %3669 = vmatmul.f32.gmra.mxu2 %v9965_v16  ;;  %5420 = vmatpush.msrb.mxu3 %v8217_v26  ;;  %v9973_v26 = vand.u32 4294901760, %v8288_v37  ;;  %v9975_v7 = vld [vmem:[#allocation158_spill] sm:$0xff]  ;;  %v9979_v63 = vld [vmem:[#allocation153_spill] sm:$0xff] }
 0x48c   :  { %5253 = vmatpush.msrb.mxu2 %v9970_v27 }
 0x48d   :  { %v3110_v55 = vpop.f32.mrf.mxu0  ;;  %5422 = vmatpush.msrb.mxu3 %v8239_v19 }
 0x48e   :  { %v3399_v35 = vpop.f32.mrf.mxu1  ;;  %v3590_v8 = vpop.f32.mrf.mxu2  ;;  %5257 = vmatpush.msrb.mxu2 %v9973_v26 }
 0x48f   :  { %v3400_v3 = vadd.f32 %v3399_v35, %v3102_v12  ;;  %v3797_v11 = vpop.f32.mrf.mxu3  ;;  %5424 = vmatpush.msrb.mxu3 %v8260_v56  ;;  %v9977_v56 = vand.u32 4294901760, %v8336_v52 }
 0x490   :  { %3237 = vmatmul.f32.gmra.mxu0 %v9968_v13  ;;  %5261 = vmatpush.msrb.mxu2 %v9974_v22  ;;  %v9986_v13 = vld [vmem:[#allocation166_spill] sm:$0xff] }
 0x491   :  { %v3591_v46 = vadd.f32 %v3590_v8, %v3400_v3  ;;  %3462 = vmatmul.f32.gmra.mxu1 %v9969_v29  ;;  %5426 = vmatpush.msrb.mxu3 %v8284_v0  ;;  %v9978_v0 = vld [vmem:[#allocation155_spill] sm:$0xff] }
 0x492   :  { %3898 = vmatmul.f32.gmra.mxu3 %v9971_v62  ;;  %5265 = vmatpush.msrb.mxu2 %v9977_v56 }
 0x493   :  { %v8444_v6 = vadd.f32 %v3797_v11, %v3591_v46  ;;  %3674 = vmatmul.f32.gmra.mxu2 %v9972_v53  ;;  %5428 = vmatpush.msrb.mxu3 %v8308_v48  ;;  %v9980_v48 = vand.u32 4294901760, %v8360_v47  ;;  %v9984_v47 = vld [vmem:[#allocation162_spill] sm:$0xff]  ;;  %v9985_v46 = vld [vmem:[#allocation160_spill] sm:$0xff] }
 0x495   :  { %v3118_v31 = vpop.f32.mrf.mxu0  ;;  %5430 = vmatpush.msrb.mxu3 %v8332_v42  ;;  %5269 = vmatpush.msrb.mxu2 %v9980_v48  ;;  %v9981_v42 = vand.u32 4294901760, %v8384_v18  ;;  %v9989_v48 = vld [vmem:[#allocation168_spill] sm:$0xff] }
 0x496   :  { %v3403_v12 = vpop.f32.mrf.mxu1  ;;  %v3595_v19 = vpop.f32.mrf.mxu2 }
 0x497   :  { %v3404_v57 = vadd.f32 %v3403_v12, %v3110_v55  ;;  %v3803_v20 = vpop.f32.mrf.mxu3  ;;  %5432 = vmatpush.msrb.mxu3 %v8356_v14  ;;  %5273 = vmatpush.msrb.mxu2 %v9981_v42  ;;  %v9983_v14 = vld [vmem:[#allocation156_spill] sm:$0xff] }
 0x498   :  { %3245 = vmatmul.f32.gmra.mxu0 %v9975_v7 }
 0x499   :  { %v3596_v51 = vadd.f32 %v3595_v19, %v3404_v57  ;;  %3466 = vmatmul.f32.gmra.mxu1 %v9976_v24  ;;  %5434 = vmatpush.msrb.mxu3 %v8380_v10  ;;  %v9987_v19 = vld [vmem:[#allocation164_spill] sm:$0xff] }
 0x49a   :  { %3904 = vmatmul.f32.gmra.mxu3 %v9978_v0 }
 0x49b   :  { %v8460_v37 = vadd.f32 %v3803_v20, %v3596_v51  ;;  %3679 = vmatmul.f32.gmra.mxu2 %v9979_v63 }
 0x49d   :  { %v3126_v33 = vpop.f32.mrf.mxu0 }
 0x49e   :  { %v3407_v60 = vpop.f32.mrf.mxu1  ;;  %v3600_v52 = vpop.f32.mrf.mxu2 }
 0x49f   :  { %v3408_v30 = vadd.f32 %v3407_v60, %v3118_v31  ;;  %v3809_v1 = vpop.f32.mrf.mxu3 }
 0x4a0   :  { %3973 = vmatmul.f32.vlgmr.msra.gmra.mxu0 %v9822_v5 }
 0x4a1   :  { %v3601_v16 = vadd.f32 %v3600_v52, %v3408_v30  ;;  %3470 = vmatmul.f32.gmra.mxu1 %v9982_v61 }
 0x4a2   :  { %4648 = vmatmul.f32.vlgmr.msra.gmra.mxu3 %v9983_v14 }
 0x4a3   :  { %v8472_v55 = vadd.f32 %v3809_v1, %v3601_v16  ;;  %4299 = vmatmul.f32.vlgmr.msra.gmra.mxu2 %v9984_v47  ;;  %v9991_v47 = vld [vmem:[#allocation172_spill] sm:$0xff] }
 0x4a5   :  { %v3134_v35 = vpop.f32.mrf.mxu0 }
 0x4a6   :  { %v3411_v3 = vpop.f32.mrf.mxu1  ;;  %v3605_v8 = vpop.f32.mrf.mxu2 }
 0x4a7   :  { %v3412_v10 = vadd.f32 %v3411_v3, %v3126_v33  ;;  %v3815_v11 = vpop.f32.mrf.mxu3 }
 0x4a8   :  { %3977 = vmatmul.f32.gmra.mxu0 %v9826_v50 }
 0x4a9   :  { %v3606_v40 = vadd.f32 %v3605_v8, %v3412_v10  ;;  %4134 = vmatmul.f32.vlgmr.msra.gmra.mxu1 %v9822_v5  ;;  %v9988_v5 = vld [vmem:[#allocation170_spill] sm:$0xff] }
 0x4aa   :  { %4652 = vmatmul.f32.gmra.mxu3 %v9985_v46 }
 0x4ab   :  { %v8478_v18 = vadd.f32 %v3815_v11, %v3606_v40  ;;  %4307 = vmatmul.f32.gmra.mxu2 %v9986_v13 }
 0x4ad   :  { %v3142_v27 = vpop.f32.mrf.mxu0 }
 0x4ae   :  { %v3415_v62 = vpop.f32.mrf.mxu1  ;;  %v3610_v26 = vpop.f32.mrf.mxu2 }
 0x4af   :  { %v3416_v53 = vadd.f32 %v3415_v62, %v3134_v35  ;;  %v3821_v31 = vpop.f32.mrf.mxu3 }
 0x4b0   :  { %3981 = vmatmul.f32.gmra.mxu0 %v9830_v2 }
 0x4b1   :  { %v3611_v12 = vadd.f32 %v3610_v26, %v3416_v53  ;;  %4138 = vmatmul.f32.gmra.mxu1 %v9826_v50  ;;  %v9990_v50 = vld [vmem:[#allocation174_spill] sm:$0xff] }
 0x4b2   :  { %4656 = vmatmul.f32.gmra.mxu3 %v9987_v19 }
 0x4b3   :  { %v8484_v57 = vadd.f32 %v3821_v31, %v3611_v12  ;;  %4315 = vmatmul.f32.gmra.mxu2 %v9988_v5 }
 0x4b5   :  { %v3150_v20 = vpop.f32.mrf.mxu0 }
 0x4b6   :  { %v3419_v22 = vpop.f32.mrf.mxu1  ;;  %v3615_v7 = vpop.f32.mrf.mxu2 }
 0x4b7   :  { %v3420_v51 = vadd.f32 %v3419_v22, %v3142_v27  ;;  %v3827_v56 = vpop.f32.mrf.mxu3  ;;  %v9993_v27 = vld [vmem:[#allocation176_spill] sm:$0xff] }
 0x4b8   :  { %3985 = vmatmul.f32.gmra.mxu0 %v9834_v58  ;;  %v9995_v22 = vld [vmem:[#allocation180_spill] sm:$0xff] }
 0x4b9   :  { %v3616_v0 = vadd.f32 %v3615_v7, %v3420_v51  ;;  %4142 = vmatmul.f32.gmra.mxu1 %v9830_v2  ;;  %v9992_v2 = vld [vmem:[#allocation178_spill] sm:$0xff] }
 0x4ba   :  { %4660 = vmatmul.f32.gmra.mxu3 %v9989_v48 }
 0x4bb   :  { %v8490_v63 = vadd.f32 %v3827_v56, %v3616_v0  ;;  %4323 = vmatmul.f32.gmra.mxu2 %v9990_v50 }
 0x4bd   :  { %v3158_v33 = vpop.f32.mrf.mxu0 }
 0x4be   :  { %v3423_v60 = vpop.f32.mrf.mxu1  ;;  %v3620_v52 = vpop.f32.mrf.mxu2 }
 0x4bf   :  { %v3424_v30 = vadd.f32 %v3423_v60, %v3150_v20  ;;  %v3833_v1 = vpop.f32.mrf.mxu3 }
 0x4c0   :  { %3989 = vmatmul.f32.gmra.mxu0 %v9839_v59 }
 0x4c1   :  { %v3621_v42 = vadd.f32 %v3620_v52, %v3424_v30  ;;  %4146 = vmatmul.f32.gmra.mxu1 %v9834_v58  ;;  %v9994_v58 = vld [vmem:[#allocation182_spill] sm:$0xff]  ;;  %v9997_v30 = vld [vmem:[#allocation184_spill] sm:$0xff] }
 0x4c2   :  { %4664 = vmatmul.f32.gmra.mxu3 %v9991_v47 }
 0x4c3   :  { %v8496_v16 = vadd.f32 %v3833_v1, %v3621_v42  ;;  %4331 = vmatmul.f32.gmra.mxu2 %v9992_v2 }
 0x4c5   :  { %v3166_v35 = vpop.f32.mrf.mxu0 }
 0x4c6   :  { %v3427_v3 = vpop.f32.mrf.mxu1  ;;  %v3625_v8 = vpop.f32.mrf.mxu2 }
 0x4c7   :  { %v3428_v10 = vadd.f32 %v3427_v3, %v3158_v33  ;;  %v3839_v11 = vpop.f32.mrf.mxu3 }
 0x4c8   :  { %3993 = vmatmul.f32.gmra.mxu0 %v9844_v43 }
 0x4c9   :  { %v3626_v40 = vadd.f32 %v3625_v8, %v3428_v10  ;;  %4150 = vmatmul.f32.gmra.mxu1 %v9839_v59  ;;  %v9996_v59 = vld [vmem:[#allocation186_spill] sm:$0xff]  ;;  %v9999_v8 = vld [vmem:[#allocation188_spill] sm:$0xff] }
 0x4ca   :  { %4668 = vmatmul.f32.gmra.mxu3 %v9993_v27 }
 0x4cb   :  { %v8502_v13 = vadd.f32 %v3839_v11, %v3626_v40  ;;  %4339 = vmatmul.f32.gmra.mxu2 %v9994_v58 }
 0x4cd   :  { %v3174_v62 = vpop.f32.mrf.mxu0 }
 0x4ce   :  { %v3431_v53 = vpop.f32.mrf.mxu1  ;;  %v3630_v31 = vpop.f32.mrf.mxu2 }
 0x4cf   :  { %v3432_v26 = vadd.f32 %v3431_v53, %v3166_v35  ;;  %v3845_v12 = vpop.f32.mrf.mxu3 }
 0x4d0   :  { %3997 = vmatmul.f32.gmra.mxu0 %v9849_v32 }
 0x4d1   :  { %v3631_v5 = vadd.f32 %v3630_v31, %v3432_v26  ;;  %4154 = vmatmul.f32.gmra.mxu1 %v9844_v43  ;;  %v9998_v43 = vld [vmem:[#allocation190_spill] sm:$0xff] }
 0x4d2   :  { %4672 = vmatmul.f32.gmra.mxu3 %v9995_v22 }
 0x4d3   :  { %v8508_v20 = vadd.f32 %v3845_v12, %v3631_v5  ;;  %4347 = vmatmul.f32.gmra.mxu2 %v9996_v59  ;;  %v10001_v12 = vld [vmem:[#allocation192_spill] sm:$0xff] }
 0x4d5   :  { %v3182_v51 = vpop.f32.mrf.mxu0 }
 0x4d6   :  { %v3435_v7 = vpop.f32.mrf.mxu1  ;;  %v3635_v0 = vpop.f32.mrf.mxu2 }
 0x4d7   :  { %v3436_v56 = vadd.f32 %v3435_v7, %v3174_v62  ;;  %v3851_v50 = vpop.f32.mrf.mxu3 }
 0x4d8   :  { %4001 = vmatmul.f32.gmra.mxu0 %v9854_v36 }
 0x4d9   :  { %v3636_v33 = vadd.f32 %v3635_v0, %v3436_v56  ;;  %4158 = vmatmul.f32.gmra.mxu1 %v9849_v32  ;;  %v10000_v32 = vld [vmem:[#allocation194_spill] sm:$0xff] }
 0x4da   :  { %4676 = vmatmul.f32.gmra.mxu3 %v9997_v30 }
 0x4db   :  { %v8514_v60 = vadd.f32 %v3851_v50, %v3636_v33  ;;  %4355 = vmatmul.f32.gmra.mxu2 %v9998_v43  ;;  %v10003_v33 = vld [vmem:[#allocation196_spill] sm:$0xff] }
 0x4dd   :  { %v3190_v52 = vpop.f32.mrf.mxu0 }
 0x4de   :  { %v3439_v1 = vpop.f32.mrf.mxu1  ;;  %v3640_v2 = vpop.f32.mrf.mxu2 }
 0x4df   :  { %v3440_v42 = vadd.f32 %v3439_v1, %v3182_v51  ;;  %v3857_v35 = vpop.f32.mrf.mxu3 }
 0x4e0   :  { %4005 = vmatmul.f32.gmra.mxu0 %v9859_v39 }
 0x4e1   :  { %v3641_v3 = vadd.f32 %v3640_v2, %v3440_v42  ;;  %4162 = vmatmul.f32.gmra.mxu1 %v9854_v36  ;;  %v10002_v36 = vld [vmem:[#allocation198_spill] sm:$0xff] }
 0x4e2   :  { %4680 = vmatmul.f32.gmra.mxu3 %v9999_v8 }
 0x4e3   :  { %v8520_v10 = vadd.f32 %v3857_v35, %v3641_v3  ;;  %4363 = vmatmul.f32.gmra.mxu2 %v10000_v32  ;;  %v10005_v32 = vld [vmem:[#allocation200_spill] sm:$0xff] }
 0x4e5   :  { %v3198_v11 = vpop.f32.mrf.mxu0 }
 0x4e6   :  { %v3443_v40 = vpop.f32.mrf.mxu1  ;;  %v3645_v62 = vpop.f32.mrf.mxu2 }
 0x4e7   :  { %v3444_v58 = vadd.f32 %v3443_v40, %v3190_v52  ;;  %v3863_v53 = vpop.f32.mrf.mxu3 }
 0x4e8   :  { %4009 = vmatmul.f32.gmra.mxu0 %v9864_v44 }
 0x4e9   :  { %v3646_v26 = vadd.f32 %v3645_v62, %v3444_v58  ;;  %4166 = vmatmul.f32.gmra.mxu1 %v9859_v39  ;;  %v10004_v39 = vld [vmem:[#allocation202_spill] sm:$0xff] }
 0x4ea   :  { %4684 = vmatmul.f32.gmra.mxu3 %v10001_v12 }
 0x4eb   :  { %v8526_v31 = vadd.f32 %v3863_v53, %v3646_v26  ;;  %4371 = vmatmul.f32.gmra.mxu2 %v10002_v36 }
 0x4ed   :  { %v3206_v5 = vpop.f32.mrf.mxu0 }
 0x4ee   :  { %v3447_v59 = vpop.f32.mrf.mxu1  ;;  %v3650_v7 = vpop.f32.mrf.mxu2 }
 0x4ef   :  { %v3448_v51 = vadd.f32 %v3447_v59, %v3198_v11  ;;  %v3869_v56 = vpop.f32.mrf.mxu3 }
 0x4f0   :  { %4013 = vmatmul.f32.gmra.mxu0 %v9869_v49 }
 0x4f1   :  { %v3651_v0 = vadd.f32 %v3650_v7, %v3448_v51  ;;  %4170 = vmatmul.f32.gmra.mxu1 %v9864_v44  ;;  %v10006_v44 = vld [vmem:[#allocation207_spill] sm:$0xff] }
 0x4f2   :  { %4688 = vmatmul.f32.gmra.mxu3 %v10003_v33 }
 0x4f3   :  { %v8532_v50 = vadd.f32 %v3869_v56, %v3651_v0  ;;  %4379 = vmatmul.f32.gmra.mxu2 %v10004_v39 }
 0x4f5   :  { %v3214_v43 = vpop.f32.mrf.mxu0 }
 0x4f6   :  { %v3451_v52 = vpop.f32.mrf.mxu1  ;;  %v3655_v42 = vpop.f32.mrf.mxu2 }
 0x4f7   :  { %v3452_v1 = vadd.f32 %v3451_v52, %v3206_v5  ;;  %v3875_v2 = vpop.f32.mrf.mxu3  ;;  %v10007_v5 = vld [vmem:[#allocation204_spill] sm:$0xff]  ;;  %v10009_v52 = vld [vmem:[#allocation209_spill] sm:$0xff] }
 0x4f8   :  { %4017 = vmatmul.f32.gmra.mxu0 %v9874_v54 }
 0x4f9   :  { %v3656_v35 = vadd.f32 %v3655_v42, %v3452_v1  ;;  %4174 = vmatmul.f32.gmra.mxu1 %v9869_v49  ;;  %v10008_v49 = vld [vmem:[#allocation212_spill] sm:$0xff] }
 0x4fa   :  { %4692 = vmatmul.f32.gmra.mxu3 %v10005_v32 }
 0x4fb   :  { %v8538_v3 = vadd.f32 %v3875_v2, %v3656_v35  ;;  %4387 = vmatmul.f32.gmra.mxu2 %v10006_v44 }
 0x4fd   :  { %v3222_v11 = vpop.f32.mrf.mxu0 }
 0x4fe   :  { %v3455_v40 = vpop.f32.mrf.mxu1  ;;  %v3660_v62 = vpop.f32.mrf.mxu2 }
 0x4ff   :  { %v3456_v58 = vadd.f32 %v3455_v40, %v3214_v43  ;;  %v3881_v53 = vpop.f32.mrf.mxu3 }
 0x500   :  { %4021 = vmatmul.f32.gmra.mxu0 %v9879_v21 }
 0x501   :  { %v3661_v26 = vadd.f32 %v3660_v62, %v3456_v58  ;;  %4178 = vmatmul.f32.gmra.mxu1 %v9874_v54  ;;  %v10010_v54 = vld [vmem:[#allocation217_spill] sm:$0xff]  ;;  %v10011_v58 = vld [vmem:[#allocation214_spill] sm:$0xff] }
 0x502   :  { %4696 = vmatmul.f32.gmra.mxu3 %v10007_v5 }
 0x503   :  { %v8544_v36 = vadd.f32 %v3881_v53, %v3661_v26  ;;  %4395 = vmatmul.f32.gmra.mxu2 %v10008_v49 }
 0x505   :  { %v3230_v59 = vpop.f32.mrf.mxu0 }
 0x506   :  { %v3459_v51 = vpop.f32.mrf.mxu1  ;;  %v3665_v56 = vpop.f32.mrf.mxu2 }
 0x507   :  { %v3460_v7 = vadd.f32 %v3459_v51, %v3222_v11  ;;  %v3887_v0 = vpop.f32.mrf.mxu3 }
 0x508   :  { %4025 = vmatmul.f32.gmra.mxu0 %v9884_v28 }
 0x509   :  { %v3666_v39 = vadd.f32 %v3665_v56, %v3460_v7  ;;  %4182 = vmatmul.f32.gmra.mxu1 %v9879_v21  ;;  %v10012_v21 = vld [vmem:[#allocation222_spill] sm:$0xff]  ;;  %v10013_v56 = vld [vmem:[#allocation219_spill] sm:$0xff] }
 0x50a   :  { %4700 = vmatmul.f32.gmra.mxu3 %v10009_v52 }
 0x50b   :  { %v8550_v43 = vadd.f32 %v3887_v0, %v3666_v39  ;;  %4403 = vmatmul.f32.gmra.mxu2 %v10010_v54 }
 0x50d   :  { %v3238_v1 = vpop.f32.mrf.mxu0 }
 0x50e   :  { %v3463_v42 = vpop.f32.mrf.mxu1  ;;  %v3670_v35 = vpop.f32.mrf.mxu2 }
 0x50f   :  { %v3464_v2 = vadd.f32 %v3463_v42, %v3230_v59  ;;  %v3893_v44 = vpop.f32.mrf.mxu3 }
 0x510   :  { %4029 = vmatmul.f32.gmra.mxu0 %v9889_v38 }
 0x511   :  { %v3671_v40 = vadd.f32 %v3670_v35, %v3464_v2  ;;  %4186 = vmatmul.f32.gmra.mxu1 %v9884_v28  ;;  %v10014_v28 = vld [vmem:[#allocation227_spill] sm:$0xff] }
 0x512   :  { %4704 = vmatmul.f32.gmra.mxu3 %v10011_v58 }
 0x513   :  { %v8556_v11 = vadd.f32 %v3893_v44, %v3671_v40  ;;  %4411 = vmatmul.f32.gmra.mxu2 %v10012_v21  ;;  %v10017_v40 = vld [vmem:[#allocation224_spill] sm:$0xff]  ;;  %v10019_v21 = vld [vmem:[#allocation239_spill] sm:$0xff] }
 0x515   :  { %v3246_v62 = vpop.f32.mrf.mxu0 }
 0x516   :  { %v3467_v53 = vpop.f32.mrf.mxu1  ;;  %v3675_v49 = vpop.f32.mrf.mxu2 }
 0x517   :  { %v3468_v26 = vadd.f32 %v3467_v53, %v3238_v1  ;;  %v3899_v51 = vpop.f32.mrf.mxu3  ;;  %v10015_v1 = vld [vmem:[#allocation81_spill] sm:$0xff] }
 0x518   :  { %4033 = vmatmul.f32.gmra.mxu0 %v9894_v4 }
 0x519   :  { %v3676_v7 = vadd.f32 %v3675_v49, %v3468_v26  ;;  %4190 = vmatmul.f32.gmra.mxu1 %v9889_v38  ;;  %v10018_v38 = vld [vmem:[#allocation232_spill] sm:$0xff] }
 0x51a   :  { %4708 = vmatmul.f32.gmra.mxu3 %v10013_v56 }
 0x51b   :  { %v8562_v59 = vadd.f32 %v3899_v51, %v3676_v7  ;;  %4419 = vmatmul.f32.gmra.mxu2 %v10014_v28 }
 0x51d   :  { %v3974_v39 = vpop.f32.mrf.mxu0 }
 0x51e   :  { %v3471_v0 = vpop.f32.mrf.mxu1  ;;  %v3680_v42 = vpop.f32.mrf.mxu2  ;;  %v3975_v53 = vadd.f32 %v3974_v39, %v10019_v21 }
 0x51f   :  { %v3472_v54 = vadd.f32 %v3471_v0, %v3246_v62  ;;  %v3905_v2 = vpop.f32.mrf.mxu3  ;;  %v10020_v0 = vld [vmem:[#allocation85_spill] sm:$0xff] }
 0x520   :  { %4037 = vmatmul.f32.gmra.mxu0 %v10015_v1 }
 0x521   :  { %v3681_v35 = vadd.f32 %v3680_v42, %v3472_v54  ;;  %4194 = vmatmul.f32.gmra.mxu1 %v9894_v4  ;;  %v10022_v4 = vld [vmem:[#allocation229_spill] sm:$0xff]  ;;  %v10023_v42 = vld [vmem:[#allocation95_spill] sm:$0xff] }
 0x522   :  { %4712 = vmatmul.f32.gmra.mxu3 %v10017_v40 }
 0x523   :  { %v8568_v44 = vadd.f32 %v3905_v2, %v3681_v35  ;;  %4427 = vmatmul.f32.gmra.mxu2 %v10018_v38  ;;  %v10024_v2 = vld [vmem:[#allocation243_spill] sm:$0xff] }
 0x525   :  { %10016 = vst [vmem:[#allocation23_spill] sm:$0xff] %v8568_v44  ;;  %v3978_v26 = vpop.f32.mrf.mxu0  ;;  %v10025_v44 = vld [vmem:[#allocation89_spill] sm:$0xff] }
 0x526   :  { %v4135_v49 = vpop.f32.mrf.mxu1  ;;  %v4300_v7 = vpop.f32.mrf.mxu2  ;;  %v3979_v35 = vadd.f32 %v3978_v26, %v10024_v2 }
 0x527   :  { %v4136_v51 = vadd.f32 %v4135_v49, %v3975_v53  ;;  %v4649_v62 = vpop.f32.mrf.mxu3 }
 0x528   :  { %4041 = vmatmul.f32.gmra.mxu0 %v10020_v0 }
 0x529   :  { %v4301_v28 = vadd.f32 %v4300_v7, %v4136_v51  ;;  %4198 = vmatmul.f32.gmra.mxu1 %v10015_v1  ;;  %v10027_v1 = vld [vmem:[#allocation234_spill] sm:$0xff]  ;;  %v10028_v7 = vld [vmem:[#allocation100_spill] sm:$0xff] }
 0x52a   :  { %4716 = vmatmul.f32.gmra.mxu3 %v10022_v4 }
 0x52b   :  { %v8575_v54 = vadd.f32 %v4649_v62, %v4301_v28  ;;  %4435 = vmatmul.f32.gmra.mxu2 %v10023_v42  ;;  %v10029_v62 = vld [vmem:[#allocation247_spill] sm:$0xff] }
 0x52d   :  { %10021 = vst [vmem:[#allocation20_spill] sm:$0xff] %v8575_v54  ;;  %v3982_v38 = vpop.f32.mrf.mxu0  ;;  %v10030_v54 = vld [vmem:[#allocation93_spill] sm:$0xff] }
 0x52e   :  { %v4139_v39 = vpop.f32.mrf.mxu1  ;;  %v4308_v40 = vpop.f32.mrf.mxu2  ;;  %v3983_v28 = vadd.f32 %v3982_v38, %v10029_v62 }
 0x52f   :  { %v4140_v21 = vadd.f32 %v4139_v39, %v3979_v35  ;;  %v4653_v53 = vpop.f32.mrf.mxu3 }
 0x530   :  { %4045 = vmatmul.f32.gmra.mxu0 %v10025_v44 }
 0x531   :  { %v4309_v49 = vadd.f32 %v4308_v40, %v4140_v21  ;;  %4202 = vmatmul.f32.gmra.mxu1 %v10020_v0  ;;  %v10032_v0 = vld [vmem:[#allocation238_spill] sm:$0xff]  ;;  %v10033_v21 = vld [vmem:[#allocation105_spill] sm:$0xff] }
 0x532   :  { %4720 = vmatmul.f32.gmra.mxu3 %v10027_v1 }
 0x533   :  { %v8582_v51 = vadd.f32 %v4653_v53, %v4309_v49  ;;  %4443 = vmatmul.f32.gmra.mxu2 %v10028_v7  ;;  %v10034_v53 = vld [vmem:[#allocation251_spill] sm:$0xff] }
 0x535   :  { %10026 = vst [vmem:[#allocation19_spill] sm:$0xff] %v8582_v51  ;;  %v3986_v42 = vpop.f32.mrf.mxu0  ;;  %v10035_v51 = vld [vmem:[#allocation98_spill] sm:$0xff] }
 0x536   :  { %v4143_v26 = vpop.f32.mrf.mxu1  ;;  %v4316_v4 = vpop.f32.mrf.mxu2  ;;  %v3987_v49 = vadd.f32 %v3986_v42, %v10034_v53 }
 0x537   :  { %v4144_v2 = vadd.f32 %v4143_v26, %v3983_v28  ;;  %v4657_v35 = vpop.f32.mrf.mxu3 }
 0x538   :  { %4049 = vmatmul.f32.gmra.mxu0 %v10030_v54 }
 0x539   :  { %v4317_v39 = vadd.f32 %v4316_v4, %v4144_v2  ;;  %4206 = vmatmul.f32.gmra.mxu1 %v10025_v44  ;;  %v10037_v44 = vld [vmem:[#allocation242_spill] sm:$0xff] }
 0x53a   :  { %4724 = vmatmul.f32.gmra.mxu3 %v10032_v0  ;;  %v10038_v2 = vld [vmem:[#allocation110_spill] sm:$0xff] }
 0x53b   :  { %v8589_v40 = vadd.f32 %v4657_v35, %v4317_v39  ;;  %4451 = vmatmul.f32.gmra.mxu2 %v10033_v21  ;;  %v10039_v35 = vld [vmem:[#allocation255_spill] sm:$0xff] }
 0x53d   :  { %10031 = vst [vmem:[#allocation27_spill] sm:$0xff] %v8589_v40  ;;  %v3990_v7 = vpop.f32.mrf.mxu0  ;;  %v10040_v40 = vld [vmem:[#allocation103_spill] sm:$0xff] }
 0x53e   :  { %v4147_v38 = vpop.f32.mrf.mxu1  ;;  %v4324_v1 = vpop.f32.mrf.mxu2  ;;  %v3991_v39 = vadd.f32 %v3990_v7, %v10039_v35 }
 0x53f   :  { %v4148_v62 = vadd.f32 %v4147_v38, %v3987_v49  ;;  %v4661_v28 = vpop.f32.mrf.mxu3 }
 0x540   :  { %4053 = vmatmul.f32.gmra.mxu0 %v10035_v51 }
 0x541   :  { %v4325_v26 = vadd.f32 %v4324_v1, %v4148_v62  ;;  %4210 = vmatmul.f32.gmra.mxu1 %v10030_v54  ;;  %v10042_v54 = vld [vmem:[#allocation246_spill] sm:$0xff]  ;;  %v10043_v62 = vld [vmem:[#allocation115_spill] sm:$0xff] }
 0x542   :  { %4728 = vmatmul.f32.gmra.mxu3 %v10037_v44 }
 0x543   :  { %v8596_v4 = vadd.f32 %v4661_v28, %v4325_v26  ;;  %4459 = vmatmul.f32.gmra.mxu2 %v10038_v2  ;;  %v10044_v28 = vld [vmem:[#allocation259_spill] sm:$0xff] }
 0x545   :  { %10036 = vst [vmem:[#allocation18_spill] sm:$0xff] %v8596_v4  ;;  %v3994_v21 = vpop.f32.mrf.mxu0  ;;  %v10045_v4 = vld [vmem:[#allocation108_spill] sm:$0xff] }
 0x546   :  { %v4151_v42 = vpop.f32.mrf.mxu1  ;;  %v4332_v0 = vpop.f32.mrf.mxu2  ;;  %v3995_v26 = vadd.f32 %v3994_v21, %v10044_v28 }
 0x547   :  { %v4152_v53 = vadd.f32 %v4151_v42, %v3991_v39  ;;  %v4665_v49 = vpop.f32.mrf.mxu3 }
 0x548   :  { %4057 = vmatmul.f32.gmra.mxu0 %v10040_v40 }
 0x549   :  { %v4333_v38 = vadd.f32 %v4332_v0, %v4152_v53  ;;  %4214 = vmatmul.f32.gmra.mxu1 %v10035_v51  ;;  %v10047_v51 = vld [vmem:[#allocation250_spill] sm:$0xff]  ;;  %v10048_v53 = vld [vmem:[#allocation120_spill] sm:$0xff] }
 0x54a   :  { %4732 = vmatmul.f32.gmra.mxu3 %v10042_v54 }
 0x54b   :  { %v8603_v1 = vadd.f32 %v4665_v49, %v4333_v38  ;;  %4467 = vmatmul.f32.gmra.mxu2 %v10043_v62  ;;  %v10049_v49 = vld [vmem:[#allocation263_spill] sm:$0xff] }
 0x54d   :  { %10041 = vst [vmem:[#allocation24_spill] sm:$0xff] %v8603_v1  ;;  %v3998_v2 = vpop.f32.mrf.mxu0  ;;  %v10050_v1 = vld [vmem:[#allocation113_spill] sm:$0xff] }
 0x54e   :  { %v4155_v7 = vpop.f32.mrf.mxu1  ;;  %v4340_v44 = vpop.f32.mrf.mxu2  ;;  %v3999_v38 = vadd.f32 %v3998_v2, %v10049_v49 }
 0x54f   :  { %v4156_v35 = vadd.f32 %v4155_v7, %v3995_v26  ;;  %v4669_v39 = vpop.f32.mrf.mxu3 }
 0x550   :  { %4061 = vmatmul.f32.gmra.mxu0 %v10045_v4 }
 0x551   :  { %v4341_v42 = vadd.f32 %v4340_v44, %v4156_v35  ;;  %4218 = vmatmul.f32.gmra.mxu1 %v10040_v40  ;;  %v10051_v40 = vld [vmem:[#allocation254_spill] sm:$0xff]  ;;  %v10052_v35 = vld [vmem:[#allocation125_spill] sm:$0xff] }
 0x552   :  { %4736 = vmatmul.f32.gmra.mxu3 %v10047_v51 }
 0x553   :  { %v8610_v0 = vadd.f32 %v4669_v39, %v4341_v42  ;;  %4475 = vmatmul.f32.gmra.mxu2 %v10048_v53  ;;  %v10053_v39 = vld [vmem:[#allocation267_spill] sm:$0xff] }
 0x555   :  { %10046 = vst [vmem:[#allocation22_spill] sm:$0xff] %v8610_v0  ;;  %v4002_v62 = vpop.f32.mrf.mxu0  ;;  %v10054_v0 = vld [vmem:[#allocation118_spill] sm:$0xff] }
 0x556   :  { %v4159_v21 = vpop.f32.mrf.mxu1  ;;  %v4348_v54 = vpop.f32.mrf.mxu2  ;;  %v4003_v42 = vadd.f32 %v4002_v62, %v10053_v39 }
 0x557   :  { %v4160_v28 = vadd.f32 %v4159_v21, %v3999_v38  ;;  %v4673_v26 = vpop.f32.mrf.mxu3 }
 0x558   :  { %4065 = vmatmul.f32.gmra.mxu0 %v10050_v1 }
 0x559   :  { %v4349_v7 = vadd.f32 %v4348_v54, %v4160_v28  ;;  %4222 = vmatmul.f32.gmra.mxu1 %v10045_v4  ;;  %v10055_v4 = vld [vmem:[#allocation258_spill] sm:$0xff] }
 0x55a   :  { %4740 = vmatmul.f32.gmra.mxu3 %v10051_v40  ;;  %v10056_v28 = vld [vmem:[#allocation130_spill] sm:$0xff] }
 0x55b   :  { %v8617_v44 = vadd.f32 %v4673_v26, %v4349_v7  ;;  %4483 = vmatmul.f32.gmra.mxu2 %v10052_v35  ;;  %v10057_v26 = vld [vmem:[#allocation285_spill] sm:$0xff] }
 0x55d   :  { %v4006_v53 = vpop.f32.mrf.mxu0 }
 0x55e   :  { %v4163_v2 = vpop.f32.mrf.mxu1  ;;  %v4356_v51 = vpop.f32.mrf.mxu2  ;;  %v4007_v7 = vadd.f32 %v4006_v53, %v10057_v26 }
 0x55f   :  { %v4164_v49 = vadd.f32 %v4163_v2, %v4003_v42  ;;  %v4677_v38 = vpop.f32.mrf.mxu3 }
 0x560   :  { %4069 = vmatmul.f32.gmra.mxu0 %v10054_v0 }
 0x561   :  { %v4357_v21 = vadd.f32 %v4356_v51, %v4164_v49  ;;  %4226 = vmatmul.f32.gmra.mxu1 %v10050_v1  ;;  %v10058_v1 = vld [vmem:[#allocation262_spill] sm:$0xff]  ;;  %v10059_v49 = vld [vmem:[#allocation135_spill] sm:$0xff] }
 0x562   :  { %4744 = vmatmul.f32.gmra.mxu3 %v10055_v4 }
 0x563   :  { %v8624_v54 = vadd.f32 %v4677_v38, %v4357_v21  ;;  %4491 = vmatmul.f32.gmra.mxu2 %v10056_v28 }
 0x565   :  { %v4010_v35 = vpop.f32.mrf.mxu0 }
 0x566   :  { %v4167_v62 = vpop.f32.mrf.mxu1  ;;  %v4364_v40 = vpop.f32.mrf.mxu2  ;;  %v4011_v38 = vadd.f32 %v4010_v35, %v8376_v15 }
 0x567   :  { %v4168_v39 = vadd.f32 %v4167_v62, %v4007_v7  ;;  %v4681_v42 = vpop.f32.mrf.mxu3 }
 0x568   :  { %4073 = vmatmul.f32.gmra.mxu0 %v9943_v41 }
 0x569   :  { %v4365_v2 = vadd.f32 %v4364_v40, %v4168_v39  ;;  %4230 = vmatmul.f32.gmra.mxu1 %v10054_v0  ;;  %v10060_v0 = vld [vmem:[#allocation266_spill] sm:$0xff]  ;;  %v10061_v39 = vld [vmem:[#allocation140_spill] sm:$0xff] }
 0x56a   :  { %4748 = vmatmul.f32.gmra.mxu3 %v10058_v1 }
 0x56b   :  { %v8631_v51 = vadd.f32 %v4681_v42, %v4365_v2  ;;  %4499 = vmatmul.f32.gmra.mxu2 %v10059_v49 }
 0x56d   :  { %v4014_v21 = vpop.f32.mrf.mxu0 }
 0x56e   :  { %v4171_v53 = vpop.f32.mrf.mxu1  ;;  %v4372_v26 = vpop.f32.mrf.mxu2  ;;  %v4015_v42 = vadd.f32 %v4014_v21, %v8395_v17 }
 0x56f   :  { %v4172_v28 = vadd.f32 %v4171_v53, %v4011_v38  ;;  %v4685_v7 = vpop.f32.mrf.mxu3 }
 0x570   :  { %4077 = vmatmul.f32.gmra.mxu0 %v9948_v45 }
 0x571   :  { %v4373_v62 = vadd.f32 %v4372_v26, %v4172_v28  ;;  %4234 = vmatmul.f32.gmra.mxu1 %v9943_v41  ;;  %v10062_v41 = vld [vmem:[#allocation270_spill] sm:$0xff]  ;;  %v10063_v26 = vld [vmem:[#allocation145_spill] sm:$0xff] }
 0x572   :  { %4752 = vmatmul.f32.gmra.mxu3 %v10060_v0 }
 0x573   :  { %v8638_v40 = vadd.f32 %v4685_v7, %v4373_v62  ;;  %4507 = vmatmul.f32.gmra.mxu2 %v10061_v39 }
 0x575   :  { %v4018_v2 = vpop.f32.mrf.mxu0 }
 0x576   :  { %v4175_v15 = vpop.f32.mrf.mxu1  ;;  %v4380_v49 = vpop.f32.mrf.mxu2  ;;  %v4019_v7 = vadd.f32 %v4018_v2, %v8412_v25 }
 0x577   :  { %v4176_v35 = vadd.f32 %v4175_v15, %v4015_v42  ;;  %v4689_v38 = vpop.f32.mrf.mxu3 }
 0x578   :  { %4081 = vmatmul.f32.gmra.mxu0 %v9955_v34 }
 0x579   :  { %v4381_v53 = vadd.f32 %v4380_v49, %v4176_v35  ;;  %4238 = vmatmul.f32.gmra.mxu1 %v9948_v45  ;;  %v10064_v45 = vld [vmem:[#allocation273_spill] sm:$0xff]  ;;  %v10065_v49 = vld [vmem:[#allocation278_spill] sm:$0xff] }
 0x57a   :  { %4756 = vmatmul.f32.gmra.mxu3 %v10062_v41 }
 0x57b   :  { %v8645_v28 = vadd.f32 %v4689_v38, %v4381_v53  ;;  %4515 = vmatmul.f32.gmra.mxu2 %v10063_v26 }
 0x57d   :  { %v4022_v62 = vpop.f32.mrf.mxu0 }
 0x57e   :  { %v4179_v17 = vpop.f32.mrf.mxu1  ;;  %v4388_v39 = vpop.f32.mrf.mxu2  ;;  %v4023_v38 = vadd.f32 %v4022_v62, %v8428_v9 }
 0x57f   :  { %v4180_v21 = vadd.f32 %v4179_v17, %v4019_v7  ;;  %v4693_v42 = vpop.f32.mrf.mxu3 }
 0x580   :  { %4085 = vmatmul.f32.gmra.mxu0 %v9962_v23 }
 0x581   :  { %v4389_v15 = vadd.f32 %v4388_v39, %v4180_v21  ;;  %4242 = vmatmul.f32.gmra.mxu1 %v9955_v34  ;;  %v10066_v34 = vld [vmem:[#allocation276_spill] sm:$0xff]  ;;  %v10067_v39 = vld [vmem:[#allocation282_spill] sm:$0xff] }
 0x582   :  { %4760 = vmatmul.f32.gmra.mxu3 %v10064_v45 }
 0x583   :  { %v8652_v35 = vadd.f32 %v4693_v42, %v4389_v15  ;;  %4523 = vmatmul.f32.gmra.mxu2 %v10065_v49 }
 0x585   :  { %v4026_v53 = vpop.f32.mrf.mxu0 }
 0x586   :  { %v4183_v25 = vpop.f32.mrf.mxu1  ;;  %v4396_v26 = vpop.f32.mrf.mxu2  ;;  %v4027_v42 = vadd.f32 %v4026_v53, %v8444_v6 }
 0x587   :  { %v4184_v2 = vadd.f32 %v4183_v25, %v4023_v38  ;;  %v4697_v7 = vpop.f32.mrf.mxu3 }
 0x588   :  { %4089 = vmatmul.f32.gmra.mxu0 %v9969_v29 }
 0x589   :  { %v4397_v17 = vadd.f32 %v4396_v26, %v4184_v2  ;;  %4246 = vmatmul.f32.gmra.mxu1 %v9962_v23  ;;  %v10068_v23 = vld [vmem:[#allocation280_spill] sm:$0xff]  ;;  %v10069_v26 = vld [vmem:[#allocation287_spill] sm:$0xff] }
 0x58a   :  { %4764 = vmatmul.f32.gmra.mxu3 %v10066_v34 }
 0x58b   :  { %v8659_v21 = vadd.f32 %v4697_v7, %v4397_v17  ;;  %4531 = vmatmul.f32.gmra.mxu2 %v10067_v39 }
 0x58d   :  { %v4030_v15 = vpop.f32.mrf.mxu0 }
 0x58e   :  { %v4187_v9 = vpop.f32.mrf.mxu1  ;;  %v4404_v49 = vpop.f32.mrf.mxu2  ;;  %v4031_v7 = vadd.f32 %v4030_v15, %v8460_v37 }
 0x58f   :  { %v4188_v62 = vadd.f32 %v4187_v9, %v4027_v42  ;;  %v4701_v38 = vpop.f32.mrf.mxu3 }
 0x590   :  { %4093 = vmatmul.f32.gmra.mxu0 %v9976_v24 }
 0x591   :  { %v4405_v25 = vadd.f32 %v4404_v49, %v4188_v62  ;;  %4250 = vmatmul.f32.gmra.mxu1 %v9969_v29  ;;  %v10070_v29 = vld [vmem:[#allocation284_spill] sm:$0xff]  ;;  %v10071_v49 = vld [vmem:[#allocation289_spill] sm:$0xff] }
 0x592   :  { %4768 = vmatmul.f32.gmra.mxu3 %v10068_v23 }
 0x593   :  { %v8666_v2 = vadd.f32 %v4701_v38, %v4405_v25  ;;  %4539 = vmatmul.f32.gmra.mxu2 %v10069_v26 }
 0x595   :  { %v4034_v17 = vpop.f32.mrf.mxu0 }
 0x596   :  { %v4191_v6 = vpop.f32.mrf.mxu1  ;;  %v4412_v39 = vpop.f32.mrf.mxu2  ;;  %v4035_v38 = vadd.f32 %v4034_v17, %v8472_v55 }
 0x597   :  { %v4192_v53 = vadd.f32 %v4191_v6, %v4031_v7  ;;  %v4705_v42 = vpop.f32.mrf.mxu3 }
 0x598   :  { %4097 = vmatmul.f32.gmra.mxu0 %v9982_v61 }
 0x599   :  { %v4413_v9 = vadd.f32 %v4412_v39, %v4192_v53  ;;  %4254 = vmatmul.f32.gmra.mxu1 %v9976_v24  ;;  %v10072_v53 = vld [vmem:[#allocation157_spill] sm:$0xff] }
 0x59a   :  { %4772 = vmatmul.f32.gmra.mxu3 %v10070_v29 }
 0x59b   :  { %v8673_v62 = vadd.f32 %v4705_v42, %v4413_v9  ;;  %4547 = vmatmul.f32.gmra.mxu2 %v10071_v49 }
 0x59d   :  { %v4038_v25 = vpop.f32.mrf.mxu0 }
 0x59e   :  { %v4195_v37 = vpop.f32.mrf.mxu1  ;;  %v4420_v26 = vpop.f32.mrf.mxu2  ;;  %v4039_v24 = vadd.f32 %v4038_v25, %v8478_v18 }
 0x59f   :  { %v4196_v15 = vadd.f32 %v4195_v37, %v4035_v38  ;;  %v4709_v7 = vpop.f32.mrf.mxu3  ;;  %v10073_v37 = vld [vmem:[#allocation161_spill] sm:$0xff] }
 0x5a0   :  { %4826 = vmatmul.f32.vlgmr.msrb.gmra.mxu0 %v10072_v53 }
 0x5a1   :  { %v4421_v6 = vadd.f32 %v4420_v26, %v4196_v15  ;;  %4258 = vmatmul.f32.gmra.mxu1 %v9982_v61  ;;  %v10074_v15 = vld [vmem:[#allocation159_spill] sm:$0xff] }
 0x5a2   :  { %5436 = vmatmul.f32.vlgmr.msrb.gmra.mxu3 %v9983_v14 }
 0x5a3   :  { %v8680_v39 = vadd.f32 %v4709_v7, %v4421_v6  ;;  %5275 = vmatmul.f32.vlgmr.msrb.gmra.mxu2 %v9983_v14 }
 0x5a5   :  { %v4042_v42 = vpop.f32.mrf.mxu0 }
 0x5a6   :  { %v4199_v55 = vpop.f32.mrf.mxu1  ;;  %v4428_v9 = vpop.f32.mrf.mxu2  ;;  %v4043_v14 = vadd.f32 %v4042_v42, %v8484_v57 }
 0x5a7   :  { %v4200_v17 = vadd.f32 %v4199_v55, %v4039_v24  ;;  %v4713_v49 = vpop.f32.mrf.mxu3  ;;  %v10075_v24 = vld [vmem:[#allocation165_spill] sm:$0xff]  ;;  %v10076_v55 = vld [vmem:[#allocation163_spill] sm:$0xff] }
 0x5a8   :  { %4831 = vmatmul.f32.gmra.mxu0 %v10073_v37 }
 0x5a9   :  { %v4429_v38 = vadd.f32 %v4428_v9, %v4200_v17  ;;  %5020 = vmatmul.f32.vlgmr.msrb.gmra.mxu1 %v10074_v15  ;;  %v10077_v15 = vld [vmem:[#allocation169_spill] sm:$0xff] }
 0x5aa   :  { %5440 = vmatmul.f32.gmra.mxu3 %v9985_v46 }
 0x5ab   :  { %v8687_v61 = vadd.f32 %v4713_v49, %v4429_v38  ;;  %5279 = vmatmul.f32.gmra.mxu2 %v9985_v46 }
 0x5ad   :  { %v4046_v26 = vpop.f32.mrf.mxu0 }
 0x5ae   :  { %v4203_v18 = vpop.f32.mrf.mxu1  ;;  %v4436_v7 = vpop.f32.mrf.mxu2  ;;  %v4047_v46 = vadd.f32 %v4046_v26, %v8490_v63 }
 0x5af   :  { %v4204_v25 = vadd.f32 %v4203_v18, %v4043_v14  ;;  %v4717_v6 = vpop.f32.mrf.mxu3  ;;  %v10078_v14 = vld [vmem:[#allocation167_spill] sm:$0xff] }
 0x5b0   :  { %4836 = vmatmul.f32.gmra.mxu0 %v10075_v24  ;;  %v10079_v24 = vld [vmem:[#allocation173_spill] sm:$0xff] }
 0x5b1   :  { %v4437_v53 = vadd.f32 %v4436_v7, %v4204_v25  ;;  %5026 = vmatmul.f32.gmra.mxu1 %v10076_v55  ;;  %v10080_v55 = vld [vmem:[#allocation171_spill] sm:$0xff] }
 0x5b2   :  { %5444 = vmatmul.f32.gmra.mxu3 %v9987_v19 }
 0x5b3   :  { %v8694_v17 = vadd.f32 %v4717_v6, %v4437_v53  ;;  %5283 = vmatmul.f32.gmra.mxu2 %v9987_v19 }
 0x5b5   :  { %v4050_v9 = vpop.f32.mrf.mxu0 }
 0x5b6   :  { %v4207_v57 = vpop.f32.mrf.mxu1  ;;  %v4444_v49 = vpop.f32.mrf.mxu2  ;;  %v4051_v19 = vadd.f32 %v4050_v9, %v8496_v16 }
 0x5b7   :  { %v4208_v42 = vadd.f32 %v4207_v57, %v4047_v46  ;;  %v4721_v38 = vpop.f32.mrf.mxu3 }
 0x5b8   :  { %4841 = vmatmul.f32.gmra.mxu0 %v10077_v15  ;;  %v10082_v15 = vld [vmem:[#allocation175_spill] sm:$0xff] }
 0x5b9   :  { %v4445_v37 = vadd.f32 %v4444_v49, %v4208_v42  ;;  %5032 = vmatmul.f32.gmra.mxu1 %v10078_v14 }
 0x5ba   :  { %5448 = vmatmul.f32.gmra.mxu3 %v9989_v48 }
 0x5bb   :  { %v8701_v18 = vadd.f32 %v4721_v38, %v4445_v37  ;;  %5287 = vmatmul.f32.gmra.mxu2 %v9989_v48  ;;  %v10081_v37 = vld [vmem:[#allocation177_spill] sm:$0xff] }
 0x5bd   :  { %v4054_v25 = vpop.f32.mrf.mxu0 }
 0x5be   :  { %v4211_v63 = vpop.f32.mrf.mxu1  ;;  %v4452_v7 = vpop.f32.mrf.mxu2  ;;  %v4055_v48 = vadd.f32 %v4054_v25, %v8502_v13 }
 0x5bf   :  { %v4212_v26 = vadd.f32 %v4211_v63, %v4051_v19  ;;  %v4725_v6 = vpop.f32.mrf.mxu3 }
 0x5c0   :  { %4846 = vmatmul.f32.gmra.mxu0 %v10079_v24 }
 0x5c1   :  { %v4453_v53 = vadd.f32 %v4452_v7, %v4212_v26  ;;  %5038 = vmatmul.f32.gmra.mxu1 %v10080_v55 }
 0x5c2   :  { %5452 = vmatmul.f32.gmra.mxu3 %v9991_v47 }
 0x5c3   :  { %v8708_v46 = vadd.f32 %v4725_v6, %v4453_v53  ;;  %5291 = vmatmul.f32.gmra.mxu2 %v9991_v47  ;;  %v10083_v6 = vld [vmem:[#allocation181_spill] sm:$0xff]  ;;  %v10084_v53 = vld [vmem:[#allocation179_spill] sm:$0xff] }
 0x5c5   :  { %v4058_v57 = vpop.f32.mrf.mxu0 }
 0x5c6   :  { %v4215_v16 = vpop.f32.mrf.mxu1  ;;  %v4460_v42 = vpop.f32.mrf.mxu2  ;;  %v4059_v47 = vadd.f32 %v4058_v57, %v8508_v20 }
 0x5c7   :  { %v4216_v9 = vadd.f32 %v4215_v16, %v4055_v48  ;;  %v4729_v49 = vpop.f32.mrf.mxu3 }
 0x5c8   :  { %4851 = vmatmul.f32.gmra.mxu0 %v10081_v37 }
 0x5c9   :  { %v4461_v38 = vadd.f32 %v4460_v42, %v4216_v9  ;;  %5044 = vmatmul.f32.gmra.mxu1 %v10082_v15  ;;  %v10085_v42 = vld [vmem:[#allocation185_spill] sm:$0xff] }
 0x5ca   :  { %5456 = vmatmul.f32.gmra.mxu3 %v9993_v27 }
 0x5cb   :  { %v8715_v14 = vadd.f32 %v4729_v49, %v4461_v38  ;;  %5295 = vmatmul.f32.gmra.mxu2 %v9993_v27  ;;  %v10086_v49 = vld [vmem:[#allocation183_spill] sm:$0xff] }
 0x5cd   :  { %v4062_v19 = vpop.f32.mrf.mxu0 }
 0x5ce   :  { %v4219_v13 = vpop.f32.mrf.mxu1  ;;  %v4468_v63 = vpop.f32.mrf.mxu2  ;;  %v4063_v27 = vadd.f32 %v4062_v19, %v8514_v60 }
 0x5cf   :  { %v4220_v25 = vadd.f32 %v4219_v13, %v4059_v47  ;;  %v4733_v26 = vpop.f32.mrf.mxu3 }
 0x5d0   :  { %4856 = vmatmul.f32.gmra.mxu0 %v10083_v6 }
 0x5d1   :  { %v4469_v7 = vadd.f32 %v4468_v63, %v4220_v25  ;;  %5050 = vmatmul.f32.gmra.mxu1 %v10084_v53  ;;  %v10087_v25 = vld [vmem:[#allocation189_spill] sm:$0xff]  ;;  %v10088_v63 = vld [vmem:[#allocation187_spill] sm:$0xff] }
 0x5d2   :  { %5460 = vmatmul.f32.gmra.mxu3 %v9995_v22 }
 0x5d3   :  { %v8722_v24 = vadd.f32 %v4733_v26, %v4469_v7  ;;  %5299 = vmatmul.f32.gmra.mxu2 %v9995_v22 }
 0x5d5   :  { %v4066_v55 = vpop.f32.mrf.mxu0 }
 0x5d6   :  { %v4223_v20 = vpop.f32.mrf.mxu1  ;;  %v4476_v57 = vpop.f32.mrf.mxu2  ;;  %v4067_v22 = vadd.f32 %v4066_v55, %v8520_v10 }
 0x5d7   :  { %v4224_v48 = vadd.f32 %v4223_v20, %v4063_v27  ;;  %v4737_v16 = vpop.f32.mrf.mxu3  ;;  %v10089_v20 = vld [vmem:[#allocation193_spill] sm:$0xff] }
 0x5d8   :  { %4861 = vmatmul.f32.gmra.mxu0 %v10085_v42 }
 0x5d9   :  { %v4477_v9 = vadd.f32 %v4476_v57, %v4224_v48  ;;  %5056 = vmatmul.f32.gmra.mxu1 %v10086_v49  ;;  %v10090_v48 = vld [vmem:[#allocation191_spill] sm:$0xff] }
 0x5da   :  { %5464 = vmatmul.f32.gmra.mxu3 %v9997_v30 }
 0x5db   :  { %v8729_v38 = vadd.f32 %v4737_v16, %v4477_v9  ;;  %5303 = vmatmul.f32.gmra.mxu2 %v9997_v30 }
 0x5dd   :  { %v4070_v37 = vpop.f32.mrf.mxu0 }
 0x5de   :  { %v4227_v60 = vpop.f32.mrf.mxu1  ;;  %v4484_v47 = vpop.f32.mrf.mxu2  ;;  %v4071_v30 = vadd.f32 %v4070_v37, %v8526_v31  ;;  %v10091_v37 = vld [vmem:[#allocation197_spill] sm:$0xff] }
 0x5df   :  { %v4228_v15 = vadd.f32 %v4227_v60, %v4067_v22  ;;  %v4741_v19 = vpop.f32.mrf.mxu3  ;;  %v10092_v60 = vld [vmem:[#allocation195_spill] sm:$0xff] }
 0x5e0   :  { %4866 = vmatmul.f32.gmra.mxu0 %v10087_v25 }
 0x5e1   :  { %v4485_v13 = vadd.f32 %v4484_v47, %v4228_v15  ;;  %5062 = vmatmul.f32.gmra.mxu1 %v10088_v63 }
 0x5e2   :  { %5468 = vmatmul.f32.gmra.mxu3 %v9999_v8 }
 0x5e3   :  { %v8736_v26 = vadd.f32 %v4741_v19, %v4485_v13  ;;  %5307 = vmatmul.f32.gmra.mxu2 %v9999_v8 }
 0x5e5   :  { %v4074_v7 = vpop.f32.mrf.mxu0 }
 0x5e6   :  { %v4231_v10 = vpop.f32.mrf.mxu1  ;;  %v4492_v53 = vpop.f32.mrf.mxu2  ;;  %v4075_v8 = vadd.f32 %v4074_v7, %v8532_v50  ;;  %v10094_v7 = vld [vmem:[#allocation199_spill] sm:$0xff] }
 0x5e7   :  { %v4232_v6 = vadd.f32 %v4231_v10, %v4071_v30  ;;  %v4745_v27 = vpop.f32.mrf.mxu3  ;;  %v10093_v30 = vld [vmem:[#allocation201_spill] sm:$0xff] }
 0x5e8   :  { %4871 = vmatmul.f32.gmra.mxu0 %v10089_v20 }
 0x5e9   :  { %v4493_v55 = vadd.f32 %v4492_v53, %v4232_v6  ;;  %5068 = vmatmul.f32.gmra.mxu1 %v10090_v48  ;;  %v10095_v48 = vld [vmem:[#allocation206_spill] sm:$0xff] }
 0x5ea   :  { %5472 = vmatmul.f32.gmra.mxu3 %v10001_v12 }
 0x5eb   :  { %v8743_v57 = vadd.f32 %v4745_v27, %v4493_v55  ;;  %5311 = vmatmul.f32.gmra.mxu2 %v10001_v12 }
 0x5ed   :  { %v4078_v16 = vpop.f32.mrf.mxu0 }
 0x5ee   :  { %v4235_v31 = vpop.f32.mrf.mxu1  ;;  %v4500_v42 = vpop.f32.mrf.mxu2  ;;  %v4079_v12 = vadd.f32 %v4078_v16, %v8538_v3 }
 0x5ef   :  { %v4236_v9 = vadd.f32 %v4235_v31, %v4075_v8  ;;  %v4749_v49 = vpop.f32.mrf.mxu3  ;;  %v10096_v8 = vld [vmem:[#allocation203_spill] sm:$0xff] }
 0x5f0   :  { %4876 = vmatmul.f32.gmra.mxu0 %v10091_v37  ;;  %v10097_v37 = vld [vmem:[#allocation211_spill] sm:$0xff] }
 0x5f1   :  { %v4501_v22 = vadd.f32 %v4500_v42, %v4236_v9  ;;  %5074 = vmatmul.f32.gmra.mxu1 %v10092_v60  ;;  %v10098_v60 = vld [vmem:[#allocation208_spill] sm:$0xff] }
 0x5f2   :  { %5476 = vmatmul.f32.gmra.mxu3 %v10003_v33 }
 0x5f3   :  { %v8750_v15 = vadd.f32 %v4749_v49, %v4501_v22  ;;  %5315 = vmatmul.f32.gmra.mxu2 %v10003_v33 }
 0x5f5   :  { %v4082_v47 = vpop.f32.mrf.mxu0 }
 0x5f6   :  { %v4239_v50 = vpop.f32.mrf.mxu1  ;;  %v4508_v13 = vpop.f32.mrf.mxu2  ;;  %v4083_v33 = vadd.f32 %v4082_v47, %v8544_v36 }
 0x5f7   :  { %v4240_v19 = vadd.f32 %v4239_v50, %v4079_v12  ;;  %v4753_v25 = vpop.f32.mrf.mxu3 }
 0x5f8   :  { %4881 = vmatmul.f32.gmra.mxu0 %v10093_v30  ;;  %v10100_v30 = vld [vmem:[#allocation213_spill] sm:$0xff] }
 0x5f9   :  { %v4509_v63 = vadd.f32 %v4508_v13, %v4240_v19  ;;  %5080 = vmatmul.f32.gmra.mxu1 %v10094_v7 }
 0x5fa   :  { %5480 = vmatmul.f32.gmra.mxu3 %v10005_v32 }
 0x5fb   :  { %v8757_v10 = vadd.f32 %v4753_v25, %v4509_v63  ;;  %5319 = vmatmul.f32.gmra.mxu2 %v10005_v32  ;;  %v10099_v63 = vld [vmem:[#allocation216_spill] sm:$0xff] }
 0x5fd   :  { %v4086_v6 = vpop.f32.mrf.mxu0 }
 0x5fe   :  { %v4243_v3 = vpop.f32.mrf.mxu1  ;;  %v4516_v27 = vpop.f32.mrf.mxu2  ;;  %v4087_v32 = vadd.f32 %v4086_v6, %v8550_v43 }
 0x5ff   :  { %v4244_v53 = vadd.f32 %v4243_v3, %v4083_v33  ;;  %v4757_v55 = vpop.f32.mrf.mxu3 }
 0x600   :  { %4886 = vmatmul.f32.gmra.mxu0 %v10095_v48 }
 0x601   :  { %v4517_v20 = vadd.f32 %v4516_v27, %v4244_v53  ;;  %5086 = vmatmul.f32.gmra.mxu1 %v10096_v8  ;;  %v10103_v8 = vld [vmem:[#allocation23_spill] sm:$0xff] }
 0x602   :  { %5484 = vmatmul.f32.gmra.mxu3 %v10007_v5 }
 0x603   :  { %v8764_v16 = vadd.f32 %v4757_v55, %v4517_v20  ;;  %5323 = vmatmul.f32.gmra.mxu2 %v10007_v5  ;;  %v10101_v55 = vld [vmem:[#allocation221_spill] sm:$0xff]  ;;  %v10102_v20 = vld [vmem:[#allocation218_spill] sm:$0xff] }
 0x605   :  { %v4090_v31 = vpop.f32.mrf.mxu0 }
 0x606   :  { %v4247_v36 = vpop.f32.mrf.mxu1  ;;  %v4524_v42 = vpop.f32.mrf.mxu2  ;;  %v4091_v5 = vadd.f32 %v4090_v31, %v8556_v11 }
 0x607   :  { %v4248_v9 = vadd.f32 %v4247_v36, %v4087_v32  ;;  %v4761_v49 = vpop.f32.mrf.mxu3 }
 0x608   :  { %4891 = vmatmul.f32.gmra.mxu0 %v10097_v37 }
 0x609   :  { %v4525_v22 = vadd.f32 %v4524_v42, %v4248_v9  ;;  %5092 = vmatmul.f32.gmra.mxu1 %v10098_v60  ;;  %v10106_v60 = vld [vmem:[#allocation224_spill] sm:$0xff] }
 0x60a   :  { %5488 = vmatmul.f32.gmra.mxu3 %v10009_v52 }
 0x60b   :  { %v8771_v12 = vadd.f32 %v4761_v49, %v4525_v22  ;;  %5327 = vmatmul.f32.gmra.mxu2 %v10009_v52  ;;  %v10104_v49 = vld [vmem:[#allocation226_spill] sm:$0xff]  ;;  %v10105_v22 = vld [vmem:[#allocation223_spill] sm:$0xff] }
 0x60d   :  { %v4094_v47 = vpop.f32.mrf.mxu0 }
 0x60e   :  { %v4251_v43 = vpop.f32.mrf.mxu1  ;;  %v4532_v19 = vpop.f32.mrf.mxu2  ;;  %v4095_v52 = vadd.f32 %v4094_v47, %v8562_v59 }
 0x60f   :  { %v4252_v50 = vadd.f32 %v4251_v43, %v4091_v5  ;;  %v4765_v13 = vpop.f32.mrf.mxu3  ;;  %v10107_v5 = vld [vmem:[#allocation20_spill] sm:$0xff] }
 0x610   :  { %4896 = vmatmul.f32.gmra.mxu0 %v10099_v63  ;;  %v10108_v63 = vld [vmem:[#allocation231_spill] sm:$0xff] }
 0x611   :  { %v4533_v25 = vadd.f32 %v4532_v19, %v4252_v50  ;;  %5098 = vmatmul.f32.gmra.mxu1 %v10100_v30  ;;  %v10109_v30 = vld [vmem:[#allocation228_spill] sm:$0xff] }
 0x612   :  { %5492 = vmatmul.f32.gmra.mxu3 %v10011_v58 }
 0x613   :  { %v8778_v7 = vadd.f32 %v4765_v13, %v4533_v25  ;;  %5331 = vmatmul.f32.gmra.mxu2 %v10011_v58 }
 0x615   :  { %v4098_v33 = vpop.f32.mrf.mxu0 }
 0x616   :  { %v4255_v11 = vpop.f32.mrf.mxu1  ;;  %v4540_v3 = vpop.f32.mrf.mxu2  ;;  %v4099_v58 = vadd.f32 %v4098_v33, %v10103_v8 }
 0x617   :  { %v4256_v6 = vadd.f32 %v4255_v11, %v4095_v52  ;;  %v4769_v53 = vpop.f32.mrf.mxu3  ;;  %v165_v52 = vld [vmem:[#allocation14 + $0x8] sm:$0xff]  ;;  %v10110_v11 = vld [vmem:[#allocation229_spill] sm:$0xff] }
 0x618   :  { %4901 = vmatmul.f32.gmra.mxu0 %v10101_v55 }
 0x619   :  { %v4541_v27 = vadd.f32 %v4540_v3, %v4256_v6  ;;  %5104 = vmatmul.f32.gmra.mxu1 %v10102_v20  ;;  %v10111_v6 = vld [vmem:[#allocation19_spill] sm:$0xff] }
 0x61a   :  { %5496 = vmatmul.f32.gmra.mxu3 %v10013_v56 }
 0x61b   :  { %v8785_v48 = vadd.f32 %v4769_v53, %v4541_v27  ;;  %5335 = vmatmul.f32.gmra.mxu2 %v10013_v56 }
 0x61d   :  { %v4827_v59 = vpop.f32.mrf.mxu0 }
 0x61e   :  { %v4259_v32 = vpop.f32.mrf.mxu1  ;;  %v4548_v36 = vpop.f32.mrf.mxu2  ;;  %v4828_v56 = vadd.f32 %v4827_v59, %v10107_v5  ;;  %v10112_v59 = vld [vmem:[#allocation236_spill] sm:$0xff] }
 0x61f   :  { %v4260_v31 = vadd.f32 %v4259_v32, %v4099_v58  ;;  %v4773_v9 = vpop.f32.mrf.mxu3 }
 0x620   :  { %4906 = vmatmul.f32.gmra.mxu0 %v10104_v49  ;;  %v10115_v49 = vld [vmem:[#allocation27_spill] sm:$0xff] }
 0x621   :  { %v4549_v42 = vadd.f32 %v4548_v36, %v4260_v31  ;;  %5110 = vmatmul.f32.gmra.mxu1 %v10105_v22  ;;  %v10113_v31 = vld [vmem:[#allocation233_spill] sm:$0xff] }
 0x622   :  { %5500 = vmatmul.f32.gmra.mxu3 %v10106_v60  ;;  %v167_v36 = vld [vmem:[#allocation14 + $0x18] sm:$0xff] }
 0x623   :  { %v8792_v37 = vadd.f32 %v4773_v9, %v4549_v42  ;;  %5339 = vmatmul.f32.gmra.mxu2 %v10106_v60  ;;  %v10114_v42 = vld [vmem:[#allocation234_spill] sm:$0xff] }
 0x625   :  { %v4832_v47 = vpop.f32.mrf.mxu0 }
 0x626   :  { %v5021_v43 = vpop.f32.mrf.mxu1  ;;  %v5276_v19 = vpop.f32.mrf.mxu2  ;;  %v4833_v3 = vadd.f32 %v4832_v47, %v10111_v6 }
 0x627   :  { %v5022_v50 = vadd.f32 %v5021_v43, %v4828_v56  ;;  %v5437_v13 = vpop.f32.mrf.mxu3 }
 0x628   :  { %4911 = vmatmul.f32.gmra.mxu0 %v10108_v63  ;;  %v169_v63 = vld [vmem:[#allocation14 + $0x28] sm:$0xff] }
 0x629   :  { %v5277_v25 = vadd.f32 %v5276_v19, %v5022_v50  ;;  %5116 = vmatmul.f32.gmra.mxu1 %v10109_v30 }
 0x62a   :  { %5504 = vmatmul.f32.gmra.mxu3 %v10110_v11 }
 0x62b   :  { %v5438_v33 = vadd.f32 %v5437_v13, %v5277_v25  ;;  %5343 = vmatmul.f32.gmra.mxu2 %v10110_v11  ;;  %v10116_v13 = vld [vmem:[#allocation240_spill] sm:$0xff]  ;;  %v10117_v25 = vld [vmem:[#allocation237_spill] sm:$0xff] }
 0x62d   :  { %v5565_v53 = vadd.f32 %v5438_v33, %v165_v52  ;;  %v4837_v27 = vpop.f32.mrf.mxu0  ;;  %v10118_v52 = vld [vmem:[#allocation238_spill] sm:$0xff] }
 0x62e   :  { %v5027_v55 = vpop.f32.mrf.mxu1  ;;  %v5280_v8 = vpop.f32.mrf.mxu2  ;;  %v4838_v22 = vadd.f32 %v4837_v27, %v10115_v49  ;;  %v10119_v33 = vld [vmem:[#allocation18_spill] sm:$0xff] }
 0x62f   :  { %5629 = vst [vmem:[#allocation14 + $0x8] sm:$0xff] %v5565_v53  ;;  %v5028_v20 = vadd.f32 %v5027_v55, %v4833_v3  ;;  %v5441_v58 = vpop.f32.mrf.mxu3 }
 0x630   :  { %4916 = vmatmul.f32.gmra.mxu0 %v10112_v59  ;;  %v171_v59 = vld [vmem:[#allocation14 + $0x38] sm:$0xff] }
 0x631   :  { %v5281_v32 = vadd.f32 %v5280_v8, %v5028_v20  ;;  %5122 = vmatmul.f32.gmra.mxu1 %v10113_v31 }
 0x632   :  { %5508 = vmatmul.f32.gmra.mxu3 %v10114_v42 }
 0x633   :  { %v5442_v9 = vadd.f32 %v5441_v58, %v5281_v32  ;;  %5347 = vmatmul.f32.gmra.mxu2 %v10114_v42  ;;  %v10120_v58 = vld [vmem:[#allocation244_spill] sm:$0xff]  ;;  %v10121_v32 = vld [vmem:[#allocation241_spill] sm:$0xff] }
 0x635   :  { %v5567_v60 = vadd.f32 %v5442_v9, %v167_v36  ;;  %v4842_v5 = vpop.f32.mrf.mxu0  ;;  %v10122_v36 = vld [vmem:[#allocation242_spill] sm:$0xff]  ;;  %v10123_v9 = vld [vmem:[#allocation24_spill] sm:$0xff] }
 0x636   :  { %v5033_v56 = vpop.f32.mrf.mxu1  ;;  %v5284_v43 = vpop.f32.mrf.mxu2  ;;  %v4843_v11 = vadd.f32 %v4842_v5, %v10119_v33 }
 0x637   :  { %5631 = vst [vmem:[#allocation14 + $0x18] sm:$0xff] %v5567_v60  ;;  %v5034_v47 = vadd.f32 %v5033_v56, %v4838_v22  ;;  %v5445_v50 = vpop.f32.mrf.mxu3 }
 0x638   :  { %4921 = vmatmul.f32.gmra.mxu0 %v10116_v13  ;;  %v173_v13 = vld [vmem:[#allocation14 + $0x48] sm:$0xff] }
 0x639   :  { %v5285_v19 = vadd.f32 %v5284_v43, %v5034_v47  ;;  %5128 = vmatmul.f32.gmra.mxu1 %v10117_v25 }
 0x63a   :  { %5512 = vmatmul.f32.gmra.mxu3 %v10118_v52 }
 0x63b   :  { %v5446_v30 = vadd.f32 %v5445_v50, %v5285_v19  ;;  %5351 = vmatmul.f32.gmra.mxu2 %v10118_v52  ;;  %v10124_v50 = vld [vmem:[#allocation248_spill] sm:$0xff]  ;;  %v10125_v19 = vld [vmem:[#allocation245_spill] sm:$0xff] }
 0x63d   :  { %v5569_v6 = vadd.f32 %v5446_v30, %v169_v63  ;;  %v4847_v3 = vpop.f32.mrf.mxu0  ;;  %v10126_v63 = vld [vmem:[#allocation246_spill] sm:$0xff] }
 0x63e   :  { %v5039_v53 = vpop.f32.mrf.mxu1  ;;  %v5288_v55 = vpop.f32.mrf.mxu2  ;;  %v4848_v42 = vadd.f32 %v4847_v3, %v10123_v9  ;;  %v10127_v30 = vld [vmem:[#allocation22_spill] sm:$0xff] }
 0x63f   :  { %5633 = vst [vmem:[#allocation14 + $0x28] sm:$0xff] %v5569_v6  ;;  %v5040_v27 = vadd.f32 %v5039_v53, %v4843_v11  ;;  %v5449_v20 = vpop.f32.mrf.mxu3 }
 0x640   :  { %4926 = vmatmul.f32.gmra.mxu0 %v10120_v58  ;;  %v175_v58 = vld [vmem:[#allocation14 + $0x58] sm:$0xff] }
 0x641   :  { %v5289_v8 = vadd.f32 %v5288_v55, %v5040_v27  ;;  %5134 = vmatmul.f32.gmra.mxu1 %v10121_v32 }
 0x642   :  { %5516 = vmatmul.f32.gmra.mxu3 %v10122_v36 }
 0x643   :  { %v5450_v31 = vadd.f32 %v5449_v20, %v5289_v8  ;;  %5355 = vmatmul.f32.gmra.mxu2 %v10122_v36  ;;  %v10128_v20 = vld [vmem:[#allocation252_spill] sm:$0xff]  ;;  %v10129_v8 = vld [vmem:[#allocation249_spill] sm:$0xff] }
 0x645   :  { %v5571_v49 = vadd.f32 %v5450_v31, %v171_v59  ;;  %v4852_v22 = vpop.f32.mrf.mxu0  ;;  %v10130_v59 = vld [vmem:[#allocation250_spill] sm:$0xff] }
 0x646   :  { %v5045_v60 = vpop.f32.mrf.mxu1  ;;  %v5292_v56 = vpop.f32.mrf.mxu2  ;;  %v4853_v52 = vadd.f32 %v4852_v22, %v10127_v30 }
 0x647   :  { %5635 = vst [vmem:[#allocation14 + $0x38] sm:$0xff] %v5571_v49  ;;  %v5046_v5 = vadd.f32 %v5045_v60, %v4848_v42  ;;  %v5453_v47 = vpop.f32.mrf.mxu3 }
 0x648   :  { %4931 = vmatmul.f32.gmra.mxu0 %v10124_v50 }
 0x649   :  { %v5293_v43 = vadd.f32 %v5292_v56, %v5046_v5  ;;  %5140 = vmatmul.f32.gmra.mxu1 %v10125_v19  ;;  %v10131_v56 = vld [vmem:[#allocation256_spill] sm:$0xff]  ;;  %v10133_v19 = vld [vmem:[#allocation254_spill] sm:$0xff] }
 0x64a   :  { %5520 = vmatmul.f32.gmra.mxu3 %v10126_v63 }
 0x64b   :  { %v5454_v25 = vadd.f32 %v5453_v47, %v5293_v43  ;;  %5359 = vmatmul.f32.gmra.mxu2 %v10126_v63  ;;  %v10132_v47 = vld [vmem:[#allocation253_spill] sm:$0xff]  ;;  %v177_v43 = vld [vmem:[#allocation14 + $0x68] sm:$0xff] }
 0x64d   :  { %v5573_v33 = vadd.f32 %v5454_v25, %v173_v13  ;;  %v4857_v11 = vpop.f32.mrf.mxu0 }
 0x64e   :  { %v5051_v6 = vpop.f32.mrf.mxu1  ;;  %v5296_v53 = vpop.f32.mrf.mxu2  ;;  %v4858_v31 = vadd.f32 %v4857_v11, %v8617_v44 }
 0x64f   :  { %5637 = vst [vmem:[#allocation14 + $0x48] sm:$0xff] %v5573_v33  ;;  %v5052_v3 = vadd.f32 %v5051_v6, %v4853_v52  ;;  %v5457_v27 = vpop.f32.mrf.mxu3  ;;  %v10134_v6 = vld [vmem:[#allocation260_spill] sm:$0xff] }
 0x650   :  { %4936 = vmatmul.f32.gmra.mxu0 %v10128_v20 }
 0x651   :  { %v5297_v55 = vadd.f32 %v5296_v53, %v5052_v3  ;;  %5146 = vmatmul.f32.gmra.mxu1 %v10129_v8  ;;  %v10135_v3 = vld [vmem:[#allocation257_spill] sm:$0xff] }
 0x652   :  { %5524 = vmatmul.f32.gmra.mxu3 %v10130_v59  ;;  %v179_v53 = vld [vmem:[#allocation14 + $0x78] sm:$0xff] }
 0x653   :  { %v5458_v32 = vadd.f32 %v5457_v27, %v5297_v55  ;;  %5363 = vmatmul.f32.gmra.mxu2 %v10130_v59 }
 0x655   :  { %v5575_v36 = vadd.f32 %v5458_v32, %v175_v58  ;;  %v4862_v9 = vpop.f32.mrf.mxu0 }
 0x656   :  { %v5057_v42 = vpop.f32.mrf.mxu1  ;;  %v5300_v22 = vpop.f32.mrf.mxu2  ;;  %v4863_v44 = vadd.f32 %v4862_v9, %v8624_v54  ;;  %v10137_v9 = vld [vmem:[#allocation261_spill] sm:$0xff] }
 0x657   :  { %5639 = vst [vmem:[#allocation14 + $0x58] sm:$0xff] %v5575_v36  ;;  %v5058_v49 = vadd.f32 %v5057_v42, %v4858_v31  ;;  %v5461_v60 = vpop.f32.mrf.mxu3  ;;  %v10136_v36 = vld [vmem:[#allocation264_spill] sm:$0xff]  ;;  %v181_v42 = vld [vmem:[#allocation14 + $0x88] sm:$0xff] }
 0x658   :  { %4941 = vmatmul.f32.gmra.mxu0 %v10131_v56 }
 0x659   :  { %v5301_v5 = vadd.f32 %v5300_v22, %v5058_v49  ;;  %5152 = vmatmul.f32.gmra.mxu1 %v10132_v47 }
 0x65a   :  { %5528 = vmatmul.f32.gmra.mxu3 %v10133_v19 }
 0x65b   :  { %v5462_v50 = vadd.f32 %v5461_v60, %v5301_v5  ;;  %5367 = vmatmul.f32.gmra.mxu2 %v10133_v19  ;;  %v10139_v19 = vld [vmem:[#allocation265_spill] sm:$0xff] }
 0x65d   :  { %v5577_v13 = vadd.f32 %v5462_v50, %v177_v43  ;;  %v4867_v25 = vpop.f32.mrf.mxu0  ;;  %v10138_v50 = vld [vmem:[#allocation268_spill] sm:$0xff] }
 0x65e   :  { %v5063_v63 = vpop.f32.mrf.mxu1  ;;  %v5304_v52 = vpop.f32.mrf.mxu2  ;;  %v4868_v54 = vadd.f32 %v4867_v25, %v8631_v51 }
 0x65f   :  { %5641 = vst [vmem:[#allocation14 + $0x68] sm:$0xff] %v5577_v13  ;;  %v5064_v30 = vadd.f32 %v5063_v63, %v4863_v44  ;;  %v5465_v33 = vpop.f32.mrf.mxu3  ;;  %v183_v44 = vld [vmem:[#allocation14 + $0x98] sm:$0xff] }
 0x660   :  { %4946 = vmatmul.f32.gmra.mxu0 %v10134_v6  ;;  %v10140_v6 = vld [vmem:[#allocation271_spill] sm:$0xff] }
 0x661   :  { %v5305_v11 = vadd.f32 %v5304_v52, %v5064_v30  ;;  %5158 = vmatmul.f32.gmra.mxu1 %v10135_v3  ;;  %v10141_v3 = vld [vmem:[#allocation269_spill] sm:$0xff] }
 0x662   :  { %5532 = vmatmul.f32.gmra.mxu3 %v10055_v4 }
 0x663   :  { %v5466_v27 = vadd.f32 %v5465_v33, %v5305_v11  ;;  %5371 = vmatmul.f32.gmra.mxu2 %v10055_v4 }
 0x665   :  { %v5579_v55 = vadd.f32 %v5466_v27, %v179_v53  ;;  %v4872_v20 = vpop.f32.mrf.mxu0  ;;  %v185_v53 = vld [vmem:[#allocation14 + $0xa8] sm:$0xff] }
 0x666   :  { %v5069_v8 = vpop.f32.mrf.mxu1  ;;  %v5308_v32 = vpop.f32.mrf.mxu2  ;;  %v4873_v4 = vadd.f32 %v4872_v20, %v8638_v40 }
 0x667   :  { %5643 = vst [vmem:[#allocation14 + $0x78] sm:$0xff] %v5579_v55  ;;  %v5070_v58 = vadd.f32 %v5069_v8, %v4868_v54  ;;  %v5469_v59 = vpop.f32.mrf.mxu3 }
 0x668   :  { %4951 = vmatmul.f32.gmra.mxu0 %v10136_v36  ;;  %v187_v36 = vld [vmem:[#allocation14 + $0xb8] sm:$0xff] }
 0x669   :  { %v5309_v31 = vadd.f32 %v5308_v32, %v5070_v58  ;;  %5164 = vmatmul.f32.gmra.mxu1 %v10137_v9 }
 0x66a   :  { %5536 = vmatmul.f32.gmra.mxu3 %v10058_v1 }
 0x66b   :  { %v5470_v49 = vadd.f32 %v5469_v59, %v5309_v31  ;;  %5375 = vmatmul.f32.gmra.mxu2 %v10058_v1  ;;  %v10142_v59 = vld [vmem:[#allocation274_spill] sm:$0xff]  ;;  %v10143_v31 = vld [vmem:[#allocation272_spill] sm:$0xff] }
 0x66d   :  { %v5581_v51 = vadd.f32 %v5470_v49, %v181_v42  ;;  %v4877_v22 = vpop.f32.mrf.mxu0 }
 0x66e   :  { %v5075_v60 = vpop.f32.mrf.mxu1  ;;  %v5312_v56 = vpop.f32.mrf.mxu2  ;;  %v4878_v1 = vadd.f32 %v4877_v22, %v8645_v28 }
 0x66f   :  { %5645 = vst [vmem:[#allocation14 + $0x88] sm:$0xff] %v5581_v51  ;;  %v5076_v5 = vadd.f32 %v5075_v60, %v4873_v4  ;;  %v5473_v47 = vpop.f32.mrf.mxu3 }
 0x670   :  { %4956 = vmatmul.f32.gmra.mxu0 %v10138_v50 }
 0x671   :  { %v5313_v43 = vadd.f32 %v5312_v56, %v5076_v5  ;;  %5170 = vmatmul.f32.gmra.mxu1 %v10139_v19  ;;  %v10144_v5 = vld [vmem:[#allocation277_spill] sm:$0xff]  ;;  %v10145_v56 = vld [vmem:[#allocation275_spill] sm:$0xff] }
 0x672   :  { %5540 = vmatmul.f32.gmra.mxu3 %v10060_v0 }
 0x673   :  { %v5474_v13 = vadd.f32 %v5473_v47, %v5313_v43  ;;  %5379 = vmatmul.f32.gmra.mxu2 %v10060_v0  ;;  %v189_v47 = vld [vmem:[#allocation14 + $0xc8] sm:$0xff] }
 0x675   :  { %v5583_v40 = vadd.f32 %v5474_v13, %v183_v44  ;;  %v4882_v25 = vpop.f32.mrf.mxu0 }
 0x676   :  { %v5081_v63 = vpop.f32.mrf.mxu1  ;;  %v5316_v52 = vpop.f32.mrf.mxu2  ;;  %v4883_v0 = vadd.f32 %v4882_v25, %v8652_v35  ;;  %v10146_v25 = vld [vmem:[#allocation281_spill] sm:$0xff] }
 0x677   :  { %5647 = vst [vmem:[#allocation14 + $0x98] sm:$0xff] %v5583_v40  ;;  %v5082_v30 = vadd.f32 %v5081_v63, %v4878_v1  ;;  %v5477_v33 = vpop.f32.mrf.mxu3  ;;  %v10147_v63 = vld [vmem:[#allocation279_spill] sm:$0xff] }
 0x678   :  { %4961 = vmatmul.f32.gmra.mxu0 %v10140_v6 }
 0x679   :  { %v5317_v11 = vadd.f32 %v5316_v52, %v5082_v30  ;;  %5176 = vmatmul.f32.gmra.mxu1 %v10141_v3  ;;  %v191_v30 = vld [vmem:[#allocation14 + $0xd8] sm:$0xff] }
 0x67a   :  { %5544 = vmatmul.f32.gmra.mxu3 %v10062_v41 }
 0x67b   :  { %v5478_v27 = vadd.f32 %v5477_v33, %v5317_v11  ;;  %5383 = vmatmul.f32.gmra.mxu2 %v10062_v41 }
 0x67d   :  { %v5585_v28 = vadd.f32 %v5478_v27, %v185_v53  ;;  %v4887_v54 = vpop.f32.mrf.mxu0 }
 0x67e   :  { %v5087_v55 = vpop.f32.mrf.mxu1  ;;  %v5320_v8 = vpop.f32.mrf.mxu2  ;;  %v4888_v41 = vadd.f32 %v4887_v54, %v8659_v21  ;;  %v193_v54 = vld [vmem:[#allocation14 + $0xe8] sm:$0xff] }
 0x67f   :  { %5649 = vst [vmem:[#allocation14 + $0xa8] sm:$0xff] %v5585_v28  ;;  %v5088_v20 = vadd.f32 %v5087_v55, %v4883_v0  ;;  %v5481_v58 = vpop.f32.mrf.mxu3  ;;  %v10148_v0 = vld [vmem:[#allocation286_spill] sm:$0xff]  ;;  %v10149_v28 = vld [vmem:[#allocation283_spill] sm:$0xff] }
 0x680   :  { %4966 = vmatmul.f32.gmra.mxu0 %v10142_v59 }
 0x681   :  { %v5321_v32 = vadd.f32 %v5320_v8, %v5088_v20  ;;  %5182 = vmatmul.f32.gmra.mxu1 %v10143_v31 }
 0x682   :  { %5548 = vmatmul.f32.gmra.mxu3 %v10064_v45 }
 0x683   :  { %v5482_v9 = vadd.f32 %v5481_v58, %v5321_v32  ;;  %5387 = vmatmul.f32.gmra.mxu2 %v10064_v45 }
 0x685   :  { %v5587_v35 = vadd.f32 %v5482_v9, %v187_v36  ;;  %v4892_v42 = vpop.f32.mrf.mxu0  ;;  %v10150_v36 = vld [vmem:[#allocation288_spill] sm:$0xff]  ;;  %v195_v9 = vld [vmem:[#allocation14 + $0xf8] sm:$0xff] }
 0x686   :  { %v5093_v49 = vpop.f32.mrf.mxu1  ;;  %v5324_v51 = vpop.f32.mrf.mxu2  ;;  %v4893_v45 = vadd.f32 %v4892_v42, %v8666_v2 }
 0x687   :  { %5651 = vst [vmem:[#allocation14 + $0xb8] sm:$0xff] %v5587_v35  ;;  %v5094_v4 = vadd.f32 %v5093_v49, %v4888_v41  ;;  %v5485_v22 = vpop.f32.mrf.mxu3 }
 0x688   :  { %4971 = vmatmul.f32.gmra.mxu0 %v10144_v5 }
 0x689   :  { %v5325_v60 = vadd.f32 %v5324_v51, %v5094_v4  ;;  %5188 = vmatmul.f32.gmra.mxu1 %v10145_v56 }
 0x68a   :  { %5552 = vmatmul.f32.gmra.mxu3 %v10066_v34 }
 0x68b   :  { %v5486_v43 = vadd.f32 %v5485_v22, %v5325_v60  ;;  %5391 = vmatmul.f32.gmra.mxu2 %v10066_v34  ;;  %v197_v60 = vld [vmem:[#allocation14 + $0x108] sm:$0xff] }
 0x68d   :  { %v5589_v21 = vadd.f32 %v5486_v43, %v189_v47  ;;  %v4897_v50 = vpop.f32.mrf.mxu0 }
 0x68e   :  { %v5099_v19 = vpop.f32.mrf.mxu1  ;;  %v5328_v13 = vpop.f32.mrf.mxu2  ;;  %v4898_v34 = vadd.f32 %v4897_v50, %v8673_v62 }
 0x68f   :  { %5653 = vst [vmem:[#allocation14 + $0xc8] sm:$0xff] %v5589_v21  ;;  %v5100_v44 = vadd.f32 %v5099_v19, %v4893_v45  ;;  %v5489_v1 = vpop.f32.mrf.mxu3 }
 0x690   :  { %4976 = vmatmul.f32.gmra.mxu0 %v10146_v25 }
 0x691   :  { %v5329_v40 = vadd.f32 %v5328_v13, %v5100_v44  ;;  %5194 = vmatmul.f32.gmra.mxu1 %v10147_v63  ;;  %v199_v44 = vld [vmem:[#allocation14 + $0x118] sm:$0xff] }
 0x692   :  { %5556 = vmatmul.f32.gmra.mxu3 %v10068_v23 }
 0x693   :  { %v5490_v52 = vadd.f32 %v5489_v1, %v5329_v40  ;;  %5395 = vmatmul.f32.gmra.mxu2 %v10068_v23 }
 0x695   :  { %v5591_v2 = vadd.f32 %v5490_v52, %v191_v30  ;;  %v4902_v33 = vpop.f32.mrf.mxu0 }
 0x696   :  { %v5105_v11 = vpop.f32.mrf.mxu1  ;;  %v5332_v3 = vpop.f32.mrf.mxu2  ;;  %v4903_v23 = vadd.f32 %v4902_v33, %v8680_v39 }
 0x697   :  { %5655 = vst [vmem:[#allocation14 + $0xd8] sm:$0xff] %v5591_v2  ;;  %v5106_v6 = vadd.f32 %v5105_v11, %v4898_v34  ;;  %v5493_v53 = vpop.f32.mrf.mxu3  ;;  %v201_v2 = vld [vmem:[#allocation14 + $0x128] sm:$0xff] }
 0x698   :  { %4981 = vmatmul.f32.gmra.mxu0 %v10148_v0 }
 0x699   :  { %v5333_v27 = vadd.f32 %v5332_v3, %v5106_v6  ;;  %5200 = vmatmul.f32.gmra.mxu1 %v10149_v28 }
 0x69a   :  { %5560 = vmatmul.f32.gmra.mxu3 %v10070_v29 }
 0x69b   :  { %v5494_v55 = vadd.f32 %v5493_v53, %v5333_v27  ;;  %5399 = vmatmul.f32.gmra.mxu2 %v10070_v29 }
 0x69d   :  { %v5593_v62 = vadd.f32 %v5494_v55, %v193_v54  ;;  %v4907_v20 = vpop.f32.mrf.mxu0  ;;  %v203_v54 = vld [vmem:[#allocation14 + $0x138] sm:$0xff] }
 0x69e   :  { %v5111_v8 = vpop.f32.mrf.mxu1  ;;  %v5336_v32 = vpop.f32.mrf.mxu2  ;;  %v4908_v35 = vadd.f32 %v4907_v20, %v8687_v61 }
 0x69f   :  { %5657 = vst [vmem:[#allocation14 + $0xe8] sm:$0xff] %v5593_v62  ;;  %v5112_v58 = vadd.f32 %v5111_v8, %v4903_v23  ;;  %v5497_v59 = vpop.f32.mrf.mxu3 }
 0x6a1   :  { %v5337_v31 = vadd.f32 %v5336_v32, %v5112_v58  ;;  %5206 = vmatmul.f32.gmra.mxu1 %v10150_v36 }
 0x6a3   :  { %v5498_v41 = vadd.f32 %v5497_v59, %v5337_v31  ;;  %v205_v31 = vld [vmem:[#allocation14 + $0x148] sm:$0xff] }
 0x6a5   :  { %v5595_v42 = vadd.f32 %v5498_v41, %v195_v9  ;;  %v4912_v49 = vpop.f32.mrf.mxu0 }
 0x6a6   :  { %v5117_v4 = vpop.f32.mrf.mxu1  ;;  %v5340_v39 = vpop.f32.mrf.mxu2  ;;  %v4913_v56 = vadd.f32 %v4912_v49, %v8694_v17 }
 0x6a7   :  { %5659 = vst [vmem:[#allocation14 + $0xf8] sm:$0xff] %v5595_v42  ;;  %v5118_v29 = vadd.f32 %v5117_v4, %v4908_v35  ;;  %v5501_v51 = vpop.f32.mrf.mxu3 }
 0x6a9   :  { %v5341_v22 = vadd.f32 %v5340_v39, %v5118_v29  ;;  %v207_v39 = vld [vmem:[#allocation14 + $0x158] sm:$0xff] }
 0x6ab   :  { %v5502_v5 = vadd.f32 %v5501_v51, %v5341_v22 }
 0x6ad   :  { %v5597_v47 = vadd.f32 %v5502_v5, %v197_v60  ;;  %v4917_v43 = vpop.f32.mrf.mxu0 }
 0x6ae   :  { %v5123_v45 = vpop.f32.mrf.mxu1  ;;  %v5344_v50 = vpop.f32.mrf.mxu2  ;;  %v4918_v1 = vadd.f32 %v4917_v43, %v8701_v18 }
 0x6af   :  { %5661 = vst [vmem:[#allocation14 + $0x108] sm:$0xff] %v5597_v47  ;;  %v5124_v21 = vadd.f32 %v5123_v45, %v4913_v56  ;;  %v5505_v19 = vpop.f32.mrf.mxu3 }
 0x6b1   :  { %v5345_v61 = vadd.f32 %v5344_v50, %v5124_v21  ;;  %v209_v21 = vld [vmem:[#allocation14 + $0x168] sm:$0xff] }
 0x6b3   :  { %v5506_v13 = vadd.f32 %v5505_v19, %v5345_v61 }
 0x6b5   :  { %v5599_v40 = vadd.f32 %v5506_v13, %v199_v44  ;;  %v4922_v25 = vpop.f32.mrf.mxu0 }
 0x6b6   :  { %v5129_v63 = vpop.f32.mrf.mxu1  ;;  %v5348_v52 = vpop.f32.mrf.mxu2  ;;  %v4923_v11 = vadd.f32 %v4922_v25, %v8708_v46 }
 0x6b7   :  { %5663 = vst [vmem:[#allocation14 + $0x118] sm:$0xff] %v5599_v40  ;;  %v5130_v30 = vadd.f32 %v5129_v63, %v4918_v1  ;;  %v5509_v34 = vpop.f32.mrf.mxu3  ;;  %v211_v63 = vld [vmem:[#allocation14 + $0x178] sm:$0xff] }
 0x6b9   :  { %v5349_v17 = vadd.f32 %v5348_v52, %v5130_v30 }
 0x6bb   :  { %v5510_v33 = vadd.f32 %v5509_v34, %v5349_v17 }
 0x6bd   :  { %v5601_v6 = vadd.f32 %v5510_v33, %v201_v2  ;;  %v4927_v3 = vpop.f32.mrf.mxu0 }
 0x6be   :  { %v5135_v53 = vpop.f32.mrf.mxu1  ;;  %v5352_v0 = vpop.f32.mrf.mxu2  ;;  %v4928_v23 = vadd.f32 %v4927_v3, %v8715_v14  ;;  %v213_v3 = vld [vmem:[#allocation14 + $0x188] sm:$0xff] }
 0x6bf   :  { %5665 = vst [vmem:[#allocation14 + $0x128] sm:$0xff] %v5601_v6  ;;  %v5136_v27 = vadd.f32 %v5135_v53, %v4923_v11  ;;  %v5513_v28 = vpop.f32.mrf.mxu3 }
 0x6c1   :  { %v5353_v18 = vadd.f32 %v5352_v0, %v5136_v27 }
 0x6c3   :  { %v5514_v55 = vadd.f32 %v5513_v28, %v5353_v18 }
 0x6c5   :  { %v5603_v62 = vadd.f32 %v5514_v55, %v203_v54  ;;  %v4932_v20 = vpop.f32.mrf.mxu0 }
 0x6c6   :  { %v5141_v8 = vpop.f32.mrf.mxu1  ;;  %v5356_v32 = vpop.f32.mrf.mxu2  ;;  %v4933_v9 = vadd.f32 %v4932_v20, %v8722_v24 }
 0x6c7   :  { %5667 = vst [vmem:[#allocation14 + $0x138] sm:$0xff] %v5603_v62  ;;  %v5142_v58 = vadd.f32 %v5141_v8, %v4928_v23  ;;  %v5517_v59 = vpop.f32.mrf.mxu3  ;;  %v215_v62 = vld [vmem:[#allocation14 + $0x198] sm:$0xff] }
 0x6c9   :  { %v5357_v46 = vadd.f32 %v5356_v32, %v5142_v58 }
 0x6cb   :  { %v5518_v36 = vadd.f32 %v5517_v59, %v5357_v46 }
 0x6cd   :  { %v5605_v41 = vadd.f32 %v5518_v36, %v205_v31  ;;  %v4937_v35 = vpop.f32.mrf.mxu0 }
 0x6ce   :  { %v5147_v42 = vpop.f32.mrf.mxu1  ;;  %v5360_v4 = vpop.f32.mrf.mxu2  ;;  %v4938_v22 = vadd.f32 %v4937_v35, %v8729_v38 }
 0x6cf   :  { %5669 = vst [vmem:[#allocation14 + $0x148] sm:$0xff] %v5605_v41  ;;  %v5148_v49 = vadd.f32 %v5147_v42, %v4933_v9  ;;  %v5521_v29 = vpop.f32.mrf.mxu3  ;;  %v217_v9 = vld [vmem:[#allocation14 + $0x1a8] sm:$0xff] }
 0x6d1   :  { %v5361_v14 = vadd.f32 %v5360_v4, %v5148_v49 }
 0x6d3   :  { %v5522_v51 = vadd.f32 %v5521_v29, %v5361_v14 }
 0x6d5   :  { %v5607_v60 = vadd.f32 %v5522_v51, %v207_v39  ;;  %v4942_v5 = vpop.f32.mrf.mxu0  ;;  %v219_v51 = vld [vmem:[#allocation14 + $0x1b8] sm:$0xff] }
 0x6d6   :  { %v5153_v56 = vpop.f32.mrf.mxu1  ;;  %v5364_v43 = vpop.f32.mrf.mxu2  ;;  %v4943_v19 = vadd.f32 %v4942_v5, %v8736_v26 }
 0x6d7   :  { %5671 = vst [vmem:[#allocation14 + $0x158] sm:$0xff] %v5607_v60  ;;  %v5154_v47 = vadd.f32 %v5153_v56, %v4938_v22  ;;  %v5525_v45 = vpop.f32.mrf.mxu3 }
 0x6d9   :  { %v5365_v24 = vadd.f32 %v5364_v43, %v5154_v47 }
 0x6db   :  { %v5526_v50 = vadd.f32 %v5525_v45, %v5365_v24 }
 0x6dd   :  { %v5609_v61 = vadd.f32 %v5526_v50, %v209_v21  ;;  %v4947_v44 = vpop.f32.mrf.mxu0  ;;  %v221_v21 = vld [vmem:[#allocation14 + $0x1c8] sm:$0xff] }
 0x6de   :  { %v5159_v13 = vpop.f32.mrf.mxu1  ;;  %v5368_v40 = vpop.f32.mrf.mxu2  ;;  %v4948_v52 = vadd.f32 %v4947_v44, %v8743_v57 }
 0x6df   :  { %5673 = vst [vmem:[#allocation14 + $0x168] sm:$0xff] %v5609_v61  ;;  %v5160_v1 = vadd.f32 %v5159_v13, %v4943_v19  ;;  %v5529_v25 = vpop.f32.mrf.mxu3 }
 0x6e1   :  { %v5369_v38 = vadd.f32 %v5368_v40, %v5160_v1 }
 0x6e3   :  { %v5530_v30 = vadd.f32 %v5529_v25, %v5369_v38  ;;  %v223_v38 = vld [vmem:[#allocation14 + $0x1d8] sm:$0xff] }
 0x6e5   :  { %v5611_v34 = vadd.f32 %v5530_v30, %v211_v63  ;;  %v4952_v17 = vpop.f32.mrf.mxu0 }
 0x6e6   :  { %v5165_v2 = vpop.f32.mrf.mxu1  ;;  %v5372_v11 = vpop.f32.mrf.mxu2  ;;  %v4953_v27 = vadd.f32 %v4952_v17, %v8750_v15 }
 0x6e7   :  { %5675 = vst [vmem:[#allocation14 + $0x178] sm:$0xff] %v5611_v34  ;;  %v5166_v33 = vadd.f32 %v5165_v2, %v4948_v52  ;;  %v5533_v6 = vpop.f32.mrf.mxu3 }
 0x6e9   :  { %v5373_v26 = vadd.f32 %v5372_v11, %v5166_v33 }
 0x6eb   :  { %v5534_v53 = vadd.f32 %v5533_v6, %v5373_v26  ;;  %v225_v6 = vld [vmem:[#allocation14 + $0x1e8] sm:$0xff] }
 0x6ed   :  { %v5613_v0 = vadd.f32 %v5534_v53, %v213_v3  ;;  %v4957_v28 = vpop.f32.mrf.mxu0 }
 0x6ee   :  { %v5171_v18 = vpop.f32.mrf.mxu1  ;;  %v5376_v55 = vpop.f32.mrf.mxu2  ;;  %v4958_v8 = vadd.f32 %v4957_v28, %v8757_v10 }
 0x6ef   :  { %5677 = vst [vmem:[#allocation14 + $0x188] sm:$0xff] %v5613_v0  ;;  %v5172_v54 = vadd.f32 %v5171_v18, %v4953_v27  ;;  %v5537_v23 = vpop.f32.mrf.mxu3 }
 0x6f1   :  { %v5377_v57 = vadd.f32 %v5376_v55, %v5172_v54 }
 0x6f3   :  { %v5538_v20 = vadd.f32 %v5537_v23, %v5377_v57 }
 0x6f5   :  { %v5615_v58 = vadd.f32 %v5538_v20, %v215_v62  ;;  %v4962_v32 = vpop.f32.mrf.mxu0 }
 0x6f6   :  { %v5177_v59 = vpop.f32.mrf.mxu1  ;;  %v5380_v31 = vpop.f32.mrf.mxu2  ;;  %v4963_v35 = vadd.f32 %v4962_v32, %v8764_v16 }
 0x6f7   :  { %5679 = vst [vmem:[#allocation14 + $0x198] sm:$0xff] %v5615_v58  ;;  %v5178_v46 = vadd.f32 %v5177_v59, %v4958_v8  ;;  %v5541_v36 = vpop.f32.mrf.mxu3 }
 0x6f9   :  { %v5381_v15 = vadd.f32 %v5380_v31, %v5178_v46 }
 0x6fb   :  { %v5542_v41 = vadd.f32 %v5541_v36, %v5381_v15 }
 0x6fd   :  { %v5617_v42 = vadd.f32 %v5542_v41, %v217_v9  ;;  %v4967_v49 = vpop.f32.mrf.mxu0 }
 0x6fe   :  { %v5183_v4 = vpop.f32.mrf.mxu1  ;;  %v5384_v14 = vpop.f32.mrf.mxu2  ;;  %v4968_v60 = vadd.f32 %v4967_v49, %v8771_v12 }
 0x6ff   :  { %5681 = vst [vmem:[#allocation14 + $0x1a8] sm:$0xff] %v5617_v42  ;;  %v5184_v29 = vadd.f32 %v5183_v4, %v4963_v35  ;;  %v5545_v39 = vpop.f32.mrf.mxu3 }
 0x701   :  { %v5385_v10 = vadd.f32 %v5384_v14, %v5184_v29 }
 0x703   :  { %v5546_v22 = vadd.f32 %v5545_v39, %v5385_v10 }
 0x705   :  { %v5619_v5 = vadd.f32 %v5546_v22, %v219_v51  ;;  %v4972_v56 = vpop.f32.mrf.mxu0 }
 0x706   :  { %v5189_v47 = vpop.f32.mrf.mxu1  ;;  %v5388_v45 = vpop.f32.mrf.mxu2  ;;  %v4973_v19 = vadd.f32 %v4972_v56, %v8778_v7 }
 0x707   :  { %5683 = vst [vmem:[#allocation14 + $0x1b8] sm:$0xff] %v5619_v5  ;;  %v5190_v43 = vadd.f32 %v5189_v47, %v4968_v60  ;;  %v5549_v24 = vpop.f32.mrf.mxu3 }
 0x709   :  { %v5389_v16 = vadd.f32 %v5388_v45, %v5190_v43 }
 0x70b   :  { %v5550_v50 = vadd.f32 %v5549_v24, %v5389_v16 }
 0x70d   :  { %v5621_v61 = vadd.f32 %v5550_v50, %v221_v21  ;;  %v4977_v25 = vpop.f32.mrf.mxu0 }
 0x70e   :  { %v5195_v44 = vpop.f32.mrf.mxu1  ;;  %v5392_v1 = vpop.f32.mrf.mxu2  ;;  %v4978_v30 = vadd.f32 %v4977_v25, %v8785_v48  ;;  %v227_v48 = vld [vmem:[#allocation14 + $0x1f8] sm:$0xff] }
 0x70f   :  { %5685 = vst [vmem:[#allocation14 + $0x1c8] sm:$0xff] %v5621_v61  ;;  %v5196_v13 = vadd.f32 %v5195_v44, %v4973_v19  ;;  %v5553_v40 = vpop.f32.mrf.mxu3 }
 0x711   :  { %v5393_v12 = vadd.f32 %v5392_v1, %v5196_v13 }
 0x713   :  { %v5554_v63 = vadd.f32 %v5553_v40, %v5393_v12 }
 0x715   :  { %v5623_v52 = vadd.f32 %v5554_v63, %v223_v38  ;;  %v4982_v7 = vpop.f32.mrf.mxu0 }
 0x716   :  { %v5201_v34 = vpop.f32.mrf.mxu1  ;;  %v5396_v2 = vpop.f32.mrf.mxu2  ;;  %v4983_v3 = vadd.f32 %v4982_v7, %v8792_v37 }
 0x717   :  { %5687 = vst [vmem:[#allocation14 + $0x1d8] sm:$0xff] %v5623_v52  ;;  %v5202_v17 = vadd.f32 %v5201_v34, %v4978_v30  ;;  %v5557_v33 = vpop.f32.mrf.mxu3 }
 0x719   :  { %v5397_v11 = vadd.f32 %v5396_v2, %v5202_v17 }
 0x71b   :  { %v5558_v26 = vadd.f32 %v5557_v33, %v5397_v11 }
 0x71d   :  { %v5625_v53 = vadd.f32 %v5558_v26, %v225_v6 }
 0x71e   :  { %v5207_v27 = vpop.f32.mrf.mxu1  ;;  %v5400_v28 = vpop.f32.mrf.mxu2 }
 0x71f   :  { %5689 = vst [vmem:[#allocation14 + $0x1e8] sm:$0xff] %v5625_v53  ;;  %v5208_v0 = vadd.f32 %v5207_v27, %v4983_v3  ;;  %v5561_v18 = vpop.f32.mrf.mxu3 }
 0x721   :  { %v5401_v54 = vadd.f32 %v5400_v28, %v5208_v0 }
 0x723   :  { %v5562_v55 = vadd.f32 %v5561_v18, %v5401_v54 }
 0x725   :  { %v5627_v23 = vadd.f32 %v5562_v55, %v227_v48 }
 0x727   :  { %5691 = vst [vmem:[#allocation14 + $0x1f8] sm:$0xff] %v5627_v23 }
 0x728 PF:  { %s5695_s7 = sld [smem:[#allocation3]]  ;;  %s5842_s28 = smov [#allocation14]  }
 0x729   :  { %s5696_s22 = sld [smem:[#allocation6]]  ;;  %s5705_s29 = sshll.u32 %s5842_s28, 4  ;;  %s5706_s29 = int_to_ptr.vmem [resolvable:$true] %s5705_s29 }
 0x72a   :  { %s5823_s0 = scalar_lea.hbm %s8909_s8, 512 }
 0x72e   :  { %s5752_s26 = sshll.u32 %s5695_s7, 6 }
 0x72f   :  { %s5747_s27 = sshll.u32 %s5696_s22, 1 }
 0x730   :  { %s5702_s30 = sadd.s32 %s5752_s26, %s5747_s27 }
 0x731   :  { %s5749_s9 = sshll.u32 %s5702_s30, 3 }
 0x732   :  { %s5704_s1 = scalar_lea.hbm %s8909_s8, %s5749_s9 }
 0x733   :  { %s5707_s12 = sshll.u32 %s5704_s1, 4  ;;  %s5708_s12 = int_to_ptr.hbm [resolvable:$true] %s5707_s12 }
 0x734   :  { %s5819_s11 = sshra.s32 %s5708_s12, 4  ;;  %s5820_s11 = int_to_ptr.hbm [resolvable:$true] %s5819_s11 }
 0x735   :  { %s5821_s13 = scalar_lea.hbm %s5820_s11, 512  ;;  %p5824_p13 = scmp.lt.s32.totalorder %s5820_s11, %s8909_s8 }
 0x736   :  { %p5822_p12 = scmp.ne.s32.totalorder %s5820_s11, %s5821_s13  ;;  %p5825_p0 = scmp.lt.s32.totalorder %s5823_s0, %s5821_s13 }
 0x738   :  { %p5826_p1 = por %p5825_p0, %p5824_p13 }
 0x73a   :  { %p5827_p2 = pnand %p5826_p1, %p5822_p12 }
 0x73c   :  { %5830 = shalt.err (!%p5827_p2)
}
 0x73d   :  { %5713 = dma.vmem_to_hbm [thread:$0]  %s5706_s29, 8192, %s5708_s12, [#allocation11], %s5839_s3, %s5839_s3, %s5840_s18  }
 0x73e   :  { %5835 = dma.done.wait [#allocation11], 8192  }
 0x73f   :  { %5836 = vsyncadd [#allocation11], 4294959104 }
 0x740   :  { %5718 = vsyncpa [#allocation10], 1 }
 0x741   :  { %5719 = vsyncpa [#allocation13], 1 }
 0x742   :  { %5720 = vsyncpa [#allocation11], 1 }

</bundles_post_ra>
